<compile_context>
chip_gen: v7x
topology: tpu7x:2x2x1
jax: 0.10.0
libtpu: 0.0.40
codegen_flags: <defaults>
</compile_context>

<pallas_src>
import functools

import jax
import jax.numpy as jnp
from jax.experimental import pallas as pl
from jax.experimental.pallas import tpu as pltpu

LEAKY_SLOPE = 0.2

# M tiling: a single block below this many (padded) rows -- the ~0.35us
# per-grid-step overhead dominates these tiny matmuls otherwise.
M_SINGLE_BLOCK_ROWS = 1024
TM_TILE = 256                 # multiple of 16 -> dense bf16 sublane packing

TK_CONV_MAX = 2048            # conv K_pad <= 1152, so convs always run kt == 1
TK_DENSE_MAX = 8192           # dense: K = 12544 -> tk = 6272, kt = 2
DENSE_VMEM_LIMIT = 40 * 1024 * 1024   # 2 x 6.1 MiB W4 buffers + A/acc/out


def _round_up(x, m):
    return (x + m - 1) // m * m


def _m_tiling(m):
    """Return (M_pad, tm, mt). M_pad is a multiple of 16; single M block unless
    the problem is big enough for the split to beat grid-step overhead."""
    m16 = _round_up(max(m, 1), 16)
    if m16 <= M_SINGLE_BLOCK_ROWS:
        return m16, m16, 1
    m_pad = _round_up(m16, TM_TILE)
    return m_pad, TM_TILE, m_pad // TM_TILE


def _choose_tk(k_pad, tk_max):
    """Largest multiple of 128 that divides k_pad and is <= tk_max."""
    if k_pad <= tk_max:
        return k_pad
    nblk = k_pad // 128
    best = 1
    for d in range(1, nblk + 1):
        if nblk % d == 0 and d * 128 <= tk_max:
            best = d
    return best * 128


# ----------------------------------------------------------------------------
# Pallas kernels: matmul with fused bias add + (optional) LeakyReLU.
# ----------------------------------------------------------------------------
def _mm_single_k_kernel(a_ref, b_ref, bias_ref, o_ref, *, apply_leaky):
    # kt == 1 fast path: no scratch accumulator; dot -> f32 epilogue -> store.
    r = jnp.dot(a_ref[...], b_ref[...], preferred_element_type=jnp.float32)
    r = r + bias_ref[...]                       # bias broadcast over rows (f32)
    if apply_leaky:
        r = jnp.where(r >= 0.0, r, LEAKY_SLOPE * r)
    o_ref[...] = r.astype(o_ref.dtype)


def _mm_multi_k_kernel(a_ref, b_ref, bias_ref, o_ref, acc_ref, *, apply_leaky):
    k = pl.program_id(1)

    @pl.when(k == 0)
    def _():
        acc_ref[...] = jnp.zeros_like(acc_ref)

    acc_ref[...] += jnp.dot(a_ref[...], b_ref[...],
                            preferred_element_type=jnp.float32)

    @pl.when(k == pl.num_programs(1) - 1)
    def _():
        r = acc_ref[...] + bias_ref[...]
        if apply_leaky:
            r = jnp.where(r >= 0.0, r, LEAKY_SLOPE * r)
        o_ref[...] = r.astype(o_ref.dtype)


def matmul_bias_act(a, w_p, bias_p, n_out, *, apply_leaky,
                    out_dtype=jnp.bfloat16):
    """out = act(a @ W + b), output dtype `out_dtype` (logical N sliced).

    a:      (M, K) activations (any float dtype; bf16 in == no cast).
    w_p:    (K_pad, N_pad) bf16 pre-padded weights (extra K rows are ZERO,
            which keeps K padding mathematically exact).
    bias_p: (1, N_pad) f32 pre-padded bias.
    """
    M, K = a.shape
    K_pad, N_pad = w_p.shape

    M_pad, tm, mt = _m_tiling(M)
    tk = _choose_tk(K_pad, TK_CONV_MAX)
    kt = K_pad // tk

    a_p = a if a.dtype == jnp.bfloat16 else a.astype(jnp.bfloat16)
    if M_pad != M or K_pad != K:
        a_p = jnp.pad(a_p, ((0, M_pad - M), (0, K_pad - K)))

    if kt == 1:
        out = pl.pallas_call(
            functools.partial(_mm_single_k_kernel, apply_leaky=apply_leaky),
            out_shape=jax.ShapeDtypeStruct((M_pad, N_pad), out_dtype),
            grid_spec=pltpu.PrefetchScalarGridSpec(
                num_scalar_prefetch=0,
                grid=(mt,),
                in_specs=[
                    pl.BlockSpec((tm, K_pad), lambda m: (m, 0)),
                    pl.BlockSpec((K_pad, N_pad), lambda m: (0, 0)),
                    pl.BlockSpec((1, N_pad), lambda m: (0, 0)),
                ],
                out_specs=pl.BlockSpec((tm, N_pad), lambda m: (m, 0)),
            ),
            compiler_params=pltpu.CompilerParams(
                dimension_semantics=("parallel",)),
        )(a_p, w_p, bias_p)
    else:
        out = pl.pallas_call(
            functools.partial(_mm_multi_k_kernel, apply_leaky=apply_leaky),
            out_shape=jax.ShapeDtypeStruct((M_pad, N_pad), out_dtype),
            grid_spec=pltpu.PrefetchScalarGridSpec(
                num_scalar_prefetch=0,
                grid=(mt, kt),
                in_specs=[
                    pl.BlockSpec((tm, tk), lambda m, k: (m, k)),
                    pl.BlockSpec((tk, N_pad), lambda m, k: (k, 0)),
                    pl.BlockSpec((1, N_pad), lambda m, k: (0, 0)),
                ],
                out_specs=pl.BlockSpec((tm, N_pad), lambda m, k: (m, 0)),
                scratch_shapes=[pltpu.VMEM((tm, N_pad), jnp.float32)],
            ),
            compiler_params=pltpu.CompilerParams(
                dimension_semantics=("parallel", "arbitrary")),
        )(a_p, w_p, bias_p)

    return out[:M, :n_out]


# ----------------------------------------------------------------------------
# Fused dense head: out = LeakyReLU(a @ W4 + b4) @ W5 + b5  (ONE pallas_call).
# ----------------------------------------------------------------------------
def _fused_dense_kernel(a_ref, w4_ref, b4_ref, w5_ref, b5_ref, o_ref, acc_ref):
    k = pl.program_id(1)

    @pl.when(k == 0)
    def _():
        acc_ref[...] = jnp.zeros_like(acc_ref)

    acc_ref[...] += jnp.dot(a_ref[...], w4_ref[...],
                            preferred_element_type=jnp.float32)

    @pl.when(k == pl.num_programs(1) - 1)
    def _():
        h = acc_ref[...] + b4_ref[...]                       # f32 epilogue
        h = jnp.where(h >= 0.0, h, LEAKY_SLOPE * h)          # LeakyReLU(0.2)
        out = jnp.dot(h.astype(w5_ref.dtype), w5_ref[...],
                      preferred_element_type=jnp.float32)
        o_ref[...] = (out + b5_ref[...]).astype(o_ref.dtype)


def fused_dense(a, w4_p, b4_p, w5_p, b5_p, n_out):
    M, K = a.shape
    K_pad, H = w4_p.shape            # H = 512, already lane-aligned
    H2, N_pad = w5_p.shape
    assert H2 == H

    M_pad, tm, mt = _m_tiling(M)
    tk = _choose_tk(K_pad, TK_DENSE_MAX)
    kt = K_pad // tk

    a_p = a if a.dtype == jnp.bfloat16 else a.astype(jnp.bfloat16)
    if M_pad != M or K_pad != K:
        a_p = jnp.pad(a_p, ((0, M_pad - M), (0, K_pad - K)))

    out = pl.pallas_call(
        _fused_dense_kernel,
        out_shape=jax.ShapeDtypeStruct((M_pad, N_pad), jnp.float32),
        grid_spec=pltpu.PrefetchScalarGridSpec(
            num_scalar_prefetch=0,
            grid=(mt, kt),
            in_specs=[
                pl.BlockSpec((tm, tk), lambda m, k: (m, k)),
                pl.BlockSpec((tk, H), lambda m, k: (k, 0)),
                pl.BlockSpec((1, H), lambda m, k: (0, 0)),
                pl.BlockSpec((H, N_pad), lambda m, k: (0, 0)),
                pl.BlockSpec((1, N_pad), lambda m, k: (0, 0)),
            ],
            out_specs=pl.BlockSpec((tm, N_pad), lambda m, k: (m, 0)),
            scratch_shapes=[pltpu.VMEM((tm, H), jnp.float32)],
        ),
        compiler_params=pltpu.CompilerParams(
            dimension_semantics=("parallel", "arbitrary"),
            vmem_limit_bytes=DENSE_VMEM_LIMIT),
    )(a_p, w4_p, b4_p, w5_p, b5_p)

    return out[:M, :n_out]


# ----------------------------------------------------------------------------
# Conv2d (stride, pad) lowered to im2col (glue, fused under jit) + Pallas matmul.
# ----------------------------------------------------------------------------
def conv2d_leaky(x_nhwc, w_p, bias_p, n_out, *, stride, pad):
    """x: (N,H,W,Cin); w_p rows in (kh, kw, Cin) tap order, cols = Cout."""
    N, H, W, C = x_nhwc.shape
    kh = kw = 3
    xp = jnp.pad(x_nhwc, ((0, 0), (pad, pad), (pad, pad), (0, 0)))
    Ho = (H + 2 * pad - kh) // stride + 1
    Wo = (W + 2 * pad - kw) // stride + 1

    cols = []
    for i in range(kh):
        for j in range(kw):
            cols.append(xp[:, i:i + (Ho - 1) * stride + 1:stride,
                           j:j + (Wo - 1) * stride + 1:stride, :])
    # (N, Ho, Wo, kh*kw, Cin) -> (N*Ho*Wo, kh*kw*Cin); tap order (i, j, c)
    patches = jnp.stack(cols, axis=3)
    a = patches.reshape(N * Ho * Wo, kh * kw * C)

    out = matmul_bias_act(a, w_p, bias_p, n_out, apply_leaky=True,
                          out_dtype=jnp.bfloat16)
    return out.reshape(N, Ho, Wo, n_out)


# ----------------------------------------------------------------------------
# Full forward pass (matches the PyTorch Discriminator, eval semantics).
# ----------------------------------------------------------------------------
@jax.jit
def discriminator_forward(x_nchw, params):
    # Cast once to bf16: all intermediate activations stay bf16 from here on.
    x = jnp.transpose(x_nchw, (0, 2, 3, 1)).astype(jnp.bfloat16)       # -> NHWC

    x = conv2d_leaky(x, params["w1"], params["b1"], 64, stride=2, pad=1)   # (N,14,14,64)
    x = conv2d_leaky(x, params["w2"], params["b2"], 128, stride=2, pad=1)  # (N,7,7,128)
    x = conv2d_leaky(x, params["w3"], params["b3"], 256, stride=1, pad=1)  # (N,7,7,256)

    # Flatten directly in NHWC order; w4's rows were laid out in (h, w, c)
    # order at init, so no runtime NHWC->NCHW transpose is needed.
    n = x.shape[0]
    x_flat = x.reshape(n, -1)                                          # (N, 7*7*256)

    return fused_dense(x_flat, params["w4"], params["b4"],
                       params["w5"], params["b5"], 1)                  # (N, 1)


# ----------------------------------------------------------------------------
# Params: padded + bf16-cast ONCE here (no per-call weight padding).
# ----------------------------------------------------------------------------
def _pad_weight(w2d):
    K, N = w2d.shape
    K_pad, N_pad = _round_up(K, 128), _round_up(N, 128)
    out = jnp.zeros((K_pad, N_pad), jnp.bfloat16)       # extra K rows MUST be 0
    return out.at[:K, :N].set(w2d.astype(jnp.bfloat16))


def _pad_bias(b):
    N = b.shape[0]
    return jnp.zeros((1, _round_up(N, 128)), jnp.float32).at[0, :N].set(
        b.astype(jnp.float32))


def init_params(key, in_channels):
    """Layout notes vs. a PyTorch checkpoint:
      * conv weights: torch (Cout, Cin, kh, kw) -> rows in (kh, kw, Cin) order,
        columns = Cout (matches the im2col tap order above).
      * w4 rows are in NHWC-flatten order (h, w, c); a torch checkpoint uses
        NCHW-flatten (c, h, w) and would need a one-time row permutation.
    """
    ks = jax.random.split(key, 5)
    s = 0.02

    w1 = s * jax.random.normal(ks[0], (3 * 3 * in_channels, 64), jnp.float32)
    w2 = s * jax.random.normal(ks[1], (3 * 3 * 64, 128), jnp.float32)
    w3 = s * jax.random.normal(ks[2], (3 * 3 * 128, 256), jnp.float32)
    w4 = s * jax.random.normal(ks[3], (256 * 7 * 7, 512), jnp.float32)
    w5 = s * jax.random.normal(ks[4], (512, 1), jnp.float32)

    return {
        "w1": _pad_weight(w1), "b1": _pad_bias(jnp.zeros((64,), jnp.float32)),
        "w2": _pad_weight(w2), "b2": _pad_bias(jnp.zeros((128,), jnp.float32)),
        "w3": _pad_weight(w3), "b3": _pad_bias(jnp.zeros((256,), jnp.float32)),
        "w4": _pad_weight(w4), "b4": _pad_bias(jnp.zeros((512,), jnp.float32)),
        "w5": _pad_weight(w5), "b5": _pad_bias(jnp.zeros((1,), jnp.float32)),
    }


if __name__ == "__main__":
    key = jax.random.PRNGKey(0)
    k_params, k_input = jax.random.split(key)

    # The dense layer (256*7*7) pins the spatial size to 28x28 after two
    # stride-2 convs; batch=2, channels=1 (MNIST-like LSGAN input).
    x = jax.random.normal(k_input, (2, 1, 28, 28), jnp.float32)   # NCHW
    params = init_params(k_params, in_channels=1)

    out = discriminator_forward(x, params)
    out = jax.block_until_ready(out)
    assert out.shape == (2, 1), out.shape
    print("KERNEL_OK")
</pallas_src>

<mosaic_0001>
module attributes {stable_mosaic.version = 11 : i64} {
  func.func @_mm_single_k_kernel(%arg0: i32, %arg1: memref<400x128xbf16, #tpu.memory_space<vmem>>, %arg2: memref<128x128xbf16, #tpu.memory_space<vmem>>, %arg3: memref<1x128xf32, #tpu.memory_space<vmem>>, %arg4: memref<400x128xbf16, #tpu.memory_space<vmem>>) attributes {dimension_semantics = [#tpu.dimension_semantics<parallel>], iteration_bounds = array<i64: 1>, scalar_prefetch = 0 : i64, scratch_operands = 0 : i64, tpu.core_type = #tpu.core_type<tc>, window_params = [{transform_indices = @transform_0, window_bounds = array<i64: 400, 128>}, {pipeline_mode = #tpu.pipeline_mode<synchronous>, transform_indices = @transform_1, window_bounds = array<i64: 128, 128>}, {pipeline_mode = #tpu.pipeline_mode<synchronous>, transform_indices = @transform_2, window_bounds = array<i64: 1, 128>}, {transform_indices = @transform_3, window_bounds = array<i64: 400, 128>}]} {
    %c0 = arith.constant 0 : index
    %c0_0 = arith.constant 0 : index
    %0 = vector.load %arg1[%c0, %c0_0] : memref<400x128xbf16, #tpu.memory_space<vmem>>, vector<400x128xbf16>
    %c0_1 = arith.constant 0 : index
    %c0_2 = arith.constant 0 : index
    %1 = vector.load %arg2[%c0_1, %c0_2] : memref<128x128xbf16, #tpu.memory_space<vmem>>, vector<128x128xbf16>
    %cst = arith.constant dense<0.000000e+00> : vector<400x128xf32>
    %2 = tpu.matmul %0, %1, %cst {dimension_numbers = #tpu.dot_dimension_numbers<[1], [0], [0], [1], [0, 0, 1, 1], [], []>} : vector<400x128xbf16>, vector<128x128xbf16>, vector<400x128xf32> -> vector<400x128xf32>
    %c0_3 = arith.constant 0 : index
    %c0_4 = arith.constant 0 : index
    %3 = vector.load %arg3[%c0_3, %c0_4] : memref<1x128xf32, #tpu.memory_space<vmem>>, vector<1x128xf32>
    %4 = vector.broadcast %3 : vector<1x128xf32> to vector<400x128xf32>
    %5 = arith.addf %2, %4 : vector<400x128xf32>
    %cst_5 = arith.constant 0.000000e+00 : f32
    %6 = vector.broadcast %cst_5 : f32 to vector<400x128xf32>
    %7 = arith.cmpf oge, %5, %6 : vector<400x128xf32>
    %cst_6 = arith.constant 2.000000e-01 : f32
    %8 = vector.broadcast %cst_6 : f32 to vector<400x128xf32>
    %9 = arith.mulf %8, %5 : vector<400x128xf32>
    %10 = arith.select %7, %5, %9 : vector<400x128xi1>, vector<400x128xf32>
    %11 = arith.truncf %10 : vector<400x128xf32> to vector<400x128xbf16>
    %c0_7 = arith.constant 0 : index
    %c0_8 = arith.constant 0 : index
    %12 = vector.load %arg4[%c0_7, %c0_8] : memref<400x128xbf16, #tpu.memory_space<vmem>>, vector<400x128xbf16>
    tpu.vector_store %arg4[%c0_7, %c0_8], %11 {strides = array<i32>} : memref<400x128xbf16, #tpu.memory_space<vmem>>, vector<400x128xbf16>,
    return
  }
  func.func @transform_0(%arg0: i32) -> (i32, i32) {
    %c0_i32 = arith.constant 0 : i32
    %c0_i32_0 = arith.constant 0 : i32
    return %arg0, %c0_i32 : i32, i32
  }
  func.func @transform_1(%arg0: i32) -> (i32, i32) {
    %c0_i32 = arith.constant 0 : i32
    %c0_i32_0 = arith.constant 0 : i32
    %c0_i32_1 = arith.constant 0 : i32
    return %c0_i32, %c0_i32_0 : i32, i32
  }
  func.func @transform_2(%arg0: i32) -> (i32, i32) {
    %c0_i32 = arith.constant 0 : i32
    %c0_i32_0 = arith.constant 0 : i32
    %c0_i32_1 = arith.constant 0 : i32
    return %c0_i32, %c0_i32_0 : i32, i32
  }
  func.func @transform_3(%arg0: i32) -> (i32, i32) {
    %c0_i32 = arith.constant 0 : i32
    %c0_i32_0 = arith.constant 0 : i32
    return %arg0, %c0_i32 : i32, i32
  }
}

module attributes {stable_mosaic.version = 11 : i64} {
  func.func @_mm_single_k_kernel(%arg0: i32, %arg1: memref<112x640xbf16, #tpu.memory_space<vmem>>, %arg2: memref<640x128xbf16, #tpu.memory_space<vmem>>, %arg3: memref<1x128xf32, #tpu.memory_space<vmem>>, %arg4: memref<112x128xbf16, #tpu.memory_space<vmem>>) attributes {dimension_semantics = [#tpu.dimension_semantics<parallel>], iteration_bounds = array<i64: 1>, scalar_prefetch = 0 : i64, scratch_operands = 0 : i64, tpu.core_type = #tpu.core_type<tc>, window_params = [{transform_indices = @transform_0, window_bounds = array<i64: 112, 640>}, {pipeline_mode = #tpu.pipeline_mode<synchronous>, transform_indices = @transform_1, window_bounds = array<i64: 640, 128>}, {pipeline_mode = #tpu.pipeline_mode<synchronous>, transform_indices = @transform_2, window_bounds = array<i64: 1, 128>}, {transform_indices = @transform_3, window_bounds = array<i64: 112, 128>}]} {
    %c0 = arith.constant 0 : index
    %c0_0 = arith.constant 0 : index
    %0 = vector.load %arg1[%c0, %c0_0] : memref<112x640xbf16, #tpu.memory_space<vmem>>, vector<112x640xbf16>
    %c0_1 = arith.constant 0 : index
    %c0_2 = arith.constant 0 : index
    %1 = vector.load %arg2[%c0_1, %c0_2] : memref<640x128xbf16, #tpu.memory_space<vmem>>, vector<640x128xbf16>
    %cst = arith.constant dense<0.000000e+00> : vector<112x128xf32>
    %2 = tpu.matmul %0, %1, %cst {dimension_numbers = #tpu.dot_dimension_numbers<[1], [0], [0], [1], [0, 0, 1, 1], [], []>} : vector<112x640xbf16>, vector<640x128xbf16>, vector<112x128xf32> -> vector<112x128xf32>
    %c0_3 = arith.constant 0 : index
    %c0_4 = arith.constant 0 : index
    %3 = vector.load %arg3[%c0_3, %c0_4] : memref<1x128xf32, #tpu.memory_space<vmem>>, vector<1x128xf32>
    %4 = vector.broadcast %3 : vector<1x128xf32> to vector<112x128xf32>
    %5 = arith.addf %2, %4 : vector<112x128xf32>
    %cst_5 = arith.constant 0.000000e+00 : f32
    %6 = vector.broadcast %cst_5 : f32 to vector<112x128xf32>
    %7 = arith.cmpf oge, %5, %6 : vector<112x128xf32>
    %cst_6 = arith.constant 2.000000e-01 : f32
    %8 = vector.broadcast %cst_6 : f32 to vector<112x128xf32>
    %9 = arith.mulf %8, %5 : vector<112x128xf32>
    %10 = arith.select %7, %5, %9 : vector<112x128xi1>, vector<112x128xf32>
    %11 = arith.truncf %10 : vector<112x128xf32> to vector<112x128xbf16>
    %c0_7 = arith.constant 0 : index
    %c0_8 = arith.constant 0 : index
    %12 = vector.load %arg4[%c0_7, %c0_8] : memref<112x128xbf16, #tpu.memory_space<vmem>>, vector<112x128xbf16>
    tpu.vector_store %arg4[%c0_7, %c0_8], %11 {strides = array<i32>} : memref<112x128xbf16, #tpu.memory_space<vmem>>, vector<112x128xbf16>,
    return
  }
  func.func @transform_0(%arg0: i32) -> (i32, i32) {
    %c0_i32 = arith.constant 0 : i32
    %c0_i32_0 = arith.constant 0 : i32
    return %arg0, %c0_i32 : i32, i32
  }
  func.func @transform_1(%arg0: i32) -> (i32, i32) {
    %c0_i32 = arith.constant 0 : i32
    %c0_i32_0 = arith.constant 0 : i32
    %c0_i32_1 = arith.constant 0 : i32
    return %c0_i32, %c0_i32_0 : i32, i32
  }
  func.func @transform_2(%arg0: i32) -> (i32, i32) {
    %c0_i32 = arith.constant 0 : i32
    %c0_i32_0 = arith.constant 0 : i32
    %c0_i32_1 = arith.constant 0 : i32
    return %c0_i32, %c0_i32_0 : i32, i32
  }
  func.func @transform_3(%arg0: i32) -> (i32, i32) {
    %c0_i32 = arith.constant 0 : i32
    %c0_i32_0 = arith.constant 0 : i32
    return %arg0, %c0_i32 : i32, i32
  }
}

module attributes {stable_mosaic.version = 11 : i64} {
  func.func @_mm_single_k_kernel(%arg0: i32, %arg1: memref<112x1152xbf16, #tpu.memory_space<vmem>>, %arg2: memref<1152x256xbf16, #tpu.memory_space<vmem>>, %arg3: memref<1x256xf32, #tpu.memory_space<vmem>>, %arg4: memref<112x256xbf16, #tpu.memory_space<vmem>>) attributes {dimension_semantics = [#tpu.dimension_semantics<parallel>], iteration_bounds = array<i64: 1>, scalar_prefetch = 0 : i64, scratch_operands = 0 : i64, tpu.core_type = #tpu.core_type<tc>, window_params = [{transform_indices = @transform_0, window_bounds = array<i64: 112, 1152>}, {pipeline_mode = #tpu.pipeline_mode<synchronous>, transform_indices = @transform_1, window_bounds = array<i64: 1152, 256>}, {pipeline_mode = #tpu.pipeline_mode<synchronous>, transform_indices = @transform_2, window_bounds = array<i64: 1, 256>}, {transform_indices = @transform_3, window_bounds = array<i64: 112, 256>}]} {
    %c0 = arith.constant 0 : index
    %c0_0 = arith.constant 0 : index
    %0 = vector.load %arg1[%c0, %c0_0] : memref<112x1152xbf16, #tpu.memory_space<vmem>>, vector<112x1152xbf16>
    %c0_1 = arith.constant 0 : index
    %c0_2 = arith.constant 0 : index
    %1 = vector.load %arg2[%c0_1, %c0_2] : memref<1152x256xbf16, #tpu.memory_space<vmem>>, vector<1152x256xbf16>
    %cst = arith.constant dense<0.000000e+00> : vector<112x256xf32>
    %2 = tpu.matmul %0, %1, %cst {dimension_numbers = #tpu.dot_dimension_numbers<[1], [0], [0], [1], [0, 0, 1, 1], [], []>} : vector<112x1152xbf16>, vector<1152x256xbf16>, vector<112x256xf32> -> vector<112x256xf32>
    %c0_3 = arith.constant 0 : index
    %c0_4 = arith.constant 0 : index
    %3 = vector.load %arg3[%c0_3, %c0_4] : memref<1x256xf32, #tpu.memory_space<vmem>>, vector<1x256xf32>
    %4 = vector.broadcast %3 : vector<1x256xf32> to vector<112x256xf32>
    %5 = arith.addf %2, %4 : vector<112x256xf32>
    %cst_5 = arith.constant 0.000000e+00 : f32
    %6 = vector.broadcast %cst_5 : f32 to vector<112x256xf32>
    %7 = arith.cmpf oge, %5, %6 : vector<112x256xf32>
    %cst_6 = arith.constant 2.000000e-01 : f32
    %8 = vector.broadcast %cst_6 : f32 to vector<112x256xf32>
    %9 = arith.mulf %8, %5 : vector<112x256xf32>
    %10 = arith.select %7, %5, %9 : vector<112x256xi1>, vector<112x256xf32>
    %11 = arith.truncf %10 : vector<112x256xf32> to vector<112x256xbf16>
    %c0_7 = arith.constant 0 : index
    %c0_8 = arith.constant 0 : index
    %12 = vector.load %arg4[%c0_7, %c0_8] : memref<112x256xbf16, #tpu.memory_space<vmem>>, vector<112x256xbf16>
    tpu.vector_store %arg4[%c0_7, %c0_8], %11 {strides = array<i32>} : memref<112x256xbf16, #tpu.memory_space<vmem>>, vector<112x256xbf16>,
    return
  }
  func.func @transform_0(%arg0: i32) -> (i32, i32) {
    %c0_i32 = arith.constant 0 : i32
    %c0_i32_0 = arith.constant 0 : i32
    return %arg0, %c0_i32 : i32, i32
  }
  func.func @transform_1(%arg0: i32) -> (i32, i32) {
    %c0_i32 = arith.constant 0 : i32
    %c0_i32_0 = arith.constant 0 : i32
    %c0_i32_1 = arith.constant 0 : i32
    return %c0_i32, %c0_i32_0 : i32, i32
  }
  func.func @transform_2(%arg0: i32) -> (i32, i32) {
    %c0_i32 = arith.constant 0 : i32
    %c0_i32_0 = arith.constant 0 : i32
    %c0_i32_1 = arith.constant 0 : i32
    return %c0_i32, %c0_i32_0 : i32, i32
  }
  func.func @transform_3(%arg0: i32) -> (i32, i32) {
    %c0_i32 = arith.constant 0 : i32
    %c0_i32_0 = arith.constant 0 : i32
    return %arg0, %c0_i32 : i32, i32
  }
}

module attributes {stable_mosaic.version = 11 : i64} {
  func.func @_fused_dense_kernel(%arg0: i32, %arg1: i32, %arg2: memref<16x6272xbf16, #tpu.memory_space<vmem>>, %arg3: memref<6272x512xbf16, #tpu.memory_space<vmem>>, %arg4: memref<1x512xf32, #tpu.memory_space<vmem>>, %arg5: memref<512x128xbf16, #tpu.memory_space<vmem>>, %arg6: memref<1x128xf32, #tpu.memory_space<vmem>>, %arg7: memref<16x128xf32, #tpu.memory_space<vmem>>, %arg8: memref<16x512xf32, #tpu.memory_space<vmem>>) attributes {dimension_semantics = [#tpu.dimension_semantics<parallel>, #tpu.dimension_semantics<arbitrary>], iteration_bounds = array<i64: 1, 2>, scalar_prefetch = 0 : i64, scratch_operands = 1 : i64, tpu.core_type = #tpu.core_type<tc>, window_params = [{transform_indices = @transform_0, window_bounds = array<i64: 16, 6272>}, {transform_indices = @transform_1, window_bounds = array<i64: 6272, 512>}, {pipeline_mode = #tpu.pipeline_mode<synchronous>, transform_indices = @transform_2, window_bounds = array<i64: 1, 512>}, {pipeline_mode = #tpu.pipeline_mode<synchronous>, transform_indices = @transform_3, window_bounds = array<i64: 512, 128>}, {pipeline_mode = #tpu.pipeline_mode<synchronous>, transform_indices = @transform_4, window_bounds = array<i64: 1, 128>}, {transform_indices = @transform_5, window_bounds = array<i64: 16, 128>}]} {
    %c0_i32 = arith.constant 0 : i32
    %0 = arith.cmpi eq, %arg1, %c0_i32 : i32
    %1 = arith.extui %0 : i1 to i32
    %c0_i32_0 = arith.constant 0 : i32
    %2 = arith.cmpi ne, %1, %c0_i32_0 : i32
    scf.if %2 {
      %cst_9 = arith.constant 0.000000e+00 : f32
      %12 = vector.broadcast %cst_9 : f32 to vector<16x512xf32>
      %c0_10 = arith.constant 0 : index
      %c0_11 = arith.constant 0 : index
      %13 = vector.load %arg8[%c0_10, %c0_11] : memref<16x512xf32, #tpu.memory_space<vmem>>, vector<16x512xf32>
      tpu.vector_store %arg8[%c0_10, %c0_11], %12 {strides = array<i32>} : memref<16x512xf32, #tpu.memory_space<vmem>>, vector<16x512xf32>,
    } else {
    }
    %c0 = arith.constant 0 : index
    %c0_1 = arith.constant 0 : index
    %3 = vector.load %arg8[%c0, %c0_1] : memref<16x512xf32, #tpu.memory_space<vmem>>, vector<16x512xf32>
    %c0_2 = arith.constant 0 : index
    %c0_3 = arith.constant 0 : index
    %4 = vector.load %arg2[%c0_2, %c0_3] : memref<16x6272xbf16, #tpu.memory_space<vmem>>, vector<16x6272xbf16>
    %c0_4 = arith.constant 0 : index
    %c0_5 = arith.constant 0 : index
    %5 = vector.load %arg3[%c0_4, %c0_5] : memref<6272x512xbf16, #tpu.memory_space<vmem>>, vector<6272x512xbf16>
    %cst = arith.constant dense<0.000000e+00> : vector<16x512xf32>
    %6 = tpu.matmul %4, %5, %cst {dimension_numbers = #tpu.dot_dimension_numbers<[1], [0], [0], [1], [0, 0, 1, 1], [], []>} : vector<16x6272xbf16>, vector<6272x512xbf16>, vector<16x512xf32> -> vector<16x512xf32>
    %7 = arith.addf %3, %6 : vector<16x512xf32>
    %c0_6 = arith.constant 0 : index
    %c0_7 = arith.constant 0 : index
    %8 = vector.load %arg8[%c0_6, %c0_7] : memref<16x512xf32, #tpu.memory_space<vmem>>, vector<16x512xf32>
    tpu.vector_store %arg8[%c0_6, %c0_7], %7 {strides = array<i32>} : memref<16x512xf32, #tpu.memory_space<vmem>>, vector<16x512xf32>,
    %c1_i32 = arith.constant 1 : i32
    %9 = arith.cmpi eq, %arg1, %c1_i32 : i32
    %10 = arith.extui %9 : i1 to i32
    %c0_i32_8 = arith.constant 0 : i32
    %11 = arith.cmpi ne, %10, %c0_i32_8 : i32
    scf.if %11 {
      %c0_9 = arith.constant 0 : index
      %c0_10 = arith.constant 0 : index
      %12 = vector.load %arg8[%c0_9, %c0_10] : memref<16x512xf32, #tpu.memory_space<vmem>>, vector<16x512xf32>
      %c0_11 = arith.constant 0 : index
      %c0_12 = arith.constant 0 : index
      %13 = vector.load %arg4[%c0_11, %c0_12] : memref<1x512xf32, #tpu.memory_space<vmem>>, vector<1x512xf32>
      %14 = vector.broadcast %13 : vector<1x512xf32> to vector<16x512xf32>
      %15 = arith.addf %12, %14 : vector<16x512xf32>
      %cst_13 = arith.constant 0.000000e+00 : f32
      %16 = vector.broadcast %cst_13 : f32 to vector<16x512xf32>
      %17 = arith.cmpf oge, %15, %16 : vector<16x512xf32>
      %cst_14 = arith.constant 2.000000e-01 : f32
      %18 = vector.broadcast %cst_14 : f32 to vector<16x512xf32>
      %19 = arith.mulf %18, %15 : vector<16x512xf32>
      %20 = arith.select %17, %15, %19 : vector<16x512xi1>, vector<16x512xf32>
      %21 = arith.truncf %20 : vector<16x512xf32> to vector<16x512xbf16>
      %c0_15 = arith.constant 0 : index
      %c0_16 = arith.constant 0 : index
      %22 = vector.load %arg5[%c0_15, %c0_16] : memref<512x128xbf16, #tpu.memory_space<vmem>>, vector<512x128xbf16>
      %cst_17 = arith.constant dense<0.000000e+00> : vector<16x128xf32>
      %23 = tpu.matmul %21, %22, %cst_17 {dimension_numbers = #tpu.dot_dimension_numbers<[1], [0], [0], [1], [0, 0, 1, 1], [], []>} : vector<16x512xbf16>, vector<512x128xbf16>, vector<16x128xf32> -> vector<16x128xf32>
      %c0_18 = arith.constant 0 : index
      %c0_19 = arith.constant 0 : index
      %24 = vector.load %arg6[%c0_18, %c0_19] : memref<1x128xf32, #tpu.memory_space<vmem>>, vector<1x128xf32>
      %25 = vector.broadcast %24 : vector<1x128xf32> to vector<16x128xf32>
      %26 = arith.addf %23, %25 : vector<16x128xf32>
      %c0_20 = arith.constant 0 : index
      %c0_21 = arith.constant 0 : index
      %27 = vector.load %arg7[%c0_20, %c0_21] : memref<16x128xf32, #tpu.memory_space<vmem>>, vector<16x128xf32>
      tpu.vector_store %arg7[%c0_20, %c0_21], %26 {strides = array<i32>} : memref<16x128xf32, #tpu.memory_space<vmem>>, vector<16x128xf32>,
    } else {
    }
    return
  }
  func.func @transform_0(%arg0: i32, %arg1: i32) -> (i32, i32) {
    %c0_i32 = arith.constant 0 : i32
    return %arg0, %arg1 : i32, i32
  }
  func.func @transform_1(%arg0: i32, %arg1: i32) -> (i32, i32) {
    %c0_i32 = arith.constant 0 : i32
    %c0_i32_0 = arith.constant 0 : i32
    return %arg1, %c0_i32 : i32, i32
  }
  func.func @transform_2(%arg0: i32, %arg1: i32) -> (i32, i32) {
    %c0_i32 = arith.constant 0 : i32
    %c0_i32_0 = arith.constant 0 : i32
    %c0_i32_1 = arith.constant 0 : i32
    return %c0_i32, %c0_i32_0 : i32, i32
  }
  func.func @transform_3(%arg0: i32, %arg1: i32) -> (i32, i32) {
    %c0_i32 = arith.constant 0 : i32
    %c0_i32_0 = arith.constant 0 : i32
    %c0_i32_1 = arith.constant 0 : i32
    return %c0_i32, %c0_i32_0 : i32, i32
  }
  func.func @transform_4(%arg0: i32, %arg1: i32) -> (i32, i32) {
    %c0_i32 = arith.constant 0 : i32
    %c0_i32_0 = arith.constant 0 : i32
    %c0_i32_1 = arith.constant 0 : i32
    return %c0_i32, %c0_i32_0 : i32, i32
  }
  func.func @transform_5(%arg0: i32, %arg1: i32) -> (i32, i32) {
    %c0_i32 = arith.constant 0 : i32
    %c0_i32_0 = arith.constant 0 : i32
    return %arg0, %c0_i32 : i32, i32
  }
}

</mosaic_0001>

<bundles_post_ra>
// kernel: discriminator_forward.4
= control target key start
LH: loop header
LB: loop body
LE: loop exit
PB: predicated region body
PF: predicated region fallthrough
CT: control target
= control target key end

     0   :  { %8 = vsyncpa [#allocation3], 0  ;;  %s1804_s0 = inlined_call_operand.vmem [shape: bf16[400,128], index: 0, kind: input, shape index: {}]   ;;  %s1805_s1 = inlined_call_operand.hbm [shape: bf16[128,128], index: 1, kind: input, shape index: {}]   ;;  %s1806_s2 = inlined_call_operand.hbm [shape: f32[1,128], index: 2, kind: input, shape index: {}]   ;;  %s1807_s3 = inlined_call_operand.vmem [shape: bf16[400,128], index: 3, kind: output, shape index: {}]  }
   0x1   :  { %9 = vsyncpa [#allocation5], 0  ;;  %s1486_s12 = smov [#allocation2]   ;;  %s1438_s16 = scalar_lea.hbm %s1805_s1, 1024 }
   0x2   :  { %s17_s13 = sshll.u32 %s1486_s12, 4  ;;  %p1439_p0 = scmp.ne.s32.totalorder %s1805_s1, %s1438_s16  ;;  %s18_s13 = int_to_ptr.vmem [resolvable:$true] %s17_s13 }
   0x3   :  { %p1442_p1 = scmp.lt.u32.totalorder %s1438_s16, %s1805_s1 }
   0x5   :  { %p1444_p2 = pnand %p1442_p1, %p1439_p0 }
   0x7   :  { %1447 = shalt.err (!%p1444_p2)
}
   0x8   :  { %s1448_s21 = scalar_lea.vmem %s18_s13, 1024  ;;  %p1453_p4 = scmp.lt.s32.totalorder %s18_s13, %s18_s13 }
   0x9   :  { %p1449_p3 = scmp.ne.s32.totalorder %s18_s13, %s1448_s21  ;;  %p1454_p5 = scmp.lt.s32.totalorder %s1448_s21, %s1448_s21 }
   0xb   :  { %p1455_p6 = por %p1454_p5, %p1453_p4 }
   0xd   :  { %p1456_p7 = pnand %p1455_p6, %p1449_p3 }
   0xf   :  { %1459 = shalt.err (!%p1456_p7)
}
  0x10   :  { %s1487_s22 = smov 64   ;;  %s1488_s23 = smov 4  }
  0x11   :  { %23 = dma.hbm_to_vmem [thread:$0]  %s1805_s1, 1024, %s18_s13, [#allocation3], %s1487_s22, %s1487_s22, %s1488_s23  }
  0x12   :  { %s1489_s26 = smov [#allocation4]   ;;  %s1460_s30 = scalar_lea.hbm %s1806_s2, 16 }
  0x13   :  { %s30_s27 = sshll.u32 %s1489_s26, 4  ;;  %p1461_p8 = scmp.ne.s32.totalorder %s1806_s2, %s1460_s30  ;;  %s31_s27 = int_to_ptr.vmem [resolvable:$true] %s30_s27 }
  0x14   :  { %p1464_p9 = scmp.lt.u32.totalorder %s1460_s30, %s1806_s2 }
  0x16   :  { %p1466_p10 = pnand %p1464_p9, %p1461_p8 }
  0x18   :  { %1469 = shalt.err (!%p1466_p10)
}
  0x19   :  { %s1470_s8 = scalar_lea.vmem %s31_s27, 16  ;;  %s1474_s1 = scalar_lea.vmem %s31_s27, 32 }
  0x1a   :  { %p1471_p11 = scmp.ne.s32.totalorder %s31_s27, %s1470_s8  ;;  %p1475_p12 = scmp.lt.s32.totalorder %s31_s27, %s31_s27 }
  0x1b   :  { %p1476_p13 = scmp.lt.s32.totalorder %s1474_s1, %s1470_s8 }
  0x1d   :  { %p1477_p0 = por %p1476_p13, %p1475_p12 }
  0x1f   :  { %p1478_p1 = pnand %p1477_p0, %p1471_p11 }
  0x21   :  { %1481 = shalt.err (!%p1478_p1)
}
  0x22   :  { %33 = dma.hbm_to_vmem [thread:$0]  %s1806_s2, 16, %s31_s27, [#allocation5]  }
  0x23   :  { %1482 = dma.done.wait [#allocation3], 1024  }
  0x24   :  { %1483 = vsyncadd [#allocation3], 4294966272 }
  0x25   :  { %1484 = dma.done.wait [#allocation5], 16  }
  0x26   :  { %1485 = vsyncadd [#allocation5], 4294967280  ;;  %v1490_v0 = vmov 0.0   ;;  %vm1491_vm0 = vmmov 0   ;;  %v1405_v1 = vld [vmem:[#allocation2] sm:$0xff]   ;;  %v1406_v2 = vld [vmem:[#allocation2 + $0x8] sm:$0xff]  }
  0x27   :  { %1267 = vmatprep.subr.bf16.mxu0 %v1490_v0  ;;  %1383 = vmatprep.subr.bf16.mxu1 %v1490_v0  ;;  %v1407_v3 = vld [vmem:[#allocation2 + $0x10] sm:$0xff]   ;;  %v1408_v4 = vld [vmem:[#allocation2 + $0x18] sm:$0xff]   ;;  %v1409_v5 = vld [vmem:[#allocation2 + $0x20] sm:$0xff]  }
  0x28   :  { %1283 = vmatprep.mubr.msk.bf16.mxu0 %vm1491_vm0, %v1490_v0  ;;  %1335 = vmatprep.mubr.msk.bf16.mxu1 %vm1491_vm0, %v1490_v0  ;;  %v1410_v6 = vld [vmem:[#allocation2 + $0x28] sm:$0xff]   ;;  %v1411_v7 = vld [vmem:[#allocation2 + $0x30] sm:$0xff]   ;;  %v1412_v8 = vld [vmem:[#allocation2 + $0x38] sm:$0xff]  }
  0x29   :  { %1268 = vmatpush3.bf16.msra.mxu0 %v1405_v1  ;;  %1391 = vmatpush3.bf16.msra.mxu1 %v1405_v1  ;;  %v1413_v9 = vld [vmem:[%s1804_s0] sm:$0xff]   ;;  %v1414_v10 = vld [vmem:[%s1804_s0 + $0x68] sm:$0xff]   ;;  %v1416_v12 = vld [vmem:[%s1804_s0 + $0x70] sm:$0xff]  }
  0x2a   :  { %1269 = vmatprep.subr.bf16.mxu0 %v1490_v0  ;;  %1384 = vmatprep.subr.bf16.mxu1 %v1490_v0  ;;  %v1415_v11 = vld [vmem:[%s1804_s0 + $0x8] sm:$0xff]   ;;  %v1417_v13 = vld [vmem:[%s1804_s0 + $0x10] sm:$0xff]   ;;  %v1418_v14 = vld [vmem:[%s1804_s0 + $0x78] sm:$0xff]  }
  0x2b   :  { %v1419_v15 = vld [vmem:[%s1804_s0 + $0x18] sm:$0xff]   ;;  %v1420_v16 = vld [vmem:[%s1804_s0 + $0x80] sm:$0xff]   ;;  %v1422_v18 = vld [vmem:[%s1804_s0 + $0x88] sm:$0xff]  }
  0x2c   :  { %v1421_v17 = vld [vmem:[%s1804_s0 + $0x20] sm:$0xff]   ;;  %v1423_v19 = vld [vmem:[%s1804_s0 + $0x28] sm:$0xff]   ;;  %v1424_v20 = vld [vmem:[%s1804_s0 + $0x90] sm:$0xff]  }
  0x2d   :  { %1270 = vmatpush3.bf16.msra.mxu0 %v1406_v2  ;;  %1392 = vmatpush3.bf16.msra.mxu1 %v1406_v2  ;;  %v1425_v21 = vld [vmem:[%s1804_s0 + $0x30] sm:$0xff]   ;;  %v1426_v22 = vld [vmem:[%s1804_s0 + $0x98] sm:$0xff]   ;;  %v1428_v24 = vld [vmem:[%s1804_s0 + $0xa0] sm:$0xff]  }
  0x2e   :  { %1271 = vmatprep.subr.bf16.mxu0 %v1490_v0  ;;  %1385 = vmatprep.subr.bf16.mxu1 %v1490_v0  ;;  %v1427_v23 = vld [vmem:[%s1804_s0 + $0x38] sm:$0xff]   ;;  %v1429_v25 = vld [vmem:[%s1804_s0 + $0x40] sm:$0xff]   ;;  %v1430_v26 = vld [vmem:[%s1804_s0 + $0xa8] sm:$0xff]  }
  0x2f   :  { %v1431_v27 = vld [vmem:[%s1804_s0 + $0x48] sm:$0xff]   ;;  %v1432_v28 = vld [vmem:[%s1804_s0 + $0xb0] sm:$0xff]   ;;  %v1434_v30 = vld [vmem:[%s1804_s0 + $0xb8] sm:$0xff]  }
  0x30   :  { %v1433_v29 = vld [vmem:[%s1804_s0 + $0x50] sm:$0xff]   ;;  %v1435_v31 = vld [vmem:[%s1804_s0 + $0x58] sm:$0xff]   ;;  %v1436_v32 = vld [vmem:[%s1804_s0 + $0xc0] sm:$0xff]  }
  0x31   :  { %1272 = vmatpush3.bf16.msra.mxu0 %v1407_v3  ;;  %1393 = vmatpush3.bf16.msra.mxu1 %v1407_v3  ;;  %v1437_v33 = vld [vmem:[%s1804_s0 + $0x60] sm:$0xff]  }
  0x32   :  { %1273 = vmatprep.subr.bf16.mxu0 %v1490_v0  ;;  %1386 = vmatprep.subr.bf16.mxu1 %v1490_v0  ;;  %v1677_v34 = vld [vmem:[#allocation4] ss:$0 sm:$0xff] }
  0x35   :  { %1274 = vmatpush3.bf16.msra.mxu0 %v1408_v4  ;;  %1394 = vmatpush3.bf16.msra.mxu1 %v1408_v4 }
  0x36   :  { %1275 = vmatprep.subr.bf16.mxu0 %v1490_v0  ;;  %1387 = vmatprep.subr.bf16.mxu1 %v1490_v0 }
  0x39   :  { %1276 = vmatpush3.bf16.msra.mxu0 %v1409_v5  ;;  %1395 = vmatpush3.bf16.msra.mxu1 %v1409_v5 }
  0x3a   :  { %1277 = vmatprep.subr.bf16.mxu0 %v1490_v0  ;;  %1388 = vmatprep.subr.bf16.mxu1 %v1490_v0 }
  0x3d   :  { %1278 = vmatpush3.bf16.msra.mxu0 %v1410_v6  ;;  %1396 = vmatpush3.bf16.msra.mxu1 %v1410_v6 }
  0x3e   :  { %1279 = vmatprep.subr.bf16.mxu0 %v1490_v0  ;;  %1389 = vmatprep.subr.bf16.mxu1 %v1490_v0 }
  0x41   :  { %1280 = vmatpush3.bf16.msra.mxu0 %v1411_v7  ;;  %1397 = vmatpush3.bf16.msra.mxu1 %v1411_v7 }
  0x42   :  { %1281 = vmatprep.subr.bf16.mxu0 %v1490_v0  ;;  %1390 = vmatprep.subr.bf16.mxu1 %v1490_v0 }
  0x45   :  { %1282 = vmatpush3.bf16.msra.mxu0 %v1412_v8  ;;  %1398 = vmatpush3.bf16.msra.mxu1 %v1412_v8 }
  0x48   :  { %1284 = vmatmul.mubr.bf16.vlgmr.msra.gmra.mrb[0].mxu0 %v1413_v9  ;;  %1336 = vmatmul.mubr.bf16.vlgmr.msra.gmra.mrb[0].mxu1 %v1414_v10 }
  0x49   :  { %1287 = vmatprep.mubr.msk.bf16.mxu0 %vm1491_vm0, %v1490_v0  ;;  %1339 = vmatprep.mubr.msk.bf16.mxu1 %vm1491_vm0, %v1490_v0 }
  0x50   :  { %1288 = vmatmul.mubr.bf16.gmra.mrb[4].mxu0 %v1415_v11  ;;  %1340 = vmatmul.mubr.bf16.gmra.mrb[4].mxu1 %v1416_v12 }
  0x51   :  { %1291 = vmatprep.mubr.msk.bf16.mxu0 %vm1491_vm0, %v1490_v0  ;;  %1343 = vmatprep.mubr.msk.bf16.mxu1 %vm1491_vm0, %v1490_v0 }
  0x58   :  { %1292 = vmatmul.mubr.bf16.gmra.mrb[8].mxu0 %v1417_v13  ;;  %1344 = vmatmul.mubr.bf16.gmra.mrb[8].mxu1 %v1418_v14 }
  0x59   :  { %1295 = vmatprep.mubr.msk.bf16.mxu0 %vm1491_vm0, %v1490_v0  ;;  %1347 = vmatprep.mubr.msk.bf16.mxu1 %vm1491_vm0, %v1490_v0 }
  0x60   :  { %1296 = vmatmul.mubr.bf16.gmra.mrb[12].mxu0 %v1419_v15  ;;  %1348 = vmatmul.mubr.bf16.gmra.mrb[12].mxu1 %v1420_v16 }
  0x61   :  { %1299 = vmatprep.mubr.msk.bf16.mxu0 %vm1491_vm0, %v1490_v0  ;;  %1351 = vmatprep.mubr.msk.bf16.mxu1 %vm1491_vm0, %v1490_v0 }
  0x68   :  { %1300 = vmatmul.mubr.bf16.gmra.mrb[16].mxu0 %v1421_v17  ;;  %1352 = vmatmul.mubr.bf16.gmra.mrb[16].mxu1 %v1422_v18 }
  0x69   :  { %1303 = vmatprep.mubr.msk.bf16.mxu0 %vm1491_vm0, %v1490_v0  ;;  %1355 = vmatprep.mubr.msk.bf16.mxu1 %vm1491_vm0, %v1490_v0 }
  0x70   :  { %1304 = vmatmul.mubr.bf16.gmra.mrb[20].mxu0 %v1423_v19  ;;  %1356 = vmatmul.mubr.bf16.gmra.mrb[20].mxu1 %v1424_v20 }
  0x71   :  { %1307 = vmatprep.mubr.msk.bf16.mxu0 %vm1491_vm0, %v1490_v0  ;;  %1359 = vmatprep.mubr.msk.bf16.mxu1 %vm1491_vm0, %v1490_v0 }
  0x78   :  { %1308 = vmatmul.mubr.bf16.gmra.mrb[24].mxu0 %v1425_v21  ;;  %1360 = vmatmul.mubr.bf16.gmra.mrb[24].mxu1 %v1426_v22 }
  0x79   :  { %1311 = vmatprep.mubr.msk.bf16.mxu0 %vm1491_vm0, %v1490_v0  ;;  %1363 = vmatprep.mubr.msk.bf16.mxu1 %vm1491_vm0, %v1490_v0 }
  0x80   :  { %1312 = vmatmul.mubr.bf16.gmra.mrb[28].mxu0 %v1427_v23  ;;  %1364 = vmatmul.mubr.bf16.gmra.mrb[28].mxu1 %v1428_v24 }
  0x81   :  { %1315 = vmatprep.mubr.msk.bf16.mxu0 %vm1491_vm0, %v1490_v0  ;;  %1367 = vmatprep.mubr.msk.bf16.mxu1 %vm1491_vm0, %v1490_v0 }
  0x88   :  { %1316 = vmatmul.mubr.bf16.gmra.mrb[32].mxu0 %v1429_v25  ;;  %1368 = vmatmul.mubr.bf16.gmra.mrb[32].mxu1 %v1430_v26 }
  0x89   :  { %1319 = vmatprep.mubr.msk.bf16.mxu0 %vm1491_vm0, %v1490_v0  ;;  %1371 = vmatprep.mubr.msk.bf16.mxu1 %vm1491_vm0, %v1490_v0 }
  0x90   :  { %1320 = vmatmul.mubr.bf16.gmra.mrb[36].mxu0 %v1431_v27  ;;  %1372 = vmatmul.mubr.bf16.gmra.mrb[36].mxu1 %v1432_v28 }
  0x91   :  { %1323 = vmatprep.mubr.msk.bf16.mxu0 %vm1491_vm0, %v1490_v0  ;;  %1375 = vmatprep.mubr.msk.bf16.mxu1 %vm1491_vm0, %v1490_v0 }
  0x98   :  { %1324 = vmatmul.mubr.bf16.gmra.mrb[40].mxu0 %v1433_v29  ;;  %1376 = vmatmul.mubr.bf16.gmra.mrb[40].mxu1 %v1434_v30 }
  0x99   :  { %1327 = vmatprep.mubr.msk.bf16.mxu0 %vm1491_vm0, %v1490_v0  ;;  %1379 = vmatprep.mubr.msk.bf16.mxu1 %vm1491_vm0, %v1490_v0 }
  0xa0   :  { %1328 = vmatmul.mubr.bf16.gmra.mrb[44].mxu0 %v1435_v31  ;;  %1380 = vmatmul.mubr.bf16.gmra.mrb[44].mxu1 %v1436_v32 }
  0xa1   :  { %1331 = vmatprep.mubr.msk.bf16.mxu0 %vm1491_vm0, %v1490_v0 }
  0xa8   :  { %1332 = vmatmul.mubr.bf16.gmra.mrb[48].mxu0 %v1437_v33 }
 0x11b   :  { %v346_v35 = vpop.f32.mrb[0].mxu0  ;;  %v450_v36 = vpop.f32.mrb[0].mxu1 }
 0x11c   :  { %v347_v37 = vadd.f32 %v1677_v34, %v346_v35  ;;  %v1285_v38 = vpop.f32.mrb[1].mxu0  ;;  %v451_v39 = vadd.f32 %v1677_v34, %v450_v36  ;;  %v1337_v40 = vpop.f32.mrb[1].mxu1 }
 0x11d   :  { %v349_v41 = vpop.f32.mrb[2].mxu0  ;;  %v453_v42 = vpop.f32.mrb[2].mxu1 }
 0x11e   :  { %v595_v43 = vmul.f32 0.2, %v347_v37  ;;  %v350_v44 = vadd.f32 %v1677_v34, %v349_v41  ;;  %v1286_v45 = vpop.f32.mrb[3].mxu0  ;;  %vm571_vm1 = vcmp.ge.f32.partialorder %v451_v39, 0.0  ;;  %v1338_v46 = vpop.f32.mrb[3].mxu1  ;;  %vm545_vm2 = vcmp.ge.f32.partialorder %v347_v37, 0.0 }
 0x11f   :  { %v621_v47 = vmul.f32 0.2, %v451_v39  ;;  %v454_v48 = vadd.f32 %v1677_v34, %v453_v42 }
 0x120   :  { %vm546_vm3 = vcmp.ge.f32.partialorder %v350_v44, 0.0  ;;  %v596_v49 = vmul.f32 0.2, %v350_v44  ;;  %v645_v52 = vsel %vm545_vm2, %v347_v37, %v595_v43 }
 0x121   :  { %v671_v50 = vsel %vm571_vm1, %v451_v39, %v621_v47  ;;  %vm572_vm4 = vcmp.ge.f32.partialorder %v454_v48, 0.0  ;;  %v622_v51 = vmul.f32 0.2, %v454_v48 }
 0x122   :  { %v646_v53 = vsel %vm546_vm3, %v350_v44, %v596_v49 }
 0x123   :  { %v1088_v54 = vpack.c.bf16 %v646_v53, %v645_v52  ;;  %v672_v55 = vsel %vm572_vm4, %v454_v48, %v622_v51  ;;  %v354_v56 = vpop.f32.mrb[4].mxu0  ;;  %v458_v57 = vpop.f32.mrb[4].mxu1 }
 0x124   :  { %v1153_v58 = vpack.c.bf16 %v672_v55, %v671_v50  ;;  %v355_v59 = vadd.f32 %v1677_v34, %v354_v56  ;;  %v1289_v60 = vpop.f32.mrb[5].mxu0  ;;  %v459_v61 = vadd.f32 %v1677_v34, %v458_v57  ;;  %v1341_v62 = vpop.f32.mrb[5].mxu1 }
 0x125   :  { %1089 = vst [vmem:[%s1807_s3] sm:$0xff] %v1088_v54   ;;  %v357_v63 = vpop.f32.mrb[6].mxu0  ;;  %v461_v0 = vpop.f32.mrb[6].mxu1 }
 0x126   :  { %1222 = vst [vmem:[%s1807_s3 + $0x68] sm:$0xff] %v1153_v58   ;;  %v597_v1 = vmul.f32 0.2, %v355_v59  ;;  %v358_v2 = vadd.f32 %v1677_v34, %v357_v63  ;;  %v1290_v3 = vpop.f32.mrb[7].mxu0  ;;  %vm573_vm5 = vcmp.ge.f32.partialorder %v459_v61, 0.0  ;;  %v1342_v4 = vpop.f32.mrb[7].mxu1  ;;  %v462_v6 = vadd.f32 %v1677_v34, %v461_v0 }
 0x127   :  { %vm547_vm6 = vcmp.ge.f32.partialorder %v355_v59, 0.0  ;;  %v623_v5 = vmul.f32 0.2, %v459_v61 }
 0x128   :  { %vm548_vm7 = vcmp.ge.f32.partialorder %v358_v2, 0.0  ;;  %v598_v7 = vmul.f32 0.2, %v358_v2  ;;  %vm574_vm8 = vcmp.ge.f32.partialorder %v462_v6, 0.0  ;;  %v624_v9 = vmul.f32 0.2, %v462_v6 }
 0x129   :  { %v673_v8 = vsel %vm573_vm5, %v459_v61, %v623_v5  ;;  %v647_v10 = vsel %vm547_vm6, %v355_v59, %v597_v1 }
 0x12a   :  { %v648_v11 = vsel %vm548_vm7, %v358_v2, %v598_v7  ;;  %v674_v13 = vsel %vm574_vm8, %v462_v6, %v624_v9 }
 0x12b   :  { %v1093_v12 = vpack.c.bf16 %v648_v11, %v647_v10  ;;  %v362_v14 = vpop.f32.mrb[8].mxu0  ;;  %v466_v15 = vpop.f32.mrb[8].mxu1  ;;  %v1158_v16 = vpack.c.bf16 %v674_v13, %v673_v8 }
 0x12c   :  { %v363_v17 = vadd.f32 %v1677_v34, %v362_v14  ;;  %v1293_v18 = vpop.f32.mrb[9].mxu0  ;;  %v467_v19 = vadd.f32 %v1677_v34, %v466_v15  ;;  %v1345_v20 = vpop.f32.mrb[9].mxu1 }
 0x12d   :  { %1210 = vst [vmem:[%s1807_s3 + $0x8] sm:$0xff] %v1093_v12   ;;  %v365_v21 = vpop.f32.mrb[10].mxu0  ;;  %v469_v22 = vpop.f32.mrb[10].mxu1  ;;  %1223 = vst [vmem:[%s1807_s3 + $0x70] sm:$0xff] %v1158_v16  }
 0x12e   :  { %v599_v23 = vmul.f32 0.2, %v363_v17  ;;  %v366_v24 = vadd.f32 %v1677_v34, %v365_v21  ;;  %v1294_v25 = vpop.f32.mrb[11].mxu0  ;;  %vm575_vm9 = vcmp.ge.f32.partialorder %v467_v19, 0.0  ;;  %v1346_v26 = vpop.f32.mrb[11].mxu1  ;;  %vm549_vm10 = vcmp.ge.f32.partialorder %v363_v17, 0.0 }
 0x12f   :  { %v625_v27 = vmul.f32 0.2, %v467_v19  ;;  %v470_v28 = vadd.f32 %v1677_v34, %v469_v22 }
 0x130   :  { %vm550_vm11 = vcmp.ge.f32.partialorder %v366_v24, 0.0  ;;  %v600_v29 = vmul.f32 0.2, %v366_v24  ;;  %v649_v32 = vsel %vm549_vm10, %v363_v17, %v599_v23 }
 0x131   :  { %v675_v30 = vsel %vm575_vm9, %v467_v19, %v625_v27  ;;  %vm576_vm12 = vcmp.ge.f32.partialorder %v470_v28, 0.0  ;;  %v626_v31 = vmul.f32 0.2, %v470_v28 }
 0x132   :  { %v650_v33 = vsel %vm550_vm11, %v366_v24, %v600_v29 }
 0x133   :  { %v1098_v35 = vpack.c.bf16 %v650_v33, %v649_v32  ;;  %v676_v36 = vsel %vm576_vm12, %v470_v28, %v626_v31  ;;  %v370_v37 = vpop.f32.mrb[12].mxu0  ;;  %v474_v38 = vpop.f32.mrb[12].mxu1 }
 0x134   :  { %v1163_v39 = vpack.c.bf16 %v676_v36, %v675_v30  ;;  %v371_v40 = vadd.f32 %v1677_v34, %v370_v37  ;;  %v1297_v41 = vpop.f32.mrb[13].mxu0  ;;  %v475_v42 = vadd.f32 %v1677_v34, %v474_v38  ;;  %v1349_v43 = vpop.f32.mrb[13].mxu1 }
 0x135   :  { %1211 = vst [vmem:[%s1807_s3 + $0x10] sm:$0xff] %v1098_v35   ;;  %v373_v44 = vpop.f32.mrb[14].mxu0  ;;  %v477_v45 = vpop.f32.mrb[14].mxu1 }
 0x136   :  { %1224 = vst [vmem:[%s1807_s3 + $0x78] sm:$0xff] %v1163_v39   ;;  %v601_v46 = vmul.f32 0.2, %v371_v40  ;;  %v374_v47 = vadd.f32 %v1677_v34, %v373_v44  ;;  %v1298_v48 = vpop.f32.mrb[15].mxu0  ;;  %vm577_vm13 = vcmp.ge.f32.partialorder %v475_v42, 0.0  ;;  %v1350_v49 = vpop.f32.mrb[15].mxu1  ;;  %v478_v51 = vadd.f32 %v1677_v34, %v477_v45 }
 0x137   :  { %vm551_vm14 = vcmp.ge.f32.partialorder %v371_v40, 0.0  ;;  %v627_v50 = vmul.f32 0.2, %v475_v42 }
 0x138   :  { %vm552_vm15 = vcmp.ge.f32.partialorder %v374_v47, 0.0  ;;  %v602_v52 = vmul.f32 0.2, %v374_v47  ;;  %vm578_vm0 = vcmp.ge.f32.partialorder %v478_v51, 0.0  ;;  %v628_v54 = vmul.f32 0.2, %v478_v51 }
 0x139   :  { %v677_v53 = vsel %vm577_vm13, %v475_v42, %v627_v50  ;;  %v651_v55 = vsel %vm551_vm14, %v371_v40, %v601_v46 }
 0x13a   :  { %v652_v56 = vsel %vm552_vm15, %v374_v47, %v602_v52  ;;  %v678_v58 = vsel %vm578_vm0, %v478_v51, %v628_v54 }
 0x13b   :  { %v1103_v57 = vpack.c.bf16 %v652_v56, %v651_v55  ;;  %v378_v59 = vpop.f32.mrb[16].mxu0  ;;  %v482_v60 = vpop.f32.mrb[16].mxu1  ;;  %v1168_v61 = vpack.c.bf16 %v678_v58, %v677_v53 }
 0x13c   :  { %v379_v62 = vadd.f32 %v1677_v34, %v378_v59  ;;  %v1301_v63 = vpop.f32.mrb[17].mxu0  ;;  %v483_v0 = vadd.f32 %v1677_v34, %v482_v60  ;;  %v1353_v1 = vpop.f32.mrb[17].mxu1 }
 0x13d   :  { %1212 = vst [vmem:[%s1807_s3 + $0x18] sm:$0xff] %v1103_v57   ;;  %v381_v2 = vpop.f32.mrb[18].mxu0  ;;  %v485_v3 = vpop.f32.mrb[18].mxu1  ;;  %1225 = vst [vmem:[%s1807_s3 + $0x80] sm:$0xff] %v1168_v61  }
 0x13e   :  { %v603_v4 = vmul.f32 0.2, %v379_v62  ;;  %v382_v5 = vadd.f32 %v1677_v34, %v381_v2  ;;  %v1302_v6 = vpop.f32.mrb[19].mxu0  ;;  %vm579_vm1 = vcmp.ge.f32.partialorder %v483_v0, 0.0  ;;  %v1354_v7 = vpop.f32.mrb[19].mxu1  ;;  %vm553_vm2 = vcmp.ge.f32.partialorder %v379_v62, 0.0 }
 0x13f   :  { %v629_v8 = vmul.f32 0.2, %v483_v0  ;;  %v486_v9 = vadd.f32 %v1677_v34, %v485_v3 }
 0x140   :  { %vm554_vm3 = vcmp.ge.f32.partialorder %v382_v5, 0.0  ;;  %v604_v10 = vmul.f32 0.2, %v382_v5  ;;  %v653_v13 = vsel %vm553_vm2, %v379_v62, %v603_v4 }
 0x141   :  { %v679_v11 = vsel %vm579_vm1, %v483_v0, %v629_v8  ;;  %vm580_vm4 = vcmp.ge.f32.partialorder %v486_v9, 0.0  ;;  %v630_v12 = vmul.f32 0.2, %v486_v9 }
 0x142   :  { %v654_v14 = vsel %vm554_vm3, %v382_v5, %v604_v10 }
 0x143   :  { %v1108_v15 = vpack.c.bf16 %v654_v14, %v653_v13  ;;  %v680_v16 = vsel %vm580_vm4, %v486_v9, %v630_v12  ;;  %v386_v17 = vpop.f32.mrb[20].mxu0  ;;  %v490_v18 = vpop.f32.mrb[20].mxu1 }
 0x144   :  { %v1173_v19 = vpack.c.bf16 %v680_v16, %v679_v11  ;;  %v387_v20 = vadd.f32 %v1677_v34, %v386_v17  ;;  %v1305_v21 = vpop.f32.mrb[21].mxu0  ;;  %v491_v22 = vadd.f32 %v1677_v34, %v490_v18  ;;  %v1357_v23 = vpop.f32.mrb[21].mxu1 }
 0x145   :  { %1213 = vst [vmem:[%s1807_s3 + $0x20] sm:$0xff] %v1108_v15   ;;  %v389_v24 = vpop.f32.mrb[22].mxu0  ;;  %v493_v25 = vpop.f32.mrb[22].mxu1 }
 0x146   :  { %1226 = vst [vmem:[%s1807_s3 + $0x88] sm:$0xff] %v1173_v19   ;;  %v605_v26 = vmul.f32 0.2, %v387_v20  ;;  %v390_v27 = vadd.f32 %v1677_v34, %v389_v24  ;;  %v1306_v28 = vpop.f32.mrb[23].mxu0  ;;  %vm581_vm5 = vcmp.ge.f32.partialorder %v491_v22, 0.0  ;;  %v1358_v29 = vpop.f32.mrb[23].mxu1  ;;  %v494_v31 = vadd.f32 %v1677_v34, %v493_v25 }
 0x147   :  { %vm555_vm6 = vcmp.ge.f32.partialorder %v387_v20, 0.0  ;;  %v631_v30 = vmul.f32 0.2, %v491_v22 }
 0x148   :  { %vm556_vm7 = vcmp.ge.f32.partialorder %v390_v27, 0.0  ;;  %v606_v32 = vmul.f32 0.2, %v390_v27  ;;  %vm582_vm8 = vcmp.ge.f32.partialorder %v494_v31, 0.0  ;;  %v632_v35 = vmul.f32 0.2, %v494_v31 }
 0x149   :  { %v681_v33 = vsel %vm581_vm5, %v491_v22, %v631_v30  ;;  %v655_v36 = vsel %vm555_vm6, %v387_v20, %v605_v26 }
 0x14a   :  { %v656_v37 = vsel %vm556_vm7, %v390_v27, %v606_v32  ;;  %v682_v39 = vsel %vm582_vm8, %v494_v31, %v632_v35 }
 0x14b   :  { %v1113_v38 = vpack.c.bf16 %v656_v37, %v655_v36  ;;  %v394_v40 = vpop.f32.mrb[24].mxu0  ;;  %v498_v41 = vpop.f32.mrb[24].mxu1  ;;  %v1178_v42 = vpack.c.bf16 %v682_v39, %v681_v33 }
 0x14c   :  { %v395_v43 = vadd.f32 %v1677_v34, %v394_v40  ;;  %v1309_v44 = vpop.f32.mrb[25].mxu0  ;;  %v499_v45 = vadd.f32 %v1677_v34, %v498_v41  ;;  %v1361_v46 = vpop.f32.mrb[25].mxu1 }
 0x14d   :  { %1214 = vst [vmem:[%s1807_s3 + $0x28] sm:$0xff] %v1113_v38   ;;  %v397_v47 = vpop.f32.mrb[26].mxu0  ;;  %v501_v48 = vpop.f32.mrb[26].mxu1  ;;  %1227 = vst [vmem:[%s1807_s3 + $0x90] sm:$0xff] %v1178_v42  }
 0x14e   :  { %v607_v49 = vmul.f32 0.2, %v395_v43  ;;  %v398_v50 = vadd.f32 %v1677_v34, %v397_v47  ;;  %v1310_v51 = vpop.f32.mrb[27].mxu0  ;;  %vm583_vm9 = vcmp.ge.f32.partialorder %v499_v45, 0.0  ;;  %v1362_v52 = vpop.f32.mrb[27].mxu1  ;;  %vm557_vm10 = vcmp.ge.f32.partialorder %v395_v43, 0.0 }
 0x14f   :  { %v633_v53 = vmul.f32 0.2, %v499_v45  ;;  %v502_v54 = vadd.f32 %v1677_v34, %v501_v48 }
 0x150   :  { %vm558_vm11 = vcmp.ge.f32.partialorder %v398_v50, 0.0  ;;  %v608_v55 = vmul.f32 0.2, %v398_v50  ;;  %v657_v58 = vsel %vm557_vm10, %v395_v43, %v607_v49 }
 0x151   :  { %v683_v56 = vsel %vm583_vm9, %v499_v45, %v633_v53  ;;  %vm584_vm12 = vcmp.ge.f32.partialorder %v502_v54, 0.0  ;;  %v634_v57 = vmul.f32 0.2, %v502_v54 }
 0x152   :  { %v658_v59 = vsel %vm558_vm11, %v398_v50, %v608_v55 }
 0x153   :  { %v1118_v60 = vpack.c.bf16 %v658_v59, %v657_v58  ;;  %v684_v61 = vsel %vm584_vm12, %v502_v54, %v634_v57  ;;  %v402_v62 = vpop.f32.mrb[28].mxu0  ;;  %v506_v63 = vpop.f32.mrb[28].mxu1 }
 0x154   :  { %v1183_v0 = vpack.c.bf16 %v684_v61, %v683_v56  ;;  %v403_v1 = vadd.f32 %v1677_v34, %v402_v62  ;;  %v1313_v2 = vpop.f32.mrb[29].mxu0  ;;  %v507_v3 = vadd.f32 %v1677_v34, %v506_v63  ;;  %v1365_v4 = vpop.f32.mrb[29].mxu1 }
 0x155   :  { %1215 = vst [vmem:[%s1807_s3 + $0x30] sm:$0xff] %v1118_v60   ;;  %v405_v5 = vpop.f32.mrb[30].mxu0  ;;  %v509_v6 = vpop.f32.mrb[30].mxu1 }
 0x156   :  { %1228 = vst [vmem:[%s1807_s3 + $0x98] sm:$0xff] %v1183_v0   ;;  %v609_v7 = vmul.f32 0.2, %v403_v1  ;;  %v406_v8 = vadd.f32 %v1677_v34, %v405_v5  ;;  %v1314_v9 = vpop.f32.mrb[31].mxu0  ;;  %vm585_vm13 = vcmp.ge.f32.partialorder %v507_v3, 0.0  ;;  %v1366_v10 = vpop.f32.mrb[31].mxu1  ;;  %v510_v12 = vadd.f32 %v1677_v34, %v509_v6 }
 0x157   :  { %vm559_vm14 = vcmp.ge.f32.partialorder %v403_v1, 0.0  ;;  %v635_v11 = vmul.f32 0.2, %v507_v3 }
 0x158   :  { %vm560_vm15 = vcmp.ge.f32.partialorder %v406_v8, 0.0  ;;  %v610_v13 = vmul.f32 0.2, %v406_v8  ;;  %vm586_vm0 = vcmp.ge.f32.partialorder %v510_v12, 0.0  ;;  %v636_v15 = vmul.f32 0.2, %v510_v12 }
 0x159   :  { %v685_v14 = vsel %vm585_vm13, %v507_v3, %v635_v11  ;;  %v659_v16 = vsel %vm559_vm14, %v403_v1, %v609_v7 }
 0x15a   :  { %v660_v17 = vsel %vm560_vm15, %v406_v8, %v610_v13  ;;  %v686_v19 = vsel %vm586_vm0, %v510_v12, %v636_v15 }
 0x15b   :  { %v1123_v18 = vpack.c.bf16 %v660_v17, %v659_v16  ;;  %v410_v20 = vpop.f32.mrb[32].mxu0  ;;  %v514_v21 = vpop.f32.mrb[32].mxu1  ;;  %v1188_v22 = vpack.c.bf16 %v686_v19, %v685_v14 }
 0x15c   :  { %v411_v23 = vadd.f32 %v1677_v34, %v410_v20  ;;  %v1317_v24 = vpop.f32.mrb[33].mxu0  ;;  %v515_v25 = vadd.f32 %v1677_v34, %v514_v21  ;;  %v1369_v26 = vpop.f32.mrb[33].mxu1 }
 0x15d   :  { %1216 = vst [vmem:[%s1807_s3 + $0x38] sm:$0xff] %v1123_v18   ;;  %v413_v27 = vpop.f32.mrb[34].mxu0  ;;  %v517_v28 = vpop.f32.mrb[34].mxu1  ;;  %1229 = vst [vmem:[%s1807_s3 + $0xa0] sm:$0xff] %v1188_v22  }
 0x15e   :  { %v611_v29 = vmul.f32 0.2, %v411_v23  ;;  %v414_v30 = vadd.f32 %v1677_v34, %v413_v27  ;;  %v1318_v31 = vpop.f32.mrb[35].mxu0  ;;  %vm587_vm1 = vcmp.ge.f32.partialorder %v515_v25, 0.0  ;;  %v1370_v32 = vpop.f32.mrb[35].mxu1  ;;  %vm561_vm2 = vcmp.ge.f32.partialorder %v411_v23, 0.0 }
 0x15f   :  { %v637_v33 = vmul.f32 0.2, %v515_v25  ;;  %v518_v35 = vadd.f32 %v1677_v34, %v517_v28 }
 0x160   :  { %vm562_vm3 = vcmp.ge.f32.partialorder %v414_v30, 0.0  ;;  %v612_v36 = vmul.f32 0.2, %v414_v30  ;;  %v661_v39 = vsel %vm561_vm2, %v411_v23, %v611_v29 }
 0x161   :  { %v687_v37 = vsel %vm587_vm1, %v515_v25, %v637_v33  ;;  %vm588_vm4 = vcmp.ge.f32.partialorder %v518_v35, 0.0  ;;  %v638_v38 = vmul.f32 0.2, %v518_v35 }
 0x162   :  { %v662_v40 = vsel %vm562_vm3, %v414_v30, %v612_v36 }
 0x163   :  { %v1128_v41 = vpack.c.bf16 %v662_v40, %v661_v39  ;;  %v688_v42 = vsel %vm588_vm4, %v518_v35, %v638_v38  ;;  %v418_v43 = vpop.f32.mrb[36].mxu0  ;;  %v522_v44 = vpop.f32.mrb[36].mxu1 }
 0x164   :  { %v1193_v45 = vpack.c.bf16 %v688_v42, %v687_v37  ;;  %v419_v46 = vadd.f32 %v1677_v34, %v418_v43  ;;  %v1321_v47 = vpop.f32.mrb[37].mxu0  ;;  %v523_v48 = vadd.f32 %v1677_v34, %v522_v44  ;;  %v1373_v49 = vpop.f32.mrb[37].mxu1 }
 0x165   :  { %1217 = vst [vmem:[%s1807_s3 + $0x40] sm:$0xff] %v1128_v41   ;;  %v421_v50 = vpop.f32.mrb[38].mxu0  ;;  %v525_v51 = vpop.f32.mrb[38].mxu1 }
 0x166   :  { %1230 = vst [vmem:[%s1807_s3 + $0xa8] sm:$0xff] %v1193_v45   ;;  %v613_v52 = vmul.f32 0.2, %v419_v46  ;;  %v422_v53 = vadd.f32 %v1677_v34, %v421_v50  ;;  %v1322_v54 = vpop.f32.mrb[39].mxu0  ;;  %vm589_vm5 = vcmp.ge.f32.partialorder %v523_v48, 0.0  ;;  %v1374_v55 = vpop.f32.mrb[39].mxu1  ;;  %v526_v57 = vadd.f32 %v1677_v34, %v525_v51 }
 0x167   :  { %vm563_vm6 = vcmp.ge.f32.partialorder %v419_v46, 0.0  ;;  %v639_v56 = vmul.f32 0.2, %v523_v48 }
 0x168   :  { %vm564_vm7 = vcmp.ge.f32.partialorder %v422_v53, 0.0  ;;  %v614_v58 = vmul.f32 0.2, %v422_v53  ;;  %vm590_vm8 = vcmp.ge.f32.partialorder %v526_v57, 0.0  ;;  %v640_v60 = vmul.f32 0.2, %v526_v57 }
 0x169   :  { %v689_v59 = vsel %vm589_vm5, %v523_v48, %v639_v56  ;;  %v663_v61 = vsel %vm563_vm6, %v419_v46, %v613_v52 }
 0x16a   :  { %v664_v62 = vsel %vm564_vm7, %v422_v53, %v614_v58  ;;  %v690_v0 = vsel %vm590_vm8, %v526_v57, %v640_v60 }
 0x16b   :  { %v1133_v63 = vpack.c.bf16 %v664_v62, %v663_v61  ;;  %v426_v1 = vpop.f32.mrb[40].mxu0  ;;  %v530_v2 = vpop.f32.mrb[40].mxu1  ;;  %v1198_v3 = vpack.c.bf16 %v690_v0, %v689_v59 }
 0x16c   :  { %v427_v4 = vadd.f32 %v1677_v34, %v426_v1  ;;  %v1325_v5 = vpop.f32.mrb[41].mxu0  ;;  %v531_v6 = vadd.f32 %v1677_v34, %v530_v2  ;;  %v1377_v7 = vpop.f32.mrb[41].mxu1 }
 0x16d   :  { %1218 = vst [vmem:[%s1807_s3 + $0x48] sm:$0xff] %v1133_v63   ;;  %v429_v8 = vpop.f32.mrb[42].mxu0  ;;  %v533_v9 = vpop.f32.mrb[42].mxu1  ;;  %1231 = vst [vmem:[%s1807_s3 + $0xb0] sm:$0xff] %v1198_v3  }
 0x16e   :  { %v615_v10 = vmul.f32 0.2, %v427_v4  ;;  %v430_v11 = vadd.f32 %v1677_v34, %v429_v8  ;;  %v1326_v12 = vpop.f32.mrb[43].mxu0  ;;  %vm591_vm9 = vcmp.ge.f32.partialorder %v531_v6, 0.0  ;;  %v1378_v13 = vpop.f32.mrb[43].mxu1  ;;  %vm565_vm10 = vcmp.ge.f32.partialorder %v427_v4, 0.0 }
 0x16f   :  { %v641_v14 = vmul.f32 0.2, %v531_v6  ;;  %v534_v15 = vadd.f32 %v1677_v34, %v533_v9 }
 0x170   :  { %vm566_vm11 = vcmp.ge.f32.partialorder %v430_v11, 0.0  ;;  %v616_v16 = vmul.f32 0.2, %v430_v11  ;;  %v665_v19 = vsel %vm565_vm10, %v427_v4, %v615_v10 }
 0x171   :  { %v691_v17 = vsel %vm591_vm9, %v531_v6, %v641_v14  ;;  %vm592_vm12 = vcmp.ge.f32.partialorder %v534_v15, 0.0  ;;  %v642_v18 = vmul.f32 0.2, %v534_v15 }
 0x172   :  { %v666_v20 = vsel %vm566_vm11, %v430_v11, %v616_v16 }
 0x173   :  { %v1138_v21 = vpack.c.bf16 %v666_v20, %v665_v19  ;;  %v692_v22 = vsel %vm592_vm12, %v534_v15, %v642_v18  ;;  %v434_v23 = vpop.f32.mrb[44].mxu0  ;;  %v538_v24 = vpop.f32.mrb[44].mxu1 }
 0x174   :  { %v1203_v25 = vpack.c.bf16 %v692_v22, %v691_v17  ;;  %v435_v26 = vadd.f32 %v1677_v34, %v434_v23  ;;  %v1329_v27 = vpop.f32.mrb[45].mxu0  ;;  %v539_v28 = vadd.f32 %v1677_v34, %v538_v24  ;;  %v1381_v29 = vpop.f32.mrb[45].mxu1 }
 0x175   :  { %1219 = vst [vmem:[%s1807_s3 + $0x50] sm:$0xff] %v1138_v21   ;;  %v437_v30 = vpop.f32.mrb[46].mxu0  ;;  %v541_v31 = vpop.f32.mrb[46].mxu1 }
 0x176   :  { %1232 = vst [vmem:[%s1807_s3 + $0xb8] sm:$0xff] %v1203_v25   ;;  %v617_v32 = vmul.f32 0.2, %v435_v26  ;;  %v438_v33 = vadd.f32 %v1677_v34, %v437_v30  ;;  %v1330_v35 = vpop.f32.mrb[47].mxu0  ;;  %vm593_vm13 = vcmp.ge.f32.partialorder %v539_v28, 0.0  ;;  %v1382_v36 = vpop.f32.mrb[47].mxu1  ;;  %v542_v38 = vadd.f32 %v1677_v34, %v541_v31 }
 0x177   :  { %vm567_vm14 = vcmp.ge.f32.partialorder %v435_v26, 0.0  ;;  %v643_v37 = vmul.f32 0.2, %v539_v28 }
 0x178   :  { %vm568_vm15 = vcmp.ge.f32.partialorder %v438_v33, 0.0  ;;  %v618_v39 = vmul.f32 0.2, %v438_v33  ;;  %vm594_vm0 = vcmp.ge.f32.partialorder %v542_v38, 0.0  ;;  %v644_v41 = vmul.f32 0.2, %v542_v38 }
 0x179   :  { %v693_v40 = vsel %vm593_vm13, %v539_v28, %v643_v37  ;;  %v667_v42 = vsel %vm567_vm14, %v435_v26, %v617_v32 }
 0x17a   :  { %v668_v43 = vsel %vm568_vm15, %v438_v33, %v618_v39  ;;  %v694_v45 = vsel %vm594_vm0, %v542_v38, %v644_v41 }
 0x17b   :  { %v1143_v44 = vpack.c.bf16 %v668_v43, %v667_v42  ;;  %v442_v46 = vpop.f32.mrb[48].mxu0  ;;  %v1208_v47 = vpack.c.bf16 %v694_v45, %v693_v40 }
 0x17c   :  { %v443_v48 = vadd.f32 %v1677_v34, %v442_v46  ;;  %v1333_v49 = vpop.f32.mrb[49].mxu0 }
 0x17d   :  { %1220 = vst [vmem:[%s1807_s3 + $0x58] sm:$0xff] %v1143_v44   ;;  %v445_v50 = vpop.f32.mrb[50].mxu0  ;;  %1233 = vst [vmem:[%s1807_s3 + $0xc0] sm:$0xff] %v1208_v47  }
 0x17e   :  { %v619_v51 = vmul.f32 0.2, %v443_v48  ;;  %v446_v52 = vadd.f32 %v1677_v34, %v445_v50  ;;  %v1334_v53 = vpop.f32.mrb[51].mxu0  ;;  %vm569_vm1 = vcmp.ge.f32.partialorder %v443_v48, 0.0 }
 0x180   :  { %vm570_vm2 = vcmp.ge.f32.partialorder %v446_v52, 0.0  ;;  %v620_v54 = vmul.f32 0.2, %v446_v52  ;;  %v669_v55 = vsel %vm569_vm1, %v443_v48, %v619_v51 }
 0x182   :  { %v670_v56 = vsel %vm570_vm2, %v446_v52, %v620_v54 }
 0x183   :  { %v1148_v57 = vpack.c.bf16 %v670_v56, %v669_v55 }
 0x185   :  { %1221 = vst [vmem:[%s1807_s3 + $0x60] sm:$0xff] %v1148_v57  }
 0x186   :  { %949 = vsyncpa [#allocation3], 1 }
 0x187   :  { %950 = vsyncpa [#allocation5], 1 }

// kernel: discriminator_forward.5
= control target key start
LH: loop header
LB: loop body
LE: loop exit
PB: predicated region body
PF: predicated region fallthrough
CT: control target
= control target key end

     0   :  { %8 = vsyncpa [#allocation3], 0  ;;  %s1694_s0 = inlined_call_operand.vmem [shape: bf16[112,640], index: 0, kind: input, shape index: {}]   ;;  %s1695_s1 = inlined_call_operand.hbm [shape: bf16[640,128], index: 1, kind: input, shape index: {}]   ;;  %s1696_s2 = inlined_call_operand.hbm [shape: f32[1,128], index: 2, kind: input, shape index: {}]   ;;  %s1697_s3 = inlined_call_operand.vmem [shape: bf16[112,128], index: 3, kind: output, shape index: {}]  }
   0x1   :  { %9 = vsyncpa [#allocation5], 0  ;;  %s1456_s12 = smov [#allocation2]   ;;  %s1408_s16 = scalar_lea.hbm %s1695_s1, 5120 }
   0x2   :  { %s17_s13 = sshll.u32 %s1456_s12, 4  ;;  %p1409_p0 = scmp.ne.s32.totalorder %s1695_s1, %s1408_s16  ;;  %s18_s13 = int_to_ptr.vmem [resolvable:$true] %s17_s13 }
   0x3   :  { %p1412_p1 = scmp.lt.u32.totalorder %s1408_s16, %s1695_s1 }
   0x5   :  { %p1414_p2 = pnand %p1412_p1, %p1409_p0 }
   0x7   :  { %1417 = shalt.err (!%p1414_p2)
}
   0x8   :  { %s1418_s21 = scalar_lea.vmem %s18_s13, 5120  ;;  %p1423_p4 = scmp.lt.s32.totalorder %s18_s13, %s18_s13 }
   0x9   :  { %p1419_p3 = scmp.ne.s32.totalorder %s18_s13, %s1418_s21  ;;  %p1424_p5 = scmp.lt.s32.totalorder %s1418_s21, %s1418_s21 }
   0xb   :  { %p1425_p6 = por %p1424_p5, %p1423_p4 }
   0xd   :  { %p1426_p7 = pnand %p1425_p6, %p1419_p3 }
   0xf   :  { %1429 = shalt.err (!%p1426_p7)
}
  0x10   :  { %s1457_s22 = smov 64   ;;  %s1458_s23 = smov 4  }
  0x11   :  { %23 = dma.hbm_to_vmem [thread:$0]  %s1695_s1, 5120, %s18_s13, [#allocation3], %s1457_s22, %s1457_s22, %s1458_s23  }
  0x12   :  { %s1459_s26 = smov [#allocation4]   ;;  %s1430_s30 = scalar_lea.hbm %s1696_s2, 16 }
  0x13   :  { %s30_s27 = sshll.u32 %s1459_s26, 4  ;;  %p1431_p8 = scmp.ne.s32.totalorder %s1696_s2, %s1430_s30  ;;  %s31_s27 = int_to_ptr.vmem [resolvable:$true] %s30_s27 }
  0x14   :  { %p1434_p9 = scmp.lt.u32.totalorder %s1430_s30, %s1696_s2 }
  0x16   :  { %p1436_p10 = pnand %p1434_p9, %p1431_p8 }
  0x18   :  { %1439 = shalt.err (!%p1436_p10)
}
  0x19   :  { %s1440_s8 = scalar_lea.vmem %s31_s27, 16  ;;  %s1444_s1 = scalar_lea.vmem %s31_s27, 32 }
  0x1a   :  { %p1441_p11 = scmp.ne.s32.totalorder %s31_s27, %s1440_s8  ;;  %p1445_p12 = scmp.lt.s32.totalorder %s31_s27, %s31_s27 }
  0x1b   :  { %p1446_p13 = scmp.lt.s32.totalorder %s1444_s1, %s1440_s8 }
  0x1d   :  { %p1447_p0 = por %p1446_p13, %p1445_p12 }
  0x1f   :  { %p1448_p1 = pnand %p1447_p0, %p1441_p11 }
  0x21   :  { %1451 = shalt.err (!%p1448_p1)
}
  0x22   :  { %33 = dma.hbm_to_vmem [thread:$0]  %s1696_s2, 16, %s31_s27, [#allocation5]  }
  0x23   :  { %1452 = dma.done.wait [#allocation3], 5120  }
  0x24   :  { %1453 = vsyncadd [#allocation3], 4294962176 }
  0x25   :  { %1454 = dma.done.wait [#allocation5], 16  }
  0x26   :  { %1455 = vsyncadd [#allocation5], 4294967280  ;;  %v1319_v0 = vld [vmem:[#allocation2 + $0x40] sm:$0xff]   ;;  %v1321_v2 = vld [vmem:[#allocation2 + $0x48] sm:$0xff]   ;;  %v1460_v24 = vmov 0.0   ;;  %vm1461_vm0 = vmmov 0  }
  0x27   :  { %v1320_v1 = vld [vmem:[#allocation2] sm:$0xff]   ;;  %1297 = vmatprep.subr.bf16.mxu1 %v1319_v0  ;;  %1122 = vmatprep.subr.bf16.mxu0 %v1319_v0  ;;  %v1322_v3 = vld [vmem:[#allocation2 + $0x8] sm:$0xff]   ;;  %v1323_v4 = vld [vmem:[#allocation2 + $0x50] sm:$0xff]  }
  0x28   :  { %1305 = vmatpush3.bf16.msra.mxu1 %v1320_v1  ;;  %1123 = vmatpush3.bf16.msra.mxu0 %v1320_v1  ;;  %v1324_v5 = vld [vmem:[#allocation2 + $0x10] sm:$0xff]   ;;  %v1325_v6 = vld [vmem:[#allocation2 + $0x58] sm:$0xff]   ;;  %v1327_v8 = vld [vmem:[#allocation2 + $0x60] sm:$0xff]  }
  0x29   :  { %1298 = vmatprep.subr.bf16.mxu1 %v1321_v2  ;;  %1124 = vmatprep.subr.bf16.mxu0 %v1321_v2  ;;  %v1326_v7 = vld [vmem:[#allocation2 + $0x18] sm:$0xff]   ;;  %v1328_v9 = vld [vmem:[#allocation2 + $0x20] sm:$0xff]   ;;  %v1329_v10 = vld [vmem:[#allocation2 + $0x68] sm:$0xff]  }
  0x2a   :  { %v1337_v11 = vld [vmem:[%s1694_s0 + $0xa4] ss:$20 sps:$4 sm:$0xff]   ;;  %v1330_v12 = vld [vmem:[#allocation2 + $0x28] sm:$0xff]   ;;  %v1331_v14 = vld [vmem:[#allocation2 + $0x70] sm:$0xff]  }
  0x2b   :  { %v1341_v13 = vld [vmem:[%s1694_s0 + $0x4] ss:$20 sps:$4 sm:$0xff]   ;;  %656 = vmatprep.mubr.bf16.mxu1 %v1337_v11  ;;  %v1332_v15 = vld [vmem:[#allocation2 + $0x30] sm:$0xff]   ;;  %v1344_v23 = vld [vmem:[#allocation2 + $0xc8] sm:$0xff]  }
  0x2c   :  { %1306 = vmatpush3.bf16.msra.mxu1 %v1322_v3  ;;  %1125 = vmatpush3.bf16.msra.mxu0 %v1322_v3  ;;  %v1333_v16 = vld [vmem:[#allocation2 + $0x78] sm:$0xff]   ;;  %v1338_v18 = vld [vmem:[#allocation2 + $0xc0] sm:$0xff]   ;;  %v1345_v27 = vld [vmem:[#allocation2 + $0x88] sm:$0xff]  }
  0x2d   :  { %1299 = vmatprep.subr.bf16.mxu1 %v1323_v4  ;;  %1126 = vmatprep.subr.bf16.mxu0 %v1323_v4  ;;  %v1334_v17 = vld [vmem:[#allocation2 + $0x38] sm:$0xff]   ;;  %v1335_v19 = vld [vmem:[%s1694_s0 + $0xa0] ss:$20 sps:$4 sm:$0xff]   ;;  %v1346_v28 = vld [vmem:[#allocation2 + $0x108] sm:$0xff]  }
  0x2e   :  { %624 = vmatprep.mubr.bf16.mxu0 %v1341_v13  ;;  %v1339_v20 = vld [vmem:[%s1694_s0] ss:$20 sps:$4 sm:$0xff]   ;;  %v1351_v31 = vld [vmem:[%s1694_s0 + $0x28] ss:$20 sps:$4 sm:$0xff]   ;;  %v1363_v41 = vld [vmem:[%s1694_s0 + $0x50] ss:$20 sps:$4 sm:$0xff]  }
  0x2f   :  { %v1342_v21 = vld [vmem:[#allocation2 + $0x80] sm:$0xff]   ;;  %v1347_v29 = vld [vmem:[#allocation2 + $0xd0] sm:$0xff]   ;;  %v1356_v32 = vld [vmem:[%s1694_s0 + $0xc8] ss:$20 sps:$4 sm:$0xff]  }
  0x30   :  { %1307 = vmatpush3.bf16.msra.mxu1 %v1324_v5  ;;  %1127 = vmatpush3.bf16.msra.mxu0 %v1324_v5  ;;  %v1343_v22 = vld [vmem:[#allocation2 + $0x100] sm:$0xff]   ;;  %v1350_v30 = vld [vmem:[#allocation2 + $0x90] sm:$0xff]   ;;  %v1355_v34 = vld [vmem:[#allocation2 + $0xd8] sm:$0xff]  }
  0x31   :  { %1300 = vmatprep.subr.bf16.mxu1 %v1325_v6  ;;  %1128 = vmatprep.subr.bf16.mxu0 %v1325_v6  ;;  %v1348_v25 = vld [vmem:[%s1694_s0 + $0x2c] ss:$20 sps:$4 sm:$0xff]   ;;  %v1352_v33 = vld [vmem:[#allocation2 + $0x110] sm:$0xff]   ;;  %v1357_v37 = vld [vmem:[#allocation2 + $0x98] sm:$0xff]  }
  0x32   :  { %v1353_v26 = vld [vmem:[%s1694_s0 + $0xcc] ss:$20 sps:$4 sm:$0xff]   ;;  %v1360_v35 = vld [vmem:[%s1694_s0 + $0x54] ss:$20 sps:$4 sm:$0xff]   ;;  %v1358_v38 = vld [vmem:[#allocation2 + $0x118] sm:$0xff]  }
  0x33   :  { %v1365_v36 = vld [vmem:[%s1694_s0 + $0xf4] ss:$20 sps:$4 sm:$0xff]   ;;  %v1359_v39 = vld [vmem:[#allocation2 + $0xe0] sm:$0xff]   ;;  %v1372_v45 = vld [vmem:[%s1694_s0 + $0x7c] ss:$20 sps:$4 sm:$0xff]  }
  0x34   :  { %1308 = vmatpush3.bf16.msra.mxu1 %v1326_v7  ;;  %1129 = vmatpush3.bf16.msra.mxu0 %v1326_v7  ;;  %v1362_v40 = vld [vmem:[#allocation2 + $0xa0] sm:$0xff]   ;;  %v1367_v44 = vld [vmem:[#allocation2 + $0xe8] sm:$0xff]   ;;  %v1371_v49 = vld [vmem:[#allocation2 + $0xf0] sm:$0xff]  }
  0x35   :  { %1301 = vmatprep.subr.bf16.mxu1 %v1327_v8  ;;  %1130 = vmatprep.subr.bf16.mxu0 %v1327_v8  ;;  %v1368_v42 = vld [vmem:[%s1694_s0 + $0xf0] ss:$20 sps:$4 sm:$0xff]   ;;  %v1381_v46 = vld [vmem:[%s1694_s0 + $0xc] ss:$20 sps:$4 sm:$0xff]   ;;  %v1377_v53 = vld [vmem:[#allocation2 + $0xf8] sm:$0xff]  }
  0x36   :  { %v1364_v43 = vld [vmem:[#allocation2 + $0x120] sm:$0xff]   ;;  %v1369_v47 = vld [vmem:[#allocation2 + $0xa8] sm:$0xff]   ;;  %v1374_v50 = vld [vmem:[#allocation2 + $0xb0] sm:$0xff]  }
  0x37   :  { %v1370_v48 = vld [vmem:[#allocation2 + $0x128] sm:$0xff]   ;;  %v1376_v52 = vld [vmem:[#allocation2 + $0x130] sm:$0xff]   ;;  %v1378_v54 = vld [vmem:[#allocation2 + $0xb8] sm:$0xff]  }
  0x38   :  { %1309 = vmatpush3.bf16.msra.mxu1 %v1328_v9  ;;  %1131 = vmatpush3.bf16.msra.mxu0 %v1328_v9  ;;  %v1375_v51 = vld [vmem:[%s1694_s0 + $0x78] ss:$20 sps:$4 sm:$0xff]   ;;  %v1379_v56 = vld [vmem:[%s1694_s0 + $0x8] ss:$20 sps:$4 sm:$0xff]   ;;  %v1383_v57 = vld [vmem:[%s1694_s0 + $0x10] ss:$20 sps:$4 sm:$0xff]  }
  0x39   :  { %1302 = vmatprep.subr.bf16.mxu1 %v1329_v10  ;;  %1132 = vmatprep.subr.bf16.mxu0 %v1329_v10  ;;  %v1382_v55 = vld [vmem:[#allocation2 + $0x138] sm:$0xff]   ;;  %v1384_v58 = vld [vmem:[%s1694_s0 + $0x34] ss:$20 sps:$4 sm:$0xff]   ;;  %v1386_v59 = vld [vmem:[%s1694_s0 + $0x30] ss:$20 sps:$4 sm:$0xff]  }
  0x3a   :  { %v1387_v60 = vld [vmem:[%s1694_s0 + $0x38] ss:$20 sps:$4 sm:$0xff]   ;;  %v1388_v61 = vld [vmem:[%s1694_s0 + $0x5c] ss:$20 sps:$4 sm:$0xff]   ;;  %v1391_v63 = vld [vmem:[%s1694_s0 + $0x60] ss:$20 sps:$4 sm:$0xff]  }
  0x3b   :  { %v1390_v62 = vld [vmem:[%s1694_s0 + $0x58] ss:$20 sps:$4 sm:$0xff]   ;;  %v1394_v1 = vld [vmem:[%s1694_s0 + $0x80] ss:$20 sps:$4 sm:$0xff]   ;;  %v1395_v2 = vld [vmem:[%s1694_s0 + $0x88] ss:$20 sps:$4 sm:$0xff]  }
  0x3c   :  { %1310 = vmatpush3.bf16.msra.mxu1 %v1330_v12  ;;  %1133 = vmatpush3.bf16.msra.mxu0 %v1330_v12  ;;  %v1392_v0 = vld [vmem:[%s1694_s0 + $0x84] ss:$20 sps:$4 sm:$0xff]   ;;  %v1396_v3 = vld [vmem:[%s1694_s0 + $0xac] ss:$20 sps:$4 sm:$0xff]   ;;  %v1398_v4 = vld [vmem:[%s1694_s0 + $0xa8] ss:$20 sps:$4 sm:$0xff]  }
  0x3d   :  { %1303 = vmatprep.subr.bf16.mxu1 %v1331_v14  ;;  %1134 = vmatprep.subr.bf16.mxu0 %v1331_v14  ;;  %v1399_v5 = vld [vmem:[%s1694_s0 + $0xb0] ss:$20 sps:$4 sm:$0xff]   ;;  %v1400_v6 = vld [vmem:[%s1694_s0 + $0xd4] ss:$20 sps:$4 sm:$0xff]   ;;  %v1403_v8 = vld [vmem:[%s1694_s0 + $0xd8] ss:$20 sps:$4 sm:$0xff]  }
  0x3e   :  { %v1402_v7 = vld [vmem:[%s1694_s0 + $0xd0] ss:$20 sps:$4 sm:$0xff]   ;;  %v1406_v10 = vld [vmem:[%s1694_s0 + $0xf8] ss:$20 sps:$4 sm:$0xff]   ;;  %v1407_v11 = vld [vmem:[%s1694_s0 + $0x100] ss:$20 sps:$4 sm:$0xff]  }
  0x3f   :  { %v1404_v9 = vld [vmem:[%s1694_s0 + $0xfc] ss:$20 sps:$4 sm:$0xff]  }
  0x40   :  { %1311 = vmatpush3.bf16.msra.mxu1 %v1332_v15  ;;  %1135 = vmatpush3.bf16.msra.mxu0 %v1332_v15 }
  0x41   :  { %1304 = vmatprep.subr.bf16.mxu1 %v1333_v16  ;;  %1136 = vmatprep.subr.bf16.mxu0 %v1333_v16 }
  0x44   :  { %1312 = vmatpush3.bf16.msra.mxu1 %v1334_v17  ;;  %1137 = vmatpush3.bf16.msra.mxu0 %v1334_v17 }
  0x45   :  { %1180 = vmatprep.subr.bf16.mxu1 %v1338_v18  ;;  %1253 = vmatprep.subr.bf16.mxu0 %v1460_v24 }
  0x47   :  { %657 = vmatmul.mubr.bf16.vlgmr.msra.gmra.mrb[0].mxu1 %v1335_v19  ;;  %625 = vmatmul.mubr.bf16.vlgmr.msra.gmra.mrb[0].mxu0 %v1339_v20 }
  0x48   :  { %1181 = vmatpush3.bf16.msra.mxu1 %v1342_v21  ;;  %1254 = vmatpush3.bf16.msra.mxu0 %v1343_v22 }
  0x49   :  { %1182 = vmatprep.subr.bf16.mxu1 %v1344_v23  ;;  %1255 = vmatprep.subr.bf16.mxu0 %v1460_v24 }
  0x4a   :  { %632 = vmatprep.mubr.bf16.mxu0 %v1348_v25  ;;  %664 = vmatprep.mubr.bf16.mxu1 %v1353_v26 }
  0x4c   :  { %1183 = vmatpush3.bf16.msra.mxu1 %v1345_v27  ;;  %1256 = vmatpush3.bf16.msra.mxu0 %v1346_v28 }
  0x4d   :  { %1184 = vmatprep.subr.bf16.mxu1 %v1347_v29  ;;  %1257 = vmatprep.subr.bf16.mxu0 %v1460_v24 }
  0x4f   :  { %633 = vmatmul.mubr.bf16.gmra.mrb[4].mxu0 %v1351_v31  ;;  %665 = vmatmul.mubr.bf16.gmra.mrb[4].mxu1 %v1356_v32 }
  0x50   :  { %1185 = vmatpush3.bf16.msra.mxu1 %v1350_v30  ;;  %1258 = vmatpush3.bf16.msra.mxu0 %v1352_v33 }
  0x51   :  { %1186 = vmatprep.subr.bf16.mxu1 %v1355_v34  ;;  %1259 = vmatprep.subr.bf16.mxu0 %v1460_v24 }
  0x52   :  { %640 = vmatprep.mubr.bf16.mxu0 %v1360_v35  ;;  %672 = vmatprep.mubr.bf16.mxu1 %v1365_v36 }
  0x54   :  { %1187 = vmatpush3.bf16.msra.mxu1 %v1357_v37  ;;  %1260 = vmatpush3.bf16.msra.mxu0 %v1358_v38 }
  0x55   :  { %1188 = vmatprep.subr.bf16.mxu1 %v1359_v39  ;;  %1261 = vmatprep.subr.bf16.mxu0 %v1460_v24 }
  0x57   :  { %641 = vmatmul.mubr.bf16.gmra.mrb[8].mxu0 %v1363_v41  ;;  %673 = vmatmul.mubr.bf16.gmra.mrb[8].mxu1 %v1368_v42 }
  0x58   :  { %1189 = vmatpush3.bf16.msra.mxu1 %v1362_v40  ;;  %1262 = vmatpush3.bf16.msra.mxu0 %v1364_v43 }
  0x59   :  { %1190 = vmatprep.subr.bf16.mxu1 %v1367_v44  ;;  %1263 = vmatprep.subr.bf16.mxu0 %v1460_v24 }
  0x5a   :  { %648 = vmatprep.mubr.bf16.mxu0 %v1372_v45  ;;  %713 = vmatprep.mubr.bf16.mxu1 %v1381_v46 }
  0x5c   :  { %1191 = vmatpush3.bf16.msra.mxu1 %v1369_v47  ;;  %1264 = vmatpush3.bf16.msra.mxu0 %v1370_v48 }
  0x5d   :  { %1192 = vmatprep.subr.bf16.mxu1 %v1371_v49  ;;  %1265 = vmatprep.subr.bf16.mxu0 %v1460_v24 }
  0x5f   :  { %649 = vmatmul.mubr.bf16.gmra.mrb[12].mxu0 %v1375_v51 }
  0x60   :  { %1193 = vmatpush3.bf16.msra.mxu1 %v1374_v50  ;;  %1266 = vmatpush3.bf16.msra.mxu0 %v1376_v52 }
  0x61   :  { %1194 = vmatprep.subr.bf16.mxu1 %v1377_v53  ;;  %1267 = vmatprep.subr.bf16.mxu0 %v1460_v24 }
  0x62   :  { %1269 = vmatprep.mubr.msk.bf16.mxu0 %vm1461_vm0, %v1460_v24 }
  0x64   :  { %1195 = vmatpush3.bf16.msra.mxu1 %v1378_v54  ;;  %1268 = vmatpush3.bf16.msra.mxu0 %v1382_v55 }
  0x67   :  { %714 = vmatmul.mubr.bf16.vlgmr.msra.gmra.mrb[12].mxu1 %v1379_v56  ;;  %1270 = vmatmul.mubr.bf16.vlgmr.msra.gmra.mrb[16].mxu0 %v1383_v57  ;;  %v1649_v56 = vld [vmem:[#allocation4] ss:$0 sm:$0xff] }
  0x68   :  { %721 = vmatprep.mubr.bf16.mxu1 %v1384_v58  ;;  %1273 = vmatprep.mubr.msk.bf16.mxu0 %vm1461_vm0, %v1460_v24 }
  0x6f   :  { %722 = vmatmul.mubr.bf16.gmra.mrb[16].mxu1 %v1386_v59  ;;  %1274 = vmatmul.mubr.bf16.gmra.mrb[20].mxu0 %v1387_v60 }
  0x70   :  { %729 = vmatprep.mubr.bf16.mxu1 %v1388_v61  ;;  %1277 = vmatprep.mubr.msk.bf16.mxu0 %vm1461_vm0, %v1460_v24 }
  0x77   :  { %730 = vmatmul.mubr.bf16.gmra.mrb[20].mxu1 %v1390_v62  ;;  %1278 = vmatmul.mubr.bf16.gmra.mrb[24].mxu0 %v1391_v63 }
  0x78   :  { %737 = vmatprep.mubr.bf16.mxu1 %v1392_v0  ;;  %1281 = vmatprep.mubr.msk.bf16.mxu0 %vm1461_vm0, %v1460_v24 }
  0x7f   :  { %738 = vmatmul.mubr.bf16.gmra.mrb[24].mxu1 %v1394_v1  ;;  %1282 = vmatmul.mubr.bf16.gmra.mrb[28].mxu0 %v1395_v2 }
  0x80   :  { %745 = vmatprep.mubr.bf16.mxu1 %v1396_v3  ;;  %1285 = vmatprep.mubr.msk.bf16.mxu0 %vm1461_vm0, %v1460_v24 }
  0x87   :  { %746 = vmatmul.mubr.bf16.gmra.mrb[28].mxu1 %v1398_v4  ;;  %1286 = vmatmul.mubr.bf16.gmra.mrb[32].mxu0 %v1399_v5 }
  0x88   :  { %753 = vmatprep.mubr.bf16.mxu1 %v1400_v6  ;;  %1289 = vmatprep.mubr.msk.bf16.mxu0 %vm1461_vm0, %v1460_v24 }
  0x8f   :  { %754 = vmatmul.mubr.bf16.gmra.mrb[32].mxu1 %v1402_v7  ;;  %1290 = vmatmul.mubr.bf16.gmra.mrb[36].mxu0 %v1403_v8 }
  0x90   :  { %761 = vmatprep.mubr.bf16.mxu1 %v1404_v9  ;;  %1293 = vmatprep.mubr.msk.bf16.mxu0 %vm1461_vm0, %v1460_v24 }
  0x97   :  { %762 = vmatmul.mubr.bf16.gmra.mrb[36].mxu1 %v1406_v10  ;;  %1294 = vmatmul.mubr.bf16.gmra.mrb[40].mxu0 %v1407_v11 }
 0x11a   :  { %v1162_v12 = vpop.f32.mrb[0].mxu1  ;;  %v1138_v13 = vpop.f32.mrb[0].mxu0 }
 0x11b   :  { %v1163_v14 = vpop.f32.mrb[1].mxu1  ;;  %v1139_v15 = vpop.f32.mrb[1].mxu0 }
 0x11c   :  { %v1633_v16 = vadd.f32 %v1163_v14, %v1162_v12  ;;  %v1165_v17 = vpop.f32.mrb[2].mxu1  ;;  %v1140_v18 = vadd.f32 %v1139_v15, %v1138_v13  ;;  %v1141_v19 = vpop.f32.mrb[2].mxu0 }
 0x11d   :  { %v1166_v20 = vpop.f32.mrb[3].mxu1  ;;  %v1142_v21 = vpop.f32.mrb[3].mxu0 }
 0x11e   :  { %v1635_v22 = vadd.f32 %v1166_v20, %v1165_v17  ;;  %v1143_v23 = vadd.f32 %v1142_v21, %v1141_v19  ;;  %v627_v59 = vadd.f32 %v1140_v18, %v1649_v56 }
 0x120   :  { %v630_v1 = vadd.f32 %v1143_v23, %v1649_v56 }
 0x122   :  { %v1144_v24 = vpop.f32.mrb[4].mxu0  ;;  %v1168_v25 = vpop.f32.mrb[4].mxu1 }
 0x123   :  { %v1145_v26 = vpop.f32.mrb[5].mxu0  ;;  %v1169_v27 = vpop.f32.mrb[5].mxu1 }
 0x124   :  { %v1146_v28 = vadd.f32 %v1145_v26, %v1144_v24  ;;  %v1147_v29 = vpop.f32.mrb[6].mxu0  ;;  %v1637_v30 = vadd.f32 %v1169_v27, %v1168_v25  ;;  %v1171_v31 = vpop.f32.mrb[6].mxu1 }
 0x125   :  { %v1148_v32 = vpop.f32.mrb[7].mxu0  ;;  %v1172_v33 = vpop.f32.mrb[7].mxu1 }
 0x126   :  { %v1149_v34 = vadd.f32 %v1148_v32, %v1147_v29  ;;  %v1639_v35 = vadd.f32 %v1172_v33, %v1171_v31  ;;  %v635_v12 = vadd.f32 %v1146_v28, %v1649_v56 }
 0x128   :  { %v638_v18 = vadd.f32 %v1149_v34, %v1649_v56 }
 0x12a   :  { %v1150_v36 = vpop.f32.mrb[8].mxu0  ;;  %v1174_v37 = vpop.f32.mrb[8].mxu1 }
 0x12b   :  { %v1151_v38 = vpop.f32.mrb[9].mxu0  ;;  %v1175_v39 = vpop.f32.mrb[9].mxu1 }
 0x12c   :  { %v1152_v40 = vadd.f32 %v1151_v38, %v1150_v36  ;;  %v1153_v41 = vpop.f32.mrb[10].mxu0  ;;  %v1641_v42 = vadd.f32 %v1175_v39, %v1174_v37  ;;  %v1177_v43 = vpop.f32.mrb[10].mxu1 }
 0x12d   :  { %v1154_v44 = vpop.f32.mrb[11].mxu0  ;;  %v1178_v45 = vpop.f32.mrb[11].mxu1 }
 0x12e   :  { %v1155_v46 = vadd.f32 %v1154_v44, %v1153_v41  ;;  %v1643_v47 = vadd.f32 %v1178_v45, %v1177_v43  ;;  %v643_v37 = vadd.f32 %v1152_v40, %v1649_v56 }
 0x130   :  { %v646_v44 = vadd.f32 %v1155_v46, %v1649_v56 }
 0x132   :  { %v1156_v48 = vpop.f32.mrb[12].mxu0 }
 0x133   :  { %v1157_v49 = vpop.f32.mrb[13].mxu0 }
 0x134   :  { %v1645_v50 = vadd.f32 %v1157_v49, %v1156_v48  ;;  %v1159_v51 = vpop.f32.mrb[14].mxu0 }
 0x135   :  { %v1160_v52 = vpop.f32.mrb[15].mxu0 }
 0x136   :  { %v1647_v53 = vadd.f32 %v1160_v52, %v1159_v51 }
 0x13a   :  { %v1196_v54 = vpop.f32.mrb[12].mxu1  ;;  %v804_v55 = vpop.f32.mrb[16].mxu0 }
 0x13b   :  { %v1197_v57 = vpop.f32.mrb[13].mxu1  ;;  %v1271_v58 = vpop.f32.mrb[17].mxu0 }
 0x13c   :  { %v1198_v60 = vadd.f32 %v1197_v57, %v1196_v54  ;;  %v1199_v61 = vpop.f32.mrb[14].mxu1  ;;  %v807_v62 = vpop.f32.mrb[18].mxu0 }
 0x13d   :  { %v1200_v63 = vpop.f32.mrb[15].mxu1  ;;  %v1272_v0 = vpop.f32.mrb[19].mxu0 }
 0x13e   :  { %v716_v2 = vadd.f32 %v1198_v60, %v627_v59  ;;  %v1201_v3 = vadd.f32 %v1200_v63, %v1199_v61  ;;  %v651_v63 = vadd.f32 %v1645_v50, %v1649_v56 }
 0x140   :  { %v805_v4 = vadd.f32 %v804_v55, %v716_v2  ;;  %v719_v5 = vadd.f32 %v1201_v3, %v630_v1 }
 0x142   :  { %v873_v6 = vmul.f32 0.2, %v805_v4  ;;  %v808_v7 = vadd.f32 %v807_v62, %v719_v5  ;;  %v1202_v8 = vpop.f32.mrb[16].mxu1  ;;  %v812_v9 = vpop.f32.mrb[20].mxu0  ;;  %vm859_vm1 = vcmp.ge.f32.partialorder %v805_v4, 0.0 }
 0x143   :  { %v1203_v10 = vpop.f32.mrb[17].mxu1  ;;  %v1275_v11 = vpop.f32.mrb[21].mxu0 }
 0x144   :  { %vm860_vm2 = vcmp.ge.f32.partialorder %v808_v7, 0.0  ;;  %v874_v13 = vmul.f32 0.2, %v808_v7  ;;  %v1204_v14 = vadd.f32 %v1203_v10, %v1202_v8  ;;  %v1205_v15 = vpop.f32.mrb[18].mxu1  ;;  %v815_v17 = vpop.f32.mrb[22].mxu0  ;;  %v887_v21 = vsel %vm859_vm1, %v805_v4, %v873_v6 }
 0x145   :  { %v1206_v19 = vpop.f32.mrb[19].mxu1  ;;  %v1276_v20 = vpop.f32.mrb[23].mxu0  ;;  %v654_v4 = vadd.f32 %v1647_v53, %v1649_v56 }
 0x146   :  { %v888_v23 = vsel %vm860_vm2, %v808_v7, %v874_v13  ;;  %v724_v24 = vadd.f32 %v1204_v14, %v635_v12  ;;  %v1207_v25 = vadd.f32 %v1206_v19, %v1205_v15  ;;  %v659_v19 = vadd.f32 %v1633_v16, %v1649_v56 }
 0x147   :  { %v1084_v26 = vpack.c.bf16 %v888_v23, %v887_v21 }
 0x148   :  { %v813_v27 = vadd.f32 %v812_v9, %v724_v24  ;;  %v727_v29 = vadd.f32 %v1207_v25, %v638_v18  ;;  %v662_v25 = vadd.f32 %v1635_v22, %v1649_v56 }
 0x149   :  { %1085 = vst [vmem:[%s1697_s3] sm:$0xff] %v1084_v26  }
 0x14a   :  { %v875_v28 = vmul.f32 0.2, %v813_v27  ;;  %v816_v31 = vadd.f32 %v815_v17, %v727_v29  ;;  %v1208_v32 = vpop.f32.mrb[20].mxu1  ;;  %v820_v33 = vpop.f32.mrb[24].mxu0  ;;  %vm861_vm3 = vcmp.ge.f32.partialorder %v813_v27, 0.0 }
 0x14b   :  { %v1209_v36 = vpop.f32.mrb[21].mxu1  ;;  %v1279_v34 = vpop.f32.mrb[25].mxu0 }
 0x14c   :  { %vm862_vm4 = vcmp.ge.f32.partialorder %v816_v31, 0.0  ;;  %v876_v38 = vmul.f32 0.2, %v816_v31  ;;  %v1210_v39 = vadd.f32 %v1209_v36, %v1208_v32  ;;  %v1211_v41 = vpop.f32.mrb[22].mxu1  ;;  %v823_v43 = vpop.f32.mrb[26].mxu0  ;;  %v889_v49 = vsel %vm861_vm3, %v813_v27, %v875_v28 }
 0x14d   :  { %v1212_v45 = vpop.f32.mrb[23].mxu1  ;;  %v1280_v48 = vpop.f32.mrb[27].mxu0 }
 0x14e   :  { %v890_v51 = vsel %vm862_vm4, %v816_v31, %v876_v38  ;;  %v732_v52 = vadd.f32 %v1210_v39, %v643_v37  ;;  %v1213_v54 = vadd.f32 %v1212_v45, %v1211_v41 }
 0x14f   :  { %v1089_v55 = vpack.c.bf16 %v890_v51, %v889_v49  ;;  %v670_v51 = vadd.f32 %v1639_v35, %v1649_v56 }
 0x150   :  { %v821_v57 = vadd.f32 %v820_v33, %v732_v52  ;;  %v735_v58 = vadd.f32 %v1213_v54, %v646_v44 }
 0x151   :  { %1116 = vst [vmem:[%s1697_s3 + $0x8] sm:$0xff] %v1089_v55  }
 0x152   :  { %v877_v40 = vmul.f32 0.2, %v821_v57  ;;  %v824_v59 = vadd.f32 %v823_v43, %v735_v58  ;;  %v1214_v60 = vpop.f32.mrb[24].mxu1  ;;  %v828_v61 = vpop.f32.mrb[28].mxu0  ;;  %vm863_vm5 = vcmp.ge.f32.partialorder %v821_v57, 0.0  ;;  %v667_v43 = vadd.f32 %v1637_v30, %v1649_v56 }
 0x153   :  { %v1215_v62 = vpop.f32.mrb[25].mxu1  ;;  %v1283_v46 = vpop.f32.mrb[29].mxu0 }
 0x154   :  { %vm864_vm6 = vcmp.ge.f32.partialorder %v824_v59, 0.0  ;;  %v878_v0 = vmul.f32 0.2, %v824_v59  ;;  %v1216_v1 = vadd.f32 %v1215_v62, %v1214_v60  ;;  %v1217_v2 = vpop.f32.mrb[26].mxu1  ;;  %v831_v3 = vpop.f32.mrb[30].mxu0  ;;  %v891_v7 = vsel %vm863_vm5, %v821_v57, %v877_v40 }
 0x155   :  { %v1218_v5 = vpop.f32.mrb[27].mxu1  ;;  %v1284_v6 = vpop.f32.mrb[31].mxu0 }
 0x156   :  { %v892_v8 = vsel %vm864_vm6, %v824_v59, %v878_v0  ;;  %v740_v9 = vadd.f32 %v1216_v1, %v651_v63  ;;  %v1219_v10 = vadd.f32 %v1218_v5, %v1217_v2  ;;  %v675_v1 = vadd.f32 %v1641_v42, %v1649_v56 }
 0x157   :  { %v1094_v11 = vpack.c.bf16 %v892_v8, %v891_v7  ;;  %v678_v6 = vadd.f32 %v1643_v47, %v1649_v56 }
 0x158   :  { %v829_v12 = vadd.f32 %v828_v61, %v740_v9  ;;  %v743_v13 = vadd.f32 %v1219_v10, %v654_v4 }
 0x159   :  { %1117 = vst [vmem:[%s1697_s3 + $0x10] sm:$0xff] %v1094_v11  }
 0x15a   :  { %v879_v50 = vmul.f32 0.2, %v829_v12  ;;  %v832_v14 = vadd.f32 %v831_v3, %v743_v13  ;;  %v1220_v15 = vpop.f32.mrb[28].mxu1  ;;  %v836_v17 = vpop.f32.mrb[32].mxu0  ;;  %vm865_vm7 = vcmp.ge.f32.partialorder %v829_v12, 0.0 }
 0x15b   :  { %v1221_v18 = vpop.f32.mrb[29].mxu1  ;;  %v1287_v53 = vpop.f32.mrb[33].mxu0 }
 0x15c   :  { %vm866_vm8 = vcmp.ge.f32.partialorder %v832_v14, 0.0  ;;  %v880_v20 = vmul.f32 0.2, %v832_v14  ;;  %v1222_v21 = vadd.f32 %v1221_v18, %v1220_v15  ;;  %v1223_v23 = vpop.f32.mrb[30].mxu1  ;;  %v839_v24 = vpop.f32.mrb[34].mxu0  ;;  %v893_v29 = vsel %vm865_vm7, %v829_v12, %v879_v50 }
 0x15d   :  { %v1224_v26 = vpop.f32.mrb[31].mxu1  ;;  %v1288_v27 = vpop.f32.mrb[35].mxu0 }
 0x15e   :  { %v894_v28 = vsel %vm866_vm8, %v832_v14, %v880_v20  ;;  %v748_v31 = vadd.f32 %v1222_v21, %v659_v19  ;;  %v1225_v32 = vadd.f32 %v1224_v26, %v1223_v23 }
 0x15f   :  { %v1099_v33 = vpack.c.bf16 %v894_v28, %v893_v29 }
 0x160   :  { %v837_v36 = vadd.f32 %v836_v17, %v748_v31  ;;  %v751_v34 = vadd.f32 %v1225_v32, %v662_v25 }
 0x161   :  { %1118 = vst [vmem:[%s1697_s3 + $0x18] sm:$0xff] %v1099_v33  }
 0x162   :  { %v881_v16 = vmul.f32 0.2, %v837_v36  ;;  %v840_v37 = vadd.f32 %v839_v24, %v751_v34  ;;  %v1226_v38 = vpop.f32.mrb[32].mxu1  ;;  %v844_v39 = vpop.f32.mrb[36].mxu0  ;;  %vm867_vm9 = vcmp.ge.f32.partialorder %v837_v36, 0.0 }
 0x163   :  { %v1227_v41 = vpop.f32.mrb[33].mxu1  ;;  %v1291_v22 = vpop.f32.mrb[37].mxu0 }
 0x164   :  { %vm868_vm10 = vcmp.ge.f32.partialorder %v840_v37, 0.0  ;;  %v882_v44 = vmul.f32 0.2, %v840_v37  ;;  %v1228_v45 = vadd.f32 %v1227_v41, %v1226_v38  ;;  %v1229_v48 = vpop.f32.mrb[34].mxu1  ;;  %v847_v49 = vpop.f32.mrb[38].mxu0  ;;  %v895_v55 = vsel %vm867_vm9, %v837_v36, %v881_v16 }
 0x165   :  { %v1230_v52 = vpop.f32.mrb[35].mxu1  ;;  %v1292_v54 = vpop.f32.mrb[39].mxu0 }
 0x166   :  { %v896_v57 = vsel %vm868_vm10, %v840_v37, %v882_v44  ;;  %v756_v58 = vadd.f32 %v1228_v45, %v667_v43  ;;  %v1231_v40 = vadd.f32 %v1230_v52, %v1229_v48 }
 0x167   :  { %v1104_v59 = vpack.c.bf16 %v896_v57, %v895_v55 }
 0x168   :  { %v845_v60 = vadd.f32 %v844_v39, %v756_v58  ;;  %v759_v61 = vadd.f32 %v1231_v40, %v670_v51 }
 0x169   :  { %1119 = vst [vmem:[%s1697_s3 + $0x20] sm:$0xff] %v1104_v59  }
 0x16a   :  { %v883_v30 = vmul.f32 0.2, %v845_v60  ;;  %v848_v62 = vadd.f32 %v847_v49, %v759_v61  ;;  %v1232_v46 = vpop.f32.mrb[36].mxu1  ;;  %v852_v63 = vpop.f32.mrb[40].mxu0  ;;  %vm869_vm11 = vcmp.ge.f32.partialorder %v845_v60, 0.0 }
 0x16b   :  { %v1233_v0 = vpop.f32.mrb[37].mxu1  ;;  %v1295_v35 = vpop.f32.mrb[41].mxu0 }
 0x16c   :  { %vm870_vm12 = vcmp.ge.f32.partialorder %v848_v62, 0.0  ;;  %v884_v2 = vmul.f32 0.2, %v848_v62  ;;  %v1234_v3 = vadd.f32 %v1233_v0, %v1232_v46  ;;  %v1235_v4 = vpop.f32.mrb[38].mxu1  ;;  %v855_v5 = vpop.f32.mrb[42].mxu0  ;;  %v897_v9 = vsel %vm869_vm11, %v845_v60, %v883_v30 }
 0x16d   :  { %v1236_v7 = vpop.f32.mrb[39].mxu1  ;;  %v1296_v8 = vpop.f32.mrb[43].mxu0 }
 0x16e   :  { %v898_v10 = vsel %vm870_vm12, %v848_v62, %v884_v2  ;;  %v764_v11 = vadd.f32 %v1234_v3, %v675_v1  ;;  %v1237_v12 = vadd.f32 %v1236_v7, %v1235_v4 }
 0x16f   :  { %v1109_v13 = vpack.c.bf16 %v898_v10, %v897_v9 }
 0x170   :  { %v853_v50 = vadd.f32 %v852_v63, %v764_v11  ;;  %v767_v14 = vadd.f32 %v1237_v12, %v678_v6 }
 0x171   :  { %1120 = vst [vmem:[%s1697_s3 + $0x28] sm:$0xff] %v1109_v13  }
 0x172   :  { %v885_v42 = vmul.f32 0.2, %v853_v50  ;;  %v856_v15 = vadd.f32 %v855_v5, %v767_v14  ;;  %vm871_vm13 = vcmp.ge.f32.partialorder %v853_v50, 0.0 }
 0x174   :  { %vm872_vm14 = vcmp.ge.f32.partialorder %v856_v15, 0.0  ;;  %v886_v17 = vmul.f32 0.2, %v856_v15  ;;  %v899_v18 = vsel %vm871_vm13, %v853_v50, %v885_v42 }
 0x176   :  { %v900_v47 = vsel %vm872_vm14, %v856_v15, %v886_v17 }
 0x177   :  { %v1114_v56 = vpack.c.bf16 %v900_v47, %v899_v18 }
 0x179   :  { %1121 = vst [vmem:[%s1697_s3 + $0x30] sm:$0xff] %v1114_v56  }
 0x17a   :  { %975 = vsyncpa [#allocation3], 1 }
 0x17b   :  { %976 = vsyncpa [#allocation5], 1 }

// kernel: discriminator_forward.6
= control target key start
LH: loop header
LB: loop body
LE: loop exit
PB: predicated region body
PF: predicated region fallthrough
CT: control target
= control target key end

     0   :  { %8 = vsyncpa [#allocation3], 0  ;;  %s3318_s0 = inlined_call_operand.vmem [shape: bf16[112,1152], index: 0, kind: input, shape index: {}]   ;;  %s3319_s1 = inlined_call_operand.hbm [shape: bf16[1152,256], index: 1, kind: input, shape index: {}]   ;;  %s3320_s2 = inlined_call_operand.hbm [shape: f32[1,256], index: 2, kind: input, shape index: {}]   ;;  %s3321_s3 = inlined_call_operand.vmem [shape: bf16[112,256], index: 3, kind: output, shape index: {}]  }
   0x1   :  { %9 = vsyncpa [#allocation5], 0  ;;  %s2779_s12 = smov [#allocation2]   ;;  %s2731_s16 = scalar_lea.hbm %s3319_s1, 18432 }
   0x2   :  { %s17_s13 = sshll.u32 %s2779_s12, 4  ;;  %p2732_p0 = scmp.ne.s32.totalorder %s3319_s1, %s2731_s16  ;;  %s18_s13 = int_to_ptr.vmem [resolvable:$true] %s17_s13 }
   0x3   :  { %p2735_p1 = scmp.lt.u32.totalorder %s2731_s16, %s3319_s1 }
   0x5   :  { %p2737_p2 = pnand %p2735_p1, %p2732_p0 }
   0x7   :  { %2740 = shalt.err (!%p2737_p2)
}
   0x8   :  { %s2741_s21 = scalar_lea.vmem %s18_s13, 18432  ;;  %p2746_p4 = scmp.lt.s32.totalorder %s18_s13, %s18_s13 }
   0x9   :  { %p2742_p3 = scmp.ne.s32.totalorder %s18_s13, %s2741_s21  ;;  %p2747_p5 = scmp.lt.s32.totalorder %s2741_s21, %s2741_s21 }
   0xb   :  { %p2748_p6 = por %p2747_p5, %p2746_p4 }
   0xd   :  { %p2749_p7 = pnand %p2748_p6, %p2742_p3 }
   0xf   :  { %2752 = shalt.err (!%p2749_p7)
}
  0x10   :  { %s2780_s22 = smov 128   ;;  %s2781_s23 = smov 8  }
  0x11   :  { %23 = dma.hbm_to_vmem [thread:$0]  %s3319_s1, 18432, %s18_s13, [#allocation3], %s2780_s22, %s2780_s22, %s2781_s23  }
  0x12   :  { %s2782_s26 = smov [#allocation4]   ;;  %s2753_s30 = scalar_lea.hbm %s3320_s2, 32 }
  0x13   :  { %s30_s27 = sshll.u32 %s2782_s26, 4  ;;  %p2754_p8 = scmp.ne.s32.totalorder %s3320_s2, %s2753_s30  ;;  %s31_s27 = int_to_ptr.vmem [resolvable:$true] %s30_s27 }
  0x14   :  { %p2757_p9 = scmp.lt.u32.totalorder %s2753_s30, %s3320_s2 }
  0x16   :  { %p2759_p10 = pnand %p2757_p9, %p2754_p8 }
  0x18   :  { %2762 = shalt.err (!%p2759_p10)
}
  0x19   :  { %s2763_s8 = scalar_lea.vmem %s31_s27, 32  ;;  %p2768_p12 = scmp.lt.s32.totalorder %s31_s27, %s31_s27 }
  0x1a   :  { %p2764_p11 = scmp.ne.s32.totalorder %s31_s27, %s2763_s8  ;;  %p2769_p13 = scmp.lt.s32.totalorder %s2763_s8, %s2763_s8 }
  0x1c   :  { %p2770_p0 = por %p2769_p13, %p2768_p12 }
  0x1e   :  { %p2771_p1 = pnand %p2770_p0, %p2764_p11 }
  0x20   :  { %2774 = shalt.err (!%p2771_p1)
}
  0x21   :  { %33 = dma.hbm_to_vmem [thread:$0]  %s3320_s2, 32, %s31_s27, [#allocation5]  }
  0x22   :  { %2775 = dma.done.wait [#allocation3], 18432  }
  0x23   :  { %2776 = vsyncadd [#allocation3], 4294948864 }
  0x24   :  { %2777 = dma.done.wait [#allocation5], 32  }
  0x25   :  { %2778 = vsyncadd [#allocation5], 4294967264  ;;  %v2424_v0 = vld [vmem:[#allocation2 + $0x4] ss:$8 sps:$4 sm:$0xff]   ;;  %v2428_v2 = vld [vmem:[#allocation2] ss:$8 sps:$4 sm:$0xff]  }
  0x26   :  { %v2426_v1 = vld [vmem:[#allocation2 + $0x204] ss:$8 sps:$4 sm:$0xff]   ;;  %1309 = vmatprep.subr.bf16.mxu1 %v2424_v0  ;;  %v2429_v3 = vld [vmem:[#allocation2 + $0x200] ss:$8 sps:$4 sm:$0xff]   ;;  %v2430_v4 = vld [vmem:[#allocation2 + $0x14] ss:$8 sps:$4 sm:$0xff]  }
  0x27   :  { %1515 = vmatprep.subr.bf16.mxu0 %v2426_v1  ;;  %1310 = vmatpush1.bf16.msra.mxu1 %v2428_v2  ;;  %v2432_v5 = vld [vmem:[#allocation2 + $0x214] ss:$8 sps:$4 sm:$0xff]   ;;  %v2434_v6 = vld [vmem:[#allocation2 + $0x10] ss:$8 sps:$4 sm:$0xff]   ;;  %v2436_v8 = vld [vmem:[#allocation2 + $0x24] ss:$8 sps:$4 sm:$0xff]  }
  0x28   :  { %1516 = vmatpush1.bf16.msra.mxu0 %v2429_v3  ;;  %1311 = vmatprep.subr.bf16.mxu1 %v2430_v4  ;;  %v2435_v7 = vld [vmem:[#allocation2 + $0x210] ss:$8 sps:$4 sm:$0xff]   ;;  %v2438_v9 = vld [vmem:[#allocation2 + $0x224] ss:$8 sps:$4 sm:$0xff]   ;;  %v2440_v10 = vld [vmem:[#allocation2 + $0x20] ss:$8 sps:$4 sm:$0xff]  }
  0x29   :  { %1517 = vmatprep.subr.bf16.mxu0 %v2432_v5  ;;  %v2441_v11 = vld [vmem:[#allocation2 + $0x220] ss:$8 sps:$4 sm:$0xff]   ;;  %v2442_v12 = vld [vmem:[#allocation2 + $0x34] ss:$8 sps:$4 sm:$0xff]   ;;  %v2446_v14 = vld [vmem:[#allocation2 + $0x30] ss:$8 sps:$4 sm:$0xff]  }
  0x2a   :  { %v2444_v13 = vld [vmem:[#allocation2 + $0x234] ss:$8 sps:$4 sm:$0xff]   ;;  %v2447_v15 = vld [vmem:[#allocation2 + $0x230] ss:$8 sps:$4 sm:$0xff]   ;;  %v2448_v16 = vld [vmem:[#allocation2 + $0x44] ss:$8 sps:$4 sm:$0xff]  }
  0x2b   :  { %1312 = vmatpush1.bf16.msra.mxu1 %v2434_v6  ;;  %v2450_v17 = vld [vmem:[#allocation2 + $0x244] ss:$8 sps:$4 sm:$0xff]   ;;  %v2452_v18 = vld [vmem:[#allocation2 + $0x40] ss:$8 sps:$4 sm:$0xff]   ;;  %v2454_v20 = vld [vmem:[#allocation2 + $0x54] ss:$8 sps:$4 sm:$0xff]  }
  0x2c   :  { %1518 = vmatpush1.bf16.msra.mxu0 %v2435_v7  ;;  %1313 = vmatprep.subr.bf16.mxu1 %v2436_v8  ;;  %v2453_v19 = vld [vmem:[#allocation2 + $0x240] ss:$8 sps:$4 sm:$0xff]   ;;  %v2456_v21 = vld [vmem:[#allocation2 + $0x254] ss:$8 sps:$4 sm:$0xff]   ;;  %v2458_v22 = vld [vmem:[#allocation2 + $0x50] ss:$8 sps:$4 sm:$0xff]  }
  0x2d   :  { %1519 = vmatprep.subr.bf16.mxu0 %v2438_v9  ;;  %v2459_v23 = vld [vmem:[#allocation2 + $0x250] ss:$8 sps:$4 sm:$0xff]   ;;  %v2460_v24 = vld [vmem:[#allocation2 + $0x64] ss:$8 sps:$4 sm:$0xff]   ;;  %v2464_v26 = vld [vmem:[#allocation2 + $0x60] ss:$8 sps:$4 sm:$0xff]  }
  0x2e   :  { %v2462_v25 = vld [vmem:[#allocation2 + $0x264] ss:$8 sps:$4 sm:$0xff]   ;;  %v2465_v27 = vld [vmem:[#allocation2 + $0x260] ss:$8 sps:$4 sm:$0xff]   ;;  %v2466_v28 = vld [vmem:[#allocation2 + $0x74] ss:$8 sps:$4 sm:$0xff]  }
  0x2f   :  { %1314 = vmatpush1.bf16.msra.mxu1 %v2440_v10  ;;  %v2468_v29 = vld [vmem:[#allocation2 + $0x274] ss:$8 sps:$4 sm:$0xff]   ;;  %v2470_v30 = vld [vmem:[#allocation2 + $0x70] ss:$8 sps:$4 sm:$0xff]   ;;  %v2472_v32 = vld [vmem:[#allocation2 + $0x84] ss:$8 sps:$4 sm:$0xff]  }
  0x30   :  { %1520 = vmatpush1.bf16.msra.mxu0 %v2441_v11  ;;  %1315 = vmatprep.subr.bf16.mxu1 %v2442_v12  ;;  %v2471_v31 = vld [vmem:[#allocation2 + $0x270] ss:$8 sps:$4 sm:$0xff]   ;;  %v2474_v33 = vld [vmem:[#allocation2 + $0x284] ss:$8 sps:$4 sm:$0xff]   ;;  %v2476_v34 = vld [vmem:[#allocation2 + $0x80] ss:$8 sps:$4 sm:$0xff]  }
  0x31   :  { %1521 = vmatprep.subr.bf16.mxu0 %v2444_v13  ;;  %v2477_v35 = vld [vmem:[#allocation2 + $0x280] ss:$8 sps:$4 sm:$0xff]   ;;  %v2478_v36 = vld [vmem:[#allocation2 + $0x94] ss:$8 sps:$4 sm:$0xff]   ;;  %v2482_v38 = vld [vmem:[#allocation2 + $0x90] ss:$8 sps:$4 sm:$0xff]  }
  0x32   :  { %v2480_v37 = vld [vmem:[#allocation2 + $0x294] ss:$8 sps:$4 sm:$0xff]   ;;  %v2483_v39 = vld [vmem:[#allocation2 + $0x290] ss:$8 sps:$4 sm:$0xff]   ;;  %v2484_v40 = vld [vmem:[#allocation2 + $0xa4] ss:$8 sps:$4 sm:$0xff]  }
  0x33   :  { %1316 = vmatpush1.bf16.msra.mxu1 %v2446_v14  ;;  %v2486_v41 = vld [vmem:[#allocation2 + $0x2a4] ss:$8 sps:$4 sm:$0xff]   ;;  %v2488_v42 = vld [vmem:[#allocation2 + $0xa0] ss:$8 sps:$4 sm:$0xff]   ;;  %v2490_v44 = vld [vmem:[#allocation2 + $0xb4] ss:$8 sps:$4 sm:$0xff]  }
  0x34   :  { %1522 = vmatpush1.bf16.msra.mxu0 %v2447_v15  ;;  %1317 = vmatprep.subr.bf16.mxu1 %v2448_v16  ;;  %v2489_v43 = vld [vmem:[#allocation2 + $0x2a0] ss:$8 sps:$4 sm:$0xff]   ;;  %v2492_v45 = vld [vmem:[#allocation2 + $0x2b4] ss:$8 sps:$4 sm:$0xff]   ;;  %v2494_v46 = vld [vmem:[#allocation2 + $0xb0] ss:$8 sps:$4 sm:$0xff]  }
  0x35   :  { %1523 = vmatprep.subr.bf16.mxu0 %v2450_v17  ;;  %v2495_v47 = vld [vmem:[#allocation2 + $0x2b0] ss:$8 sps:$4 sm:$0xff]   ;;  %v2522_v48 = vld [vmem:[%s3318_s0 + $0x4] ss:$36 sps:$4 sm:$0xff]   ;;  %v2502_v54 = vld [vmem:[#allocation2 + $0xd4] ss:$8 sps:$4 sm:$0xff]  }
  0x36   :  { %v2496_v49 = vld [vmem:[#allocation2 + $0xc4] ss:$8 sps:$4 sm:$0xff]   ;;  %1341 = vmatprep.mubr.bf16.mxu1 %v2522_v48  ;;  %v2528_v51 = vld [vmem:[%s3318_s0 + $0x14] ss:$36 sps:$4 sm:$0xff]   ;;  %v2500_v52 = vld [vmem:[#allocation2 + $0xc0] ss:$8 sps:$4 sm:$0xff]  }
  0x37   :  { %1318 = vmatpush1.bf16.msra.mxu1 %v2452_v18  ;;  %v2498_v50 = vld [vmem:[#allocation2 + $0x2c4] ss:$8 sps:$4 sm:$0xff]   ;;  %v2501_v53 = vld [vmem:[#allocation2 + $0x2c0] ss:$8 sps:$4 sm:$0xff]   ;;  %v2504_v55 = vld [vmem:[#allocation2 + $0x2d4] ss:$8 sps:$4 sm:$0xff]   ;;  %1547 = vmatprep.mubr.bf16.mxu0 %v2528_v51 }
  0x38   :  { %1524 = vmatpush1.bf16.msra.mxu0 %v2453_v19  ;;  %1319 = vmatprep.subr.bf16.mxu1 %v2454_v20  ;;  %v2506_v56 = vld [vmem:[#allocation2 + $0xd0] ss:$8 sps:$4 sm:$0xff]   ;;  %v2508_v58 = vld [vmem:[#allocation2 + $0xe4] ss:$8 sps:$4 sm:$0xff]   ;;  %v2512_v60 = vld [vmem:[#allocation2 + $0xe0] ss:$8 sps:$4 sm:$0xff]  }
  0x39   :  { %1525 = vmatprep.subr.bf16.mxu0 %v2456_v21  ;;  %v2507_v57 = vld [vmem:[#allocation2 + $0x2d0] ss:$8 sps:$4 sm:$0xff]   ;;  %v2510_v59 = vld [vmem:[#allocation2 + $0x2e4] ss:$8 sps:$4 sm:$0xff]   ;;  %v2513_v61 = vld [vmem:[#allocation2 + $0x2e0] ss:$8 sps:$4 sm:$0xff]  }
  0x3a   :  { %v2514_v62 = vld [vmem:[#allocation2 + $0xf4] ss:$8 sps:$4 sm:$0xff]   ;;  %v2518_v0 = vld [vmem:[#allocation2 + $0xf0] ss:$8 sps:$4 sm:$0xff]   ;;  %v2525_v2 = vld [vmem:[#allocation2 + $0x104] ss:$8 sps:$4 sm:$0xff]  }
  0x3b   :  { %1320 = vmatpush1.bf16.msra.mxu1 %v2458_v22  ;;  %v2516_v63 = vld [vmem:[#allocation2 + $0x2f4] ss:$8 sps:$4 sm:$0xff]   ;;  %v2519_v1 = vld [vmem:[#allocation2 + $0x2f0] ss:$8 sps:$4 sm:$0xff]   ;;  %v2834_v3 = vld [vmem:[#allocation2 + $0x304] ss:$8 sps:$4 sm:$0xff]  }
  0x3c   :  { %1526 = vmatpush1.bf16.msra.mxu0 %v2459_v23  ;;  %1321 = vmatprep.subr.bf16.mxu1 %v2460_v24  ;;  %v2520_v4 = vld [vmem:[%s3318_s0] ss:$36 sps:$4 sm:$0xff]   ;;  %v2526_v6 = vld [vmem:[%s3318_s0 + $0x10] ss:$36 sps:$4 sm:$0xff]   ;;  %v2554_v18 = vld [vmem:[%s3318_s0 + $0x58] ss:$36 sps:$4 sm:$0xff]  }
  0x3d   :  { %1527 = vmatprep.subr.bf16.mxu0 %v2462_v25  ;;  %v2523_v5 = vld [vmem:[#allocation2 + $0x100] ss:$8 sps:$4 sm:$0xff]   ;;  %v2534_v8 = vld [vmem:[#allocation2 + $0x114] ss:$8 sps:$4 sm:$0xff]   ;;  %v2552_v11 = vld [vmem:[%s3318_s0 + $0x4c] ss:$36 sps:$4 sm:$0xff]  }
  0x3e   :  { %v2842_v7 = vld [vmem:[#allocation2 + $0x300] ss:$8 sps:$4 sm:$0xff]   ;;  %v2845_v9 = vld [vmem:[#allocation2 + $0x314] ss:$8 sps:$4 sm:$0xff]   ;;  %v2532_v12 = vld [vmem:[#allocation2 + $0x110] ss:$8 sps:$4 sm:$0xff]  }
  0x3f   :  { %1322 = vmatpush1.bf16.msra.mxu1 %v2464_v26  ;;  %v2550_v10 = vld [vmem:[%s3318_s0 + $0x5c] ss:$36 sps:$4 sm:$0xff]   ;;  %v2853_v13 = vld [vmem:[#allocation2 + $0x310] ss:$8 sps:$4 sm:$0xff]   ;;  %v2540_v14 = vld [vmem:[#allocation2 + $0x124] ss:$8 sps:$4 sm:$0xff]  }
  0x40   :  { %1528 = vmatpush1.bf16.msra.mxu0 %v2465_v27  ;;  %1323 = vmatprep.subr.bf16.mxu1 %v2466_v28  ;;  %v2857_v15 = vld [vmem:[#allocation2 + $0x324] ss:$8 sps:$4 sm:$0xff]   ;;  %v2538_v16 = vld [vmem:[#allocation2 + $0x120] ss:$8 sps:$4 sm:$0xff]   ;;  %v2546_v20 = vld [vmem:[#allocation2 + $0x134] ss:$8 sps:$4 sm:$0xff]  }
  0x41   :  { %1529 = vmatprep.subr.bf16.mxu0 %v2468_v29  ;;  %v2859_v17 = vld [vmem:[#allocation2 + $0x320] ss:$8 sps:$4 sm:$0xff]   ;;  %v2869_v21 = vld [vmem:[#allocation2 + $0x334] ss:$8 sps:$4 sm:$0xff]   ;;  %v2544_v24 = vld [vmem:[#allocation2 + $0x130] ss:$8 sps:$4 sm:$0xff]  }
  0x42   :  { %v2555_v19 = vld [vmem:[%s3318_s0 + $0x48] ss:$36 sps:$4 sm:$0xff]   ;;  %v2570_v23 = vld [vmem:[%s3318_s0 + $0x94] ss:$36 sps:$4 sm:$0xff]  }
  0x43   :  { %1324 = vmatpush1.bf16.msra.mxu1 %v2470_v30  ;;  %v2568_v22 = vld [vmem:[%s3318_s0 + $0xa4] ss:$36 sps:$4 sm:$0xff]   ;;  %v2877_v25 = vld [vmem:[#allocation2 + $0x330] ss:$8 sps:$4 sm:$0xff]  }
  0x44   :  { %1530 = vmatpush1.bf16.msra.mxu0 %v2471_v31  ;;  %1325 = vmatprep.subr.bf16.mxu1 %v2472_v32  ;;  %v2558_v26 = vld [vmem:[#allocation2 + $0x144] ss:$8 sps:$4 sm:$0xff]   ;;  %v2556_v28 = vld [vmem:[#allocation2 + $0x140] ss:$8 sps:$4 sm:$0xff]   ;;  %v2573_v31 = vld [vmem:[%s3318_s0 + $0x90] ss:$36 sps:$4 sm:$0xff]  }
  0x45   :  { %1531 = vmatprep.subr.bf16.mxu0 %v2474_v33  ;;  %v2881_v27 = vld [vmem:[#allocation2 + $0x344] ss:$8 sps:$4 sm:$0xff]   ;;  %v2883_v29 = vld [vmem:[#allocation2 + $0x340] ss:$8 sps:$4 sm:$0xff]   ;;  %v2564_v32 = vld [vmem:[#allocation2 + $0x154] ss:$8 sps:$4 sm:$0xff]  }
  0x46   :  { %v2572_v30 = vld [vmem:[%s3318_s0 + $0xa0] ss:$36 sps:$4 sm:$0xff]   ;;  %v2893_v33 = vld [vmem:[#allocation2 + $0x354] ss:$8 sps:$4 sm:$0xff]   ;;  %v2580_v48 = vld [vmem:[#allocation2 + $0x170] ss:$8 sps:$4 sm:$0xff]  }
  0x47   :  { %1326 = vmatpush1.bf16.msra.mxu1 %v2476_v34  ;;  %v2586_v34 = vld [vmem:[%s3318_s0 + $0xec] ss:$36 sps:$4 sm:$0xff]  }
  0x48   :  { %1532 = vmatpush1.bf16.msra.mxu0 %v2477_v35  ;;  %1327 = vmatprep.subr.bf16.mxu1 %v2478_v36  ;;  %v2588_v35 = vld [vmem:[%s3318_s0 + $0xdc] ss:$36 sps:$4 sm:$0xff]   ;;  %v2562_v36 = vld [vmem:[#allocation2 + $0x150] ss:$8 sps:$4 sm:$0xff]   ;;  %v2929_v51 = vld [vmem:[#allocation2 + $0x384] ss:$8 sps:$4 sm:$0xff]  }
  0x49   :  { %1533 = vmatprep.subr.bf16.mxu0 %v2480_v37  ;;  %v2901_v37 = vld [vmem:[#allocation2 + $0x350] ss:$8 sps:$4 sm:$0xff]  }
  0x4b   :  { %1328 = vmatpush1.bf16.msra.mxu1 %v2482_v38  ;;  %v2576_v38 = vld [vmem:[#allocation2 + $0x164] ss:$8 sps:$4 sm:$0xff]  }
  0x4c   :  { %1534 = vmatpush1.bf16.msra.mxu0 %v2483_v39  ;;  %1329 = vmatprep.subr.bf16.mxu1 %v2484_v40  ;;  %v2905_v39 = vld [vmem:[#allocation2 + $0x364] ss:$8 sps:$4 sm:$0xff]   ;;  %v2574_v40 = vld [vmem:[#allocation2 + $0x160] ss:$8 sps:$4 sm:$0xff]  }
  0x4d   :  { %1535 = vmatprep.subr.bf16.mxu0 %v2486_v41  ;;  %v2907_v41 = vld [vmem:[#allocation2 + $0x360] ss:$8 sps:$4 sm:$0xff]  }
  0x4f   :  { %1330 = vmatpush1.bf16.msra.mxu1 %v2488_v42  ;;  %v2590_v42 = vld [vmem:[%s3318_s0 + $0xe8] ss:$36 sps:$4 sm:$0xff]  }
  0x50   :  { %1536 = vmatpush1.bf16.msra.mxu0 %v2489_v43  ;;  %1331 = vmatprep.subr.bf16.mxu1 %v2490_v44  ;;  %v2591_v43 = vld [vmem:[%s3318_s0 + $0xd8] ss:$36 sps:$4 sm:$0xff]  }
  0x51   :  { %1537 = vmatprep.subr.bf16.mxu0 %v2492_v45  ;;  %v2582_v44 = vld [vmem:[#allocation2 + $0x174] ss:$8 sps:$4 sm:$0xff]  }
  0x52   :  { %v2917_v45 = vld [vmem:[#allocation2 + $0x374] ss:$8 sps:$4 sm:$0xff]  }
  0x53   :  { %1332 = vmatpush1.bf16.msra.mxu1 %v2494_v46  ;;  %v2604_v46 = vld [vmem:[%s3318_s0 + $0x134] ss:$36 sps:$4 sm:$0xff]  }
  0x54   :  { %1538 = vmatpush1.bf16.msra.mxu0 %v2495_v47  ;;  %1333 = vmatprep.subr.bf16.mxu1 %v2496_v49  ;;  %v2606_v47 = vld [vmem:[%s3318_s0 + $0x124] ss:$36 sps:$4 sm:$0xff]   ;;  %v2925_v49 = vld [vmem:[#allocation2 + $0x370] ss:$8 sps:$4 sm:$0xff]  }
  0x55   :  { %1539 = vmatprep.subr.bf16.mxu0 %v2498_v50  ;;  %v2594_v50 = vld [vmem:[#allocation2 + $0x184] ss:$8 sps:$4 sm:$0xff]  }
  0x57   :  { %1334 = vmatpush1.bf16.msra.mxu1 %v2500_v52  ;;  %v2592_v52 = vld [vmem:[#allocation2 + $0x180] ss:$8 sps:$4 sm:$0xff]  }
  0x58   :  { %1540 = vmatpush1.bf16.msra.mxu0 %v2501_v53  ;;  %1335 = vmatprep.subr.bf16.mxu1 %v2502_v54  ;;  %v2931_v53 = vld [vmem:[#allocation2 + $0x380] ss:$8 sps:$4 sm:$0xff]   ;;  %v2608_v54 = vld [vmem:[%s3318_s0 + $0x130] ss:$36 sps:$4 sm:$0xff]  }
  0x59   :  { %1541 = vmatprep.subr.bf16.mxu0 %v2504_v55  ;;  %v2609_v55 = vld [vmem:[%s3318_s0 + $0x120] ss:$36 sps:$4 sm:$0xff]  }
  0x5b   :  { %1336 = vmatpush1.bf16.msra.mxu1 %v2506_v56  ;;  %v2600_v56 = vld [vmem:[#allocation2 + $0x194] ss:$8 sps:$4 sm:$0xff]  }
  0x5c   :  { %1542 = vmatpush1.bf16.msra.mxu0 %v2507_v57  ;;  %1337 = vmatprep.subr.bf16.mxu1 %v2508_v58  ;;  %v2941_v57 = vld [vmem:[#allocation2 + $0x394] ss:$8 sps:$4 sm:$0xff]  }
  0x5d   :  { %1543 = vmatprep.subr.bf16.mxu0 %v2510_v59  ;;  %v2622_v58 = vld [vmem:[%s3318_s0 + $0x17c] ss:$36 sps:$4 sm:$0xff]   ;;  %v2624_v59 = vld [vmem:[%s3318_s0 + $0x16c] ss:$36 sps:$4 sm:$0xff]  }
  0x5f   :  { %1338 = vmatpush1.bf16.msra.mxu1 %v2512_v60  ;;  %v2598_v60 = vld [vmem:[#allocation2 + $0x190] ss:$8 sps:$4 sm:$0xff]  }
  0x60   :  { %1544 = vmatpush1.bf16.msra.mxu0 %v2513_v61  ;;  %1339 = vmatprep.subr.bf16.mxu1 %v2514_v62  ;;  %v2949_v61 = vld [vmem:[#allocation2 + $0x390] ss:$8 sps:$4 sm:$0xff]   ;;  %v2612_v62 = vld [vmem:[#allocation2 + $0x1a4] ss:$8 sps:$4 sm:$0xff]  }
  0x61   :  { %1545 = vmatprep.subr.bf16.mxu0 %v2516_v63  ;;  %v2953_v63 = vld [vmem:[#allocation2 + $0x3a4] ss:$8 sps:$4 sm:$0xff]  }
  0x63   :  { %1340 = vmatpush1.bf16.msra.mxu1 %v2518_v0  ;;  %v2610_v0 = vld [vmem:[#allocation2 + $0x1a0] ss:$8 sps:$4 sm:$0xff]  }
  0x64   :  { %1546 = vmatpush1.bf16.msra.mxu0 %v2519_v1  ;;  %1412 = vmatprep.subr.bf16.mxu1 %v2525_v2  ;;  %v2955_v1 = vld [vmem:[#allocation2 + $0x3a0] ss:$8 sps:$4 sm:$0xff]   ;;  %v2626_v2 = vld [vmem:[%s3318_s0 + $0x178] ss:$36 sps:$4 sm:$0xff]  }
  0x65   :  { %1618 = vmatprep.subr.bf16.mxu0 %v2834_v3 }
  0x66   :  { %1342 = vmatmul.mubr.bf16.vlgmr.msra.gmra.mrb[0].mxu1 %v2520_v4  ;;  %v2627_v4 = vld [vmem:[%s3318_s0 + $0x168] ss:$36 sps:$4 sm:$0xff]  }
  0x67   :  { %1548 = vmatmul.mubr.bf16.vlgmr.msra.gmra.mrb[0].mxu0 %v2526_v6  ;;  %1413 = vmatpush1.bf16.msra.mxu1 %v2523_v5  ;;  %v2618_v5 = vld [vmem:[#allocation2 + $0x1b4] ss:$8 sps:$4 sm:$0xff]  }
  0x68   :  { %1619 = vmatpush1.bf16.msra.mxu0 %v2842_v7  ;;  %1414 = vmatprep.subr.bf16.mxu1 %v2534_v8  ;;  %v2965_v6 = vld [vmem:[#allocation2 + $0x3b4] ss:$8 sps:$4 sm:$0xff]   ;;  %v2640_v8 = vld [vmem:[%s3318_s0 + $0x1c4] ss:$36 sps:$4 sm:$0xff]  }
  0x69   :  { %1620 = vmatprep.subr.bf16.mxu0 %v2845_v9  ;;  %1557 = vmatprep.mubr.bf16.mxu0 %v2550_v10  ;;  %v2642_v10 = vld [vmem:[%s3318_s0 + $0x1b4] ss:$36 sps:$4 sm:$0xff]  }
  0x6a   :  { %1351 = vmatprep.mubr.bf16.mxu1 %v2552_v11  ;;  %v2616_v11 = vld [vmem:[#allocation2 + $0x1b0] ss:$8 sps:$4 sm:$0xff]  }
  0x6b   :  { %1415 = vmatpush1.bf16.msra.mxu1 %v2532_v12  ;;  %v2973_v12 = vld [vmem:[#allocation2 + $0x3b0] ss:$8 sps:$4 sm:$0xff]  }
  0x6c   :  { %1621 = vmatpush1.bf16.msra.mxu0 %v2853_v13  ;;  %1416 = vmatprep.subr.bf16.mxu1 %v2540_v14  ;;  %v2630_v14 = vld [vmem:[#allocation2 + $0x1c4] ss:$8 sps:$4 sm:$0xff]  }
  0x6d   :  { %1622 = vmatprep.subr.bf16.mxu0 %v2857_v15 }
  0x6e   :  { %1352 = vmatmul.mubr.bf16.gmra.mrb[4].mxu1 %v2555_v19  ;;  %v2979_v19 = vld [vmem:[#allocation2 + $0x3c0] ss:$8 sps:$4 sm:$0xff]  }
  0x6f   :  { %1558 = vmatmul.mubr.bf16.gmra.mrb[4].mxu0 %v2554_v18  ;;  %1417 = vmatpush1.bf16.msra.mxu1 %v2538_v16  ;;  %v2977_v16 = vld [vmem:[#allocation2 + $0x3c4] ss:$8 sps:$4 sm:$0xff]   ;;  %v2628_v18 = vld [vmem:[#allocation2 + $0x1c0] ss:$8 sps:$4 sm:$0xff]  }
  0x70   :  { %1623 = vmatpush1.bf16.msra.mxu0 %v2859_v17  ;;  %1418 = vmatprep.subr.bf16.mxu1 %v2546_v20  ;;  %v2644_v20 = vld [vmem:[%s3318_s0 + $0x1c0] ss:$36 sps:$4 sm:$0xff]  }
  0x71   :  { %1624 = vmatprep.subr.bf16.mxu0 %v2869_v21  ;;  %1567 = vmatprep.mubr.bf16.mxu0 %v2568_v22  ;;  %v2645_v22 = vld [vmem:[%s3318_s0 + $0x1b0] ss:$36 sps:$4 sm:$0xff]  }
  0x72   :  { %1361 = vmatprep.mubr.bf16.mxu1 %v2570_v23  ;;  %v2636_v23 = vld [vmem:[#allocation2 + $0x1d4] ss:$8 sps:$4 sm:$0xff]  }
  0x73   :  { %1419 = vmatpush1.bf16.msra.mxu1 %v2544_v24  ;;  %v2989_v24 = vld [vmem:[#allocation2 + $0x3d4] ss:$8 sps:$4 sm:$0xff]  }
  0x74   :  { %1625 = vmatpush1.bf16.msra.mxu0 %v2877_v25  ;;  %1420 = vmatprep.subr.bf16.mxu1 %v2558_v26  ;;  %v2660_v26 = vld [vmem:[%s3318_s0 + $0xc] ss:$36 sps:$4 sm:$0xff]  }
  0x75   :  { %1626 = vmatprep.subr.bf16.mxu0 %v2881_v27 }
  0x76   :  { %1362 = vmatmul.mubr.bf16.gmra.mrb[8].mxu1 %v2573_v31  ;;  %v2998_v31 = vld [vmem:[#allocation2 + $0x3d0] ss:$8 sps:$4 sm:$0xff]  }
  0x77   :  { %1568 = vmatmul.mubr.bf16.gmra.mrb[8].mxu0 %v2572_v30  ;;  %1421 = vmatpush1.bf16.msra.mxu1 %v2556_v28  ;;  %v2663_v28 = vld [vmem:[%s3318_s0 + $0x1c] ss:$36 sps:$4 sm:$0xff]   ;;  %v2634_v30 = vld [vmem:[#allocation2 + $0x1d0] ss:$8 sps:$4 sm:$0xff]  }
  0x78   :  { %1627 = vmatpush1.bf16.msra.mxu0 %v2883_v29  ;;  %1422 = vmatprep.subr.bf16.mxu1 %v2564_v32  ;;  %v2648_v32 = vld [vmem:[#allocation2 + $0x1e4] ss:$8 sps:$4 sm:$0xff]  }
  0x79   :  { %1628 = vmatprep.subr.bf16.mxu0 %v2893_v33  ;;  %1577 = vmatprep.mubr.bf16.mxu0 %v2586_v34  ;;  %v3001_v34 = vld [vmem:[#allocation2 + $0x3e4] ss:$8 sps:$4 sm:$0xff]  }
  0x7a   :  { %1371 = vmatprep.mubr.bf16.mxu1 %v2588_v35  ;;  %v2646_v35 = vld [vmem:[#allocation2 + $0x1e0] ss:$8 sps:$4 sm:$0xff]  }
  0x7b   :  { %1423 = vmatpush1.bf16.msra.mxu1 %v2562_v36  ;;  %v3003_v36 = vld [vmem:[#allocation2 + $0x3e0] ss:$8 sps:$4 sm:$0xff]  }
  0x7c   :  { %1629 = vmatpush1.bf16.msra.mxu0 %v2901_v37  ;;  %1424 = vmatprep.subr.bf16.mxu1 %v2576_v38  ;;  %v2654_v38 = vld [vmem:[#allocation2 + $0x1f4] ss:$8 sps:$4 sm:$0xff]  }
  0x7d   :  { %1630 = vmatprep.subr.bf16.mxu0 %v2905_v39 }
  0x7e   :  { %1372 = vmatmul.mubr.bf16.gmra.mrb[12].mxu1 %v2591_v43  ;;  %v3010_v43 = vld [vmem:[#allocation2 + $0x3f0] ss:$8 sps:$4 sm:$0xff]  }
  0x7f   :  { %1578 = vmatmul.mubr.bf16.gmra.mrb[12].mxu0 %v2590_v42  ;;  %1425 = vmatpush1.bf16.msra.mxu1 %v2574_v40  ;;  %v3007_v40 = vld [vmem:[#allocation2 + $0x3f4] ss:$8 sps:$4 sm:$0xff]   ;;  %v2652_v42 = vld [vmem:[#allocation2 + $0x1f0] ss:$8 sps:$4 sm:$0xff]  }
  0x80   :  { %1631 = vmatpush1.bf16.msra.mxu0 %v2907_v41  ;;  %1426 = vmatprep.subr.bf16.mxu1 %v2582_v44  ;;  %v2666_v44 = vld [vmem:[#allocation2 + $0x404] ss:$8 sps:$4 sm:$0xff]  }
  0x81   :  { %1632 = vmatprep.subr.bf16.mxu0 %v2917_v45  ;;  %1587 = vmatprep.mubr.bf16.mxu0 %v2604_v46  ;;  %v2658_v46 = vld [vmem:[%s3318_s0 + $0x8] ss:$36 sps:$4 sm:$0xff]  }
  0x82   :  { %1381 = vmatprep.mubr.bf16.mxu1 %v2606_v47  ;;  %v2661_v47 = vld [vmem:[%s3318_s0 + $0x18] ss:$36 sps:$4 sm:$0xff]  }
  0x83   :  { %1427 = vmatpush1.bf16.msra.mxu1 %v2580_v48  ;;  %v2664_v48 = vld [vmem:[#allocation2 + $0x400] ss:$8 sps:$4 sm:$0xff]  }
  0x84   :  { %1633 = vmatpush1.bf16.msra.mxu0 %v2925_v49  ;;  %1428 = vmatprep.subr.bf16.mxu1 %v2594_v50  ;;  %v2669_v50 = vld [vmem:[#allocation2 + $0x414] ss:$8 sps:$4 sm:$0xff]  }
  0x85   :  { %1634 = vmatprep.subr.bf16.mxu0 %v2929_v51 }
  0x86   :  { %1382 = vmatmul.mubr.bf16.gmra.mrb[16].mxu1 %v2609_v55  ;;  %v2667_v55 = vld [vmem:[#allocation2 + $0x410] ss:$8 sps:$4 sm:$0xff]  }
  0x87   :  { %1588 = vmatmul.mubr.bf16.gmra.mrb[16].mxu0 %v2608_v54  ;;  %1429 = vmatpush1.bf16.msra.mxu1 %v2592_v52  ;;  %v2670_v52 = vld [vmem:[%s3318_s0 + $0x54] ss:$36 sps:$4 sm:$0xff]   ;;  %v2672_v54 = vld [vmem:[%s3318_s0 + $0x64] ss:$36 sps:$4 sm:$0xff]  }
  0x88   :  { %1635 = vmatpush1.bf16.msra.mxu0 %v2931_v53  ;;  %1430 = vmatprep.subr.bf16.mxu1 %v2600_v56  ;;  %v2678_v56 = vld [vmem:[#allocation2 + $0x424] ss:$8 sps:$4 sm:$0xff]  }
  0x89   :  { %1636 = vmatprep.subr.bf16.mxu0 %v2941_v57  ;;  %1597 = vmatprep.mubr.bf16.mxu0 %v2622_v58  ;;  %v2675_v58 = vld [vmem:[%s3318_s0 + $0x60] ss:$36 sps:$4 sm:$0xff]  }
  0x8a   :  { %1391 = vmatprep.mubr.bf16.mxu1 %v2624_v59  ;;  %v2681_v59 = vld [vmem:[#allocation2 + $0x434] ss:$8 sps:$4 sm:$0xff]  }
  0x8b   :  { %1431 = vmatpush1.bf16.msra.mxu1 %v2598_v60  ;;  %v2684_v60 = vld [vmem:[%s3318_s0 + $0xac] ss:$36 sps:$4 sm:$0xff]  }
  0x8c   :  { %1637 = vmatpush1.bf16.msra.mxu0 %v2949_v61  ;;  %1432 = vmatprep.subr.bf16.mxu1 %v2612_v62  ;;  %v2690_v62 = vld [vmem:[#allocation2 + $0x444] ss:$8 sps:$4 sm:$0xff]  }
  0x8d   :  { %1638 = vmatprep.subr.bf16.mxu0 %v2953_v63 }
  0x8e   :  { %1392 = vmatmul.mubr.bf16.gmra.mrb[20].mxu1 %v2627_v4  ;;  %v2696_v4 = vld [vmem:[%s3318_s0 + $0xf4] ss:$36 sps:$4 sm:$0xff]  }
  0x8f   :  { %1598 = vmatmul.mubr.bf16.gmra.mrb[20].mxu0 %v2626_v2  ;;  %1433 = vmatpush1.bf16.msra.mxu1 %v2610_v0  ;;  %v2687_v0 = vld [vmem:[%s3318_s0 + $0xa8] ss:$36 sps:$4 sm:$0xff]  }
  0x90   :  { %1639 = vmatpush1.bf16.msra.mxu0 %v2955_v1  ;;  %1434 = vmatprep.subr.bf16.mxu1 %v2618_v5  ;;  %v2694_v2 = vld [vmem:[%s3318_s0 + $0xe4] ss:$36 sps:$4 sm:$0xff]  }
  0x91   :  { %1640 = vmatprep.subr.bf16.mxu0 %v2965_v6  ;;  %1607 = vmatprep.mubr.bf16.mxu0 %v2640_v8  ;;  %v2698_v5 = vld [vmem:[%s3318_s0 + $0xe0] ss:$36 sps:$4 sm:$0xff]   ;;  %v2699_v8 = vld [vmem:[%s3318_s0 + $0xf0] ss:$36 sps:$4 sm:$0xff]  }
  0x92   :  { %1401 = vmatprep.mubr.bf16.mxu1 %v2642_v10  ;;  %v2706_v10 = vld [vmem:[%s3318_s0 + $0x12c] ss:$36 sps:$4 sm:$0xff]  }
  0x93   :  { %1435 = vmatpush1.bf16.msra.mxu1 %v2616_v11  ;;  %v2703_v11 = vld [vmem:[#allocation2 + $0x470] ss:$8 sps:$4 sm:$0xff]  }
  0x94   :  { %1641 = vmatpush1.bf16.msra.mxu0 %v2973_v12  ;;  %1436 = vmatprep.subr.bf16.mxu1 %v2630_v14  ;;  %v2709_v14 = vld [vmem:[%s3318_s0 + $0x20] ss:$36 sps:$4 sm:$0xff]  }
  0x95   :  { %1642 = vmatprep.subr.bf16.mxu0 %v2977_v16 }
  0x96   :  { %1402 = vmatmul.mubr.bf16.gmra.mrb[24].mxu1 %v2645_v22  ;;  %v2730_v22 = vld [vmem:[%s3318_s0 + $0x1d0] ss:$36 sps:$4 sm:$0xff]  }
  0x97   :  { %1608 = vmatmul.mubr.bf16.gmra.mrb[24].mxu0 %v2644_v20  ;;  %1437 = vmatpush1.bf16.msra.mxu1 %v2628_v18  ;;  %v2726_v18 = vld [vmem:[%s3318_s0 + $0x188] ss:$36 sps:$4 sm:$0xff]  }
  0x98   :  { %1643 = vmatpush1.bf16.msra.mxu0 %v2979_v19  ;;  %1438 = vmatprep.subr.bf16.mxu1 %v2636_v23  ;;  %v2729_v20 = vld [vmem:[%s3318_s0 + $0x1c8] ss:$36 sps:$4 sm:$0xff]  }
  0x99   :  { %1644 = vmatprep.subr.bf16.mxu0 %v2989_v24  ;;  %1444 = vmatprep.mubr.bf16.mxu1 %v2660_v26 }
  0x9a   :  { %1650 = vmatprep.mubr.bf16.mxu0 %v2663_v28 }
  0x9b   :  { %1439 = vmatpush1.bf16.msra.mxu1 %v2634_v30 }
  0x9c   :  { %1645 = vmatpush1.bf16.msra.mxu0 %v2998_v31  ;;  %1440 = vmatprep.subr.bf16.mxu1 %v2648_v32 }
  0x9d   :  { %1646 = vmatprep.subr.bf16.mxu0 %v3001_v34 }
  0x9f   :  { %1441 = vmatpush1.bf16.msra.mxu1 %v2646_v35 }
  0xa0   :  { %1647 = vmatpush1.bf16.msra.mxu0 %v3003_v36  ;;  %1442 = vmatprep.subr.bf16.mxu1 %v2654_v38 }
  0xa1   :  { %1648 = vmatprep.subr.bf16.mxu0 %v3007_v40 }
  0xa3   :  { %1443 = vmatpush1.bf16.msra.mxu1 %v2652_v42 }
  0xa4   :  { %1649 = vmatpush1.bf16.msra.mxu0 %v3010_v43  ;;  %2247 = vmatprep.subr.bf16.mxu1 %v2834_v3  ;;  %v2674_v3 = vld [vmem:[%s3318_s0 + $0x50] ss:$36 sps:$4 sm:$0xff]  }
  0xa5   :  { %1721 = vmatprep.subr.bf16.mxu0 %v2666_v44 }
  0xa6   :  { %1445 = vmatmul.mubr.bf16.vlgmr.msra.gmra.mrb[0].mxu1 %v2658_v46 }
  0xa7   :  { %1651 = vmatmul.mubr.bf16.vlgmr.msra.gmra.mrb[0].mxu0 %v2661_v47  ;;  %2263 = vmatpush1.bf16.msra.mxu1 %v2842_v7  ;;  %v2676_v7 = vld [vmem:[#allocation2 + $0x420] ss:$8 sps:$4 sm:$0xff]  }
  0xa8   :  { %1722 = vmatpush1.bf16.msra.mxu0 %v2664_v48  ;;  %2248 = vmatprep.subr.bf16.mxu1 %v2845_v9  ;;  %v2682_v9 = vld [vmem:[%s3318_s0 + $0x9c] ss:$36 sps:$4 sm:$0xff]  }
  0xa9   :  { %1723 = vmatprep.subr.bf16.mxu0 %v2669_v50  ;;  %1454 = vmatprep.mubr.bf16.mxu1 %v2670_v52 }
  0xaa   :  { %1660 = vmatprep.mubr.bf16.mxu0 %v2672_v54  ;;  %v257_v54 = vlaneseq }
  0xab   :  { %2264 = vmatpush1.bf16.msra.mxu1 %v2853_v13  ;;  %v2679_v13 = vld [vmem:[#allocation2 + $0x430] ss:$8 sps:$4 sm:$0xff]  }
  0xac   :  { %1724 = vmatpush1.bf16.msra.mxu0 %v2667_v55  ;;  %2249 = vmatprep.subr.bf16.mxu1 %v2857_v15  ;;  %v2686_v15 = vld [vmem:[%s3318_s0 + $0x98] ss:$36 sps:$4 sm:$0xff]  }
  0xad   :  { %1725 = vmatprep.subr.bf16.mxu0 %v2678_v56 }
  0xae   :  { %1455 = vmatmul.mubr.bf16.gmra.mrb[4].mxu1 %v2674_v3 }
  0xaf   :  { %1661 = vmatmul.mubr.bf16.gmra.mrb[4].mxu0 %v2675_v58  ;;  %2265 = vmatpush1.bf16.msra.mxu1 %v2859_v17  ;;  %v2688_v17 = vld [vmem:[#allocation2 + $0x440] ss:$8 sps:$4 sm:$0xff]   ;;  %v258_v58 = vshrl.u32 %v257_v54, 7 }
  0xb0   :  { %1726 = vmatpush1.bf16.msra.mxu0 %v2676_v7  ;;  %2250 = vmatprep.subr.bf16.mxu1 %v2869_v21  ;;  %v2693_v21 = vld [vmem:[#allocation2 + $0x454] ss:$8 sps:$4 sm:$0xff]  }
  0xb1   :  { %1727 = vmatprep.subr.bf16.mxu0 %v2681_v59  ;;  %1464 = vmatprep.mubr.bf16.mxu1 %v2682_v9  ;;  %v259_v59 = vsub.s32 0, %v258_v58  ;;  %v255_v9 = vld [vmem:[#allocation4] sm:$0x3] }
  0xb2   :  { %1670 = vmatprep.mubr.bf16.mxu0 %v2684_v60  ;;  %v263_v60 = vsub.s32 1, %v258_v58 }
  0xb3   :  { %2266 = vmatpush1.bf16.msra.mxu1 %v2877_v25  ;;  %v2691_v25 = vld [vmem:[#allocation2 + $0x450] ss:$8 sps:$4 sm:$0xff]  }
  0xb4   :  { %1728 = vmatpush1.bf16.msra.mxu0 %v2679_v13  ;;  %2251 = vmatprep.subr.bf16.mxu1 %v2881_v27  ;;  %v2702_v27 = vld [vmem:[#allocation2 + $0x464] ss:$8 sps:$4 sm:$0xff]  }
  0xb5   :  { %1729 = vmatprep.subr.bf16.mxu0 %v2690_v62 }
  0xb6   :  { %1465 = vmatmul.mubr.bf16.gmra.mrb[8].mxu1 %v2686_v15 }
  0xb7   :  { %1671 = vmatmul.mubr.bf16.gmra.mrb[8].mxu0 %v2687_v0  ;;  %2267 = vmatpush1.bf16.msra.mxu1 %v2883_v29  ;;  %v2700_v29 = vld [vmem:[#allocation2 + $0x460] ss:$8 sps:$4 sm:$0xff]   ;;  %v3185_v0 = vrot.slane %v255_v9, %v259_v59 }
  0xb8   :  { %1730 = vmatpush1.bf16.msra.mxu0 %v2688_v17  ;;  %2252 = vmatprep.subr.bf16.mxu1 %v2893_v33  ;;  %v2705_v33 = vld [vmem:[#allocation2 + $0x474] ss:$8 sps:$4 sm:$0xff]  }
  0xb9   :  { %1731 = vmatprep.subr.bf16.mxu0 %v2693_v21  ;;  %1474 = vmatprep.mubr.bf16.mxu1 %v2694_v2  ;;  %v3189_v21 = vrot.slane %v255_v9, %v263_v60 }
  0xba   :  { %1680 = vmatprep.mubr.bf16.mxu0 %v2696_v4 }
  0xbb   :  { %2268 = vmatpush1.bf16.msra.mxu1 %v2901_v37  ;;  %v2783_v37 = vmov 0  }
  0xbc   :  { %1732 = vmatpush1.bf16.msra.mxu0 %v2691_v25  ;;  %2253 = vmatprep.subr.bf16.mxu1 %v2905_v39  ;;  %v2708_v39 = vld [vmem:[%s3318_s0 + $0x128] ss:$36 sps:$4 sm:$0xff]  }
  0xbd   :  { %1733 = vmatprep.subr.bf16.mxu0 %v2702_v27 }
  0xbe   :  { %1475 = vmatmul.mubr.bf16.gmra.mrb[12].mxu1 %v2698_v5 }
  0xbf   :  { %1681 = vmatmul.mubr.bf16.gmra.mrb[12].mxu0 %v2699_v8  ;;  %2269 = vmatpush1.bf16.msra.mxu1 %v2907_v41  ;;  %v2710_v41 = vld [vmem:[%s3318_s0 + $0x174] ss:$36 sps:$4 sm:$0xff]  }
  0xc0   :  { %1734 = vmatpush1.bf16.msra.mxu0 %v2700_v29  ;;  %2254 = vmatprep.subr.bf16.mxu1 %v2917_v45  ;;  %v2712_v45 = vld [vmem:[%s3318_s0 + $0x170] ss:$36 sps:$4 sm:$0xff]  }
  0xc1   :  { %1735 = vmatprep.subr.bf16.mxu0 %v2705_v33  ;;  %1484 = vmatprep.mubr.bf16.mxu1 %v2706_v10 }
  0xc2   :  { %1753 = vmatprep.mubr.bf16.mxu0 %v2783_v37 }
  0xc3   :  { %2270 = vmatpush1.bf16.msra.mxu1 %v2925_v49  ;;  %v2713_v49 = vld [vmem:[%s3318_s0 + $0x68] ss:$36 sps:$4 sm:$0xff]  }
  0xc4   :  { %1736 = vmatpush1.bf16.msra.mxu0 %v2703_v11  ;;  %2255 = vmatprep.subr.bf16.mxu1 %v2929_v51  ;;  %v2714_v51 = vld [vmem:[%s3318_s0 + $0x1bc] ss:$36 sps:$4 sm:$0xff]  }
  0xc6   :  { %1485 = vmatmul.mubr.bf16.gmra.mrb[16].mxu1 %v2708_v39 }
  0xc7   :  { %1754 = vmatmul.mubr.bf16.vlgmr.msra.gmra.mrb[0].mxu0 %v2709_v14  ;;  %2271 = vmatpush1.bf16.msra.mxu1 %v2931_v53  ;;  %v2716_v53 = vld [vmem:[%s3318_s0 + $0x1b8] ss:$36 sps:$4 sm:$0xff]  }
  0xc8   :  { %1494 = vmatprep.mubr.bf16.mxu1 %v2710_v41  ;;  %2256 = vmatprep.subr.bf16.mxu1 %v2941_v57  ;;  %v2717_v57 = vld [vmem:[%s3318_s0 + $0xb0] ss:$36 sps:$4 sm:$0xff]  }
  0xc9   :  { %1763 = vmatprep.mubr.bf16.mxu0 %v2783_v37 }
  0xcb   :  { %2272 = vmatpush1.bf16.msra.mxu1 %v2949_v61  ;;  %v2721_v61 = vld [vmem:[%s3318_s0 + $0x13c] ss:$36 sps:$4 sm:$0xff]  }
  0xcc   :  { %2257 = vmatprep.subr.bf16.mxu1 %v2953_v63  ;;  %v2718_v63 = vld [vmem:[%s3318_s0 + $0xf8] ss:$36 sps:$4 sm:$0xff]  }
  0xce   :  { %1495 = vmatmul.mubr.bf16.gmra.mrb[20].mxu1 %v2712_v45 }
  0xcf   :  { %1764 = vmatmul.mubr.bf16.gmra.mrb[4].mxu0 %v2713_v49  ;;  %2273 = vmatpush1.bf16.msra.mxu1 %v2955_v1  ;;  %v2719_v1 = vld [vmem:[%s3318_s0 + $0x138] ss:$36 sps:$4 sm:$0xff]  }
  0xd0   :  { %1504 = vmatprep.mubr.bf16.mxu1 %v2714_v51  ;;  %2258 = vmatprep.subr.bf16.mxu1 %v2965_v6  ;;  %v2722_v6 = vld [vmem:[%s3318_s0 + $0x140] ss:$36 sps:$4 sm:$0xff]  }
  0xd1   :  { %1773 = vmatprep.mubr.bf16.mxu0 %v2783_v37 }
  0xd3   :  { %2274 = vmatpush1.bf16.msra.mxu1 %v2973_v12  ;;  %v2723_v12 = vld [vmem:[%s3318_s0 + $0x184] ss:$36 sps:$4 sm:$0xff]  }
  0xd4   :  { %2259 = vmatprep.subr.bf16.mxu1 %v2977_v16  ;;  %v2725_v16 = vld [vmem:[%s3318_s0 + $0x180] ss:$36 sps:$4 sm:$0xff]  }
  0xd6   :  { %1505 = vmatmul.mubr.bf16.gmra.mrb[24].mxu1 %v2716_v53 }
  0xd7   :  { %1774 = vmatmul.mubr.bf16.gmra.mrb[8].mxu0 %v2717_v57  ;;  %2275 = vmatpush1.bf16.msra.mxu1 %v2979_v19  ;;  %v2727_v19 = vld [vmem:[%s3318_s0 + $0x1cc] ss:$36 sps:$4 sm:$0xff]  }
  0xd8   :  { %1783 = vmatprep.mubr.bf16.mxu0 %v2783_v37  ;;  %2260 = vmatprep.subr.bf16.mxu1 %v2989_v24 }
  0xd9   :  { %1690 = vmatprep.mubr.bf16.mxu1 %v2721_v61 }
  0xdb   :  { %2276 = vmatpush1.bf16.msra.mxu1 %v2998_v31 }
  0xdc   :  { %2261 = vmatprep.subr.bf16.mxu1 %v3001_v34 }
  0xdf   :  { %1784 = vmatmul.mubr.bf16.gmra.mrb[12].mxu0 %v2718_v63  ;;  %2277 = vmatpush1.bf16.msra.mxu1 %v3003_v36 }
  0xe0   :  { %1793 = vmatprep.mubr.bf16.mxu0 %v2783_v37  ;;  %2262 = vmatprep.subr.bf16.mxu1 %v3007_v40 }
  0xe3   :  { %2278 = vmatpush1.bf16.msra.mxu1 %v3010_v43 }
  0xe6   :  { %1691 = vmatmul.mubr.bf16.vlgmr.msra.gmra.mrb[28].mxu1 %v2719_v1 }
  0xe7   :  { %1794 = vmatmul.mubr.bf16.gmra.mrb[28].mxu0 %v2722_v6  ;;  %1700 = vmatprep.mubr.bf16.mxu1 %v2723_v12 }
  0xe8   :  { %1803 = vmatprep.mubr.bf16.mxu0 %v2783_v37 }
  0xee   :  { %1701 = vmatmul.mubr.bf16.gmra.mrb[32].mxu1 %v2725_v16 }
  0xef   :  { %1804 = vmatmul.mubr.bf16.gmra.mrb[32].mxu0 %v2726_v18  ;;  %1710 = vmatprep.mubr.bf16.mxu1 %v2727_v19 }
  0xf0   :  { %1813 = vmatprep.mubr.bf16.mxu0 %v2783_v37 }
  0xf6   :  { %1711 = vmatmul.mubr.bf16.gmra.mrb[36].mxu1 %v2729_v20 }
  0xf7   :  { %1814 = vmatmul.mubr.bf16.gmra.mrb[36].mxu0 %v2730_v22 }
 0x15a   :  { %v3145_v23 = vpop.f32.mrb[16].mxu0 }
 0x15b   :  { %v3147_v24 = vpop.f32.mrb[17].mxu0 }
 0x15c   :  { %v3149_v26 = vpop.f32.mrb[18].mxu0 }
 0x15d   :  { %v3151_v28 = vpop.f32.mrb[19].mxu0 }
 0x162   :  { %v3153_v30 = vpop.f32.mrb[20].mxu0 }
 0x163   :  { %v3155_v31 = vpop.f32.mrb[21].mxu0 }
 0x164   :  { %v3157_v32 = vpop.f32.mrb[22].mxu0 }
 0x165   :  { %v3159_v34 = vpop.f32.mrb[23].mxu0 }
 0x16a   :  { %v3161_v35 = vpop.f32.mrb[24].mxu0 }
 0x16b   :  { %v3163_v36 = vpop.f32.mrb[25].mxu0 }
 0x16c   :  { %v3165_v38 = vpop.f32.mrb[26].mxu0 }
 0x16d   :  { %v3167_v40 = vpop.f32.mrb[27].mxu0 }
 0x179   :  { %v1446_v42 = vpop.f32.mrb[0].mxu1 }
 0x17a   :  { %v1448_v43 = vpop.f32.mrb[1].mxu1  ;;  %v2279_v2 = vadd.f32 %v1446_v42, %v3185_v0 }
 0x17b   :  { %v1450_v44 = vpop.f32.mrb[2].mxu1  ;;  %v2281_v4 = vadd.f32 %v1448_v43, %v3189_v21 }
 0x17c   :  { %v1452_v46 = vpop.f32.mrb[3].mxu1  ;;  %v2283_v5 = vadd.f32 %v1450_v44, %v3185_v0 }
 0x17d   :  { %v2285_v11 = vadd.f32 %v1452_v46, %v3189_v21 }
 0x181   :  { %v1456_v47 = vpop.f32.mrb[4].mxu1 }
 0x182   :  { %v1458_v48 = vpop.f32.mrb[5].mxu1  ;;  %v2287_v37 = vadd.f32 %v1456_v47, %v3185_v0 }
 0x183   :  { %v1460_v50 = vpop.f32.mrb[6].mxu1  ;;  %v2289_v47 = vadd.f32 %v1458_v48, %v3189_v21 }
 0x184   :  { %v3169_v52 = vpop.f32.mrb[7].mxu1  ;;  %v2291_v59 = vadd.f32 %v1460_v50, %v3185_v0 }
 0x189   :  { %v3171_v55 = vpop.f32.mrb[8].mxu1 }
 0x18a   :  { %v3173_v56 = vpop.f32.mrb[9].mxu1  ;;  %v2295_v48 = vadd.f32 %v3171_v55, %v3185_v0 }
 0x18b   :  { %v3175_v3 = vpop.f32.mrb[10].mxu1 }
 0x18c   :  { %v3177_v7 = vpop.f32.mrb[11].mxu1 }
 0x191   :  { %v3179_v13 = vpop.f32.mrb[12].mxu1 }
 0x192   :  { %v3181_v62 = vpop.f32.mrb[13].mxu1 }
 0x193   :  { %v3183_v15 = vpop.f32.mrb[14].mxu1 }
 0x194   :  { %v3187_v17 = vpop.f32.mrb[15].mxu1 }
 0x199   :  { %v1486_v25 = vpop.f32.mrb[16].mxu1 }
 0x19a   :  { %v1755_v27 = vpop.f32.mrb[0].mxu0  ;;  %v2311_v8 = vadd.f32 %v1486_v25, %v3185_v0  ;;  %v1488_v33 = vpop.f32.mrb[17].mxu1 }
 0x19b   :  { %v2280_v29 = vadd.f32 %v2279_v2, %v1755_v27  ;;  %v1757_v10 = vpop.f32.mrb[1].mxu0  ;;  %v2315_v39 = vadd.f32 %v1488_v33, %v3189_v21  ;;  %v1490_v41 = vpop.f32.mrb[18].mxu1 }
 0x19c   :  { %v2282_v14 = vadd.f32 %v2281_v4, %v1757_v10  ;;  %v1759_v45 = vpop.f32.mrb[2].mxu0  ;;  %v2319_v51 = vadd.f32 %v1490_v41, %v3185_v0  ;;  %v1492_v57 = vpop.f32.mrb[19].mxu1  ;;  %v3201_v18 = vadd.f32 %v2311_v8, %v3145_v23 }
 0x19d   :  { %vm1824_vm0 = vcmp.ge.f32.partialorder %v2280_v29, 0.0  ;;  %v1852_v49 = vmul.f32 0.2, %v2280_v29  ;;  %v2284_v53 = vadd.f32 %v2283_v5, %v1759_v45  ;;  %v1761_v61 = vpop.f32.mrb[3].mxu0  ;;  %v2323_v1 = vadd.f32 %v1492_v57, %v3189_v21 }
 0x19e   :  { %vm1825_vm1 = vcmp.ge.f32.partialorder %v2282_v14, 0.0  ;;  %v1853_v63 = vmul.f32 0.2, %v2282_v14  ;;  %v2286_v6 = vadd.f32 %v2285_v11, %v1761_v61  ;;  %v3204_v22 = vadd.f32 %v2315_v39, %v3147_v24 }
 0x19f   :  { %v1880_v12 = vsel %vm1824_vm0, %v2280_v29, %v1852_v49  ;;  %vm1826_vm2 = vcmp.ge.f32.partialorder %v2284_v53, 0.0  ;;  %v1854_v16 = vmul.f32 0.2, %v2284_v53  ;;  %v3207_v44 = vadd.f32 %v2319_v51, %v3149_v26 }
 0x1a0   :  { %v1881_v19 = vsel %vm1825_vm1, %v2282_v14, %v1853_v63  ;;  %vm1827_vm3 = vcmp.ge.f32.partialorder %v2286_v6, 0.0  ;;  %v1855_v20 = vmul.f32 0.2, %v2286_v6  ;;  %v3210_v46 = vadd.f32 %v2323_v1, %v3151_v28 }
 0x1a1   :  { %v2233_v42 = vpack.c.bf16 %v1881_v19, %v1880_v12  ;;  %v1882_v43 = vsel %vm1826_vm2, %v2284_v53, %v1854_v16  ;;  %v1496_v58 = vpop.f32.mrb[20].mxu1  ;;  %v2293_v28 = vadd.f32 %v3169_v52, %v3189_v21  ;;  %v2297_v63 = vadd.f32 %v3173_v56, %v3189_v21 }
 0x1a2   :  { %v1883_v54 = vsel %vm1827_vm3, %v2286_v6, %v1855_v20  ;;  %v1765_v23 = vpop.f32.mrb[4].mxu0  ;;  %v2327_v9 = vadd.f32 %v1496_v58, %v3185_v0  ;;  %v1498_v26 = vpop.f32.mrb[21].mxu1  ;;  %v2299_v12 = vadd.f32 %v3175_v3, %v3185_v0  ;;  %v2301_v20 = vadd.f32 %v3177_v7, %v3189_v21 }
 0x1a3   :  { %1992 = vst [vmem:[%s3321_s3] sm:$0xff] %v2233_v42  ;;  %v2234_v24 = vpack.c.bf16 %v1883_v54, %v1882_v43  ;;  %v2288_v60 = vadd.f32 %v2287_v37, %v1765_v23  ;;  %v1767_v2 = vpop.f32.mrb[5].mxu0  ;;  %v2331_v4 = vadd.f32 %v1498_v26, %v3189_v21  ;;  %v1500_v50 = vpop.f32.mrb[22].mxu1  ;;  %v2303_v56 = vadd.f32 %v3179_v13, %v3185_v0 }
 0x1a4   :  { %v2290_v25 = vadd.f32 %v2289_v47, %v1767_v2  ;;  %v1769_v27 = vpop.f32.mrb[6].mxu0  ;;  %v2335_v8 = vadd.f32 %v1500_v50, %v3185_v0  ;;  %v1502_v33 = vpop.f32.mrb[23].mxu1  ;;  %v3229_v14 = vadd.f32 %v2327_v9, %v3153_v30 }
 0x1a5   :  { %1993 = vst [vmem:[%s3321_s3 + $0x8] sm:$0xff] %v2234_v24  ;;  %vm1828_vm4 = vcmp.ge.f32.partialorder %v2288_v60, 0.0  ;;  %v1856_v5 = vmul.f32 0.2, %v2288_v60  ;;  %v2292_v29 = vadd.f32 %v2291_v59, %v1769_v27  ;;  %v1771_v10 = vpop.f32.mrb[7].mxu0  ;;  %v2339_v55 = vadd.f32 %v1502_v33, %v3189_v21 }
 0x1a6   :  { %vm1829_vm5 = vcmp.ge.f32.partialorder %v2290_v25, 0.0  ;;  %v1857_v52 = vmul.f32 0.2, %v2290_v25  ;;  %v2294_v11 = vadd.f32 %v2293_v28, %v1771_v10  ;;  %v3232_v49 = vadd.f32 %v2331_v4, %v3155_v31 }
 0x1a7   :  { %v1884_v37 = vsel %vm1828_vm4, %v2288_v60, %v1856_v5  ;;  %vm1830_vm6 = vcmp.ge.f32.partialorder %v2292_v29, 0.0  ;;  %v1858_v39 = vmul.f32 0.2, %v2292_v29  ;;  %v3235_v57 = vadd.f32 %v2335_v8, %v3157_v32 }
 0x1a8   :  { %v1885_v41 = vsel %vm1829_vm5, %v2290_v25, %v1857_v52  ;;  %vm1831_vm7 = vcmp.ge.f32.partialorder %v2294_v11, 0.0  ;;  %v1859_v45 = vmul.f32 0.2, %v2294_v11  ;;  %v3238_v61 = vadd.f32 %v2339_v55, %v3159_v34 }
 0x1a9   :  { %v2235_v51 = vpack.c.bf16 %v1885_v41, %v1884_v37  ;;  %v1886_v53 = vsel %vm1830_vm6, %v2292_v29, %v1858_v39  ;;  %v1506_v30 = vpop.f32.mrb[24].mxu1  ;;  %v2305_v8 = vadd.f32 %v3181_v62, %v3189_v21  ;;  %v2307_v33 = vadd.f32 %v3183_v15, %v3185_v0 }
 0x1aa   :  { %v1887_v1 = vsel %vm1831_vm7, %v2294_v11, %v1859_v45  ;;  %v1775_v6 = vpop.f32.mrb[8].mxu0  ;;  %v2343_v32 = vadd.f32 %v1506_v30, %v3185_v0  ;;  %v1508_v19 = vpop.f32.mrb[25].mxu1 }
 0x1ab   :  { %1994 = vst [vmem:[%s3321_s3 + $0x10] sm:$0xff] %v2235_v51  ;;  %v2236_v31 = vpack.c.bf16 %v1887_v1, %v1886_v53  ;;  %v2296_v16 = vadd.f32 %v2295_v48, %v1775_v6  ;;  %v1777_v34 = vpop.f32.mrb[9].mxu0  ;;  %v2347_v42 = vadd.f32 %v1508_v19, %v3189_v21  ;;  %v1510_v3 = vpop.f32.mrb[26].mxu1 }
 0x1ac   :  { %v2298_v43 = vadd.f32 %v2297_v63, %v1777_v34  ;;  %v1779_v47 = vpop.f32.mrb[10].mxu0  ;;  %v2351_v58 = vadd.f32 %v1510_v3, %v3185_v0  ;;  %v1512_v59 = vpop.f32.mrb[27].mxu1  ;;  %v3259_v2 = vadd.f32 %v2343_v32, %v3161_v35 }
 0x1ad   :  { %1995 = vst [vmem:[%s3321_s3 + $0x18] sm:$0xff] %v2236_v31  ;;  %vm1832_vm8 = vcmp.ge.f32.partialorder %v2296_v16, 0.0  ;;  %v1860_v54 = vmul.f32 0.2, %v2296_v16  ;;  %v2300_v23 = vadd.f32 %v2299_v12, %v1779_v47  ;;  %v1781_v24 = vpop.f32.mrb[11].mxu0  ;;  %v2355_v13 = vadd.f32 %v1512_v59, %v3189_v21 }
 0x1ae   :  { %vm1833_vm9 = vcmp.ge.f32.partialorder %v2298_v43, 0.0  ;;  %v1861_v7 = vmul.f32 0.2, %v2298_v43  ;;  %v2302_v9 = vadd.f32 %v2301_v20, %v1781_v24  ;;  %v3262_v4 = vadd.f32 %v2347_v42, %v3163_v36 }
 0x1af   :  { %v1888_v60 = vsel %vm1832_vm8, %v2296_v16, %v1860_v54  ;;  %vm1834_vm10 = vcmp.ge.f32.partialorder %v2300_v23, 0.0  ;;  %v1862_v26 = vmul.f32 0.2, %v2300_v23  ;;  %v3265_v27 = vadd.f32 %v2351_v58, %v3165_v38 }
 0x1b0   :  { %v1889_v28 = vsel %vm1833_vm9, %v2298_v43, %v1861_v7  ;;  %vm1835_vm11 = vcmp.ge.f32.partialorder %v2302_v9, 0.0  ;;  %v1863_v48 = vmul.f32 0.2, %v2302_v9  ;;  %v3268_v5 = vadd.f32 %v2355_v13, %v3167_v40 }
 0x1b1   :  { %v2237_v25 = vpack.c.bf16 %v1889_v28, %v1888_v60  ;;  %v1890_v50 = vsel %vm1834_vm10, %v2300_v23, %v1862_v26  ;;  %v2309_v38 = vadd.f32 %v3187_v17, %v3189_v21 }
 0x1b2   :  { %v1891_v29 = vsel %vm1835_vm11, %v2302_v9, %v1863_v48  ;;  %v1785_v35 = vpop.f32.mrb[12].mxu0 }
 0x1b3   :  { %1996 = vst [vmem:[%s3321_s3 + $0x20] sm:$0xff] %v2237_v25  ;;  %v2238_v36 = vpack.c.bf16 %v1891_v29, %v1890_v50  ;;  %v2304_v10 = vadd.f32 %v2303_v56, %v1785_v35  ;;  %v1787_v52 = vpop.f32.mrb[13].mxu0 }
 0x1b4   :  { %v2306_v40 = vadd.f32 %v2305_v8, %v1787_v52  ;;  %v1789_v55 = vpop.f32.mrb[14].mxu0 }
 0x1b5   :  { %1997 = vst [vmem:[%s3321_s3 + $0x28] sm:$0xff] %v2238_v36  ;;  %vm1836_vm12 = vcmp.ge.f32.partialorder %v2304_v10, 0.0  ;;  %v1864_v62 = vmul.f32 0.2, %v2304_v10  ;;  %v2308_v11 = vadd.f32 %v2307_v33, %v1789_v55  ;;  %v1791_v15 = vpop.f32.mrb[15].mxu0 }
 0x1b6   :  { %vm1837_vm13 = vcmp.ge.f32.partialorder %v2306_v40, 0.0  ;;  %v1865_v0 = vmul.f32 0.2, %v2306_v40  ;;  %v2310_v37 = vadd.f32 %v2309_v38, %v1791_v15 }
 0x1b7   :  { %v1892_v39 = vsel %vm1836_vm12, %v2304_v10, %v1864_v62  ;;  %vm1838_vm14 = vcmp.ge.f32.partialorder %v2308_v11, 0.0  ;;  %v1866_v41 = vmul.f32 0.2, %v2308_v11 }
 0x1b8   :  { %v1893_v45 = vsel %vm1837_vm13, %v2306_v40, %v1865_v0  ;;  %vm1839_vm15 = vcmp.ge.f32.partialorder %v2310_v37, 0.0  ;;  %v1867_v51 = vmul.f32 0.2, %v2310_v37 }
 0x1b9   :  { %v2239_v17 = vpack.c.bf16 %v1893_v45, %v1892_v39  ;;  %v1894_v21 = vsel %vm1838_vm14, %v2308_v11, %v1866_v41  ;;  %v1692_v63 = vpop.f32.mrb[28].mxu1 }
 0x1ba   :  { %v1895_v53 = vsel %vm1839_vm15, %v2310_v37, %v1867_v51  ;;  %v1795_v1 = vpop.f32.mrb[28].mxu0  ;;  %v2313_v6 = vadd.f32 %v3201_v18, %v1692_v63  ;;  %v1694_v12 = vpop.f32.mrb[29].mxu1 }
 0x1bb   :  { %1998 = vst [vmem:[%s3321_s3 + $0x30] sm:$0xff] %v2239_v17  ;;  %v2240_v30 = vpack.c.bf16 %v1895_v53, %v1894_v21  ;;  %v1797_v31 = vpop.f32.mrb[29].mxu0  ;;  %v2317_v32 = vadd.f32 %v3204_v22, %v1694_v12  ;;  %v1696_v16 = vpop.f32.mrb[30].mxu1 }
 0x1bc   :  { %v1799_v19 = vpop.f32.mrb[30].mxu0  ;;  %v2314_v34 = vadd.f32 %v2313_v6, %v1795_v1  ;;  %v2321_v20 = vadd.f32 %v3207_v44, %v1696_v16  ;;  %v1698_v56 = vpop.f32.mrb[31].mxu1 }
 0x1bd   :  { %1999 = vst [vmem:[%s3321_s3 + $0x38] sm:$0xff] %v2240_v30  ;;  %v1801_v42 = vpop.f32.mrb[31].mxu0  ;;  %v2318_v43 = vadd.f32 %v2317_v32, %v1797_v31  ;;  %v2325_v3 = vadd.f32 %v3210_v46, %v1698_v56 }
 0x1be   :  { %vm1840_vm0 = vcmp.ge.f32.partialorder %v2314_v34, 0.0  ;;  %v1868_v18 = vmul.f32 0.2, %v2314_v34  ;;  %v2322_v47 = vadd.f32 %v2321_v20, %v1799_v19 }
 0x1bf   :  { %vm1841_vm1 = vcmp.ge.f32.partialorder %v2318_v43, 0.0  ;;  %v1869_v54 = vmul.f32 0.2, %v2318_v43  ;;  %v2326_v22 = vadd.f32 %v2325_v3, %v1801_v42 }
 0x1c0   :  { %v1896_v58 = vsel %vm1840_vm0, %v2314_v34, %v1868_v18  ;;  %vm1842_vm2 = vcmp.ge.f32.partialorder %v2322_v47, 0.0  ;;  %v1870_v23 = vmul.f32 0.2, %v2322_v47 }
 0x1c1   :  { %v1897_v59 = vsel %vm1841_vm1, %v2318_v43, %v1869_v54  ;;  %vm1843_vm3 = vcmp.ge.f32.partialorder %v2326_v22, 0.0  ;;  %v1871_v24 = vmul.f32 0.2, %v2326_v22  ;;  %v1702_v7 = vpop.f32.mrb[32].mxu1 }
 0x1c2   :  { %v1805_v13 = vpop.f32.mrb[32].mxu0  ;;  %v2241_v44 = vpack.c.bf16 %v1897_v59, %v1896_v58  ;;  %v1898_v9 = vsel %vm1842_vm2, %v2322_v47, %v1870_v23  ;;  %v2329_v60 = vadd.f32 %v3229_v14, %v1702_v7  ;;  %v1704_v26 = vpop.f32.mrb[33].mxu1 }
 0x1c3   :  { %v1807_v46 = vpop.f32.mrb[33].mxu0  ;;  %v1899_v28 = vsel %vm1843_vm3, %v2326_v22, %v1871_v24  ;;  %v2333_v48 = vadd.f32 %v3232_v49, %v1704_v26  ;;  %v1706_v25 = vpop.f32.mrb[34].mxu1 }
 0x1c4   :  { %v1809_v50 = vpop.f32.mrb[34].mxu0  ;;  %2000 = vst [vmem:[%s3321_s3 + $0x40] sm:$0xff] %v2241_v44  ;;  %v2242_v8 = vpack.c.bf16 %v1899_v28, %v1898_v9  ;;  %v2330_v29 = vadd.f32 %v2329_v60, %v1805_v13  ;;  %v2337_v35 = vadd.f32 %v3235_v57, %v1706_v25  ;;  %v1708_v33 = vpop.f32.mrb[35].mxu1 }
 0x1c5   :  { %v1811_v36 = vpop.f32.mrb[35].mxu0  ;;  %v2334_v10 = vadd.f32 %v2333_v48, %v1807_v46  ;;  %v2341_v14 = vadd.f32 %v3238_v61, %v1708_v33 }
 0x1c6   :  { %2001 = vst [vmem:[%s3321_s3 + $0x48] sm:$0xff] %v2242_v8  ;;  %vm1844_vm4 = vcmp.ge.f32.partialorder %v2330_v29, 0.0  ;;  %v1872_v49 = vmul.f32 0.2, %v2330_v29  ;;  %v2338_v52 = vadd.f32 %v2337_v35, %v1809_v50 }
 0x1c7   :  { %vm1845_vm5 = vcmp.ge.f32.partialorder %v2334_v10, 0.0  ;;  %v1873_v38 = vmul.f32 0.2, %v2334_v10  ;;  %v2342_v40 = vadd.f32 %v2341_v14, %v1811_v36 }
 0x1c8   :  { %v1900_v55 = vsel %vm1844_vm4, %v2330_v29, %v1872_v49  ;;  %vm1846_vm6 = vcmp.ge.f32.partialorder %v2338_v52, 0.0  ;;  %v1874_v62 = vmul.f32 0.2, %v2338_v52 }
 0x1c9   :  { %v1901_v11 = vsel %vm1845_vm5, %v2334_v10, %v1873_v38  ;;  %vm1847_vm7 = vcmp.ge.f32.partialorder %v2342_v40, 0.0  ;;  %v1875_v57 = vmul.f32 0.2, %v2342_v40  ;;  %v1712_v15 = vpop.f32.mrb[36].mxu1 }
 0x1ca   :  { %v1815_v0 = vpop.f32.mrb[36].mxu0  ;;  %v2243_v37 = vpack.c.bf16 %v1901_v11, %v1900_v55  ;;  %v1902_v61 = vsel %vm1846_vm6, %v2338_v52, %v1874_v62  ;;  %v2345_v39 = vadd.f32 %v3259_v2, %v1712_v15  ;;  %v1714_v41 = vpop.f32.mrb[37].mxu1 }
 0x1cb   :  { %v1817_v45 = vpop.f32.mrb[37].mxu0  ;;  %v1903_v51 = vsel %vm1847_vm7, %v2342_v40, %v1875_v57  ;;  %v2349_v17 = vadd.f32 %v3262_v4, %v1714_v41  ;;  %v1716_v21 = vpop.f32.mrb[38].mxu1 }
 0x1cc   :  { %v1819_v53 = vpop.f32.mrb[38].mxu0  ;;  %2002 = vst [vmem:[%s3321_s3 + $0x50] sm:$0xff] %v2243_v37  ;;  %v2244_v63 = vpack.c.bf16 %v1903_v51, %v1902_v61  ;;  %v2346_v1 = vadd.f32 %v2345_v39, %v1815_v0  ;;  %v2353_v30 = vadd.f32 %v3265_v27, %v1716_v21  ;;  %v1718_v6 = vpop.f32.mrb[39].mxu1 }
 0x1cd   :  { %v1821_v12 = vpop.f32.mrb[39].mxu0  ;;  %v2350_v31 = vadd.f32 %v2349_v17, %v1817_v45  ;;  %v2357_v2 = vadd.f32 %v3268_v5, %v1718_v6 }
 0x1ce   :  { %2003 = vst [vmem:[%s3321_s3 + $0x58] sm:$0xff] %v2244_v63  ;;  %vm1848_vm8 = vcmp.ge.f32.partialorder %v2346_v1, 0.0  ;;  %v1876_v4 = vmul.f32 0.2, %v2346_v1  ;;  %v2354_v32 = vadd.f32 %v2353_v30, %v1819_v53 }
 0x1cf   :  { %vm1849_vm9 = vcmp.ge.f32.partialorder %v2350_v31, 0.0  ;;  %v1877_v16 = vmul.f32 0.2, %v2350_v31  ;;  %v2358_v19 = vadd.f32 %v2357_v2, %v1821_v12 }
 0x1d0   :  { %v1904_v34 = vsel %vm1848_vm8, %v2346_v1, %v1876_v4  ;;  %vm1850_vm10 = vcmp.ge.f32.partialorder %v2354_v32, 0.0  ;;  %v1878_v20 = vmul.f32 0.2, %v2354_v32 }
 0x1d1   :  { %v1905_v56 = vsel %vm1849_vm9, %v2350_v31, %v1877_v16  ;;  %vm1851_vm11 = vcmp.ge.f32.partialorder %v2358_v19, 0.0  ;;  %v1879_v27 = vmul.f32 0.2, %v2358_v19 }
 0x1d2   :  { %v2245_v42 = vpack.c.bf16 %v1905_v56, %v1904_v34  ;;  %v1906_v43 = vsel %vm1850_vm10, %v2354_v32, %v1878_v20 }
 0x1d3   :  { %v1907_v3 = vsel %vm1851_vm11, %v2358_v19, %v1879_v27 }
 0x1d4   :  { %2004 = vst [vmem:[%s3321_s3 + $0x60] sm:$0xff] %v2245_v42  ;;  %v2246_v5 = vpack.c.bf16 %v1907_v3, %v1906_v43 }
 0x1d6   :  { %2005 = vst [vmem:[%s3321_s3 + $0x68] sm:$0xff] %v2246_v5 }
 0x1d7   :  { %2010 = vsyncpa [#allocation3], 1 }
 0x1d8   :  { %2011 = vsyncpa [#allocation5], 1 }

// kernel: discriminator_forward.7
= control target key start
LH: loop header
LB: loop body
LE: loop exit
PB: predicated region body
PF: predicated region fallthrough
CT: control target
= control target key end

     0   :  { %s19506_s0 = inlined_call_operand.vmem [shape: bf16[16,12544], index: 0, kind: input, shape index: {}]   ;;  %s19507_s1 = inlined_call_operand.hbm [shape: bf16[12544,512], index: 1, kind: input, shape index: {}]   ;;  %s19508_s2 = inlined_call_operand.hbm [shape: f32[1,512], index: 2, kind: input, shape index: {}]   ;;  %s19509_s3 = inlined_call_operand.hbm [shape: bf16[512,128], index: 3, kind: input, shape index: {}]   ;;  %s19510_s4 = inlined_call_operand.hbm [shape: f32[1,128], index: 4, kind: input, shape index: {}]   ;;  %s19511_s5 = inlined_call_operand.vmem [shape: f32[16,128], index: 5, kind: output, shape index: {}]  }
   0x1   :  { %19518 = sst [smem:[#allocation15_spill]] %s19508_s2 }
   0x2   :  { %10 = vsyncpa [#allocation5], 0 }
   0x3   :  { %12 = vsyncpa [#allocation5 + $0x1], 0 }
   0x4   :  { %13 = vsyncpa [#allocation7], 0 }
   0x5   :  { %14 = vsyncpa [#allocation10], 0  ;;  %s17562_s18 = smov 0   ;;  %s17564_s19 = smov 0  }
   0x6   :  { %s17566_s20 = smov 0   ;;  %s17568_s21 = smov 0  }
   0x7   :  { %s17570_s22 = smov 0   ;;  %s17572_s23 = smov 0  }
   0x8 LB: > { %s12889_s24 = sadd.s32 4294967295, %s17520_s23   ;;  %s29_s25 = sadd.s32 1, %s17516_s22  ;;  %s17520_s23 = sphi %s17572_s23, %s20_s23   ;;  %s17516_s22 = sphi %s17570_s22, %s19537_s22   ;;  %s17512_s21 = sphi %s17568_s21, %s19536_s21   ;;  %s17508_s20 = sphi %s17566_s20, %s19535_s20   ;;  %s17504_s19 = sphi %s17564_s19, %s19534_s19   ;;  %s17500_s18 = sphi %s17562_s18, %s19533_s18  }
   0x9   : > { %p30_p0 = scmp.ge.s32.totalorder %s29_s25, 2  ;;  %s41_s26 = sadd.s32 1, %s17508_s20 }
   0xa   : > { %p48_p1 = scmp.ne.s32.totalorder %s17508_s20, %s17504_s19  ;;  %p49_p2 = scmp.eq.s32.totalorder %s17520_s23, 0 }
   0xb   : > { %s19539_s25 = smov (%p30_p0, %s29_s25), 0  ;;  %p80_p4 = scmp.ne.s32.totalorder %s17504_s19, %s17500_s18 }
   0xc   : > { %19519 = sst [smem:[#allocation14_spill]] %s19539_s25  ;;  %p17598_p3 = por %p49_p2, %p48_p1 }
   0xd   : > { %s37_s28 = ssub.s32 %s17516_s22, %s19539_s25  ;;  %p17605_p5 = scmp.eq.s32.totalorder %s12889_s24, 0 }
   0xe   : > { %s19520_s27 = scalar_select %p17598_p3, 1, 0 }
   0xf   : > { %s19521_s29 = scalar_select %p17605_p5, 1, 0 }
  0x10   : > { %p39_p6 = scmp.eq.s32.totalorder %s37_s28, 0  ;;  %p12890_p7 = scmp.ge.s32.totalorder %s17520_s23, 1 }
  0x11   : > { %p17612_p8 = por %p17605_p5, %p80_p4  ;;  %p180_p9 = scmp.lt.s32.totalorder %s17520_s23, 3 }
  0x12   : > { %s17618_s6 = scalar_select %p39_p6, %s17508_s20, %s41_s26  }
  0x13   : > { %s19522_s30 = scalar_select %p17612_p8, 1, 0 }
  0x14   : > { %p17620_p10 = pnand %p12890_p7, %p180_p9  ;;  %s17522_s8 = smov [#allocation6]  }
  0x15   : > { %s193_s9 = sshll.u32 %s17522_s8, 4  ;;  %s17523_s10 = smov [#allocation8]   ;;  %s194_s9 = int_to_ptr.vmem [resolvable:$true] %s193_s9 }
  0x16   : > { %s19523_s7 = scalar_select %p17620_p10, 1, 0 }
  0x17   : > { %p14820_p11 = pneg %p17620_p10  ;;  %s203_s11 = sshll.u32 %s17523_s10, 4  ;;  %s17632_s11 = int_to_ptr.vmem [resolvable:$true] %s203_s11 }
  0x18   : > { %s19525_s2 = sld [smem:[#allocation15_spill]] }
  0x19   : > { %p17628_p12 = pnand %p14820_p11, %p17605_p5 }
  0x1b   : > { %p17642_p0 = pneg %p17628_p12 }
  0x1e   : > { %s17350_s15 = scalar_lea.hbm %s19525_s2, 64 }
  0x1f   : > { %p17351_p13 = scmp.ne.s32.totalorder %s19525_s2, %s17350_s15  ;;  %p17357_p4 = scmp.lt.u32.totalorder %s17350_s15, %s19525_s2 }
  0x21   : > { %p17353_p1 = pnand %p17642_p0, %p17351_p13 }
  0x23   : > { %p17354_p2 = pneg %p17353_p1 }
  0x25   : > { %p17359_p6 = pnand %p17357_p4, %p17354_p2 }
  0x27   : > { %17362 = shalt.err (!%p17359_p6)
}
  0x28   : > { %s17363_s28 = scalar_lea.vmem %s194_s9, 64  ;;  %p17371_p5 = scmp.lt.s32.totalorder %s194_s9, %s194_s9 }
  0x29   : > { %p17364_p7 = scmp.ne.s32.totalorder %s194_s9, %s17363_s28  ;;  %p17372_p8 = scmp.lt.s32.totalorder %s17363_s28, %s17363_s28 }
  0x2b   : > { %p17366_p9 = pnand %p17364_p7, %p17642_p0  ;;  %p17373_p10 = por %p17372_p8, %p17371_p5 }
  0x2d   : > { %p17367_p11 = pneg %p17366_p9 }
  0x2f   : > { %p17374_p3 = pnand %p17373_p10, %p17367_p11 }
  0x31   : > { %17377 = shalt.err (!%p17374_p3)
}
  0x32   : > { %14823 = dma.hbm_to_vmem [thread:$0]  (!%p17628_p12), %s19525_s2, 64, %s194_s9, [#allocation7]  }
  0x33   : > { %s17378_s15 = scalar_lea.hbm %s19509_s3, 4096 }
  0x34   : > { %p17379_p13 = scmp.ne.s32.totalorder %s19509_s3, %s17378_s15  ;;  %p17385_p3 = scmp.lt.u32.totalorder %s17378_s15, %s19509_s3 }
  0x36   : > { %p17381_p1 = pnand %p17379_p13, %p17642_p0 }
  0x38   : > { %p17382_p5 = pneg %p17381_p1 }
  0x3a   : > { %p17387_p8 = pnand %p17385_p3, %p17382_p5 }
  0x3c   : > { %17390 = shalt.err (!%p17387_p8)
}
  0x3d   : > { %s17391_s9 = scalar_lea.vmem %s17632_s11, 4096  ;;  %p17399_p6 = scmp.lt.s32.totalorder %s17632_s11, %s17632_s11 }
  0x3e   : > { %p17392_p10 = scmp.ne.s32.totalorder %s17632_s11, %s17391_s9  ;;  %p17400_p7 = scmp.lt.s32.totalorder %s17391_s9, %s17391_s9 }
  0x40   : > { %p17394_p2 = pnand %p17392_p10, %p17642_p0  ;;  %p17401_p9 = por %p17400_p7, %p17399_p6 }
  0x42   : > { %p17395_p4 = pneg %p17394_p2 }
  0x44   : > { %p17402_p11 = pnand %p17401_p9, %p17395_p4 }
  0x46   : > { %17405 = shalt.err (!%p17402_p11)
}
  0x47   : > { %s17524_s28 = smov 64   ;;  %s17525_s8 = smov 4  }
  0x48   : > { %14826 = dma.hbm_to_vmem [thread:$0]  (!%p17628_p12), %s19509_s3, 4096, %s17632_s11, [#allocation7], %s17524_s28, %s17524_s28, %s17525_s8  }
  0x49   : > { %s17526_s14 = smov [#allocation9]   ;;  %s17406_s24 = scalar_lea.hbm %s19510_s4, 16 }
  0x4a   : > { %s217_s15 = sshll.u32 %s17526_s14, 4  ;;  %p17407_p13 = scmp.ne.s32.totalorder %s19510_s4, %s17406_s24  ;;  %s218_s15 = int_to_ptr.vmem [resolvable:$true] %s217_s15 }
  0x4b   : > { %p17413_p3 = scmp.lt.u32.totalorder %s17406_s24, %s19510_s4 }
  0x4c   : > { %p17409_p1 = pnand %p17407_p13, %p17642_p0 }
  0x4e   : > { %p17410_p5 = pneg %p17409_p1 }
  0x50   : > { %p17415_p8 = pnand %p17413_p3, %p17410_p5 }
  0x52   : > { %17418 = shalt.err (!%p17415_p8)
}
  0x53   : > { %s17419_s11 = scalar_lea.vmem %s218_s15, 16  ;;  %s17426_s28 = scalar_lea.vmem %s218_s15, 32 }
  0x54   : > { %p17420_p10 = scmp.ne.s32.totalorder %s218_s15, %s17419_s11  ;;  %p17427_p6 = scmp.lt.s32.totalorder %s218_s15, %s218_s15 }
  0x55   : > { %p17428_p7 = scmp.lt.s32.totalorder %s17426_s28, %s17419_s11 }
  0x56   : > { %p17422_p2 = pnand %p17420_p10, %p17642_p0 }
  0x57   : > { %p17429_p9 = por %p17428_p7, %p17427_p6 }
  0x58   : > { %p17423_p4 = pneg %p17422_p2 }
  0x5a   : > { %p17430_p11 = pnand %p17429_p9, %p17423_p4 }
  0x5c   : > { %17433 = shalt.err (!%p17430_p11)
}
  0x5d   : > { %14829 = dma.hbm_to_vmem [thread:$0]  (!%p17628_p12), %s19510_s4, 16, %s218_s15, [#allocation10]  }
  0x5e   : > { %p12894_p13 = scmp.ge.s32.totalorder %s17520_s23, 2 }
  0x5f   : > { %p19527_p1 = scmp.ne.s32.totalorder (!%p12894_p13), %s19520_s27, 0 }
  0x60   : > { %224 = sbr.rel (%p12894_p13) target bundleno = 160 (0xa0), region = 28 }
  0x67   : > { %227 = sbr.rel (!%p19527_p1) target bundleno = 133 (0x85), region = 32  ;;  %s229_s2 = sand.u32 (%p19527_p1), 1, %s17508_s20  }
  0x68   : > { %s14562_s25 = smul.u32 (%p19527_p1), 196, %s17516_s22 }
  0x69   : > { %s14802_s18 = smul.u32 (%p19527_p1), 392, %s229_s2 }
  0x6a   : > { %s17707_s16 = scalar_lea.vmem (%p19527_p1), %s19506_s0, %s14562_s25 }
  0x6b   : > { %v252_v0 = vld [vmem:[%s17707_s16] sm:$0xff] (%p19527_p1)  ;;  %v254_v1 = vld [vmem:[%s17707_s16 + $0x8] sm:$0xff] (%p19527_p1)  ;;  %v256_v2 = vld [vmem:[%s17707_s16 + $0x10] sm:$0xff] (%p19527_p1)  ;;  %s17712_s12 = scalar_lea.vmem (%p19527_p1), [#allocation3], %s14802_s18 }
  0x6c   : > { %253 = vst [vmem:[%s17712_s12] sm:$0xff] (%p19527_p1), %v252_v0  ;;  %255 = vst [vmem:[%s17712_s12 + $0x8] sm:$0xff] (%p19527_p1), %v254_v1  ;;  %v258_v3 = vld [vmem:[%s17707_s16 + $0x18] sm:$0xff] (%p19527_p1)  ;;  %v260_v4 = vld [vmem:[%s17707_s16 + $0x20] sm:$0xff] (%p19527_p1) }
  0x6d   : > { %257 = vst [vmem:[%s17712_s12 + $0x10] sm:$0xff] (%p19527_p1), %v256_v2  ;;  %v262_v5 = vld [vmem:[%s17707_s16 + $0x28] sm:$0xff] (%p19527_p1)  ;;  %259 = vst [vmem:[%s17712_s12 + $0x18] sm:$0xff] (%p19527_p1), %v258_v3  ;;  %v264_v6 = vld [vmem:[%s17707_s16 + $0x30] sm:$0xff] (%p19527_p1) }
  0x6e   : > { %261 = vst [vmem:[%s17712_s12 + $0x20] sm:$0xff] %v260_v4  ;;  %263 = vst [vmem:[%s17712_s12 + $0x28] sm:$0xff] %v262_v5  ;;  %v266_v7 = vld [vmem:[%s17707_s16 + $0x38] sm:$0xff]  ;;  %v268_v8 = vld [vmem:[%s17707_s16 + $0x40] sm:$0xff] }
  0x6f   : > { %265 = vst [vmem:[%s17712_s12 + $0x30] sm:$0xff] %v264_v6  ;;  %267 = vst [vmem:[%s17712_s12 + $0x38] sm:$0xff] %v266_v7  ;;  %v270_v9 = vld [vmem:[%s17707_s16 + $0x48] sm:$0xff]  ;;  %v272_v10 = vld [vmem:[%s17707_s16 + $0x50] sm:$0xff] }
  0x70   : > { %269 = vst [vmem:[%s17712_s12 + $0x40] sm:$0xff] %v268_v8  ;;  %v274_v11 = vld [vmem:[%s17707_s16 + $0x58] sm:$0xff]  ;;  %271 = vst [vmem:[%s17712_s12 + $0x48] sm:$0xff] %v270_v9  ;;  %v276_v12 = vld [vmem:[%s17707_s16 + $0x60] sm:$0xff] }
  0x71   : > { %273 = vst [vmem:[%s17712_s12 + $0x50] sm:$0xff] %v272_v10  ;;  %275 = vst [vmem:[%s17712_s12 + $0x58] sm:$0xff] %v274_v11  ;;  %v278_v13 = vld [vmem:[%s17707_s16 + $0x68] sm:$0xff]  ;;  %v280_v14 = vld [vmem:[%s17707_s16 + $0x70] sm:$0xff] }
  0x72   : > { %277 = vst [vmem:[%s17712_s12 + $0x60] sm:$0xff] %v276_v12  ;;  %279 = vst [vmem:[%s17712_s12 + $0x68] sm:$0xff] %v278_v13  ;;  %v282_v15 = vld [vmem:[%s17707_s16 + $0x78] sm:$0xff]  ;;  %v284_v16 = vld [vmem:[%s17707_s16 + $0x80] sm:$0xff] }
  0x73   : > { %281 = vst [vmem:[%s17712_s12 + $0x70] sm:$0xff] %v280_v14  ;;  %v286_v17 = vld [vmem:[%s17707_s16 + $0x88] sm:$0xff]  ;;  %283 = vst [vmem:[%s17712_s12 + $0x78] sm:$0xff] %v282_v15  ;;  %v288_v18 = vld [vmem:[%s17707_s16 + $0x90] sm:$0xff] }
  0x74   : > { %285 = vst [vmem:[%s17712_s12 + $0x80] sm:$0xff] %v284_v16  ;;  %287 = vst [vmem:[%s17712_s12 + $0x88] sm:$0xff] %v286_v17  ;;  %v290_v19 = vld [vmem:[%s17707_s16 + $0x98] sm:$0xff]  ;;  %v292_v20 = vld [vmem:[%s17707_s16 + $0xa0] sm:$0xff] }
  0x75   : > { %289 = vst [vmem:[%s17712_s12 + $0x90] sm:$0xff] %v288_v18  ;;  %291 = vst [vmem:[%s17712_s12 + $0x98] sm:$0xff] %v290_v19  ;;  %v294_v21 = vld [vmem:[%s17707_s16 + $0xa8] sm:$0xff]  ;;  %v296_v22 = vld [vmem:[%s17707_s16 + $0xb0] sm:$0xff] }
  0x76   : > { %293 = vst [vmem:[%s17712_s12 + $0xa0] sm:$0xff] %v292_v20  ;;  %v298_v23 = vld [vmem:[%s17707_s16 + $0xb8] sm:$0xff]  ;;  %295 = vst [vmem:[%s17712_s12 + $0xa8] sm:$0xff] %v294_v21  ;;  %v300_v24 = vld [vmem:[%s17707_s16 + $0x188] sm:$0xff] }
  0x77   : > { %297 = vst [vmem:[%s17712_s12 + $0xb0] sm:$0xff] %v296_v22  ;;  %299 = vst [vmem:[%s17712_s12 + $0xb8] sm:$0xff] %v298_v23  ;;  %v302_v25 = vld [vmem:[%s17707_s16 + $0x190] sm:$0xff]  ;;  %v304_v26 = vld [vmem:[%s17707_s16 + $0x198] sm:$0xff] }
  0x78   : > { %301 = vst [vmem:[%s17712_s12 + $0xc4] sm:$0xff] %v300_v24  ;;  %303 = vst [vmem:[%s17712_s12 + $0xcc] sm:$0xff] %v302_v25  ;;  %v306_v27 = vld [vmem:[%s17707_s16 + $0x1a0] sm:$0xff]  ;;  %v308_v28 = vld [vmem:[%s17707_s16 + $0x1a8] sm:$0xff] }
  0x79   : > { %305 = vst [vmem:[%s17712_s12 + $0xd4] sm:$0xff] %v304_v26  ;;  %v310_v29 = vld [vmem:[%s17707_s16 + $0x1b0] sm:$0xff]  ;;  %307 = vst [vmem:[%s17712_s12 + $0xdc] sm:$0xff] %v306_v27  ;;  %v312_v30 = vld [vmem:[%s17707_s16 + $0x1b8] sm:$0xff] }
  0x7a   : > { %309 = vst [vmem:[%s17712_s12 + $0xe4] sm:$0xff] %v308_v28  ;;  %311 = vst [vmem:[%s17712_s12 + $0xec] sm:$0xff] %v310_v29  ;;  %v314_v31 = vld [vmem:[%s17707_s16 + $0x1c0] sm:$0xff]  ;;  %v316_v32 = vld [vmem:[%s17707_s16 + $0x1c8] sm:$0xff] }
  0x7b   : > { %313 = vst [vmem:[%s17712_s12 + $0xf4] sm:$0xff] %v312_v30  ;;  %315 = vst [vmem:[%s17712_s12 + $0xfc] sm:$0xff] %v314_v31  ;;  %v318_v33 = vld [vmem:[%s17707_s16 + $0x1d0] sm:$0xff]  ;;  %v320_v34 = vld [vmem:[%s17707_s16 + $0x1d8] sm:$0xff] }
  0x7c   : > { %317 = vst [vmem:[%s17712_s12 + $0x104] sm:$0xff] %v316_v32  ;;  %v322_v35 = vld [vmem:[%s17707_s16 + $0x1e0] sm:$0xff]  ;;  %319 = vst [vmem:[%s17712_s12 + $0x10c] sm:$0xff] %v318_v33  ;;  %v324_v36 = vld [vmem:[%s17707_s16 + $0x1e8] sm:$0xff] }
  0x7d   : > { %321 = vst [vmem:[%s17712_s12 + $0x114] sm:$0xff] %v320_v34  ;;  %323 = vst [vmem:[%s17712_s12 + $0x11c] sm:$0xff] %v322_v35  ;;  %v326_v37 = vld [vmem:[%s17707_s16 + $0x1f0] sm:$0xff]  ;;  %v328_v38 = vld [vmem:[%s17707_s16 + $0x1f8] sm:$0xff] }
  0x7e   : > { %325 = vst [vmem:[%s17712_s12 + $0x124] sm:$0xff] %v324_v36  ;;  %327 = vst [vmem:[%s17712_s12 + $0x12c] sm:$0xff] %v326_v37  ;;  %v330_v39 = vld [vmem:[%s17707_s16 + $0x200] sm:$0xff]  ;;  %v332_v40 = vld [vmem:[%s17707_s16 + $0x208] sm:$0xff] }
  0x7f   : > { %329 = vst [vmem:[%s17712_s12 + $0x134] sm:$0xff] %v328_v38  ;;  %v334_v41 = vld [vmem:[%s17707_s16 + $0x210] sm:$0xff]  ;;  %331 = vst [vmem:[%s17712_s12 + $0x13c] sm:$0xff] %v330_v39  ;;  %v336_v42 = vld [vmem:[%s17707_s16 + $0x218] sm:$0xff] }
  0x80   : > { %333 = vst [vmem:[%s17712_s12 + $0x144] sm:$0xff] %v332_v40  ;;  %335 = vst [vmem:[%s17712_s12 + $0x14c] sm:$0xff] %v334_v41  ;;  %v338_v43 = vld [vmem:[%s17707_s16 + $0x220] sm:$0xff]  ;;  %v340_v44 = vld [vmem:[%s17707_s16 + $0x228] sm:$0xff] }
  0x81   : > { %337 = vst [vmem:[%s17712_s12 + $0x154] sm:$0xff] %v336_v42  ;;  %339 = vst [vmem:[%s17712_s12 + $0x15c] sm:$0xff] %v338_v43  ;;  %v342_v45 = vld [vmem:[%s17707_s16 + $0x230] sm:$0xff]  ;;  %v344_v46 = vld [vmem:[%s17707_s16 + $0x238] sm:$0xff] }
  0x82   : > { %341 = vst [vmem:[%s17712_s12 + $0x164] sm:$0xff] %v340_v44  ;;  %v346_v47 = vld [vmem:[%s17707_s16 + $0x240] sm:$0xff]  ;;  %343 = vst [vmem:[%s17712_s12 + $0x16c] sm:$0xff] %v342_v45  ;;  %v12898_v49 = vld [vmem:[%s17707_s16 + $0x248] sm:$0xf] }
  0x83   : > { %345 = vst [vmem:[%s17712_s12 + $0x174] sm:$0xff] %v344_v46  ;;  %347 = vst [vmem:[%s17712_s12 + $0x17c] sm:$0xff] %v346_v47  ;;  %v12896_v48 = vld [vmem:[%s17707_s16 + $0xc0] sm:$0xf] }
  0x84   : > { %12897 = vst [vmem:[%s17712_s12 + $0xc0] sm:$0xf] %v12896_v48  ;;  %12899 = vst [vmem:[%s17712_s12 + $0x184] sm:$0xf] %v12898_v49 }
  0x85 PF: > { %s365_s15 = sand.u32 1, %s17508_s20   ;;  %s14565_s17 = smul.u32 200704, %s17516_s22 }
  0x86   : > { %s14803_s24 = smul.u32 12544, %s365_s15  ;;  %s17820_s10 = scalar_lea.sflag [#allocation5], %s365_s15 }
  0x87   : > { %s17816_s11 = scalar_lea.hbm %s19507_s1, %s14565_s17  ;;  %p19528_p0 = scmp.ne.s32.totalorder %s19520_s27, 0 }
  0x88   : > { %s369_s28 = scalar_lea.vmem [#allocation4], %s14803_s24  ;;  %s17434_s2 = scalar_lea.hbm %s17816_s11, 200704 }
  0x89   : > { %s377_s8 = sshll.u32 %s369_s28, 4  ;;  %p17435_p12 = scmp.ne.s32.totalorder %s17816_s11, %s17434_s2  ;;  %s17818_s8 = int_to_ptr.vmem [resolvable:$true] %s377_s8 }
  0x8a   : > { %s17438_s13 = scalar_lea.hbm %s19507_s1, 401408  ;;  %p17439_p8 = scmp.lt.u32.totalorder %s17816_s11, %s19507_s1 }
  0x8b   : > { %p17436_p5 = pnand %p17435_p12, %p19528_p0  ;;  %p17440_p10 = scmp.lt.u32.totalorder %s17438_s13, %s17434_s2 }
  0x8c   : > { %p17442_p4 = scmp.lt.u32.totalorder %s17434_s2, %s17816_s11 }
  0x8d   : > { %p17437_p3 = pneg %p17436_p5  ;;  %p17441_p2 = por %p17440_p10, %p17439_p8 }
  0x8f   : > { %p17443_p6 = por %p17442_p4, %p17441_p2 }
  0x91   : > { %p17444_p7 = pnand %p17443_p6, %p17437_p3 }
  0x93   : > { %17447 = shalt.err (!%p17444_p7)
}
  0x94   : > { %s17448_s12 = scalar_lea.vmem %s17818_s8, 200704  ;;  %s17527_s15 = smov [#allocation4]  }
  0x95   : > { %p17449_p9 = scmp.ne.s32.totalorder %s17818_s8, %s17448_s12  ;;  %s17452_s17 = sshll.u32 %s17527_s15, 4  ;;  %s17453_s17 = int_to_ptr.vmem [resolvable:$false] %s17452_s17 }
  0x96   : > { %s17454_s24 = scalar_lea.vmem %s17453_s17, 401408  ;;  %p17455_p1 = scmp.lt.s32.totalorder %s17818_s8, %s17453_s17 }
  0x97   : > { %p17450_p11 = pnand %p17449_p9, %p19528_p0  ;;  %p17456_p12 = scmp.lt.s32.totalorder %s17454_s24, %s17448_s12 }
  0x99   : > { %p17451_p13 = pneg %p17450_p11  ;;  %p17457_p5 = por %p17456_p12, %p17455_p1 }
  0x9b   : > { %p17458_p8 = pnand %p17457_p5, %p17451_p13 }
  0x9d   : > { %17461 = shalt.err (!%p17458_p8)
}
  0x9e   : > { %s17528_s26 = smov 256   ;;  %s17529_s9 = smov 16  }
  0x9f   : > { %14812 = dma.hbm_to_vmem [thread:$0]  (%p19528_p0), %s17816_s11, 200704, %s17818_s8, %s17820_s10, %s17528_s26, %s17528_s26, %s17529_s9  }
  0xa0 PF: > { %p19529_p3 = scmp.ne.s32.totalorder %s19523_s7, 0 }
  0xa1   : > { %s392_s28 = sand.u32 (!%p19529_p3), 1, %s17504_s19   ;;  %p19530_p10 = scmp.ne.s32.totalorder (!%p19529_p3), %s19522_s30, 0 }
  0xa2   : > { %389 = sbr.rel (%p19529_p3) target bundleno = 2208 (0x8a0), region = 62  ;;  %s399_s13 = scalar_lea.sflag (!%p19529_p3), [#allocation5], %s392_s28 }
  0xa3   : > { %s14804_s2 = smul.u32 (!%p19529_p3), 392, %s392_s28 }
  0xa4   : > { %s14805_s25 = smul.u32 (!%p19529_p3), 12544, %s392_s28 }
  0xa5   : > { %s17847_s18 = scalar_lea.vmem (!%p19529_p3), [#allocation3], %s14804_s2 }
  0xa6   : > { %s17849_s14 = scalar_lea.vmem (!%p19529_p3), [#allocation4], %s14805_s25 }
  0xa9   : > { %17487 = dma.done.wait (%p19530_p10), %s399_s13, 200704  }
  0xaa   : > { %17489 = vsyncadd (%p19530_p10), %s399_s13, 4294766592  ;;  %p19531_p0 = scmp.ne.s32.totalorder %s19521_s29, 0 }
  0xac   : > { %17491 = dma.done.wait (%p19531_p0), [#allocation7], 4160  }
  0xad   : > { %17493 = vsyncadd (%p19531_p0), [#allocation7], 4294963136 }
  0xae   : > { %17495 = dma.done.wait (%p19531_p0), [#allocation10], 16  }
  0xaf   : > { %17497 = vsyncadd (%p19531_p0), [#allocation10], 4294967280  ;;  %p12906_p2 = scmp.ne.s32.totalorder %s17512_s21, 0 }
  0xb0   : > { %v17530_v50 = vmov (!%p12906_p2), 0.0  }
  0xb1   : > { %458 = sbr.rel (%p12906_p2) target bundleno = 184 (0xb8), region = 86  ;;  %459 = vst [vmem:[#allocation2] sm:$0xff] (!%p12906_p2), %v17530_v50  ;;  %460 = vst [vmem:[#allocation2 + $0x8] sm:$0xff] (!%p12906_p2), %v17530_v50 }
  0xb2   : > { %461 = vst [vmem:[#allocation2 + $0x10] sm:$0xff] (!%p12906_p2), %v17530_v50  ;;  %462 = vst [vmem:[#allocation2 + $0x18] sm:$0xff] (!%p12906_p2), %v17530_v50 }
  0xb3   : > { %463 = vst [vmem:[#allocation2 + $0x20] sm:$0xff] (!%p12906_p2), %v17530_v50  ;;  %464 = vst [vmem:[#allocation2 + $0x28] sm:$0xff] (!%p12906_p2), %v17530_v50 }
  0xb4   : > { %465 = vst [vmem:[#allocation2 + $0x30] sm:$0xff] (!%p12906_p2), %v17530_v50  ;;  %466 = vst [vmem:[#allocation2 + $0x38] sm:$0xff] (!%p12906_p2), %v17530_v50 }
  0xb8 PF: > { %v14893_v51 = vld [vmem:[%s17849_s14 + $0x4] ss:$16 sps:$4 sm:$0xff]   ;;  %v14895_v52 = vld [vmem:[%s17849_s14 + $0xc] ss:$16 sps:$4 sm:$0xff]   ;;  %v14897_v53 = vld [vmem:[%s17849_s14] ss:$16 sps:$4 sm:$0xff]  }
  0xb9   : > { %10179 = vmatprep.subr.bf16.mxu0 %v14893_v51  ;;  %v14898_v54 = vld [vmem:[%s17849_s14 + $0x8] ss:$16 sps:$4 sm:$0xff]   ;;  %11254 = vmatprep.subr.bf16.mxu1 %v14895_v52  ;;  %v14899_v55 = vld [vmem:[%s17849_s14 + $0x24] ss:$16 sps:$4 sm:$0xff]   ;;  %v14901_v56 = vld [vmem:[%s17849_s14 + $0x2c] ss:$16 sps:$4 sm:$0xff]  }
  0xba   : > { %10180 = vmatpush1.bf16.msra.mxu0 %v14897_v53  ;;  %11255 = vmatpush1.bf16.msra.mxu1 %v14898_v54  ;;  %v14903_v57 = vld [vmem:[%s17849_s14 + $0x20] ss:$16 sps:$4 sm:$0xff]   ;;  %v14904_v58 = vld [vmem:[%s17849_s14 + $0x28] ss:$16 sps:$4 sm:$0xff]   ;;  %v14905_v59 = vld [vmem:[%s17849_s14 + $0x44] ss:$16 sps:$4 sm:$0xff]  }
  0xbb   : > { %10181 = vmatprep.subr.bf16.mxu0 %v14899_v55  ;;  %11256 = vmatprep.subr.bf16.mxu1 %v14901_v56  ;;  %v14907_v60 = vld [vmem:[%s17849_s14 + $0x4c] ss:$16 sps:$4 sm:$0xff]   ;;  %v14909_v61 = vld [vmem:[%s17849_s14 + $0x40] ss:$16 sps:$4 sm:$0xff]   ;;  %v14910_v62 = vld [vmem:[%s17849_s14 + $0x48] ss:$16 sps:$4 sm:$0xff]  }
  0xbc   : > { %v14911_v63 = vld [vmem:[%s17849_s14 + $0x64] ss:$16 sps:$4 sm:$0xff]   ;;  %v14913_v0 = vld [vmem:[%s17849_s14 + $0x6c] ss:$16 sps:$4 sm:$0xff]   ;;  %v14915_v1 = vld [vmem:[%s17849_s14 + $0x60] ss:$16 sps:$4 sm:$0xff]  }
  0xbd   : > { %v14916_v2 = vld [vmem:[%s17849_s14 + $0x68] ss:$16 sps:$4 sm:$0xff]   ;;  %v14917_v3 = vld [vmem:[%s17849_s14 + $0x84] ss:$16 sps:$4 sm:$0xff]   ;;  %v14919_v4 = vld [vmem:[%s17849_s14 + $0x8c] ss:$16 sps:$4 sm:$0xff]  }
  0xbe   : > { %10182 = vmatpush1.bf16.msra.mxu0 %v14903_v57  ;;  %11257 = vmatpush1.bf16.msra.mxu1 %v14904_v58  ;;  %v14921_v5 = vld [vmem:[%s17849_s14 + $0x80] ss:$16 sps:$4 sm:$0xff]   ;;  %v14922_v6 = vld [vmem:[%s17849_s14 + $0x88] ss:$16 sps:$4 sm:$0xff]   ;;  %v14923_v7 = vld [vmem:[%s17849_s14 + $0xa4] ss:$16 sps:$4 sm:$0xff]  }
  0xbf   : > { %10183 = vmatprep.subr.bf16.mxu0 %v14905_v59  ;;  %11258 = vmatprep.subr.bf16.mxu1 %v14907_v60  ;;  %v14925_v8 = vld [vmem:[%s17849_s14 + $0xac] ss:$16 sps:$4 sm:$0xff]   ;;  %v14927_v9 = vld [vmem:[%s17849_s14 + $0xa0] ss:$16 sps:$4 sm:$0xff]   ;;  %v14928_v10 = vld [vmem:[%s17849_s14 + $0xa8] ss:$16 sps:$4 sm:$0xff]  }
  0xc0   : > { %v14929_v11 = vld [vmem:[%s17849_s14 + $0xc4] ss:$16 sps:$4 sm:$0xff]   ;;  %v14931_v12 = vld [vmem:[%s17849_s14 + $0xcc] ss:$16 sps:$4 sm:$0xff]   ;;  %v14933_v13 = vld [vmem:[%s17849_s14 + $0xc0] ss:$16 sps:$4 sm:$0xff]  }
  0xc1   : > { %v14934_v14 = vld [vmem:[%s17849_s14 + $0xc8] ss:$16 sps:$4 sm:$0xff]   ;;  %v14935_v15 = vld [vmem:[%s17849_s14 + $0xe4] ss:$16 sps:$4 sm:$0xff]   ;;  %v14937_v16 = vld [vmem:[%s17849_s14 + $0xec] ss:$16 sps:$4 sm:$0xff]  }
  0xc2   : > { %10184 = vmatpush1.bf16.msra.mxu0 %v14909_v61  ;;  %11259 = vmatpush1.bf16.msra.mxu1 %v14910_v62  ;;  %v14939_v17 = vld [vmem:[%s17849_s14 + $0xe0] ss:$16 sps:$4 sm:$0xff]   ;;  %v14940_v18 = vld [vmem:[%s17849_s14 + $0xe8] ss:$16 sps:$4 sm:$0xff]   ;;  %v14941_v19 = vld [vmem:[%s17849_s14 + $0x104] ss:$16 sps:$4 sm:$0xff]  }
  0xc3   : > { %10185 = vmatprep.subr.bf16.mxu0 %v14911_v63  ;;  %11260 = vmatprep.subr.bf16.mxu1 %v14913_v0  ;;  %v14943_v20 = vld [vmem:[%s17849_s14 + $0x10c] ss:$16 sps:$4 sm:$0xff]   ;;  %v14945_v21 = vld [vmem:[%s17849_s14 + $0x100] ss:$16 sps:$4 sm:$0xff]   ;;  %v14946_v22 = vld [vmem:[%s17849_s14 + $0x108] ss:$16 sps:$4 sm:$0xff]  }
  0xc4   : > { %v14947_v23 = vld [vmem:[%s17849_s14 + $0x124] ss:$16 sps:$4 sm:$0xff]   ;;  %v14949_v24 = vld [vmem:[%s17849_s14 + $0x12c] ss:$16 sps:$4 sm:$0xff]   ;;  %v14951_v25 = vld [vmem:[%s17849_s14 + $0x120] ss:$16 sps:$4 sm:$0xff]  }
  0xc5   : > { %v14952_v26 = vld [vmem:[%s17849_s14 + $0x128] ss:$16 sps:$4 sm:$0xff]   ;;  %v14953_v27 = vld [vmem:[%s17849_s14 + $0x144] ss:$16 sps:$4 sm:$0xff]   ;;  %v14955_v28 = vld [vmem:[%s17849_s14 + $0x14c] ss:$16 sps:$4 sm:$0xff]  }
  0xc6   : > { %10186 = vmatpush1.bf16.msra.mxu0 %v14915_v1  ;;  %11261 = vmatpush1.bf16.msra.mxu1 %v14916_v2  ;;  %v14957_v29 = vld [vmem:[%s17849_s14 + $0x140] ss:$16 sps:$4 sm:$0xff]   ;;  %v14958_v30 = vld [vmem:[%s17849_s14 + $0x148] ss:$16 sps:$4 sm:$0xff]   ;;  %v14959_v31 = vld [vmem:[%s17849_s14 + $0x164] ss:$16 sps:$4 sm:$0xff]  }
  0xc7   : > { %10187 = vmatprep.subr.bf16.mxu0 %v14917_v3  ;;  %11262 = vmatprep.subr.bf16.mxu1 %v14919_v4  ;;  %v14961_v32 = vld [vmem:[%s17849_s14 + $0x16c] ss:$16 sps:$4 sm:$0xff]   ;;  %v14963_v33 = vld [vmem:[%s17849_s14 + $0x160] ss:$16 sps:$4 sm:$0xff]   ;;  %v14964_v34 = vld [vmem:[%s17849_s14 + $0x168] ss:$16 sps:$4 sm:$0xff]  }
  0xc8   : > { %v14991_v35 = vld [vmem:[%s17847_s18 + $0x4] ss:$196 sps:$4 sm:$0xff]   ;;  %p14524_p4 = scmp.ne.s32.totalorder %s17512_s21, 1 }
  0xc9   : > { %v14965_v36 = vld [vmem:[%s17849_s14 + $0x184] ss:$16 sps:$4 sm:$0xff]   ;;  %v14967_v37 = vld [vmem:[%s17849_s14 + $0x18c] ss:$16 sps:$4 sm:$0xff]   ;;  %10211 = vmatprep.mubr.bf16.mxu0 %v14991_v35  ;;  %11286 = vmatprep.mubr.bf16.mxu1 %v14991_v35  ;;  %v14969_v38 = vld [vmem:[%s17849_s14 + $0x180] ss:$16 sps:$4 sm:$0xff]  }
  0xca   : > { %10188 = vmatpush1.bf16.msra.mxu0 %v14921_v5  ;;  %11263 = vmatpush1.bf16.msra.mxu1 %v14922_v6  ;;  %v14970_v39 = vld [vmem:[%s17849_s14 + $0x188] ss:$16 sps:$4 sm:$0xff]   ;;  %v14971_v40 = vld [vmem:[%s17849_s14 + $0x1a4] ss:$16 sps:$4 sm:$0xff]   ;;  %v14973_v41 = vld [vmem:[%s17849_s14 + $0x1ac] ss:$16 sps:$4 sm:$0xff]  }
  0xcb   : > { %10189 = vmatprep.subr.bf16.mxu0 %v14923_v7  ;;  %11264 = vmatprep.subr.bf16.mxu1 %v14925_v8  ;;  %v14975_v42 = vld [vmem:[%s17849_s14 + $0x1a0] ss:$16 sps:$4 sm:$0xff]   ;;  %v14976_v43 = vld [vmem:[%s17849_s14 + $0x1a8] ss:$16 sps:$4 sm:$0xff]   ;;  %v14977_v44 = vld [vmem:[%s17849_s14 + $0x1c4] ss:$16 sps:$4 sm:$0xff]  }
  0xcc   : > { %v14979_v45 = vld [vmem:[%s17849_s14 + $0x1cc] ss:$16 sps:$4 sm:$0xff]   ;;  %v14981_v46 = vld [vmem:[%s17849_s14 + $0x1c0] ss:$16 sps:$4 sm:$0xff]   ;;  %v14982_v47 = vld [vmem:[%s17849_s14 + $0x1c8] ss:$16 sps:$4 sm:$0xff]  }
  0xcd   : > { %v14983_v48 = vld [vmem:[%s17849_s14 + $0x1e4] ss:$16 sps:$4 sm:$0xff]   ;;  %v14985_v49 = vld [vmem:[%s17849_s14 + $0x1ec] ss:$16 sps:$4 sm:$0xff]   ;;  %v14987_v50 = vld [vmem:[%s17849_s14 + $0x1e0] ss:$16 sps:$4 sm:$0xff]  }
  0xce   : > { %10190 = vmatpush1.bf16.msra.mxu0 %v14927_v9  ;;  %11265 = vmatpush1.bf16.msra.mxu1 %v14928_v10  ;;  %v14988_v51 = vld [vmem:[%s17849_s14 + $0x1e8] ss:$16 sps:$4 sm:$0xff]   ;;  %v14994_v52 = vld [vmem:[%s17849_s14 + $0x204] ss:$16 sps:$4 sm:$0xff]   ;;  %v14997_v53 = vld [vmem:[%s17849_s14 + $0x20c] ss:$16 sps:$4 sm:$0xff]  }
  0xcf   : > { %10191 = vmatprep.subr.bf16.mxu0 %v14929_v11  ;;  %11266 = vmatprep.subr.bf16.mxu1 %v14931_v12  ;;  %v14989_v54 = vld [vmem:[%s17847_s18] ss:$196 sps:$4 sm:$0xff]  }
  0xd0   : > { %v14992_v55 = vld [vmem:[%s17849_s14 + $0x200] ss:$16 sps:$4 sm:$0xff]   ;;  %v14995_v56 = vld [vmem:[%s17849_s14 + $0x208] ss:$16 sps:$4 sm:$0xff]   ;;  %v15000_v57 = vld [vmem:[%s17849_s14 + $0x224] ss:$16 sps:$4 sm:$0xff]  }
  0xd1   : > { %v15003_v58 = vld [vmem:[%s17849_s14 + $0x22c] ss:$16 sps:$4 sm:$0xff]   ;;  %v14998_v59 = vld [vmem:[%s17849_s14 + $0x220] ss:$16 sps:$4 sm:$0xff]   ;;  %v15001_v60 = vld [vmem:[%s17849_s14 + $0x228] ss:$16 sps:$4 sm:$0xff]  }
  0xd2   : > { %10192 = vmatpush1.bf16.msra.mxu0 %v14933_v13  ;;  %11267 = vmatpush1.bf16.msra.mxu1 %v14934_v14  ;;  %v15006_v61 = vld [vmem:[%s17849_s14 + $0x244] ss:$16 sps:$4 sm:$0xff]   ;;  %v15009_v62 = vld [vmem:[%s17849_s14 + $0x24c] ss:$16 sps:$4 sm:$0xff]   ;;  %v15004_v63 = vld [vmem:[%s17849_s14 + $0x240] ss:$16 sps:$4 sm:$0xff]  }
  0xd3   : > { %10193 = vmatprep.subr.bf16.mxu0 %v14935_v15  ;;  %11268 = vmatprep.subr.bf16.mxu1 %v14937_v16  ;;  %v15007_v0 = vld [vmem:[%s17849_s14 + $0x248] ss:$16 sps:$4 sm:$0xff]   ;;  %v15012_v1 = vld [vmem:[%s17849_s14 + $0x264] ss:$16 sps:$4 sm:$0xff]   ;;  %v15015_v2 = vld [vmem:[%s17849_s14 + $0x26c] ss:$16 sps:$4 sm:$0xff]  }
  0xd4   : > { %v15010_v3 = vld [vmem:[%s17849_s14 + $0x260] ss:$16 sps:$4 sm:$0xff]   ;;  %v15013_v4 = vld [vmem:[%s17849_s14 + $0x268] ss:$16 sps:$4 sm:$0xff]   ;;  %v15018_v5 = vld [vmem:[%s17849_s14 + $0x284] ss:$16 sps:$4 sm:$0xff]  }
  0xd5   : > { %v15021_v6 = vld [vmem:[%s17849_s14 + $0x28c] ss:$16 sps:$4 sm:$0xff]   ;;  %v15016_v7 = vld [vmem:[%s17849_s14 + $0x280] ss:$16 sps:$4 sm:$0xff]   ;;  %v15019_v8 = vld [vmem:[%s17849_s14 + $0x288] ss:$16 sps:$4 sm:$0xff]  }
  0xd6   : > { %10194 = vmatpush1.bf16.msra.mxu0 %v14939_v17  ;;  %11269 = vmatpush1.bf16.msra.mxu1 %v14940_v18  ;;  %v15024_v9 = vld [vmem:[%s17849_s14 + $0x2a4] ss:$16 sps:$4 sm:$0xff]   ;;  %v15027_v10 = vld [vmem:[%s17849_s14 + $0x2ac] ss:$16 sps:$4 sm:$0xff]   ;;  %v15022_v11 = vld [vmem:[%s17849_s14 + $0x2a0] ss:$16 sps:$4 sm:$0xff]  }
  0xd7   : > { %10195 = vmatprep.subr.bf16.mxu0 %v14941_v19  ;;  %11270 = vmatprep.subr.bf16.mxu1 %v14943_v20  ;;  %v15025_v12 = vld [vmem:[%s17849_s14 + $0x2a8] ss:$16 sps:$4 sm:$0xff]   ;;  %v15030_v13 = vld [vmem:[%s17849_s14 + $0x2c4] ss:$16 sps:$4 sm:$0xff]   ;;  %v15033_v14 = vld [vmem:[%s17849_s14 + $0x2cc] ss:$16 sps:$4 sm:$0xff]  }
  0xd8   : > { %v15028_v15 = vld [vmem:[%s17849_s14 + $0x2c0] ss:$16 sps:$4 sm:$0xff]   ;;  %v15031_v16 = vld [vmem:[%s17849_s14 + $0x2c8] ss:$16 sps:$4 sm:$0xff]   ;;  %v15036_v18 = vld [vmem:[%s17849_s14 + $0x2e4] ss:$16 sps:$4 sm:$0xff]  }
  0xd9   : > { %v15090_v17 = vld [vmem:[%s17847_s18 + $0xc] ss:$196 sps:$4 sm:$0xff]  }
  0xda   : > { %10196 = vmatpush1.bf16.msra.mxu0 %v14945_v21  ;;  %11271 = vmatpush1.bf16.msra.mxu1 %v14946_v22  ;;  %v15039_v19 = vld [vmem:[%s17849_s14 + $0x2ec] ss:$16 sps:$4 sm:$0xff]   ;;  %v15034_v20 = vld [vmem:[%s17849_s14 + $0x2e0] ss:$16 sps:$4 sm:$0xff]   ;;  %v15037_v21 = vld [vmem:[%s17849_s14 + $0x2e8] ss:$16 sps:$4 sm:$0xff]  }
  0xdb   : > { %10197 = vmatprep.subr.bf16.mxu0 %v14947_v23  ;;  %11272 = vmatprep.subr.bf16.mxu1 %v14949_v24  ;;  %v15042_v22 = vld [vmem:[%s17849_s14 + $0x304] ss:$16 sps:$4 sm:$0xff]   ;;  %v15045_v23 = vld [vmem:[%s17849_s14 + $0x30c] ss:$16 sps:$4 sm:$0xff]   ;;  %v15040_v24 = vld [vmem:[%s17849_s14 + $0x300] ss:$16 sps:$4 sm:$0xff]  }
  0xdc   : > { %v15063_v35 = vld [vmem:[%s17849_s14 + $0x36c] ss:$16 sps:$4 sm:$0xff]  }
  0xde   : > { %10198 = vmatpush1.bf16.msra.mxu0 %v14951_v25  ;;  %11273 = vmatpush1.bf16.msra.mxu1 %v14952_v26  ;;  %v15043_v25 = vld [vmem:[%s17849_s14 + $0x308] ss:$16 sps:$4 sm:$0xff]   ;;  %v15048_v26 = vld [vmem:[%s17849_s14 + $0x324] ss:$16 sps:$4 sm:$0xff]  }
  0xdf   : > { %10199 = vmatprep.subr.bf16.mxu0 %v14953_v27  ;;  %11274 = vmatprep.subr.bf16.mxu1 %v14955_v28  ;;  %v15051_v27 = vld [vmem:[%s17849_s14 + $0x32c] ss:$16 sps:$4 sm:$0xff]   ;;  %v15046_v28 = vld [vmem:[%s17849_s14 + $0x320] ss:$16 sps:$4 sm:$0xff]  }
  0xe2   : > { %10200 = vmatpush1.bf16.msra.mxu0 %v14957_v29  ;;  %11275 = vmatpush1.bf16.msra.mxu1 %v14958_v30  ;;  %v15049_v29 = vld [vmem:[%s17849_s14 + $0x328] ss:$16 sps:$4 sm:$0xff]   ;;  %v15054_v30 = vld [vmem:[%s17849_s14 + $0x344] ss:$16 sps:$4 sm:$0xff]  }
  0xe3   : > { %10201 = vmatprep.subr.bf16.mxu0 %v14959_v31  ;;  %11276 = vmatprep.subr.bf16.mxu1 %v14961_v32  ;;  %v15057_v31 = vld [vmem:[%s17849_s14 + $0x34c] ss:$16 sps:$4 sm:$0xff]   ;;  %v15052_v32 = vld [vmem:[%s17849_s14 + $0x340] ss:$16 sps:$4 sm:$0xff]  }
  0xe6   : > { %10202 = vmatpush1.bf16.msra.mxu0 %v14963_v33  ;;  %11277 = vmatpush1.bf16.msra.mxu1 %v14964_v34  ;;  %v15055_v33 = vld [vmem:[%s17849_s14 + $0x348] ss:$16 sps:$4 sm:$0xff]   ;;  %v15060_v34 = vld [vmem:[%s17849_s14 + $0x364] ss:$16 sps:$4 sm:$0xff]  }
  0xe7   : > { %10203 = vmatprep.subr.bf16.mxu0 %v14965_v36  ;;  %11278 = vmatprep.subr.bf16.mxu1 %v14967_v37  ;;  %v15058_v36 = vld [vmem:[%s17849_s14 + $0x360] ss:$16 sps:$4 sm:$0xff]   ;;  %v15061_v37 = vld [vmem:[%s17849_s14 + $0x368] ss:$16 sps:$4 sm:$0xff]  }
  0xea   : > { %10204 = vmatpush1.bf16.msra.mxu0 %v14969_v38  ;;  %11279 = vmatpush1.bf16.msra.mxu1 %v14970_v39  ;;  %v15066_v38 = vld [vmem:[%s17849_s14 + $0x384] ss:$16 sps:$4 sm:$0xff]   ;;  %v15069_v39 = vld [vmem:[%s17849_s14 + $0x38c] ss:$16 sps:$4 sm:$0xff]  }
  0xeb   : > { %10205 = vmatprep.subr.bf16.mxu0 %v14971_v40  ;;  %11280 = vmatprep.subr.bf16.mxu1 %v14973_v41  ;;  %v15064_v40 = vld [vmem:[%s17849_s14 + $0x380] ss:$16 sps:$4 sm:$0xff]   ;;  %v15067_v41 = vld [vmem:[%s17849_s14 + $0x388] ss:$16 sps:$4 sm:$0xff]  }
  0xee   : > { %10206 = vmatpush1.bf16.msra.mxu0 %v14975_v42  ;;  %11281 = vmatpush1.bf16.msra.mxu1 %v14976_v43  ;;  %v15072_v42 = vld [vmem:[%s17849_s14 + $0x3a4] ss:$16 sps:$4 sm:$0xff]   ;;  %v15075_v43 = vld [vmem:[%s17849_s14 + $0x3ac] ss:$16 sps:$4 sm:$0xff]  }
  0xef   : > { %10207 = vmatprep.subr.bf16.mxu0 %v14977_v44  ;;  %11282 = vmatprep.subr.bf16.mxu1 %v14979_v45  ;;  %v15070_v44 = vld [vmem:[%s17849_s14 + $0x3a0] ss:$16 sps:$4 sm:$0xff]   ;;  %v15073_v45 = vld [vmem:[%s17849_s14 + $0x3a8] ss:$16 sps:$4 sm:$0xff]  }
  0xf2   : > { %10208 = vmatpush1.bf16.msra.mxu0 %v14981_v46  ;;  %11283 = vmatpush1.bf16.msra.mxu1 %v14982_v47  ;;  %v15078_v46 = vld [vmem:[%s17849_s14 + $0x3c4] ss:$16 sps:$4 sm:$0xff]   ;;  %v15081_v47 = vld [vmem:[%s17849_s14 + $0x3cc] ss:$16 sps:$4 sm:$0xff]  }
  0xf3   : > { %10209 = vmatprep.subr.bf16.mxu0 %v14983_v48  ;;  %11284 = vmatprep.subr.bf16.mxu1 %v14985_v49  ;;  %v15076_v48 = vld [vmem:[%s17849_s14 + $0x3c0] ss:$16 sps:$4 sm:$0xff]   ;;  %v15079_v49 = vld [vmem:[%s17849_s14 + $0x3c8] ss:$16 sps:$4 sm:$0xff]  }
  0xf6   : > { %10210 = vmatpush1.bf16.msra.mxu0 %v14987_v50  ;;  %11285 = vmatpush1.bf16.msra.mxu1 %v14988_v51  ;;  %v15084_v50 = vld [vmem:[%s17849_s14 + $0x3e4] ss:$16 sps:$4 sm:$0xff]   ;;  %v15087_v51 = vld [vmem:[%s17849_s14 + $0x3ec] ss:$16 sps:$4 sm:$0xff]  }
  0xf7   : > { %10222 = vmatprep.subr.bf16.mxu0 %v14994_v52  ;;  %11297 = vmatprep.subr.bf16.mxu1 %v14997_v53  ;;  %v15082_v52 = vld [vmem:[%s17849_s14 + $0x3e0] ss:$16 sps:$4 sm:$0xff]   ;;  %v15085_v53 = vld [vmem:[%s17849_s14 + $0x3e8] ss:$16 sps:$4 sm:$0xff]  }
  0xf9   : > { %10212 = vmatmul.mubr.bf16.vlgmr.msra.gmra.mrb[0].mxu0 %v14989_v54  ;;  %11287 = vmatmul.mubr.bf16.vlgmr.msra.gmra.mrb[0].mxu1 %v14989_v54  ;;  %v15093_v54 = vld [vmem:[%s17849_s14 + $0x404] ss:$16 sps:$4 sm:$0xff]  }
  0xfa   : > { %10223 = vmatpush1.bf16.msra.mxu0 %v14992_v55  ;;  %11298 = vmatpush1.bf16.msra.mxu1 %v14995_v56  ;;  %v15096_v55 = vld [vmem:[%s17849_s14 + $0x40c] ss:$16 sps:$4 sm:$0xff]  }
  0xfb   : > { %10224 = vmatprep.subr.bf16.mxu0 %v15000_v57  ;;  %11299 = vmatprep.subr.bf16.mxu1 %v15003_v58  ;;  %v15088_v56 = vld [vmem:[%s17847_s18 + $0x8] ss:$196 sps:$4 sm:$0xff]  }
  0xfc   : > { %10254 = vmatprep.mubr.bf16.mxu0 %v15090_v17  ;;  %11329 = vmatprep.mubr.bf16.mxu1 %v15090_v17  ;;  %v15091_v57 = vld [vmem:[%s17849_s14 + $0x400] ss:$16 sps:$4 sm:$0xff]   ;;  %v15094_v58 = vld [vmem:[%s17849_s14 + $0x408] ss:$16 sps:$4 sm:$0xff]   ;;  %v15132_v17 = vld [vmem:[%s17849_s14 + $0x4cc] ss:$16 sps:$4 sm:$0xff]  }
  0xfe   : > { %10225 = vmatpush1.bf16.msra.mxu0 %v14998_v59  ;;  %11300 = vmatpush1.bf16.msra.mxu1 %v15001_v60  ;;  %v15099_v59 = vld [vmem:[%s17849_s14 + $0x424] ss:$16 sps:$4 sm:$0xff]   ;;  %v15102_v60 = vld [vmem:[%s17849_s14 + $0x42c] ss:$16 sps:$4 sm:$0xff]  }
  0xff   : > { %10226 = vmatprep.subr.bf16.mxu0 %v15006_v61  ;;  %11301 = vmatprep.subr.bf16.mxu1 %v15009_v62  ;;  %v15097_v61 = vld [vmem:[%s17849_s14 + $0x420] ss:$16 sps:$4 sm:$0xff]   ;;  %v15100_v62 = vld [vmem:[%s17849_s14 + $0x428] ss:$16 sps:$4 sm:$0xff]  }
 0x102   : > { %10227 = vmatpush1.bf16.msra.mxu0 %v15004_v63  ;;  %11302 = vmatpush1.bf16.msra.mxu1 %v15007_v0  ;;  %v15189_v63 = vld [vmem:[%s17847_s18 + $0x14] ss:$196 sps:$4 sm:$0xff]  }
 0x103   : > { %10228 = vmatprep.subr.bf16.mxu0 %v15012_v1  ;;  %11303 = vmatprep.subr.bf16.mxu1 %v15015_v2  ;;  %v15105_v0 = vld [vmem:[%s17849_s14 + $0x444] ss:$16 sps:$4 sm:$0xff]   ;;  %v15108_v1 = vld [vmem:[%s17849_s14 + $0x44c] ss:$16 sps:$4 sm:$0xff]   ;;  %v15103_v2 = vld [vmem:[%s17849_s14 + $0x440] ss:$16 sps:$4 sm:$0xff]  }
 0x106   : > { %10229 = vmatpush1.bf16.msra.mxu0 %v15010_v3  ;;  %11304 = vmatpush1.bf16.msra.mxu1 %v15013_v4  ;;  %v15106_v3 = vld [vmem:[%s17849_s14 + $0x448] ss:$16 sps:$4 sm:$0xff]   ;;  %v15111_v4 = vld [vmem:[%s17849_s14 + $0x464] ss:$16 sps:$4 sm:$0xff]  }
 0x107   : > { %10230 = vmatprep.subr.bf16.mxu0 %v15018_v5  ;;  %11305 = vmatprep.subr.bf16.mxu1 %v15021_v6  ;;  %v15114_v5 = vld [vmem:[%s17849_s14 + $0x46c] ss:$16 sps:$4 sm:$0xff]   ;;  %v15109_v6 = vld [vmem:[%s17849_s14 + $0x460] ss:$16 sps:$4 sm:$0xff]  }
 0x10a   : > { %10231 = vmatpush1.bf16.msra.mxu0 %v15016_v7  ;;  %11306 = vmatpush1.bf16.msra.mxu1 %v15019_v8  ;;  %v15112_v7 = vld [vmem:[%s17849_s14 + $0x468] ss:$16 sps:$4 sm:$0xff]   ;;  %v15117_v8 = vld [vmem:[%s17849_s14 + $0x484] ss:$16 sps:$4 sm:$0xff]  }
 0x10b   : > { %10232 = vmatprep.subr.bf16.mxu0 %v15024_v9  ;;  %11307 = vmatprep.subr.bf16.mxu1 %v15027_v10  ;;  %v15120_v9 = vld [vmem:[%s17849_s14 + $0x48c] ss:$16 sps:$4 sm:$0xff]   ;;  %v15115_v10 = vld [vmem:[%s17849_s14 + $0x480] ss:$16 sps:$4 sm:$0xff]  }
 0x10e   : > { %10233 = vmatpush1.bf16.msra.mxu0 %v15022_v11  ;;  %11308 = vmatpush1.bf16.msra.mxu1 %v15025_v12  ;;  %v15118_v11 = vld [vmem:[%s17849_s14 + $0x488] ss:$16 sps:$4 sm:$0xff]   ;;  %v15123_v12 = vld [vmem:[%s17849_s14 + $0x4a4] ss:$16 sps:$4 sm:$0xff]  }
 0x10f   : > { %10234 = vmatprep.subr.bf16.mxu0 %v15030_v13  ;;  %11309 = vmatprep.subr.bf16.mxu1 %v15033_v14  ;;  %v15126_v13 = vld [vmem:[%s17849_s14 + $0x4ac] ss:$16 sps:$4 sm:$0xff]   ;;  %v15121_v14 = vld [vmem:[%s17849_s14 + $0x4a0] ss:$16 sps:$4 sm:$0xff]  }
 0x112   : > { %10235 = vmatpush1.bf16.msra.mxu0 %v15028_v15  ;;  %11310 = vmatpush1.bf16.msra.mxu1 %v15031_v16  ;;  %v15124_v15 = vld [vmem:[%s17849_s14 + $0x4a8] ss:$16 sps:$4 sm:$0xff]   ;;  %v15129_v16 = vld [vmem:[%s17849_s14 + $0x4c4] ss:$16 sps:$4 sm:$0xff]  }
 0x113   : > { %10236 = vmatprep.subr.bf16.mxu0 %v15036_v18  ;;  %11311 = vmatprep.subr.bf16.mxu1 %v15039_v19  ;;  %v15127_v18 = vld [vmem:[%s17849_s14 + $0x4c0] ss:$16 sps:$4 sm:$0xff]   ;;  %v15130_v19 = vld [vmem:[%s17849_s14 + $0x4c8] ss:$16 sps:$4 sm:$0xff]  }
 0x116   : > { %10237 = vmatpush1.bf16.msra.mxu0 %v15034_v20  ;;  %11312 = vmatpush1.bf16.msra.mxu1 %v15037_v21  ;;  %v15135_v20 = vld [vmem:[%s17849_s14 + $0x4e4] ss:$16 sps:$4 sm:$0xff]   ;;  %v15138_v21 = vld [vmem:[%s17849_s14 + $0x4ec] ss:$16 sps:$4 sm:$0xff]  }
 0x117   : > { %10238 = vmatprep.subr.bf16.mxu0 %v15042_v22  ;;  %11313 = vmatprep.subr.bf16.mxu1 %v15045_v23  ;;  %v15133_v22 = vld [vmem:[%s17849_s14 + $0x4e0] ss:$16 sps:$4 sm:$0xff]   ;;  %v15136_v23 = vld [vmem:[%s17849_s14 + $0x4e8] ss:$16 sps:$4 sm:$0xff]  }
 0x11a   : > { %10239 = vmatpush1.bf16.msra.mxu0 %v15040_v24  ;;  %11314 = vmatpush1.bf16.msra.mxu1 %v15043_v25  ;;  %v15141_v24 = vld [vmem:[%s17849_s14 + $0x504] ss:$16 sps:$4 sm:$0xff]   ;;  %v15144_v25 = vld [vmem:[%s17849_s14 + $0x50c] ss:$16 sps:$4 sm:$0xff]  }
 0x11b   : > { %10240 = vmatprep.subr.bf16.mxu0 %v15048_v26  ;;  %11315 = vmatprep.subr.bf16.mxu1 %v15051_v27  ;;  %v15139_v26 = vld [vmem:[%s17849_s14 + $0x500] ss:$16 sps:$4 sm:$0xff]   ;;  %v15142_v27 = vld [vmem:[%s17849_s14 + $0x508] ss:$16 sps:$4 sm:$0xff]  }
 0x11e   : > { %10241 = vmatpush1.bf16.msra.mxu0 %v15046_v28  ;;  %11316 = vmatpush1.bf16.msra.mxu1 %v15049_v29  ;;  %v15147_v28 = vld [vmem:[%s17849_s14 + $0x524] ss:$16 sps:$4 sm:$0xff]   ;;  %v15150_v29 = vld [vmem:[%s17849_s14 + $0x52c] ss:$16 sps:$4 sm:$0xff]  }
 0x11f   : > { %10242 = vmatprep.subr.bf16.mxu0 %v15054_v30  ;;  %11317 = vmatprep.subr.bf16.mxu1 %v15057_v31  ;;  %v15145_v30 = vld [vmem:[%s17849_s14 + $0x520] ss:$16 sps:$4 sm:$0xff]   ;;  %v15148_v31 = vld [vmem:[%s17849_s14 + $0x528] ss:$16 sps:$4 sm:$0xff]  }
 0x122   : > { %10243 = vmatpush1.bf16.msra.mxu0 %v15052_v32  ;;  %11318 = vmatpush1.bf16.msra.mxu1 %v15055_v33  ;;  %v15153_v32 = vld [vmem:[%s17849_s14 + $0x544] ss:$16 sps:$4 sm:$0xff]   ;;  %v15156_v33 = vld [vmem:[%s17849_s14 + $0x54c] ss:$16 sps:$4 sm:$0xff]  }
 0x123   : > { %10244 = vmatprep.subr.bf16.mxu0 %v15060_v34  ;;  %11319 = vmatprep.subr.bf16.mxu1 %v15063_v35  ;;  %v15151_v34 = vld [vmem:[%s17849_s14 + $0x540] ss:$16 sps:$4 sm:$0xff]   ;;  %v15154_v35 = vld [vmem:[%s17849_s14 + $0x548] ss:$16 sps:$4 sm:$0xff]  }
 0x126   : > { %10245 = vmatpush1.bf16.msra.mxu0 %v15058_v36  ;;  %11320 = vmatpush1.bf16.msra.mxu1 %v15061_v37  ;;  %v15159_v36 = vld [vmem:[%s17849_s14 + $0x564] ss:$16 sps:$4 sm:$0xff]   ;;  %v15162_v37 = vld [vmem:[%s17849_s14 + $0x56c] ss:$16 sps:$4 sm:$0xff]  }
 0x127   : > { %10246 = vmatprep.subr.bf16.mxu0 %v15066_v38  ;;  %11321 = vmatprep.subr.bf16.mxu1 %v15069_v39  ;;  %v15157_v38 = vld [vmem:[%s17849_s14 + $0x560] ss:$16 sps:$4 sm:$0xff]   ;;  %v15160_v39 = vld [vmem:[%s17849_s14 + $0x568] ss:$16 sps:$4 sm:$0xff]  }
 0x12a   : > { %10247 = vmatpush1.bf16.msra.mxu0 %v15064_v40  ;;  %11322 = vmatpush1.bf16.msra.mxu1 %v15067_v41  ;;  %v15165_v40 = vld [vmem:[%s17849_s14 + $0x584] ss:$16 sps:$4 sm:$0xff]   ;;  %v15168_v41 = vld [vmem:[%s17849_s14 + $0x58c] ss:$16 sps:$4 sm:$0xff]  }
 0x12b   : > { %10248 = vmatprep.subr.bf16.mxu0 %v15072_v42  ;;  %11323 = vmatprep.subr.bf16.mxu1 %v15075_v43  ;;  %v15163_v42 = vld [vmem:[%s17849_s14 + $0x580] ss:$16 sps:$4 sm:$0xff]   ;;  %v15166_v43 = vld [vmem:[%s17849_s14 + $0x588] ss:$16 sps:$4 sm:$0xff]  }
 0x12e   : > { %10249 = vmatpush1.bf16.msra.mxu0 %v15070_v44  ;;  %11324 = vmatpush1.bf16.msra.mxu1 %v15073_v45  ;;  %v15171_v44 = vld [vmem:[%s17849_s14 + $0x5a4] ss:$16 sps:$4 sm:$0xff]   ;;  %v15174_v45 = vld [vmem:[%s17849_s14 + $0x5ac] ss:$16 sps:$4 sm:$0xff]  }
 0x12f   : > { %10250 = vmatprep.subr.bf16.mxu0 %v15078_v46  ;;  %11325 = vmatprep.subr.bf16.mxu1 %v15081_v47  ;;  %v15169_v46 = vld [vmem:[%s17849_s14 + $0x5a0] ss:$16 sps:$4 sm:$0xff]   ;;  %v15172_v47 = vld [vmem:[%s17849_s14 + $0x5a8] ss:$16 sps:$4 sm:$0xff]  }
 0x132   : > { %10251 = vmatpush1.bf16.msra.mxu0 %v15076_v48  ;;  %11326 = vmatpush1.bf16.msra.mxu1 %v15079_v49  ;;  %v15177_v48 = vld [vmem:[%s17849_s14 + $0x5c4] ss:$16 sps:$4 sm:$0xff]   ;;  %v15180_v49 = vld [vmem:[%s17849_s14 + $0x5cc] ss:$16 sps:$4 sm:$0xff]  }
 0x133   : > { %10252 = vmatprep.subr.bf16.mxu0 %v15084_v50  ;;  %11327 = vmatprep.subr.bf16.mxu1 %v15087_v51  ;;  %v15175_v50 = vld [vmem:[%s17849_s14 + $0x5c0] ss:$16 sps:$4 sm:$0xff]   ;;  %v15178_v51 = vld [vmem:[%s17849_s14 + $0x5c8] ss:$16 sps:$4 sm:$0xff]  }
 0x136   : > { %10253 = vmatpush1.bf16.msra.mxu0 %v15082_v52  ;;  %11328 = vmatpush1.bf16.msra.mxu1 %v15085_v53  ;;  %v15183_v52 = vld [vmem:[%s17849_s14 + $0x5e4] ss:$16 sps:$4 sm:$0xff]   ;;  %v15186_v53 = vld [vmem:[%s17849_s14 + $0x5ec] ss:$16 sps:$4 sm:$0xff]  }
 0x137   : > { %10265 = vmatprep.subr.bf16.mxu0 %v15093_v54  ;;  %11340 = vmatprep.subr.bf16.mxu1 %v15096_v55  ;;  %v15181_v54 = vld [vmem:[%s17849_s14 + $0x5e0] ss:$16 sps:$4 sm:$0xff]   ;;  %v15184_v55 = vld [vmem:[%s17849_s14 + $0x5e8] ss:$16 sps:$4 sm:$0xff]  }
 0x139   : > { %10255 = vmatmul.mubr.bf16.vlgmr.msra.gmra.mrb[0].mxu0 %v15088_v56  ;;  %11330 = vmatmul.mubr.bf16.vlgmr.msra.gmra.mrb[0].mxu1 %v15088_v56  ;;  %v15192_v56 = vld [vmem:[%s17849_s14 + $0x604] ss:$16 sps:$4 sm:$0xff]  }
 0x13a   : > { %10266 = vmatpush1.bf16.msra.mxu0 %v15091_v57  ;;  %11341 = vmatpush1.bf16.msra.mxu1 %v15094_v58  ;;  %v15195_v57 = vld [vmem:[%s17849_s14 + $0x60c] ss:$16 sps:$4 sm:$0xff]  }
 0x13b   : > { %10267 = vmatprep.subr.bf16.mxu0 %v15099_v59  ;;  %11342 = vmatprep.subr.bf16.mxu1 %v15102_v60  ;;  %v15187_v58 = vld [vmem:[%s17847_s18 + $0x10] ss:$196 sps:$4 sm:$0xff]  }
 0x13c   : > { %10297 = vmatprep.mubr.bf16.mxu0 %v15189_v63  ;;  %11372 = vmatprep.mubr.bf16.mxu1 %v15189_v63  ;;  %v15190_v59 = vld [vmem:[%s17849_s14 + $0x600] ss:$16 sps:$4 sm:$0xff]   ;;  %v15193_v60 = vld [vmem:[%s17849_s14 + $0x608] ss:$16 sps:$4 sm:$0xff]  }
 0x13d   : > { %v15288_v63 = vld [vmem:[%s17847_s18 + $0x1c] ss:$196 sps:$4 sm:$0xff]  }
 0x13e   : > { %10268 = vmatpush1.bf16.msra.mxu0 %v15097_v61  ;;  %11343 = vmatpush1.bf16.msra.mxu1 %v15100_v62  ;;  %v15198_v61 = vld [vmem:[%s17849_s14 + $0x624] ss:$16 sps:$4 sm:$0xff]   ;;  %v15201_v62 = vld [vmem:[%s17849_s14 + $0x62c] ss:$16 sps:$4 sm:$0xff]  }
 0x13f   : > { %10269 = vmatprep.subr.bf16.mxu0 %v15105_v0  ;;  %11344 = vmatprep.subr.bf16.mxu1 %v15108_v1  ;;  %v15196_v0 = vld [vmem:[%s17849_s14 + $0x620] ss:$16 sps:$4 sm:$0xff]   ;;  %v15199_v1 = vld [vmem:[%s17849_s14 + $0x628] ss:$16 sps:$4 sm:$0xff]  }
 0x142   : > { %10270 = vmatpush1.bf16.msra.mxu0 %v15103_v2  ;;  %11345 = vmatpush1.bf16.msra.mxu1 %v15106_v3  ;;  %v15204_v2 = vld [vmem:[%s17849_s14 + $0x644] ss:$16 sps:$4 sm:$0xff]   ;;  %v15207_v3 = vld [vmem:[%s17849_s14 + $0x64c] ss:$16 sps:$4 sm:$0xff]  }
 0x143   : > { %10271 = vmatprep.subr.bf16.mxu0 %v15111_v4  ;;  %11346 = vmatprep.subr.bf16.mxu1 %v15114_v5  ;;  %v15202_v4 = vld [vmem:[%s17849_s14 + $0x640] ss:$16 sps:$4 sm:$0xff]   ;;  %v15205_v5 = vld [vmem:[%s17849_s14 + $0x648] ss:$16 sps:$4 sm:$0xff]  }
 0x146   : > { %10272 = vmatpush1.bf16.msra.mxu0 %v15109_v6  ;;  %11347 = vmatpush1.bf16.msra.mxu1 %v15112_v7  ;;  %v15210_v6 = vld [vmem:[%s17849_s14 + $0x664] ss:$16 sps:$4 sm:$0xff]   ;;  %v15213_v7 = vld [vmem:[%s17849_s14 + $0x66c] ss:$16 sps:$4 sm:$0xff]  }
 0x147   : > { %10273 = vmatprep.subr.bf16.mxu0 %v15117_v8  ;;  %11348 = vmatprep.subr.bf16.mxu1 %v15120_v9  ;;  %v15208_v8 = vld [vmem:[%s17849_s14 + $0x660] ss:$16 sps:$4 sm:$0xff]   ;;  %v15211_v9 = vld [vmem:[%s17849_s14 + $0x668] ss:$16 sps:$4 sm:$0xff]  }
 0x14a   : > { %10274 = vmatpush1.bf16.msra.mxu0 %v15115_v10  ;;  %11349 = vmatpush1.bf16.msra.mxu1 %v15118_v11  ;;  %v15216_v10 = vld [vmem:[%s17849_s14 + $0x684] ss:$16 sps:$4 sm:$0xff]   ;;  %v15219_v11 = vld [vmem:[%s17849_s14 + $0x68c] ss:$16 sps:$4 sm:$0xff]  }
 0x14b   : > { %10275 = vmatprep.subr.bf16.mxu0 %v15123_v12  ;;  %11350 = vmatprep.subr.bf16.mxu1 %v15126_v13  ;;  %v15214_v12 = vld [vmem:[%s17849_s14 + $0x680] ss:$16 sps:$4 sm:$0xff]   ;;  %v15217_v13 = vld [vmem:[%s17849_s14 + $0x688] ss:$16 sps:$4 sm:$0xff]  }
 0x14e   : > { %10276 = vmatpush1.bf16.msra.mxu0 %v15121_v14  ;;  %11351 = vmatpush1.bf16.msra.mxu1 %v15124_v15  ;;  %v15222_v14 = vld [vmem:[%s17849_s14 + $0x6a4] ss:$16 sps:$4 sm:$0xff]   ;;  %v15225_v15 = vld [vmem:[%s17849_s14 + $0x6ac] ss:$16 sps:$4 sm:$0xff]  }
 0x14f   : > { %10277 = vmatprep.subr.bf16.mxu0 %v15129_v16  ;;  %11352 = vmatprep.subr.bf16.mxu1 %v15132_v17  ;;  %v15220_v16 = vld [vmem:[%s17849_s14 + $0x6a0] ss:$16 sps:$4 sm:$0xff]   ;;  %v15223_v17 = vld [vmem:[%s17849_s14 + $0x6a8] ss:$16 sps:$4 sm:$0xff]  }
 0x152   : > { %10278 = vmatpush1.bf16.msra.mxu0 %v15127_v18  ;;  %11353 = vmatpush1.bf16.msra.mxu1 %v15130_v19  ;;  %v15228_v18 = vld [vmem:[%s17849_s14 + $0x6c4] ss:$16 sps:$4 sm:$0xff]   ;;  %v15231_v19 = vld [vmem:[%s17849_s14 + $0x6cc] ss:$16 sps:$4 sm:$0xff]  }
 0x153   : > { %10279 = vmatprep.subr.bf16.mxu0 %v15135_v20  ;;  %11354 = vmatprep.subr.bf16.mxu1 %v15138_v21  ;;  %v15226_v20 = vld [vmem:[%s17849_s14 + $0x6c0] ss:$16 sps:$4 sm:$0xff]   ;;  %v15229_v21 = vld [vmem:[%s17849_s14 + $0x6c8] ss:$16 sps:$4 sm:$0xff]  }
 0x156   : > { %10280 = vmatpush1.bf16.msra.mxu0 %v15133_v22  ;;  %11355 = vmatpush1.bf16.msra.mxu1 %v15136_v23  ;;  %v15234_v22 = vld [vmem:[%s17849_s14 + $0x6e4] ss:$16 sps:$4 sm:$0xff]   ;;  %v15237_v23 = vld [vmem:[%s17849_s14 + $0x6ec] ss:$16 sps:$4 sm:$0xff]  }
 0x157   : > { %10281 = vmatprep.subr.bf16.mxu0 %v15141_v24  ;;  %11356 = vmatprep.subr.bf16.mxu1 %v15144_v25  ;;  %v15232_v24 = vld [vmem:[%s17849_s14 + $0x6e0] ss:$16 sps:$4 sm:$0xff]   ;;  %v15235_v25 = vld [vmem:[%s17849_s14 + $0x6e8] ss:$16 sps:$4 sm:$0xff]  }
 0x15a   : > { %10282 = vmatpush1.bf16.msra.mxu0 %v15139_v26  ;;  %11357 = vmatpush1.bf16.msra.mxu1 %v15142_v27  ;;  %v15240_v26 = vld [vmem:[%s17849_s14 + $0x704] ss:$16 sps:$4 sm:$0xff]   ;;  %v15243_v27 = vld [vmem:[%s17849_s14 + $0x70c] ss:$16 sps:$4 sm:$0xff]  }
 0x15b   : > { %10283 = vmatprep.subr.bf16.mxu0 %v15147_v28  ;;  %11358 = vmatprep.subr.bf16.mxu1 %v15150_v29  ;;  %v15238_v28 = vld [vmem:[%s17849_s14 + $0x700] ss:$16 sps:$4 sm:$0xff]   ;;  %v15241_v29 = vld [vmem:[%s17849_s14 + $0x708] ss:$16 sps:$4 sm:$0xff]  }
 0x15e   : > { %10284 = vmatpush1.bf16.msra.mxu0 %v15145_v30  ;;  %11359 = vmatpush1.bf16.msra.mxu1 %v15148_v31  ;;  %v15246_v30 = vld [vmem:[%s17849_s14 + $0x724] ss:$16 sps:$4 sm:$0xff]   ;;  %v15249_v31 = vld [vmem:[%s17849_s14 + $0x72c] ss:$16 sps:$4 sm:$0xff]  }
 0x15f   : > { %10285 = vmatprep.subr.bf16.mxu0 %v15153_v32  ;;  %11360 = vmatprep.subr.bf16.mxu1 %v15156_v33  ;;  %v15244_v32 = vld [vmem:[%s17849_s14 + $0x720] ss:$16 sps:$4 sm:$0xff]   ;;  %v15247_v33 = vld [vmem:[%s17849_s14 + $0x728] ss:$16 sps:$4 sm:$0xff]  }
 0x162   : > { %10286 = vmatpush1.bf16.msra.mxu0 %v15151_v34  ;;  %11361 = vmatpush1.bf16.msra.mxu1 %v15154_v35  ;;  %v15252_v34 = vld [vmem:[%s17849_s14 + $0x744] ss:$16 sps:$4 sm:$0xff]   ;;  %v15255_v35 = vld [vmem:[%s17849_s14 + $0x74c] ss:$16 sps:$4 sm:$0xff]  }
 0x163   : > { %10287 = vmatprep.subr.bf16.mxu0 %v15159_v36  ;;  %11362 = vmatprep.subr.bf16.mxu1 %v15162_v37  ;;  %v15250_v36 = vld [vmem:[%s17849_s14 + $0x740] ss:$16 sps:$4 sm:$0xff]   ;;  %v15253_v37 = vld [vmem:[%s17849_s14 + $0x748] ss:$16 sps:$4 sm:$0xff]  }
 0x166   : > { %10288 = vmatpush1.bf16.msra.mxu0 %v15157_v38  ;;  %11363 = vmatpush1.bf16.msra.mxu1 %v15160_v39  ;;  %v15258_v38 = vld [vmem:[%s17849_s14 + $0x764] ss:$16 sps:$4 sm:$0xff]   ;;  %v15261_v39 = vld [vmem:[%s17849_s14 + $0x76c] ss:$16 sps:$4 sm:$0xff]  }
 0x167   : > { %10289 = vmatprep.subr.bf16.mxu0 %v15165_v40  ;;  %11364 = vmatprep.subr.bf16.mxu1 %v15168_v41  ;;  %v15256_v40 = vld [vmem:[%s17849_s14 + $0x760] ss:$16 sps:$4 sm:$0xff]   ;;  %v15259_v41 = vld [vmem:[%s17849_s14 + $0x768] ss:$16 sps:$4 sm:$0xff]  }
 0x16a   : > { %10290 = vmatpush1.bf16.msra.mxu0 %v15163_v42  ;;  %11365 = vmatpush1.bf16.msra.mxu1 %v15166_v43  ;;  %v15264_v42 = vld [vmem:[%s17849_s14 + $0x784] ss:$16 sps:$4 sm:$0xff]   ;;  %v15267_v43 = vld [vmem:[%s17849_s14 + $0x78c] ss:$16 sps:$4 sm:$0xff]  }
 0x16b   : > { %10291 = vmatprep.subr.bf16.mxu0 %v15171_v44  ;;  %11366 = vmatprep.subr.bf16.mxu1 %v15174_v45  ;;  %v15262_v44 = vld [vmem:[%s17849_s14 + $0x780] ss:$16 sps:$4 sm:$0xff]   ;;  %v15265_v45 = vld [vmem:[%s17849_s14 + $0x788] ss:$16 sps:$4 sm:$0xff]  }
 0x16e   : > { %10292 = vmatpush1.bf16.msra.mxu0 %v15169_v46  ;;  %11367 = vmatpush1.bf16.msra.mxu1 %v15172_v47  ;;  %v15270_v46 = vld [vmem:[%s17849_s14 + $0x7a4] ss:$16 sps:$4 sm:$0xff]   ;;  %v15273_v47 = vld [vmem:[%s17849_s14 + $0x7ac] ss:$16 sps:$4 sm:$0xff]  }
 0x16f   : > { %10293 = vmatprep.subr.bf16.mxu0 %v15177_v48  ;;  %11368 = vmatprep.subr.bf16.mxu1 %v15180_v49  ;;  %v15268_v48 = vld [vmem:[%s17849_s14 + $0x7a0] ss:$16 sps:$4 sm:$0xff]   ;;  %v15271_v49 = vld [vmem:[%s17849_s14 + $0x7a8] ss:$16 sps:$4 sm:$0xff]  }
 0x172   : > { %10294 = vmatpush1.bf16.msra.mxu0 %v15175_v50  ;;  %11369 = vmatpush1.bf16.msra.mxu1 %v15178_v51  ;;  %v15276_v50 = vld [vmem:[%s17849_s14 + $0x7c4] ss:$16 sps:$4 sm:$0xff]   ;;  %v15279_v51 = vld [vmem:[%s17849_s14 + $0x7cc] ss:$16 sps:$4 sm:$0xff]  }
 0x173   : > { %10295 = vmatprep.subr.bf16.mxu0 %v15183_v52  ;;  %11370 = vmatprep.subr.bf16.mxu1 %v15186_v53  ;;  %v15274_v52 = vld [vmem:[%s17849_s14 + $0x7c0] ss:$16 sps:$4 sm:$0xff]   ;;  %v15277_v53 = vld [vmem:[%s17849_s14 + $0x7c8] ss:$16 sps:$4 sm:$0xff]  }
 0x176   : > { %10296 = vmatpush1.bf16.msra.mxu0 %v15181_v54  ;;  %11371 = vmatpush1.bf16.msra.mxu1 %v15184_v55  ;;  %v15282_v54 = vld [vmem:[%s17849_s14 + $0x7e4] ss:$16 sps:$4 sm:$0xff]   ;;  %v15285_v55 = vld [vmem:[%s17849_s14 + $0x7ec] ss:$16 sps:$4 sm:$0xff]  }
 0x177   : > { %10308 = vmatprep.subr.bf16.mxu0 %v15192_v56  ;;  %11383 = vmatprep.subr.bf16.mxu1 %v15195_v57  ;;  %v15280_v56 = vld [vmem:[%s17849_s14 + $0x7e0] ss:$16 sps:$4 sm:$0xff]   ;;  %v15283_v57 = vld [vmem:[%s17849_s14 + $0x7e8] ss:$16 sps:$4 sm:$0xff]  }
 0x179   : > { %10298 = vmatmul.mubr.bf16.vlgmr.msra.gmra.mrb[0].mxu0 %v15187_v58  ;;  %11373 = vmatmul.mubr.bf16.vlgmr.msra.gmra.mrb[0].mxu1 %v15187_v58  ;;  %v15291_v58 = vld [vmem:[%s17849_s14 + $0x804] ss:$16 sps:$4 sm:$0xff]  }
 0x17a   : > { %10309 = vmatpush1.bf16.msra.mxu0 %v15190_v59  ;;  %11384 = vmatpush1.bf16.msra.mxu1 %v15193_v60  ;;  %v15294_v59 = vld [vmem:[%s17849_s14 + $0x80c] ss:$16 sps:$4 sm:$0xff]  }
 0x17b   : > { %10310 = vmatprep.subr.bf16.mxu0 %v15198_v61  ;;  %11385 = vmatprep.subr.bf16.mxu1 %v15201_v62  ;;  %v15286_v60 = vld [vmem:[%s17847_s18 + $0x18] ss:$196 sps:$4 sm:$0xff]  }
 0x17c   : > { %10340 = vmatprep.mubr.bf16.mxu0 %v15288_v63  ;;  %11415 = vmatprep.mubr.bf16.mxu1 %v15288_v63  ;;  %v15289_v61 = vld [vmem:[%s17849_s14 + $0x800] ss:$16 sps:$4 sm:$0xff]   ;;  %v15292_v62 = vld [vmem:[%s17849_s14 + $0x808] ss:$16 sps:$4 sm:$0xff]   ;;  %v15297_v63 = vld [vmem:[%s17849_s14 + $0x824] ss:$16 sps:$4 sm:$0xff]  }
 0x17e   : > { %10311 = vmatpush1.bf16.msra.mxu0 %v15196_v0  ;;  %11386 = vmatpush1.bf16.msra.mxu1 %v15199_v1  ;;  %v15300_v0 = vld [vmem:[%s17849_s14 + $0x82c] ss:$16 sps:$4 sm:$0xff]  }
 0x17f   : > { %10312 = vmatprep.subr.bf16.mxu0 %v15204_v2  ;;  %11387 = vmatprep.subr.bf16.mxu1 %v15207_v3  ;;  %v15387_v1 = vld [vmem:[%s17847_s18 + $0x24] ss:$196 sps:$4 sm:$0xff]  }
 0x180   : > { %v15295_v2 = vld [vmem:[%s17849_s14 + $0x820] ss:$16 sps:$4 sm:$0xff]   ;;  %v15298_v3 = vld [vmem:[%s17849_s14 + $0x828] ss:$16 sps:$4 sm:$0xff]  }
 0x182   : > { %10313 = vmatpush1.bf16.msra.mxu0 %v15202_v4  ;;  %11388 = vmatpush1.bf16.msra.mxu1 %v15205_v5  ;;  %v15303_v4 = vld [vmem:[%s17849_s14 + $0x844] ss:$16 sps:$4 sm:$0xff]   ;;  %v15306_v5 = vld [vmem:[%s17849_s14 + $0x84c] ss:$16 sps:$4 sm:$0xff]  }
 0x183   : > { %10314 = vmatprep.subr.bf16.mxu0 %v15210_v6  ;;  %11389 = vmatprep.subr.bf16.mxu1 %v15213_v7  ;;  %v15301_v6 = vld [vmem:[%s17849_s14 + $0x840] ss:$16 sps:$4 sm:$0xff]   ;;  %v15304_v7 = vld [vmem:[%s17849_s14 + $0x848] ss:$16 sps:$4 sm:$0xff]  }
 0x186   : > { %10315 = vmatpush1.bf16.msra.mxu0 %v15208_v8  ;;  %11390 = vmatpush1.bf16.msra.mxu1 %v15211_v9  ;;  %v15309_v8 = vld [vmem:[%s17849_s14 + $0x864] ss:$16 sps:$4 sm:$0xff]   ;;  %v15312_v9 = vld [vmem:[%s17849_s14 + $0x86c] ss:$16 sps:$4 sm:$0xff]  }
 0x187   : > { %10316 = vmatprep.subr.bf16.mxu0 %v15216_v10  ;;  %11391 = vmatprep.subr.bf16.mxu1 %v15219_v11  ;;  %v15307_v10 = vld [vmem:[%s17849_s14 + $0x860] ss:$16 sps:$4 sm:$0xff]   ;;  %v15310_v11 = vld [vmem:[%s17849_s14 + $0x868] ss:$16 sps:$4 sm:$0xff]  }
 0x18a   : > { %10317 = vmatpush1.bf16.msra.mxu0 %v15214_v12  ;;  %11392 = vmatpush1.bf16.msra.mxu1 %v15217_v13  ;;  %v15315_v12 = vld [vmem:[%s17849_s14 + $0x884] ss:$16 sps:$4 sm:$0xff]   ;;  %v15318_v13 = vld [vmem:[%s17849_s14 + $0x88c] ss:$16 sps:$4 sm:$0xff]  }
 0x18b   : > { %10318 = vmatprep.subr.bf16.mxu0 %v15222_v14  ;;  %11393 = vmatprep.subr.bf16.mxu1 %v15225_v15  ;;  %v15313_v14 = vld [vmem:[%s17849_s14 + $0x880] ss:$16 sps:$4 sm:$0xff]   ;;  %v15316_v15 = vld [vmem:[%s17849_s14 + $0x888] ss:$16 sps:$4 sm:$0xff]  }
 0x18e   : > { %10319 = vmatpush1.bf16.msra.mxu0 %v15220_v16  ;;  %11394 = vmatpush1.bf16.msra.mxu1 %v15223_v17  ;;  %v15321_v16 = vld [vmem:[%s17849_s14 + $0x8a4] ss:$16 sps:$4 sm:$0xff]   ;;  %v15324_v17 = vld [vmem:[%s17849_s14 + $0x8ac] ss:$16 sps:$4 sm:$0xff]  }
 0x18f   : > { %10320 = vmatprep.subr.bf16.mxu0 %v15228_v18  ;;  %11395 = vmatprep.subr.bf16.mxu1 %v15231_v19  ;;  %v15319_v18 = vld [vmem:[%s17849_s14 + $0x8a0] ss:$16 sps:$4 sm:$0xff]   ;;  %v15322_v19 = vld [vmem:[%s17849_s14 + $0x8a8] ss:$16 sps:$4 sm:$0xff]  }
 0x192   : > { %10321 = vmatpush1.bf16.msra.mxu0 %v15226_v20  ;;  %11396 = vmatpush1.bf16.msra.mxu1 %v15229_v21  ;;  %v15327_v20 = vld [vmem:[%s17849_s14 + $0x8c4] ss:$16 sps:$4 sm:$0xff]   ;;  %v15330_v21 = vld [vmem:[%s17849_s14 + $0x8cc] ss:$16 sps:$4 sm:$0xff]  }
 0x193   : > { %10322 = vmatprep.subr.bf16.mxu0 %v15234_v22  ;;  %11397 = vmatprep.subr.bf16.mxu1 %v15237_v23  ;;  %v15325_v22 = vld [vmem:[%s17849_s14 + $0x8c0] ss:$16 sps:$4 sm:$0xff]   ;;  %v15328_v23 = vld [vmem:[%s17849_s14 + $0x8c8] ss:$16 sps:$4 sm:$0xff]  }
 0x196   : > { %10323 = vmatpush1.bf16.msra.mxu0 %v15232_v24  ;;  %11398 = vmatpush1.bf16.msra.mxu1 %v15235_v25  ;;  %v15333_v24 = vld [vmem:[%s17849_s14 + $0x8e4] ss:$16 sps:$4 sm:$0xff]   ;;  %v15336_v25 = vld [vmem:[%s17849_s14 + $0x8ec] ss:$16 sps:$4 sm:$0xff]  }
 0x197   : > { %10324 = vmatprep.subr.bf16.mxu0 %v15240_v26  ;;  %11399 = vmatprep.subr.bf16.mxu1 %v15243_v27  ;;  %v15331_v26 = vld [vmem:[%s17849_s14 + $0x8e0] ss:$16 sps:$4 sm:$0xff]   ;;  %v15334_v27 = vld [vmem:[%s17849_s14 + $0x8e8] ss:$16 sps:$4 sm:$0xff]  }
 0x19a   : > { %10325 = vmatpush1.bf16.msra.mxu0 %v15238_v28  ;;  %11400 = vmatpush1.bf16.msra.mxu1 %v15241_v29  ;;  %v15339_v28 = vld [vmem:[%s17849_s14 + $0x904] ss:$16 sps:$4 sm:$0xff]   ;;  %v15342_v29 = vld [vmem:[%s17849_s14 + $0x90c] ss:$16 sps:$4 sm:$0xff]  }
 0x19b   : > { %10326 = vmatprep.subr.bf16.mxu0 %v15246_v30  ;;  %11401 = vmatprep.subr.bf16.mxu1 %v15249_v31  ;;  %v15337_v30 = vld [vmem:[%s17849_s14 + $0x900] ss:$16 sps:$4 sm:$0xff]   ;;  %v15340_v31 = vld [vmem:[%s17849_s14 + $0x908] ss:$16 sps:$4 sm:$0xff]  }
 0x19e   : > { %10327 = vmatpush1.bf16.msra.mxu0 %v15244_v32  ;;  %11402 = vmatpush1.bf16.msra.mxu1 %v15247_v33  ;;  %v15345_v32 = vld [vmem:[%s17849_s14 + $0x924] ss:$16 sps:$4 sm:$0xff]   ;;  %v15348_v33 = vld [vmem:[%s17849_s14 + $0x92c] ss:$16 sps:$4 sm:$0xff]  }
 0x19f   : > { %10328 = vmatprep.subr.bf16.mxu0 %v15252_v34  ;;  %11403 = vmatprep.subr.bf16.mxu1 %v15255_v35  ;;  %v15343_v34 = vld [vmem:[%s17849_s14 + $0x920] ss:$16 sps:$4 sm:$0xff]   ;;  %v15346_v35 = vld [vmem:[%s17849_s14 + $0x928] ss:$16 sps:$4 sm:$0xff]  }
 0x1a2   : > { %10329 = vmatpush1.bf16.msra.mxu0 %v15250_v36  ;;  %11404 = vmatpush1.bf16.msra.mxu1 %v15253_v37  ;;  %v15351_v36 = vld [vmem:[%s17849_s14 + $0x944] ss:$16 sps:$4 sm:$0xff]   ;;  %v15354_v37 = vld [vmem:[%s17849_s14 + $0x94c] ss:$16 sps:$4 sm:$0xff]  }
 0x1a3   : > { %10330 = vmatprep.subr.bf16.mxu0 %v15258_v38  ;;  %11405 = vmatprep.subr.bf16.mxu1 %v15261_v39  ;;  %v15349_v38 = vld [vmem:[%s17849_s14 + $0x940] ss:$16 sps:$4 sm:$0xff]   ;;  %v15352_v39 = vld [vmem:[%s17849_s14 + $0x948] ss:$16 sps:$4 sm:$0xff]  }
 0x1a6   : > { %10331 = vmatpush1.bf16.msra.mxu0 %v15256_v40  ;;  %11406 = vmatpush1.bf16.msra.mxu1 %v15259_v41  ;;  %v15357_v40 = vld [vmem:[%s17849_s14 + $0x964] ss:$16 sps:$4 sm:$0xff]   ;;  %v15360_v41 = vld [vmem:[%s17849_s14 + $0x96c] ss:$16 sps:$4 sm:$0xff]  }
 0x1a7   : > { %10332 = vmatprep.subr.bf16.mxu0 %v15264_v42  ;;  %11407 = vmatprep.subr.bf16.mxu1 %v15267_v43  ;;  %v15355_v42 = vld [vmem:[%s17849_s14 + $0x960] ss:$16 sps:$4 sm:$0xff]   ;;  %v15358_v43 = vld [vmem:[%s17849_s14 + $0x968] ss:$16 sps:$4 sm:$0xff]  }
 0x1aa   : > { %10333 = vmatpush1.bf16.msra.mxu0 %v15262_v44  ;;  %11408 = vmatpush1.bf16.msra.mxu1 %v15265_v45  ;;  %v15363_v44 = vld [vmem:[%s17849_s14 + $0x984] ss:$16 sps:$4 sm:$0xff]   ;;  %v15366_v45 = vld [vmem:[%s17849_s14 + $0x98c] ss:$16 sps:$4 sm:$0xff]  }
 0x1ab   : > { %10334 = vmatprep.subr.bf16.mxu0 %v15270_v46  ;;  %11409 = vmatprep.subr.bf16.mxu1 %v15273_v47  ;;  %v15361_v46 = vld [vmem:[%s17849_s14 + $0x980] ss:$16 sps:$4 sm:$0xff]   ;;  %v15364_v47 = vld [vmem:[%s17849_s14 + $0x988] ss:$16 sps:$4 sm:$0xff]  }
 0x1ae   : > { %10335 = vmatpush1.bf16.msra.mxu0 %v15268_v48  ;;  %11410 = vmatpush1.bf16.msra.mxu1 %v15271_v49  ;;  %v15369_v48 = vld [vmem:[%s17849_s14 + $0x9a4] ss:$16 sps:$4 sm:$0xff]   ;;  %v15372_v49 = vld [vmem:[%s17849_s14 + $0x9ac] ss:$16 sps:$4 sm:$0xff]  }
 0x1af   : > { %10336 = vmatprep.subr.bf16.mxu0 %v15276_v50  ;;  %11411 = vmatprep.subr.bf16.mxu1 %v15279_v51  ;;  %v15367_v50 = vld [vmem:[%s17849_s14 + $0x9a0] ss:$16 sps:$4 sm:$0xff]   ;;  %v15370_v51 = vld [vmem:[%s17849_s14 + $0x9a8] ss:$16 sps:$4 sm:$0xff]  }
 0x1b2   : > { %10337 = vmatpush1.bf16.msra.mxu0 %v15274_v52  ;;  %11412 = vmatpush1.bf16.msra.mxu1 %v15277_v53  ;;  %v15375_v52 = vld [vmem:[%s17849_s14 + $0x9c4] ss:$16 sps:$4 sm:$0xff]   ;;  %v15378_v53 = vld [vmem:[%s17849_s14 + $0x9cc] ss:$16 sps:$4 sm:$0xff]  }
 0x1b3   : > { %10338 = vmatprep.subr.bf16.mxu0 %v15282_v54  ;;  %11413 = vmatprep.subr.bf16.mxu1 %v15285_v55  ;;  %v15373_v54 = vld [vmem:[%s17849_s14 + $0x9c0] ss:$16 sps:$4 sm:$0xff]   ;;  %v15376_v55 = vld [vmem:[%s17849_s14 + $0x9c8] ss:$16 sps:$4 sm:$0xff]  }
 0x1b6   : > { %10339 = vmatpush1.bf16.msra.mxu0 %v15280_v56  ;;  %11414 = vmatpush1.bf16.msra.mxu1 %v15283_v57  ;;  %v15381_v56 = vld [vmem:[%s17849_s14 + $0x9e4] ss:$16 sps:$4 sm:$0xff]   ;;  %v15384_v57 = vld [vmem:[%s17849_s14 + $0x9ec] ss:$16 sps:$4 sm:$0xff]  }
 0x1b7   : > { %10351 = vmatprep.subr.bf16.mxu0 %v15291_v58  ;;  %11426 = vmatprep.subr.bf16.mxu1 %v15294_v59  ;;  %v15379_v58 = vld [vmem:[%s17849_s14 + $0x9e0] ss:$16 sps:$4 sm:$0xff]   ;;  %v15382_v59 = vld [vmem:[%s17849_s14 + $0x9e8] ss:$16 sps:$4 sm:$0xff]  }
 0x1b9   : > { %10341 = vmatmul.mubr.bf16.vlgmr.msra.gmra.mrb[0].mxu0 %v15286_v60  ;;  %11416 = vmatmul.mubr.bf16.vlgmr.msra.gmra.mrb[0].mxu1 %v15286_v60  ;;  %v15385_v60 = vld [vmem:[%s17847_s18 + $0x20] ss:$196 sps:$4 sm:$0xff]  }
 0x1ba   : > { %10352 = vmatpush1.bf16.msra.mxu0 %v15289_v61  ;;  %11427 = vmatpush1.bf16.msra.mxu1 %v15292_v62  ;;  %v15390_v61 = vld [vmem:[%s17849_s14 + $0xa04] ss:$16 sps:$4 sm:$0xff]   ;;  %v15393_v62 = vld [vmem:[%s17849_s14 + $0xa0c] ss:$16 sps:$4 sm:$0xff]  }
 0x1bb   : > { %10353 = vmatprep.subr.bf16.mxu0 %v15297_v63  ;;  %11428 = vmatprep.subr.bf16.mxu1 %v15300_v0  ;;  %v15388_v63 = vld [vmem:[%s17849_s14 + $0xa00] ss:$16 sps:$4 sm:$0xff]   ;;  %v15391_v0 = vld [vmem:[%s17849_s14 + $0xa08] ss:$16 sps:$4 sm:$0xff]  }
 0x1bc   : > { %10383 = vmatprep.mubr.bf16.mxu0 %v15387_v1  ;;  %11458 = vmatprep.mubr.bf16.mxu1 %v15387_v1  ;;  %v15396_v1 = vld [vmem:[%s17849_s14 + $0xa24] ss:$16 sps:$4 sm:$0xff]  }
 0x1be   : > { %10354 = vmatpush1.bf16.msra.mxu0 %v15295_v2  ;;  %11429 = vmatpush1.bf16.msra.mxu1 %v15298_v3  ;;  %v15399_v2 = vld [vmem:[%s17849_s14 + $0xa2c] ss:$16 sps:$4 sm:$0xff]  }
 0x1bf   : > { %10355 = vmatprep.subr.bf16.mxu0 %v15303_v4  ;;  %11430 = vmatprep.subr.bf16.mxu1 %v15306_v5  ;;  %v15486_v3 = vld [vmem:[%s17847_s18 + $0x2c] ss:$196 sps:$4 sm:$0xff]  }
 0x1c0   : > { %v15394_v4 = vld [vmem:[%s17849_s14 + $0xa20] ss:$16 sps:$4 sm:$0xff]   ;;  %v15397_v5 = vld [vmem:[%s17849_s14 + $0xa28] ss:$16 sps:$4 sm:$0xff]  }
 0x1c2   : > { %10356 = vmatpush1.bf16.msra.mxu0 %v15301_v6  ;;  %11431 = vmatpush1.bf16.msra.mxu1 %v15304_v7  ;;  %v15402_v6 = vld [vmem:[%s17849_s14 + $0xa44] ss:$16 sps:$4 sm:$0xff]   ;;  %v15405_v7 = vld [vmem:[%s17849_s14 + $0xa4c] ss:$16 sps:$4 sm:$0xff]  }
 0x1c3   : > { %10357 = vmatprep.subr.bf16.mxu0 %v15309_v8  ;;  %11432 = vmatprep.subr.bf16.mxu1 %v15312_v9  ;;  %v15400_v8 = vld [vmem:[%s17849_s14 + $0xa40] ss:$16 sps:$4 sm:$0xff]   ;;  %v15403_v9 = vld [vmem:[%s17849_s14 + $0xa48] ss:$16 sps:$4 sm:$0xff]  }
 0x1c6   : > { %10358 = vmatpush1.bf16.msra.mxu0 %v15307_v10  ;;  %11433 = vmatpush1.bf16.msra.mxu1 %v15310_v11  ;;  %v15408_v10 = vld [vmem:[%s17849_s14 + $0xa64] ss:$16 sps:$4 sm:$0xff]   ;;  %v15411_v11 = vld [vmem:[%s17849_s14 + $0xa6c] ss:$16 sps:$4 sm:$0xff]  }
 0x1c7   : > { %10359 = vmatprep.subr.bf16.mxu0 %v15315_v12  ;;  %11434 = vmatprep.subr.bf16.mxu1 %v15318_v13  ;;  %v15406_v12 = vld [vmem:[%s17849_s14 + $0xa60] ss:$16 sps:$4 sm:$0xff]   ;;  %v15409_v13 = vld [vmem:[%s17849_s14 + $0xa68] ss:$16 sps:$4 sm:$0xff]  }
 0x1ca   : > { %10360 = vmatpush1.bf16.msra.mxu0 %v15313_v14  ;;  %11435 = vmatpush1.bf16.msra.mxu1 %v15316_v15  ;;  %v15414_v14 = vld [vmem:[%s17849_s14 + $0xa84] ss:$16 sps:$4 sm:$0xff]   ;;  %v15417_v15 = vld [vmem:[%s17849_s14 + $0xa8c] ss:$16 sps:$4 sm:$0xff]  }
 0x1cb   : > { %10361 = vmatprep.subr.bf16.mxu0 %v15321_v16  ;;  %11436 = vmatprep.subr.bf16.mxu1 %v15324_v17  ;;  %v15412_v16 = vld [vmem:[%s17849_s14 + $0xa80] ss:$16 sps:$4 sm:$0xff]   ;;  %v15415_v17 = vld [vmem:[%s17849_s14 + $0xa88] ss:$16 sps:$4 sm:$0xff]  }
 0x1ce   : > { %10362 = vmatpush1.bf16.msra.mxu0 %v15319_v18  ;;  %11437 = vmatpush1.bf16.msra.mxu1 %v15322_v19  ;;  %v15420_v18 = vld [vmem:[%s17849_s14 + $0xaa4] ss:$16 sps:$4 sm:$0xff]   ;;  %v15423_v19 = vld [vmem:[%s17849_s14 + $0xaac] ss:$16 sps:$4 sm:$0xff]  }
 0x1cf   : > { %10363 = vmatprep.subr.bf16.mxu0 %v15327_v20  ;;  %11438 = vmatprep.subr.bf16.mxu1 %v15330_v21  ;;  %v15418_v20 = vld [vmem:[%s17849_s14 + $0xaa0] ss:$16 sps:$4 sm:$0xff]   ;;  %v15421_v21 = vld [vmem:[%s17849_s14 + $0xaa8] ss:$16 sps:$4 sm:$0xff]  }
 0x1d2   : > { %10364 = vmatpush1.bf16.msra.mxu0 %v15325_v22  ;;  %11439 = vmatpush1.bf16.msra.mxu1 %v15328_v23  ;;  %v15426_v22 = vld [vmem:[%s17849_s14 + $0xac4] ss:$16 sps:$4 sm:$0xff]   ;;  %v15429_v23 = vld [vmem:[%s17849_s14 + $0xacc] ss:$16 sps:$4 sm:$0xff]  }
 0x1d3   : > { %10365 = vmatprep.subr.bf16.mxu0 %v15333_v24  ;;  %11440 = vmatprep.subr.bf16.mxu1 %v15336_v25  ;;  %v15424_v24 = vld [vmem:[%s17849_s14 + $0xac0] ss:$16 sps:$4 sm:$0xff]   ;;  %v15427_v25 = vld [vmem:[%s17849_s14 + $0xac8] ss:$16 sps:$4 sm:$0xff]  }
 0x1d6   : > { %10366 = vmatpush1.bf16.msra.mxu0 %v15331_v26  ;;  %11441 = vmatpush1.bf16.msra.mxu1 %v15334_v27  ;;  %v15432_v26 = vld [vmem:[%s17849_s14 + $0xae4] ss:$16 sps:$4 sm:$0xff]   ;;  %v15435_v27 = vld [vmem:[%s17849_s14 + $0xaec] ss:$16 sps:$4 sm:$0xff]  }
 0x1d7   : > { %10367 = vmatprep.subr.bf16.mxu0 %v15339_v28  ;;  %11442 = vmatprep.subr.bf16.mxu1 %v15342_v29  ;;  %v15430_v28 = vld [vmem:[%s17849_s14 + $0xae0] ss:$16 sps:$4 sm:$0xff]   ;;  %v15433_v29 = vld [vmem:[%s17849_s14 + $0xae8] ss:$16 sps:$4 sm:$0xff]  }
 0x1da   : > { %10368 = vmatpush1.bf16.msra.mxu0 %v15337_v30  ;;  %11443 = vmatpush1.bf16.msra.mxu1 %v15340_v31  ;;  %v15438_v30 = vld [vmem:[%s17849_s14 + $0xb04] ss:$16 sps:$4 sm:$0xff]   ;;  %v15441_v31 = vld [vmem:[%s17849_s14 + $0xb0c] ss:$16 sps:$4 sm:$0xff]  }
 0x1db   : > { %10369 = vmatprep.subr.bf16.mxu0 %v15345_v32  ;;  %11444 = vmatprep.subr.bf16.mxu1 %v15348_v33  ;;  %v15436_v32 = vld [vmem:[%s17849_s14 + $0xb00] ss:$16 sps:$4 sm:$0xff]   ;;  %v15439_v33 = vld [vmem:[%s17849_s14 + $0xb08] ss:$16 sps:$4 sm:$0xff]  }
 0x1de   : > { %10370 = vmatpush1.bf16.msra.mxu0 %v15343_v34  ;;  %11445 = vmatpush1.bf16.msra.mxu1 %v15346_v35  ;;  %v15444_v34 = vld [vmem:[%s17849_s14 + $0xb24] ss:$16 sps:$4 sm:$0xff]   ;;  %v15447_v35 = vld [vmem:[%s17849_s14 + $0xb2c] ss:$16 sps:$4 sm:$0xff]  }
 0x1df   : > { %10371 = vmatprep.subr.bf16.mxu0 %v15351_v36  ;;  %11446 = vmatprep.subr.bf16.mxu1 %v15354_v37  ;;  %v15442_v36 = vld [vmem:[%s17849_s14 + $0xb20] ss:$16 sps:$4 sm:$0xff]   ;;  %v15445_v37 = vld [vmem:[%s17849_s14 + $0xb28] ss:$16 sps:$4 sm:$0xff]  }
 0x1e2   : > { %10372 = vmatpush1.bf16.msra.mxu0 %v15349_v38  ;;  %11447 = vmatpush1.bf16.msra.mxu1 %v15352_v39  ;;  %v15450_v38 = vld [vmem:[%s17849_s14 + $0xb44] ss:$16 sps:$4 sm:$0xff]   ;;  %v15453_v39 = vld [vmem:[%s17849_s14 + $0xb4c] ss:$16 sps:$4 sm:$0xff]  }
 0x1e3   : > { %10373 = vmatprep.subr.bf16.mxu0 %v15357_v40  ;;  %11448 = vmatprep.subr.bf16.mxu1 %v15360_v41  ;;  %v15448_v40 = vld [vmem:[%s17849_s14 + $0xb40] ss:$16 sps:$4 sm:$0xff]   ;;  %v15451_v41 = vld [vmem:[%s17849_s14 + $0xb48] ss:$16 sps:$4 sm:$0xff]  }
 0x1e6   : > { %10374 = vmatpush1.bf16.msra.mxu0 %v15355_v42  ;;  %11449 = vmatpush1.bf16.msra.mxu1 %v15358_v43  ;;  %v15456_v42 = vld [vmem:[%s17849_s14 + $0xb64] ss:$16 sps:$4 sm:$0xff]   ;;  %v15459_v43 = vld [vmem:[%s17849_s14 + $0xb6c] ss:$16 sps:$4 sm:$0xff]  }
 0x1e7   : > { %10375 = vmatprep.subr.bf16.mxu0 %v15363_v44  ;;  %11450 = vmatprep.subr.bf16.mxu1 %v15366_v45  ;;  %v15454_v44 = vld [vmem:[%s17849_s14 + $0xb60] ss:$16 sps:$4 sm:$0xff]   ;;  %v15457_v45 = vld [vmem:[%s17849_s14 + $0xb68] ss:$16 sps:$4 sm:$0xff]  }
 0x1ea   : > { %10376 = vmatpush1.bf16.msra.mxu0 %v15361_v46  ;;  %11451 = vmatpush1.bf16.msra.mxu1 %v15364_v47  ;;  %v15462_v46 = vld [vmem:[%s17849_s14 + $0xb84] ss:$16 sps:$4 sm:$0xff]   ;;  %v15465_v47 = vld [vmem:[%s17849_s14 + $0xb8c] ss:$16 sps:$4 sm:$0xff]  }
 0x1eb   : > { %10377 = vmatprep.subr.bf16.mxu0 %v15369_v48  ;;  %11452 = vmatprep.subr.bf16.mxu1 %v15372_v49  ;;  %v15460_v48 = vld [vmem:[%s17849_s14 + $0xb80] ss:$16 sps:$4 sm:$0xff]   ;;  %v15463_v49 = vld [vmem:[%s17849_s14 + $0xb88] ss:$16 sps:$4 sm:$0xff]  }
 0x1ee   : > { %10378 = vmatpush1.bf16.msra.mxu0 %v15367_v50  ;;  %11453 = vmatpush1.bf16.msra.mxu1 %v15370_v51  ;;  %v15468_v50 = vld [vmem:[%s17849_s14 + $0xba4] ss:$16 sps:$4 sm:$0xff]   ;;  %v15471_v51 = vld [vmem:[%s17849_s14 + $0xbac] ss:$16 sps:$4 sm:$0xff]  }
 0x1ef   : > { %10379 = vmatprep.subr.bf16.mxu0 %v15375_v52  ;;  %11454 = vmatprep.subr.bf16.mxu1 %v15378_v53  ;;  %v15466_v52 = vld [vmem:[%s17849_s14 + $0xba0] ss:$16 sps:$4 sm:$0xff]   ;;  %v15469_v53 = vld [vmem:[%s17849_s14 + $0xba8] ss:$16 sps:$4 sm:$0xff]  }
 0x1f2   : > { %10380 = vmatpush1.bf16.msra.mxu0 %v15373_v54  ;;  %11455 = vmatpush1.bf16.msra.mxu1 %v15376_v55  ;;  %v15474_v54 = vld [vmem:[%s17849_s14 + $0xbc4] ss:$16 sps:$4 sm:$0xff]   ;;  %v15477_v55 = vld [vmem:[%s17849_s14 + $0xbcc] ss:$16 sps:$4 sm:$0xff]  }
 0x1f3   : > { %10381 = vmatprep.subr.bf16.mxu0 %v15381_v56  ;;  %11456 = vmatprep.subr.bf16.mxu1 %v15384_v57  ;;  %v15472_v56 = vld [vmem:[%s17849_s14 + $0xbc0] ss:$16 sps:$4 sm:$0xff]   ;;  %v15475_v57 = vld [vmem:[%s17849_s14 + $0xbc8] ss:$16 sps:$4 sm:$0xff]  }
 0x1f6   : > { %10382 = vmatpush1.bf16.msra.mxu0 %v15379_v58  ;;  %11457 = vmatpush1.bf16.msra.mxu1 %v15382_v59  ;;  %v15480_v58 = vld [vmem:[%s17849_s14 + $0xbe4] ss:$16 sps:$4 sm:$0xff]   ;;  %v15483_v59 = vld [vmem:[%s17849_s14 + $0xbec] ss:$16 sps:$4 sm:$0xff]  }
 0x1f7   : > { %10394 = vmatprep.subr.bf16.mxu0 %v15390_v61  ;;  %11469 = vmatprep.subr.bf16.mxu1 %v15393_v62  ;;  %v15481_v61 = vld [vmem:[%s17849_s14 + $0xbe8] ss:$16 sps:$4 sm:$0xff]  }
 0x1f8   : > { %v15484_v62 = vld [vmem:[%s17847_s18 + $0x28] ss:$196 sps:$4 sm:$0xff]  }
 0x1f9   : > { %10384 = vmatmul.mubr.bf16.vlgmr.msra.gmra.mrb[0].mxu0 %v15385_v60  ;;  %11459 = vmatmul.mubr.bf16.vlgmr.msra.gmra.mrb[0].mxu1 %v15385_v60  ;;  %v15478_v60 = vld [vmem:[%s17849_s14 + $0xbe0] ss:$16 sps:$4 sm:$0xff]  }
 0x1fa   : > { %10395 = vmatpush1.bf16.msra.mxu0 %v15388_v63  ;;  %11470 = vmatpush1.bf16.msra.mxu1 %v15391_v0  ;;  %v15489_v63 = vld [vmem:[%s17849_s14 + $0xc04] ss:$16 sps:$4 sm:$0xff]   ;;  %v15492_v0 = vld [vmem:[%s17849_s14 + $0xc0c] ss:$16 sps:$4 sm:$0xff]  }
 0x1fb   : > { %10396 = vmatprep.subr.bf16.mxu0 %v15396_v1  ;;  %11471 = vmatprep.subr.bf16.mxu1 %v15399_v2  ;;  %v15487_v1 = vld [vmem:[%s17849_s14 + $0xc00] ss:$16 sps:$4 sm:$0xff]   ;;  %v15490_v2 = vld [vmem:[%s17849_s14 + $0xc08] ss:$16 sps:$4 sm:$0xff]  }
 0x1fc   : > { %10426 = vmatprep.mubr.bf16.mxu0 %v15486_v3  ;;  %11501 = vmatprep.mubr.bf16.mxu1 %v15486_v3  ;;  %v15495_v3 = vld [vmem:[%s17849_s14 + $0xc24] ss:$16 sps:$4 sm:$0xff]  }
 0x1fe   : > { %10397 = vmatpush1.bf16.msra.mxu0 %v15394_v4  ;;  %11472 = vmatpush1.bf16.msra.mxu1 %v15397_v5  ;;  %v15498_v4 = vld [vmem:[%s17849_s14 + $0xc2c] ss:$16 sps:$4 sm:$0xff]  }
 0x1ff   : > { %10398 = vmatprep.subr.bf16.mxu0 %v15402_v6  ;;  %11473 = vmatprep.subr.bf16.mxu1 %v15405_v7  ;;  %v15585_v5 = vld [vmem:[%s17847_s18 + $0x34] ss:$196 sps:$4 sm:$0xff]  }
 0x200   : > { %v15493_v6 = vld [vmem:[%s17849_s14 + $0xc20] ss:$16 sps:$4 sm:$0xff]   ;;  %v15496_v7 = vld [vmem:[%s17849_s14 + $0xc28] ss:$16 sps:$4 sm:$0xff]  }
 0x202   : > { %10399 = vmatpush1.bf16.msra.mxu0 %v15400_v8  ;;  %11474 = vmatpush1.bf16.msra.mxu1 %v15403_v9  ;;  %v15501_v8 = vld [vmem:[%s17849_s14 + $0xc44] ss:$16 sps:$4 sm:$0xff]   ;;  %v15504_v9 = vld [vmem:[%s17849_s14 + $0xc4c] ss:$16 sps:$4 sm:$0xff]  }
 0x203   : > { %10400 = vmatprep.subr.bf16.mxu0 %v15408_v10  ;;  %11475 = vmatprep.subr.bf16.mxu1 %v15411_v11  ;;  %v15499_v10 = vld [vmem:[%s17849_s14 + $0xc40] ss:$16 sps:$4 sm:$0xff]   ;;  %v15502_v11 = vld [vmem:[%s17849_s14 + $0xc48] ss:$16 sps:$4 sm:$0xff]  }
 0x206   : > { %10401 = vmatpush1.bf16.msra.mxu0 %v15406_v12  ;;  %11476 = vmatpush1.bf16.msra.mxu1 %v15409_v13  ;;  %v15507_v12 = vld [vmem:[%s17849_s14 + $0xc64] ss:$16 sps:$4 sm:$0xff]   ;;  %v15510_v13 = vld [vmem:[%s17849_s14 + $0xc6c] ss:$16 sps:$4 sm:$0xff]  }
 0x207   : > { %10402 = vmatprep.subr.bf16.mxu0 %v15414_v14  ;;  %11477 = vmatprep.subr.bf16.mxu1 %v15417_v15  ;;  %v15505_v14 = vld [vmem:[%s17849_s14 + $0xc60] ss:$16 sps:$4 sm:$0xff]   ;;  %v15508_v15 = vld [vmem:[%s17849_s14 + $0xc68] ss:$16 sps:$4 sm:$0xff]  }
 0x20a   : > { %10403 = vmatpush1.bf16.msra.mxu0 %v15412_v16  ;;  %11478 = vmatpush1.bf16.msra.mxu1 %v15415_v17  ;;  %v15513_v16 = vld [vmem:[%s17849_s14 + $0xc84] ss:$16 sps:$4 sm:$0xff]   ;;  %v15516_v17 = vld [vmem:[%s17849_s14 + $0xc8c] ss:$16 sps:$4 sm:$0xff]  }
 0x20b   : > { %10404 = vmatprep.subr.bf16.mxu0 %v15420_v18  ;;  %11479 = vmatprep.subr.bf16.mxu1 %v15423_v19  ;;  %v15511_v18 = vld [vmem:[%s17849_s14 + $0xc80] ss:$16 sps:$4 sm:$0xff]   ;;  %v15514_v19 = vld [vmem:[%s17849_s14 + $0xc88] ss:$16 sps:$4 sm:$0xff]  }
 0x20e   : > { %10405 = vmatpush1.bf16.msra.mxu0 %v15418_v20  ;;  %11480 = vmatpush1.bf16.msra.mxu1 %v15421_v21  ;;  %v15519_v20 = vld [vmem:[%s17849_s14 + $0xca4] ss:$16 sps:$4 sm:$0xff]   ;;  %v15522_v21 = vld [vmem:[%s17849_s14 + $0xcac] ss:$16 sps:$4 sm:$0xff]  }
 0x20f   : > { %10406 = vmatprep.subr.bf16.mxu0 %v15426_v22  ;;  %11481 = vmatprep.subr.bf16.mxu1 %v15429_v23  ;;  %v15517_v22 = vld [vmem:[%s17849_s14 + $0xca0] ss:$16 sps:$4 sm:$0xff]   ;;  %v15520_v23 = vld [vmem:[%s17849_s14 + $0xca8] ss:$16 sps:$4 sm:$0xff]  }
 0x212   : > { %10407 = vmatpush1.bf16.msra.mxu0 %v15424_v24  ;;  %11482 = vmatpush1.bf16.msra.mxu1 %v15427_v25  ;;  %v15525_v24 = vld [vmem:[%s17849_s14 + $0xcc4] ss:$16 sps:$4 sm:$0xff]   ;;  %v15528_v25 = vld [vmem:[%s17849_s14 + $0xccc] ss:$16 sps:$4 sm:$0xff]  }
 0x213   : > { %10408 = vmatprep.subr.bf16.mxu0 %v15432_v26  ;;  %11483 = vmatprep.subr.bf16.mxu1 %v15435_v27  ;;  %v15523_v26 = vld [vmem:[%s17849_s14 + $0xcc0] ss:$16 sps:$4 sm:$0xff]   ;;  %v15526_v27 = vld [vmem:[%s17849_s14 + $0xcc8] ss:$16 sps:$4 sm:$0xff]  }
 0x216   : > { %10409 = vmatpush1.bf16.msra.mxu0 %v15430_v28  ;;  %11484 = vmatpush1.bf16.msra.mxu1 %v15433_v29  ;;  %v15531_v28 = vld [vmem:[%s17849_s14 + $0xce4] ss:$16 sps:$4 sm:$0xff]   ;;  %v15534_v29 = vld [vmem:[%s17849_s14 + $0xcec] ss:$16 sps:$4 sm:$0xff]  }
 0x217   : > { %10410 = vmatprep.subr.bf16.mxu0 %v15438_v30  ;;  %11485 = vmatprep.subr.bf16.mxu1 %v15441_v31  ;;  %v15529_v30 = vld [vmem:[%s17849_s14 + $0xce0] ss:$16 sps:$4 sm:$0xff]   ;;  %v15532_v31 = vld [vmem:[%s17849_s14 + $0xce8] ss:$16 sps:$4 sm:$0xff]  }
 0x21a   : > { %10411 = vmatpush1.bf16.msra.mxu0 %v15436_v32  ;;  %11486 = vmatpush1.bf16.msra.mxu1 %v15439_v33  ;;  %v15537_v32 = vld [vmem:[%s17849_s14 + $0xd04] ss:$16 sps:$4 sm:$0xff]   ;;  %v15540_v33 = vld [vmem:[%s17849_s14 + $0xd0c] ss:$16 sps:$4 sm:$0xff]  }
 0x21b   : > { %10412 = vmatprep.subr.bf16.mxu0 %v15444_v34  ;;  %11487 = vmatprep.subr.bf16.mxu1 %v15447_v35  ;;  %v15535_v34 = vld [vmem:[%s17849_s14 + $0xd00] ss:$16 sps:$4 sm:$0xff]   ;;  %v15538_v35 = vld [vmem:[%s17849_s14 + $0xd08] ss:$16 sps:$4 sm:$0xff]  }
 0x21e   : > { %10413 = vmatpush1.bf16.msra.mxu0 %v15442_v36  ;;  %11488 = vmatpush1.bf16.msra.mxu1 %v15445_v37  ;;  %v15543_v36 = vld [vmem:[%s17849_s14 + $0xd24] ss:$16 sps:$4 sm:$0xff]   ;;  %v15546_v37 = vld [vmem:[%s17849_s14 + $0xd2c] ss:$16 sps:$4 sm:$0xff]  }
 0x21f   : > { %10414 = vmatprep.subr.bf16.mxu0 %v15450_v38  ;;  %11489 = vmatprep.subr.bf16.mxu1 %v15453_v39  ;;  %v15541_v38 = vld [vmem:[%s17849_s14 + $0xd20] ss:$16 sps:$4 sm:$0xff]   ;;  %v15544_v39 = vld [vmem:[%s17849_s14 + $0xd28] ss:$16 sps:$4 sm:$0xff]  }
 0x222   : > { %10415 = vmatpush1.bf16.msra.mxu0 %v15448_v40  ;;  %11490 = vmatpush1.bf16.msra.mxu1 %v15451_v41  ;;  %v15549_v40 = vld [vmem:[%s17849_s14 + $0xd44] ss:$16 sps:$4 sm:$0xff]   ;;  %v15552_v41 = vld [vmem:[%s17849_s14 + $0xd4c] ss:$16 sps:$4 sm:$0xff]  }
 0x223   : > { %10416 = vmatprep.subr.bf16.mxu0 %v15456_v42  ;;  %11491 = vmatprep.subr.bf16.mxu1 %v15459_v43  ;;  %v15547_v42 = vld [vmem:[%s17849_s14 + $0xd40] ss:$16 sps:$4 sm:$0xff]   ;;  %v15550_v43 = vld [vmem:[%s17849_s14 + $0xd48] ss:$16 sps:$4 sm:$0xff]  }
 0x226   : > { %10417 = vmatpush1.bf16.msra.mxu0 %v15454_v44  ;;  %11492 = vmatpush1.bf16.msra.mxu1 %v15457_v45  ;;  %v15555_v44 = vld [vmem:[%s17849_s14 + $0xd64] ss:$16 sps:$4 sm:$0xff]   ;;  %v15558_v45 = vld [vmem:[%s17849_s14 + $0xd6c] ss:$16 sps:$4 sm:$0xff]  }
 0x227   : > { %10418 = vmatprep.subr.bf16.mxu0 %v15462_v46  ;;  %11493 = vmatprep.subr.bf16.mxu1 %v15465_v47  ;;  %v15553_v46 = vld [vmem:[%s17849_s14 + $0xd60] ss:$16 sps:$4 sm:$0xff]   ;;  %v15556_v47 = vld [vmem:[%s17849_s14 + $0xd68] ss:$16 sps:$4 sm:$0xff]  }
 0x22a   : > { %10419 = vmatpush1.bf16.msra.mxu0 %v15460_v48  ;;  %11494 = vmatpush1.bf16.msra.mxu1 %v15463_v49  ;;  %v15561_v48 = vld [vmem:[%s17849_s14 + $0xd84] ss:$16 sps:$4 sm:$0xff]   ;;  %v15564_v49 = vld [vmem:[%s17849_s14 + $0xd8c] ss:$16 sps:$4 sm:$0xff]  }
 0x22b   : > { %10420 = vmatprep.subr.bf16.mxu0 %v15468_v50  ;;  %11495 = vmatprep.subr.bf16.mxu1 %v15471_v51  ;;  %v15559_v50 = vld [vmem:[%s17849_s14 + $0xd80] ss:$16 sps:$4 sm:$0xff]   ;;  %v15562_v51 = vld [vmem:[%s17849_s14 + $0xd88] ss:$16 sps:$4 sm:$0xff]  }
 0x22e   : > { %10421 = vmatpush1.bf16.msra.mxu0 %v15466_v52  ;;  %11496 = vmatpush1.bf16.msra.mxu1 %v15469_v53  ;;  %v15567_v52 = vld [vmem:[%s17849_s14 + $0xda4] ss:$16 sps:$4 sm:$0xff]   ;;  %v15570_v53 = vld [vmem:[%s17849_s14 + $0xdac] ss:$16 sps:$4 sm:$0xff]  }
 0x22f   : > { %10422 = vmatprep.subr.bf16.mxu0 %v15474_v54  ;;  %11497 = vmatprep.subr.bf16.mxu1 %v15477_v55  ;;  %v15565_v54 = vld [vmem:[%s17849_s14 + $0xda0] ss:$16 sps:$4 sm:$0xff]   ;;  %v15568_v55 = vld [vmem:[%s17849_s14 + $0xda8] ss:$16 sps:$4 sm:$0xff]  }
 0x232   : > { %10423 = vmatpush1.bf16.msra.mxu0 %v15472_v56  ;;  %11498 = vmatpush1.bf16.msra.mxu1 %v15475_v57  ;;  %v15573_v56 = vld [vmem:[%s17849_s14 + $0xdc4] ss:$16 sps:$4 sm:$0xff]   ;;  %v15576_v57 = vld [vmem:[%s17849_s14 + $0xdcc] ss:$16 sps:$4 sm:$0xff]  }
 0x233   : > { %10424 = vmatprep.subr.bf16.mxu0 %v15480_v58  ;;  %11499 = vmatprep.subr.bf16.mxu1 %v15483_v59  ;;  %v15571_v58 = vld [vmem:[%s17849_s14 + $0xdc0] ss:$16 sps:$4 sm:$0xff]   ;;  %v15574_v59 = vld [vmem:[%s17849_s14 + $0xdc8] ss:$16 sps:$4 sm:$0xff]  }
 0x236   : > { %10425 = vmatpush1.bf16.msra.mxu0 %v15478_v60  ;;  %11500 = vmatpush1.bf16.msra.mxu1 %v15481_v61  ;;  %v15579_v60 = vld [vmem:[%s17849_s14 + $0xde4] ss:$16 sps:$4 sm:$0xff]   ;;  %v15582_v61 = vld [vmem:[%s17849_s14 + $0xdec] ss:$16 sps:$4 sm:$0xff]  }
 0x237   : > { %10437 = vmatprep.subr.bf16.mxu0 %v15489_v63  ;;  %11512 = vmatprep.subr.bf16.mxu1 %v15492_v0  ;;  %v15580_v63 = vld [vmem:[%s17849_s14 + $0xde8] ss:$16 sps:$4 sm:$0xff]  }
 0x238   : > { %v15583_v0 = vld [vmem:[%s17847_s18 + $0x30] ss:$196 sps:$4 sm:$0xff]  }
 0x239   : > { %10427 = vmatmul.mubr.bf16.vlgmr.msra.gmra.mrb[0].mxu0 %v15484_v62  ;;  %11502 = vmatmul.mubr.bf16.vlgmr.msra.gmra.mrb[0].mxu1 %v15484_v62  ;;  %v15577_v62 = vld [vmem:[%s17849_s14 + $0xde0] ss:$16 sps:$4 sm:$0xff]  }
 0x23a   : > { %10438 = vmatpush1.bf16.msra.mxu0 %v15487_v1  ;;  %11513 = vmatpush1.bf16.msra.mxu1 %v15490_v2  ;;  %v15588_v1 = vld [vmem:[%s17849_s14 + $0xe04] ss:$16 sps:$4 sm:$0xff]   ;;  %v15591_v2 = vld [vmem:[%s17849_s14 + $0xe0c] ss:$16 sps:$4 sm:$0xff]  }
 0x23b   : > { %10439 = vmatprep.subr.bf16.mxu0 %v15495_v3  ;;  %11514 = vmatprep.subr.bf16.mxu1 %v15498_v4  ;;  %v15586_v3 = vld [vmem:[%s17849_s14 + $0xe00] ss:$16 sps:$4 sm:$0xff]   ;;  %v15589_v4 = vld [vmem:[%s17849_s14 + $0xe08] ss:$16 sps:$4 sm:$0xff]  }
 0x23c   : > { %10469 = vmatprep.mubr.bf16.mxu0 %v15585_v5  ;;  %11544 = vmatprep.mubr.bf16.mxu1 %v15585_v5  ;;  %v15594_v5 = vld [vmem:[%s17849_s14 + $0xe24] ss:$16 sps:$4 sm:$0xff]  }
 0x23e   : > { %10440 = vmatpush1.bf16.msra.mxu0 %v15493_v6  ;;  %11515 = vmatpush1.bf16.msra.mxu1 %v15496_v7  ;;  %v15597_v6 = vld [vmem:[%s17849_s14 + $0xe2c] ss:$16 sps:$4 sm:$0xff]  }
 0x23f   : > { %10441 = vmatprep.subr.bf16.mxu0 %v15501_v8  ;;  %11516 = vmatprep.subr.bf16.mxu1 %v15504_v9  ;;  %v15684_v7 = vld [vmem:[%s17847_s18 + $0x3c] ss:$196 sps:$4 sm:$0xff]  }
 0x240   : > { %v15592_v8 = vld [vmem:[%s17849_s14 + $0xe20] ss:$16 sps:$4 sm:$0xff]   ;;  %v15595_v9 = vld [vmem:[%s17849_s14 + $0xe28] ss:$16 sps:$4 sm:$0xff]  }
 0x242   : > { %10442 = vmatpush1.bf16.msra.mxu0 %v15499_v10  ;;  %11517 = vmatpush1.bf16.msra.mxu1 %v15502_v11  ;;  %v15600_v10 = vld [vmem:[%s17849_s14 + $0xe44] ss:$16 sps:$4 sm:$0xff]   ;;  %v15603_v11 = vld [vmem:[%s17849_s14 + $0xe4c] ss:$16 sps:$4 sm:$0xff]  }
 0x243   : > { %10443 = vmatprep.subr.bf16.mxu0 %v15507_v12  ;;  %11518 = vmatprep.subr.bf16.mxu1 %v15510_v13  ;;  %v15598_v12 = vld [vmem:[%s17849_s14 + $0xe40] ss:$16 sps:$4 sm:$0xff]   ;;  %v15601_v13 = vld [vmem:[%s17849_s14 + $0xe48] ss:$16 sps:$4 sm:$0xff]  }
 0x246   : > { %10444 = vmatpush1.bf16.msra.mxu0 %v15505_v14  ;;  %11519 = vmatpush1.bf16.msra.mxu1 %v15508_v15  ;;  %v15606_v14 = vld [vmem:[%s17849_s14 + $0xe64] ss:$16 sps:$4 sm:$0xff]   ;;  %v15609_v15 = vld [vmem:[%s17849_s14 + $0xe6c] ss:$16 sps:$4 sm:$0xff]  }
 0x247   : > { %10445 = vmatprep.subr.bf16.mxu0 %v15513_v16  ;;  %11520 = vmatprep.subr.bf16.mxu1 %v15516_v17  ;;  %v15604_v16 = vld [vmem:[%s17849_s14 + $0xe60] ss:$16 sps:$4 sm:$0xff]   ;;  %v15607_v17 = vld [vmem:[%s17849_s14 + $0xe68] ss:$16 sps:$4 sm:$0xff]  }
 0x24a   : > { %10446 = vmatpush1.bf16.msra.mxu0 %v15511_v18  ;;  %11521 = vmatpush1.bf16.msra.mxu1 %v15514_v19  ;;  %v15612_v18 = vld [vmem:[%s17849_s14 + $0xe84] ss:$16 sps:$4 sm:$0xff]   ;;  %v15615_v19 = vld [vmem:[%s17849_s14 + $0xe8c] ss:$16 sps:$4 sm:$0xff]  }
 0x24b   : > { %10447 = vmatprep.subr.bf16.mxu0 %v15519_v20  ;;  %11522 = vmatprep.subr.bf16.mxu1 %v15522_v21  ;;  %v15610_v20 = vld [vmem:[%s17849_s14 + $0xe80] ss:$16 sps:$4 sm:$0xff]   ;;  %v15613_v21 = vld [vmem:[%s17849_s14 + $0xe88] ss:$16 sps:$4 sm:$0xff]  }
 0x24e   : > { %10448 = vmatpush1.bf16.msra.mxu0 %v15517_v22  ;;  %11523 = vmatpush1.bf16.msra.mxu1 %v15520_v23  ;;  %v15618_v22 = vld [vmem:[%s17849_s14 + $0xea4] ss:$16 sps:$4 sm:$0xff]   ;;  %v15621_v23 = vld [vmem:[%s17849_s14 + $0xeac] ss:$16 sps:$4 sm:$0xff]  }
 0x24f   : > { %10449 = vmatprep.subr.bf16.mxu0 %v15525_v24  ;;  %11524 = vmatprep.subr.bf16.mxu1 %v15528_v25  ;;  %v15616_v24 = vld [vmem:[%s17849_s14 + $0xea0] ss:$16 sps:$4 sm:$0xff]   ;;  %v15619_v25 = vld [vmem:[%s17849_s14 + $0xea8] ss:$16 sps:$4 sm:$0xff]  }
 0x252   : > { %10450 = vmatpush1.bf16.msra.mxu0 %v15523_v26  ;;  %11525 = vmatpush1.bf16.msra.mxu1 %v15526_v27  ;;  %v15624_v26 = vld [vmem:[%s17849_s14 + $0xec4] ss:$16 sps:$4 sm:$0xff]   ;;  %v15627_v27 = vld [vmem:[%s17849_s14 + $0xecc] ss:$16 sps:$4 sm:$0xff]  }
 0x253   : > { %10451 = vmatprep.subr.bf16.mxu0 %v15531_v28  ;;  %11526 = vmatprep.subr.bf16.mxu1 %v15534_v29  ;;  %v15622_v28 = vld [vmem:[%s17849_s14 + $0xec0] ss:$16 sps:$4 sm:$0xff]   ;;  %v15625_v29 = vld [vmem:[%s17849_s14 + $0xec8] ss:$16 sps:$4 sm:$0xff]  }
 0x256   : > { %10452 = vmatpush1.bf16.msra.mxu0 %v15529_v30  ;;  %11527 = vmatpush1.bf16.msra.mxu1 %v15532_v31  ;;  %v15630_v30 = vld [vmem:[%s17849_s14 + $0xee4] ss:$16 sps:$4 sm:$0xff]   ;;  %v15633_v31 = vld [vmem:[%s17849_s14 + $0xeec] ss:$16 sps:$4 sm:$0xff]  }
 0x257   : > { %10453 = vmatprep.subr.bf16.mxu0 %v15537_v32  ;;  %11528 = vmatprep.subr.bf16.mxu1 %v15540_v33  ;;  %v15628_v32 = vld [vmem:[%s17849_s14 + $0xee0] ss:$16 sps:$4 sm:$0xff]   ;;  %v15631_v33 = vld [vmem:[%s17849_s14 + $0xee8] ss:$16 sps:$4 sm:$0xff]  }
 0x25a   : > { %10454 = vmatpush1.bf16.msra.mxu0 %v15535_v34  ;;  %11529 = vmatpush1.bf16.msra.mxu1 %v15538_v35  ;;  %v15636_v34 = vld [vmem:[%s17849_s14 + $0xf04] ss:$16 sps:$4 sm:$0xff]   ;;  %v15639_v35 = vld [vmem:[%s17849_s14 + $0xf0c] ss:$16 sps:$4 sm:$0xff]  }
 0x25b   : > { %10455 = vmatprep.subr.bf16.mxu0 %v15543_v36  ;;  %11530 = vmatprep.subr.bf16.mxu1 %v15546_v37  ;;  %v15634_v36 = vld [vmem:[%s17849_s14 + $0xf00] ss:$16 sps:$4 sm:$0xff]   ;;  %v15637_v37 = vld [vmem:[%s17849_s14 + $0xf08] ss:$16 sps:$4 sm:$0xff]  }
 0x25e   : > { %10456 = vmatpush1.bf16.msra.mxu0 %v15541_v38  ;;  %11531 = vmatpush1.bf16.msra.mxu1 %v15544_v39  ;;  %v15642_v38 = vld [vmem:[%s17849_s14 + $0xf24] ss:$16 sps:$4 sm:$0xff]   ;;  %v15645_v39 = vld [vmem:[%s17849_s14 + $0xf2c] ss:$16 sps:$4 sm:$0xff]  }
 0x25f   : > { %10457 = vmatprep.subr.bf16.mxu0 %v15549_v40  ;;  %11532 = vmatprep.subr.bf16.mxu1 %v15552_v41  ;;  %v15640_v40 = vld [vmem:[%s17849_s14 + $0xf20] ss:$16 sps:$4 sm:$0xff]   ;;  %v15643_v41 = vld [vmem:[%s17849_s14 + $0xf28] ss:$16 sps:$4 sm:$0xff]  }
 0x262   : > { %10458 = vmatpush1.bf16.msra.mxu0 %v15547_v42  ;;  %11533 = vmatpush1.bf16.msra.mxu1 %v15550_v43  ;;  %v15648_v42 = vld [vmem:[%s17849_s14 + $0xf44] ss:$16 sps:$4 sm:$0xff]   ;;  %v15651_v43 = vld [vmem:[%s17849_s14 + $0xf4c] ss:$16 sps:$4 sm:$0xff]  }
 0x263   : > { %10459 = vmatprep.subr.bf16.mxu0 %v15555_v44  ;;  %11534 = vmatprep.subr.bf16.mxu1 %v15558_v45  ;;  %v15646_v44 = vld [vmem:[%s17849_s14 + $0xf40] ss:$16 sps:$4 sm:$0xff]   ;;  %v15649_v45 = vld [vmem:[%s17849_s14 + $0xf48] ss:$16 sps:$4 sm:$0xff]  }
 0x266   : > { %10460 = vmatpush1.bf16.msra.mxu0 %v15553_v46  ;;  %11535 = vmatpush1.bf16.msra.mxu1 %v15556_v47  ;;  %v15654_v46 = vld [vmem:[%s17849_s14 + $0xf64] ss:$16 sps:$4 sm:$0xff]   ;;  %v15657_v47 = vld [vmem:[%s17849_s14 + $0xf6c] ss:$16 sps:$4 sm:$0xff]  }
 0x267   : > { %10461 = vmatprep.subr.bf16.mxu0 %v15561_v48  ;;  %11536 = vmatprep.subr.bf16.mxu1 %v15564_v49  ;;  %v15652_v48 = vld [vmem:[%s17849_s14 + $0xf60] ss:$16 sps:$4 sm:$0xff]   ;;  %v15655_v49 = vld [vmem:[%s17849_s14 + $0xf68] ss:$16 sps:$4 sm:$0xff]  }
 0x26a   : > { %10462 = vmatpush1.bf16.msra.mxu0 %v15559_v50  ;;  %11537 = vmatpush1.bf16.msra.mxu1 %v15562_v51  ;;  %v15660_v50 = vld [vmem:[%s17849_s14 + $0xf84] ss:$16 sps:$4 sm:$0xff]   ;;  %v15663_v51 = vld [vmem:[%s17849_s14 + $0xf8c] ss:$16 sps:$4 sm:$0xff]  }
 0x26b   : > { %10463 = vmatprep.subr.bf16.mxu0 %v15567_v52  ;;  %11538 = vmatprep.subr.bf16.mxu1 %v15570_v53  ;;  %v15658_v52 = vld [vmem:[%s17849_s14 + $0xf80] ss:$16 sps:$4 sm:$0xff]   ;;  %v15661_v53 = vld [vmem:[%s17849_s14 + $0xf88] ss:$16 sps:$4 sm:$0xff]  }
 0x26e   : > { %10464 = vmatpush1.bf16.msra.mxu0 %v15565_v54  ;;  %11539 = vmatpush1.bf16.msra.mxu1 %v15568_v55  ;;  %v15666_v54 = vld [vmem:[%s17849_s14 + $0xfa4] ss:$16 sps:$4 sm:$0xff]   ;;  %v15669_v55 = vld [vmem:[%s17849_s14 + $0xfac] ss:$16 sps:$4 sm:$0xff]  }
 0x26f   : > { %10465 = vmatprep.subr.bf16.mxu0 %v15573_v56  ;;  %11540 = vmatprep.subr.bf16.mxu1 %v15576_v57  ;;  %v15664_v56 = vld [vmem:[%s17849_s14 + $0xfa0] ss:$16 sps:$4 sm:$0xff]   ;;  %v15667_v57 = vld [vmem:[%s17849_s14 + $0xfa8] ss:$16 sps:$4 sm:$0xff]  }
 0x272   : > { %10466 = vmatpush1.bf16.msra.mxu0 %v15571_v58  ;;  %11541 = vmatpush1.bf16.msra.mxu1 %v15574_v59  ;;  %v15672_v58 = vld [vmem:[%s17849_s14 + $0xfc4] ss:$16 sps:$4 sm:$0xff]   ;;  %v15675_v59 = vld [vmem:[%s17849_s14 + $0xfcc] ss:$16 sps:$4 sm:$0xff]  }
 0x273   : > { %10467 = vmatprep.subr.bf16.mxu0 %v15579_v60  ;;  %11542 = vmatprep.subr.bf16.mxu1 %v15582_v61  ;;  %v15670_v60 = vld [vmem:[%s17849_s14 + $0xfc0] ss:$16 sps:$4 sm:$0xff]   ;;  %v15673_v61 = vld [vmem:[%s17849_s14 + $0xfc8] ss:$16 sps:$4 sm:$0xff]  }
 0x276   : > { %10468 = vmatpush1.bf16.msra.mxu0 %v15577_v62  ;;  %11543 = vmatpush1.bf16.msra.mxu1 %v15580_v63  ;;  %v15678_v62 = vld [vmem:[%s17849_s14 + $0xfe4] ss:$16 sps:$4 sm:$0xff]   ;;  %v15681_v63 = vld [vmem:[%s17849_s14 + $0xfec] ss:$16 sps:$4 sm:$0xff]  }
 0x277   : > { %10480 = vmatprep.subr.bf16.mxu0 %v15588_v1  ;;  %11555 = vmatprep.subr.bf16.mxu1 %v15591_v2  ;;  %v15679_v1 = vld [vmem:[%s17849_s14 + $0xfe8] ss:$16 sps:$4 sm:$0xff]  }
 0x278   : > { %v15682_v2 = vld [vmem:[%s17847_s18 + $0x38] ss:$196 sps:$4 sm:$0xff]  }
 0x279   : > { %10470 = vmatmul.mubr.bf16.vlgmr.msra.gmra.mrb[0].mxu0 %v15583_v0  ;;  %11545 = vmatmul.mubr.bf16.vlgmr.msra.gmra.mrb[0].mxu1 %v15583_v0  ;;  %v15676_v0 = vld [vmem:[%s17849_s14 + $0xfe0] ss:$16 sps:$4 sm:$0xff]  }
 0x27a   : > { %10481 = vmatpush1.bf16.msra.mxu0 %v15586_v3  ;;  %11556 = vmatpush1.bf16.msra.mxu1 %v15589_v4  ;;  %v15687_v3 = vld [vmem:[%s17849_s14 + $0x1004] ss:$16 sps:$4 sm:$0xff]   ;;  %v15690_v4 = vld [vmem:[%s17849_s14 + $0x100c] ss:$16 sps:$4 sm:$0xff]  }
 0x27b   : > { %10482 = vmatprep.subr.bf16.mxu0 %v15594_v5  ;;  %11557 = vmatprep.subr.bf16.mxu1 %v15597_v6  ;;  %v15685_v5 = vld [vmem:[%s17849_s14 + $0x1000] ss:$16 sps:$4 sm:$0xff]   ;;  %v15688_v6 = vld [vmem:[%s17849_s14 + $0x1008] ss:$16 sps:$4 sm:$0xff]  }
 0x27c   : > { %10512 = vmatprep.mubr.bf16.mxu0 %v15684_v7  ;;  %11587 = vmatprep.mubr.bf16.mxu1 %v15684_v7  ;;  %v15693_v7 = vld [vmem:[%s17849_s14 + $0x1024] ss:$16 sps:$4 sm:$0xff]  }
 0x27e   : > { %10483 = vmatpush1.bf16.msra.mxu0 %v15592_v8  ;;  %11558 = vmatpush1.bf16.msra.mxu1 %v15595_v9  ;;  %v15696_v8 = vld [vmem:[%s17849_s14 + $0x102c] ss:$16 sps:$4 sm:$0xff]  }
 0x27f   : > { %10484 = vmatprep.subr.bf16.mxu0 %v15600_v10  ;;  %11559 = vmatprep.subr.bf16.mxu1 %v15603_v11  ;;  %v15783_v9 = vld [vmem:[%s17847_s18 + $0x44] ss:$196 sps:$4 sm:$0xff]  }
 0x280   : > { %v15691_v10 = vld [vmem:[%s17849_s14 + $0x1020] ss:$16 sps:$4 sm:$0xff]   ;;  %v15694_v11 = vld [vmem:[%s17849_s14 + $0x1028] ss:$16 sps:$4 sm:$0xff]  }
 0x282   : > { %10485 = vmatpush1.bf16.msra.mxu0 %v15598_v12  ;;  %11560 = vmatpush1.bf16.msra.mxu1 %v15601_v13  ;;  %v15699_v12 = vld [vmem:[%s17849_s14 + $0x1044] ss:$16 sps:$4 sm:$0xff]   ;;  %v15702_v13 = vld [vmem:[%s17849_s14 + $0x104c] ss:$16 sps:$4 sm:$0xff]  }
 0x283   : > { %10486 = vmatprep.subr.bf16.mxu0 %v15606_v14  ;;  %11561 = vmatprep.subr.bf16.mxu1 %v15609_v15  ;;  %v15697_v14 = vld [vmem:[%s17849_s14 + $0x1040] ss:$16 sps:$4 sm:$0xff]   ;;  %v15700_v15 = vld [vmem:[%s17849_s14 + $0x1048] ss:$16 sps:$4 sm:$0xff]  }
 0x286   : > { %10487 = vmatpush1.bf16.msra.mxu0 %v15604_v16  ;;  %11562 = vmatpush1.bf16.msra.mxu1 %v15607_v17  ;;  %v15705_v16 = vld [vmem:[%s17849_s14 + $0x1064] ss:$16 sps:$4 sm:$0xff]   ;;  %v15708_v17 = vld [vmem:[%s17849_s14 + $0x106c] ss:$16 sps:$4 sm:$0xff]  }
 0x287   : > { %10488 = vmatprep.subr.bf16.mxu0 %v15612_v18  ;;  %11563 = vmatprep.subr.bf16.mxu1 %v15615_v19  ;;  %v15703_v18 = vld [vmem:[%s17849_s14 + $0x1060] ss:$16 sps:$4 sm:$0xff]   ;;  %v15706_v19 = vld [vmem:[%s17849_s14 + $0x1068] ss:$16 sps:$4 sm:$0xff]  }
 0x28a   : > { %10489 = vmatpush1.bf16.msra.mxu0 %v15610_v20  ;;  %11564 = vmatpush1.bf16.msra.mxu1 %v15613_v21  ;;  %v15711_v20 = vld [vmem:[%s17849_s14 + $0x1084] ss:$16 sps:$4 sm:$0xff]   ;;  %v15714_v21 = vld [vmem:[%s17849_s14 + $0x108c] ss:$16 sps:$4 sm:$0xff]  }
 0x28b   : > { %10490 = vmatprep.subr.bf16.mxu0 %v15618_v22  ;;  %11565 = vmatprep.subr.bf16.mxu1 %v15621_v23  ;;  %v15709_v22 = vld [vmem:[%s17849_s14 + $0x1080] ss:$16 sps:$4 sm:$0xff]   ;;  %v15712_v23 = vld [vmem:[%s17849_s14 + $0x1088] ss:$16 sps:$4 sm:$0xff]  }
 0x28e   : > { %10491 = vmatpush1.bf16.msra.mxu0 %v15616_v24  ;;  %11566 = vmatpush1.bf16.msra.mxu1 %v15619_v25  ;;  %v15717_v24 = vld [vmem:[%s17849_s14 + $0x10a4] ss:$16 sps:$4 sm:$0xff]   ;;  %v15720_v25 = vld [vmem:[%s17849_s14 + $0x10ac] ss:$16 sps:$4 sm:$0xff]  }
 0x28f   : > { %10492 = vmatprep.subr.bf16.mxu0 %v15624_v26  ;;  %11567 = vmatprep.subr.bf16.mxu1 %v15627_v27  ;;  %v15715_v26 = vld [vmem:[%s17849_s14 + $0x10a0] ss:$16 sps:$4 sm:$0xff]   ;;  %v15718_v27 = vld [vmem:[%s17849_s14 + $0x10a8] ss:$16 sps:$4 sm:$0xff]  }
 0x292   : > { %10493 = vmatpush1.bf16.msra.mxu0 %v15622_v28  ;;  %11568 = vmatpush1.bf16.msra.mxu1 %v15625_v29  ;;  %v15723_v28 = vld [vmem:[%s17849_s14 + $0x10c4] ss:$16 sps:$4 sm:$0xff]   ;;  %v15726_v29 = vld [vmem:[%s17849_s14 + $0x10cc] ss:$16 sps:$4 sm:$0xff]  }
 0x293   : > { %10494 = vmatprep.subr.bf16.mxu0 %v15630_v30  ;;  %11569 = vmatprep.subr.bf16.mxu1 %v15633_v31  ;;  %v15721_v30 = vld [vmem:[%s17849_s14 + $0x10c0] ss:$16 sps:$4 sm:$0xff]   ;;  %v15724_v31 = vld [vmem:[%s17849_s14 + $0x10c8] ss:$16 sps:$4 sm:$0xff]  }
 0x296   : > { %10495 = vmatpush1.bf16.msra.mxu0 %v15628_v32  ;;  %11570 = vmatpush1.bf16.msra.mxu1 %v15631_v33  ;;  %v15729_v32 = vld [vmem:[%s17849_s14 + $0x10e4] ss:$16 sps:$4 sm:$0xff]   ;;  %v15732_v33 = vld [vmem:[%s17849_s14 + $0x10ec] ss:$16 sps:$4 sm:$0xff]  }
 0x297   : > { %10496 = vmatprep.subr.bf16.mxu0 %v15636_v34  ;;  %11571 = vmatprep.subr.bf16.mxu1 %v15639_v35  ;;  %v15727_v34 = vld [vmem:[%s17849_s14 + $0x10e0] ss:$16 sps:$4 sm:$0xff]   ;;  %v15730_v35 = vld [vmem:[%s17849_s14 + $0x10e8] ss:$16 sps:$4 sm:$0xff]  }
 0x29a   : > { %10497 = vmatpush1.bf16.msra.mxu0 %v15634_v36  ;;  %11572 = vmatpush1.bf16.msra.mxu1 %v15637_v37  ;;  %v15735_v36 = vld [vmem:[%s17849_s14 + $0x1104] ss:$16 sps:$4 sm:$0xff]   ;;  %v15738_v37 = vld [vmem:[%s17849_s14 + $0x110c] ss:$16 sps:$4 sm:$0xff]  }
 0x29b   : > { %10498 = vmatprep.subr.bf16.mxu0 %v15642_v38  ;;  %11573 = vmatprep.subr.bf16.mxu1 %v15645_v39  ;;  %v15733_v38 = vld [vmem:[%s17849_s14 + $0x1100] ss:$16 sps:$4 sm:$0xff]   ;;  %v15736_v39 = vld [vmem:[%s17849_s14 + $0x1108] ss:$16 sps:$4 sm:$0xff]  }
 0x29e   : > { %10499 = vmatpush1.bf16.msra.mxu0 %v15640_v40  ;;  %11574 = vmatpush1.bf16.msra.mxu1 %v15643_v41  ;;  %v15741_v40 = vld [vmem:[%s17849_s14 + $0x1124] ss:$16 sps:$4 sm:$0xff]   ;;  %v15744_v41 = vld [vmem:[%s17849_s14 + $0x112c] ss:$16 sps:$4 sm:$0xff]  }
 0x29f   : > { %10500 = vmatprep.subr.bf16.mxu0 %v15648_v42  ;;  %11575 = vmatprep.subr.bf16.mxu1 %v15651_v43  ;;  %v15739_v42 = vld [vmem:[%s17849_s14 + $0x1120] ss:$16 sps:$4 sm:$0xff]   ;;  %v15742_v43 = vld [vmem:[%s17849_s14 + $0x1128] ss:$16 sps:$4 sm:$0xff]  }
 0x2a2   : > { %10501 = vmatpush1.bf16.msra.mxu0 %v15646_v44  ;;  %11576 = vmatpush1.bf16.msra.mxu1 %v15649_v45  ;;  %v15747_v44 = vld [vmem:[%s17849_s14 + $0x1144] ss:$16 sps:$4 sm:$0xff]   ;;  %v15750_v45 = vld [vmem:[%s17849_s14 + $0x114c] ss:$16 sps:$4 sm:$0xff]  }
 0x2a3   : > { %10502 = vmatprep.subr.bf16.mxu0 %v15654_v46  ;;  %11577 = vmatprep.subr.bf16.mxu1 %v15657_v47  ;;  %v15745_v46 = vld [vmem:[%s17849_s14 + $0x1140] ss:$16 sps:$4 sm:$0xff]   ;;  %v15748_v47 = vld [vmem:[%s17849_s14 + $0x1148] ss:$16 sps:$4 sm:$0xff]  }
 0x2a6   : > { %10503 = vmatpush1.bf16.msra.mxu0 %v15652_v48  ;;  %11578 = vmatpush1.bf16.msra.mxu1 %v15655_v49  ;;  %v15753_v48 = vld [vmem:[%s17849_s14 + $0x1164] ss:$16 sps:$4 sm:$0xff]   ;;  %v15756_v49 = vld [vmem:[%s17849_s14 + $0x116c] ss:$16 sps:$4 sm:$0xff]  }
 0x2a7   : > { %10504 = vmatprep.subr.bf16.mxu0 %v15660_v50  ;;  %11579 = vmatprep.subr.bf16.mxu1 %v15663_v51  ;;  %v15751_v50 = vld [vmem:[%s17849_s14 + $0x1160] ss:$16 sps:$4 sm:$0xff]   ;;  %v15754_v51 = vld [vmem:[%s17849_s14 + $0x1168] ss:$16 sps:$4 sm:$0xff]  }
 0x2aa   : > { %10505 = vmatpush1.bf16.msra.mxu0 %v15658_v52  ;;  %11580 = vmatpush1.bf16.msra.mxu1 %v15661_v53  ;;  %v15759_v52 = vld [vmem:[%s17849_s14 + $0x1184] ss:$16 sps:$4 sm:$0xff]   ;;  %v15762_v53 = vld [vmem:[%s17849_s14 + $0x118c] ss:$16 sps:$4 sm:$0xff]  }
 0x2ab   : > { %10506 = vmatprep.subr.bf16.mxu0 %v15666_v54  ;;  %11581 = vmatprep.subr.bf16.mxu1 %v15669_v55  ;;  %v15757_v54 = vld [vmem:[%s17849_s14 + $0x1180] ss:$16 sps:$4 sm:$0xff]   ;;  %v15760_v55 = vld [vmem:[%s17849_s14 + $0x1188] ss:$16 sps:$4 sm:$0xff]  }
 0x2ae   : > { %10507 = vmatpush1.bf16.msra.mxu0 %v15664_v56  ;;  %11582 = vmatpush1.bf16.msra.mxu1 %v15667_v57  ;;  %v15765_v56 = vld [vmem:[%s17849_s14 + $0x11a4] ss:$16 sps:$4 sm:$0xff]   ;;  %v15768_v57 = vld [vmem:[%s17849_s14 + $0x11ac] ss:$16 sps:$4 sm:$0xff]  }
 0x2af   : > { %10508 = vmatprep.subr.bf16.mxu0 %v15672_v58  ;;  %11583 = vmatprep.subr.bf16.mxu1 %v15675_v59  ;;  %v15763_v58 = vld [vmem:[%s17849_s14 + $0x11a0] ss:$16 sps:$4 sm:$0xff]   ;;  %v15766_v59 = vld [vmem:[%s17849_s14 + $0x11a8] ss:$16 sps:$4 sm:$0xff]  }
 0x2b2   : > { %10509 = vmatpush1.bf16.msra.mxu0 %v15670_v60  ;;  %11584 = vmatpush1.bf16.msra.mxu1 %v15673_v61  ;;  %v15771_v60 = vld [vmem:[%s17849_s14 + $0x11c4] ss:$16 sps:$4 sm:$0xff]   ;;  %v15774_v61 = vld [vmem:[%s17849_s14 + $0x11cc] ss:$16 sps:$4 sm:$0xff]  }
 0x2b3   : > { %10510 = vmatprep.subr.bf16.mxu0 %v15678_v62  ;;  %11585 = vmatprep.subr.bf16.mxu1 %v15681_v63  ;;  %v15769_v62 = vld [vmem:[%s17849_s14 + $0x11c0] ss:$16 sps:$4 sm:$0xff]   ;;  %v15772_v63 = vld [vmem:[%s17849_s14 + $0x11c8] ss:$16 sps:$4 sm:$0xff]  }
 0x2b6   : > { %10511 = vmatpush1.bf16.msra.mxu0 %v15676_v0  ;;  %11586 = vmatpush1.bf16.msra.mxu1 %v15679_v1  ;;  %v15777_v0 = vld [vmem:[%s17849_s14 + $0x11e4] ss:$16 sps:$4 sm:$0xff]   ;;  %v15780_v1 = vld [vmem:[%s17849_s14 + $0x11ec] ss:$16 sps:$4 sm:$0xff]  }
 0x2b7   : > { %10523 = vmatprep.subr.bf16.mxu0 %v15687_v3  ;;  %11598 = vmatprep.subr.bf16.mxu1 %v15690_v4  ;;  %v15778_v3 = vld [vmem:[%s17849_s14 + $0x11e8] ss:$16 sps:$4 sm:$0xff]  }
 0x2b8   : > { %v15781_v4 = vld [vmem:[%s17847_s18 + $0x40] ss:$196 sps:$4 sm:$0xff]  }
 0x2b9   : > { %10513 = vmatmul.mubr.bf16.vlgmr.msra.gmra.mrb[0].mxu0 %v15682_v2  ;;  %11588 = vmatmul.mubr.bf16.vlgmr.msra.gmra.mrb[0].mxu1 %v15682_v2  ;;  %v15775_v2 = vld [vmem:[%s17849_s14 + $0x11e0] ss:$16 sps:$4 sm:$0xff]  }
 0x2ba   : > { %10524 = vmatpush1.bf16.msra.mxu0 %v15685_v5  ;;  %11599 = vmatpush1.bf16.msra.mxu1 %v15688_v6  ;;  %v15786_v5 = vld [vmem:[%s17849_s14 + $0x1204] ss:$16 sps:$4 sm:$0xff]   ;;  %v15789_v6 = vld [vmem:[%s17849_s14 + $0x120c] ss:$16 sps:$4 sm:$0xff]  }
 0x2bb   : > { %10525 = vmatprep.subr.bf16.mxu0 %v15693_v7  ;;  %11600 = vmatprep.subr.bf16.mxu1 %v15696_v8  ;;  %v15784_v7 = vld [vmem:[%s17849_s14 + $0x1200] ss:$16 sps:$4 sm:$0xff]   ;;  %v15787_v8 = vld [vmem:[%s17849_s14 + $0x1208] ss:$16 sps:$4 sm:$0xff]  }
 0x2bc   : > { %10555 = vmatprep.mubr.bf16.mxu0 %v15783_v9  ;;  %11630 = vmatprep.mubr.bf16.mxu1 %v15783_v9  ;;  %v15792_v9 = vld [vmem:[%s17849_s14 + $0x1224] ss:$16 sps:$4 sm:$0xff]  }
 0x2be   : > { %10526 = vmatpush1.bf16.msra.mxu0 %v15691_v10  ;;  %11601 = vmatpush1.bf16.msra.mxu1 %v15694_v11  ;;  %v15795_v10 = vld [vmem:[%s17849_s14 + $0x122c] ss:$16 sps:$4 sm:$0xff]  }
 0x2bf   : > { %10527 = vmatprep.subr.bf16.mxu0 %v15699_v12  ;;  %11602 = vmatprep.subr.bf16.mxu1 %v15702_v13  ;;  %v15882_v11 = vld [vmem:[%s17847_s18 + $0x4c] ss:$196 sps:$4 sm:$0xff]  }
 0x2c0   : > { %v15790_v12 = vld [vmem:[%s17849_s14 + $0x1220] ss:$16 sps:$4 sm:$0xff]   ;;  %v15793_v13 = vld [vmem:[%s17849_s14 + $0x1228] ss:$16 sps:$4 sm:$0xff]  }
 0x2c2   : > { %10528 = vmatpush1.bf16.msra.mxu0 %v15697_v14  ;;  %11603 = vmatpush1.bf16.msra.mxu1 %v15700_v15  ;;  %v15798_v14 = vld [vmem:[%s17849_s14 + $0x1244] ss:$16 sps:$4 sm:$0xff]   ;;  %v15801_v15 = vld [vmem:[%s17849_s14 + $0x124c] ss:$16 sps:$4 sm:$0xff]  }
 0x2c3   : > { %10529 = vmatprep.subr.bf16.mxu0 %v15705_v16  ;;  %11604 = vmatprep.subr.bf16.mxu1 %v15708_v17  ;;  %v15796_v16 = vld [vmem:[%s17849_s14 + $0x1240] ss:$16 sps:$4 sm:$0xff]   ;;  %v15799_v17 = vld [vmem:[%s17849_s14 + $0x1248] ss:$16 sps:$4 sm:$0xff]  }
 0x2c6   : > { %10530 = vmatpush1.bf16.msra.mxu0 %v15703_v18  ;;  %11605 = vmatpush1.bf16.msra.mxu1 %v15706_v19  ;;  %v15804_v18 = vld [vmem:[%s17849_s14 + $0x1264] ss:$16 sps:$4 sm:$0xff]   ;;  %v15807_v19 = vld [vmem:[%s17849_s14 + $0x126c] ss:$16 sps:$4 sm:$0xff]  }
 0x2c7   : > { %10531 = vmatprep.subr.bf16.mxu0 %v15711_v20  ;;  %11606 = vmatprep.subr.bf16.mxu1 %v15714_v21  ;;  %v15802_v20 = vld [vmem:[%s17849_s14 + $0x1260] ss:$16 sps:$4 sm:$0xff]   ;;  %v15805_v21 = vld [vmem:[%s17849_s14 + $0x1268] ss:$16 sps:$4 sm:$0xff]  }
 0x2ca   : > { %10532 = vmatpush1.bf16.msra.mxu0 %v15709_v22  ;;  %11607 = vmatpush1.bf16.msra.mxu1 %v15712_v23  ;;  %v15810_v22 = vld [vmem:[%s17849_s14 + $0x1284] ss:$16 sps:$4 sm:$0xff]   ;;  %v15813_v23 = vld [vmem:[%s17849_s14 + $0x128c] ss:$16 sps:$4 sm:$0xff]  }
 0x2cb   : > { %10533 = vmatprep.subr.bf16.mxu0 %v15717_v24  ;;  %11608 = vmatprep.subr.bf16.mxu1 %v15720_v25  ;;  %v15808_v24 = vld [vmem:[%s17849_s14 + $0x1280] ss:$16 sps:$4 sm:$0xff]   ;;  %v15811_v25 = vld [vmem:[%s17849_s14 + $0x1288] ss:$16 sps:$4 sm:$0xff]  }
 0x2ce   : > { %10534 = vmatpush1.bf16.msra.mxu0 %v15715_v26  ;;  %11609 = vmatpush1.bf16.msra.mxu1 %v15718_v27  ;;  %v15816_v26 = vld [vmem:[%s17849_s14 + $0x12a4] ss:$16 sps:$4 sm:$0xff]   ;;  %v15819_v27 = vld [vmem:[%s17849_s14 + $0x12ac] ss:$16 sps:$4 sm:$0xff]  }
 0x2cf   : > { %10535 = vmatprep.subr.bf16.mxu0 %v15723_v28  ;;  %11610 = vmatprep.subr.bf16.mxu1 %v15726_v29  ;;  %v15814_v28 = vld [vmem:[%s17849_s14 + $0x12a0] ss:$16 sps:$4 sm:$0xff]   ;;  %v15817_v29 = vld [vmem:[%s17849_s14 + $0x12a8] ss:$16 sps:$4 sm:$0xff]  }
 0x2d2   : > { %10536 = vmatpush1.bf16.msra.mxu0 %v15721_v30  ;;  %11611 = vmatpush1.bf16.msra.mxu1 %v15724_v31  ;;  %v15822_v30 = vld [vmem:[%s17849_s14 + $0x12c4] ss:$16 sps:$4 sm:$0xff]   ;;  %v15825_v31 = vld [vmem:[%s17849_s14 + $0x12cc] ss:$16 sps:$4 sm:$0xff]  }
 0x2d3   : > { %10537 = vmatprep.subr.bf16.mxu0 %v15729_v32  ;;  %11612 = vmatprep.subr.bf16.mxu1 %v15732_v33  ;;  %v15820_v32 = vld [vmem:[%s17849_s14 + $0x12c0] ss:$16 sps:$4 sm:$0xff]   ;;  %v15823_v33 = vld [vmem:[%s17849_s14 + $0x12c8] ss:$16 sps:$4 sm:$0xff]  }
 0x2d6   : > { %10538 = vmatpush1.bf16.msra.mxu0 %v15727_v34  ;;  %11613 = vmatpush1.bf16.msra.mxu1 %v15730_v35  ;;  %v15828_v34 = vld [vmem:[%s17849_s14 + $0x12e4] ss:$16 sps:$4 sm:$0xff]   ;;  %v15831_v35 = vld [vmem:[%s17849_s14 + $0x12ec] ss:$16 sps:$4 sm:$0xff]  }
 0x2d7   : > { %10539 = vmatprep.subr.bf16.mxu0 %v15735_v36  ;;  %11614 = vmatprep.subr.bf16.mxu1 %v15738_v37  ;;  %v15826_v36 = vld [vmem:[%s17849_s14 + $0x12e0] ss:$16 sps:$4 sm:$0xff]   ;;  %v15829_v37 = vld [vmem:[%s17849_s14 + $0x12e8] ss:$16 sps:$4 sm:$0xff]  }
 0x2da   : > { %10540 = vmatpush1.bf16.msra.mxu0 %v15733_v38  ;;  %11615 = vmatpush1.bf16.msra.mxu1 %v15736_v39  ;;  %v15834_v38 = vld [vmem:[%s17849_s14 + $0x1304] ss:$16 sps:$4 sm:$0xff]   ;;  %v15837_v39 = vld [vmem:[%s17849_s14 + $0x130c] ss:$16 sps:$4 sm:$0xff]  }
 0x2db   : > { %10541 = vmatprep.subr.bf16.mxu0 %v15741_v40  ;;  %11616 = vmatprep.subr.bf16.mxu1 %v15744_v41  ;;  %v15832_v40 = vld [vmem:[%s17849_s14 + $0x1300] ss:$16 sps:$4 sm:$0xff]   ;;  %v15835_v41 = vld [vmem:[%s17849_s14 + $0x1308] ss:$16 sps:$4 sm:$0xff]  }
 0x2de   : > { %10542 = vmatpush1.bf16.msra.mxu0 %v15739_v42  ;;  %11617 = vmatpush1.bf16.msra.mxu1 %v15742_v43  ;;  %v15840_v42 = vld [vmem:[%s17849_s14 + $0x1324] ss:$16 sps:$4 sm:$0xff]   ;;  %v15843_v43 = vld [vmem:[%s17849_s14 + $0x132c] ss:$16 sps:$4 sm:$0xff]  }
 0x2df   : > { %10543 = vmatprep.subr.bf16.mxu0 %v15747_v44  ;;  %11618 = vmatprep.subr.bf16.mxu1 %v15750_v45  ;;  %v15838_v44 = vld [vmem:[%s17849_s14 + $0x1320] ss:$16 sps:$4 sm:$0xff]   ;;  %v15841_v45 = vld [vmem:[%s17849_s14 + $0x1328] ss:$16 sps:$4 sm:$0xff]  }
 0x2e2   : > { %10544 = vmatpush1.bf16.msra.mxu0 %v15745_v46  ;;  %11619 = vmatpush1.bf16.msra.mxu1 %v15748_v47  ;;  %v15846_v46 = vld [vmem:[%s17849_s14 + $0x1344] ss:$16 sps:$4 sm:$0xff]   ;;  %v15849_v47 = vld [vmem:[%s17849_s14 + $0x134c] ss:$16 sps:$4 sm:$0xff]  }
 0x2e3   : > { %10545 = vmatprep.subr.bf16.mxu0 %v15753_v48  ;;  %11620 = vmatprep.subr.bf16.mxu1 %v15756_v49  ;;  %v15844_v48 = vld [vmem:[%s17849_s14 + $0x1340] ss:$16 sps:$4 sm:$0xff]   ;;  %v15847_v49 = vld [vmem:[%s17849_s14 + $0x1348] ss:$16 sps:$4 sm:$0xff]  }
 0x2e6   : > { %10546 = vmatpush1.bf16.msra.mxu0 %v15751_v50  ;;  %11621 = vmatpush1.bf16.msra.mxu1 %v15754_v51  ;;  %v15852_v50 = vld [vmem:[%s17849_s14 + $0x1364] ss:$16 sps:$4 sm:$0xff]   ;;  %v15855_v51 = vld [vmem:[%s17849_s14 + $0x136c] ss:$16 sps:$4 sm:$0xff]  }
 0x2e7   : > { %10547 = vmatprep.subr.bf16.mxu0 %v15759_v52  ;;  %11622 = vmatprep.subr.bf16.mxu1 %v15762_v53  ;;  %v15850_v52 = vld [vmem:[%s17849_s14 + $0x1360] ss:$16 sps:$4 sm:$0xff]   ;;  %v15853_v53 = vld [vmem:[%s17849_s14 + $0x1368] ss:$16 sps:$4 sm:$0xff]  }
 0x2ea   : > { %10548 = vmatpush1.bf16.msra.mxu0 %v15757_v54  ;;  %11623 = vmatpush1.bf16.msra.mxu1 %v15760_v55  ;;  %v15858_v54 = vld [vmem:[%s17849_s14 + $0x1384] ss:$16 sps:$4 sm:$0xff]   ;;  %v15861_v55 = vld [vmem:[%s17849_s14 + $0x138c] ss:$16 sps:$4 sm:$0xff]  }
 0x2eb   : > { %10549 = vmatprep.subr.bf16.mxu0 %v15765_v56  ;;  %11624 = vmatprep.subr.bf16.mxu1 %v15768_v57  ;;  %v15856_v56 = vld [vmem:[%s17849_s14 + $0x1380] ss:$16 sps:$4 sm:$0xff]   ;;  %v15859_v57 = vld [vmem:[%s17849_s14 + $0x1388] ss:$16 sps:$4 sm:$0xff]  }
 0x2ee   : > { %10550 = vmatpush1.bf16.msra.mxu0 %v15763_v58  ;;  %11625 = vmatpush1.bf16.msra.mxu1 %v15766_v59  ;;  %v15864_v58 = vld [vmem:[%s17849_s14 + $0x13a4] ss:$16 sps:$4 sm:$0xff]   ;;  %v15867_v59 = vld [vmem:[%s17849_s14 + $0x13ac] ss:$16 sps:$4 sm:$0xff]  }
 0x2ef   : > { %10551 = vmatprep.subr.bf16.mxu0 %v15771_v60  ;;  %11626 = vmatprep.subr.bf16.mxu1 %v15774_v61  ;;  %v15862_v60 = vld [vmem:[%s17849_s14 + $0x13a0] ss:$16 sps:$4 sm:$0xff]   ;;  %v15865_v61 = vld [vmem:[%s17849_s14 + $0x13a8] ss:$16 sps:$4 sm:$0xff]  }
 0x2f2   : > { %10552 = vmatpush1.bf16.msra.mxu0 %v15769_v62  ;;  %11627 = vmatpush1.bf16.msra.mxu1 %v15772_v63  ;;  %v15870_v62 = vld [vmem:[%s17849_s14 + $0x13c4] ss:$16 sps:$4 sm:$0xff]   ;;  %v15873_v63 = vld [vmem:[%s17849_s14 + $0x13cc] ss:$16 sps:$4 sm:$0xff]  }
 0x2f3   : > { %10553 = vmatprep.subr.bf16.mxu0 %v15777_v0  ;;  %11628 = vmatprep.subr.bf16.mxu1 %v15780_v1  ;;  %v15868_v0 = vld [vmem:[%s17849_s14 + $0x13c0] ss:$16 sps:$4 sm:$0xff]   ;;  %v15871_v1 = vld [vmem:[%s17849_s14 + $0x13c8] ss:$16 sps:$4 sm:$0xff]  }
 0x2f6   : > { %10554 = vmatpush1.bf16.msra.mxu0 %v15775_v2  ;;  %11629 = vmatpush1.bf16.msra.mxu1 %v15778_v3  ;;  %v15876_v2 = vld [vmem:[%s17849_s14 + $0x13e4] ss:$16 sps:$4 sm:$0xff]   ;;  %v15879_v3 = vld [vmem:[%s17849_s14 + $0x13ec] ss:$16 sps:$4 sm:$0xff]  }
 0x2f7   : > { %10566 = vmatprep.subr.bf16.mxu0 %v15786_v5  ;;  %11641 = vmatprep.subr.bf16.mxu1 %v15789_v6  ;;  %v15877_v5 = vld [vmem:[%s17849_s14 + $0x13e8] ss:$16 sps:$4 sm:$0xff]  }
 0x2f8   : > { %v15880_v6 = vld [vmem:[%s17847_s18 + $0x48] ss:$196 sps:$4 sm:$0xff]  }
 0x2f9   : > { %10556 = vmatmul.mubr.bf16.vlgmr.msra.gmra.mrb[0].mxu0 %v15781_v4  ;;  %11631 = vmatmul.mubr.bf16.vlgmr.msra.gmra.mrb[0].mxu1 %v15781_v4  ;;  %v15874_v4 = vld [vmem:[%s17849_s14 + $0x13e0] ss:$16 sps:$4 sm:$0xff]  }
 0x2fa   : > { %10567 = vmatpush1.bf16.msra.mxu0 %v15784_v7  ;;  %11642 = vmatpush1.bf16.msra.mxu1 %v15787_v8  ;;  %v15885_v7 = vld [vmem:[%s17849_s14 + $0x1404] ss:$16 sps:$4 sm:$0xff]   ;;  %v15888_v8 = vld [vmem:[%s17849_s14 + $0x140c] ss:$16 sps:$4 sm:$0xff]  }
 0x2fb   : > { %10568 = vmatprep.subr.bf16.mxu0 %v15792_v9  ;;  %11643 = vmatprep.subr.bf16.mxu1 %v15795_v10  ;;  %v15883_v9 = vld [vmem:[%s17849_s14 + $0x1400] ss:$16 sps:$4 sm:$0xff]   ;;  %v15886_v10 = vld [vmem:[%s17849_s14 + $0x1408] ss:$16 sps:$4 sm:$0xff]  }
 0x2fc   : > { %10598 = vmatprep.mubr.bf16.mxu0 %v15882_v11  ;;  %11673 = vmatprep.mubr.bf16.mxu1 %v15882_v11  ;;  %v15891_v11 = vld [vmem:[%s17849_s14 + $0x1424] ss:$16 sps:$4 sm:$0xff]  }
 0x2fe   : > { %10569 = vmatpush1.bf16.msra.mxu0 %v15790_v12  ;;  %11644 = vmatpush1.bf16.msra.mxu1 %v15793_v13  ;;  %v15894_v12 = vld [vmem:[%s17849_s14 + $0x142c] ss:$16 sps:$4 sm:$0xff]  }
 0x2ff   : > { %10570 = vmatprep.subr.bf16.mxu0 %v15798_v14  ;;  %11645 = vmatprep.subr.bf16.mxu1 %v15801_v15  ;;  %v15981_v13 = vld [vmem:[%s17847_s18 + $0x54] ss:$196 sps:$4 sm:$0xff]  }
 0x300   : > { %v15889_v14 = vld [vmem:[%s17849_s14 + $0x1420] ss:$16 sps:$4 sm:$0xff]   ;;  %v15892_v15 = vld [vmem:[%s17849_s14 + $0x1428] ss:$16 sps:$4 sm:$0xff]  }
 0x302   : > { %10571 = vmatpush1.bf16.msra.mxu0 %v15796_v16  ;;  %11646 = vmatpush1.bf16.msra.mxu1 %v15799_v17  ;;  %v15897_v16 = vld [vmem:[%s17849_s14 + $0x1444] ss:$16 sps:$4 sm:$0xff]   ;;  %v15900_v17 = vld [vmem:[%s17849_s14 + $0x144c] ss:$16 sps:$4 sm:$0xff]  }
 0x303   : > { %10572 = vmatprep.subr.bf16.mxu0 %v15804_v18  ;;  %11647 = vmatprep.subr.bf16.mxu1 %v15807_v19  ;;  %v15895_v18 = vld [vmem:[%s17849_s14 + $0x1440] ss:$16 sps:$4 sm:$0xff]   ;;  %v15898_v19 = vld [vmem:[%s17849_s14 + $0x1448] ss:$16 sps:$4 sm:$0xff]  }
 0x306   : > { %10573 = vmatpush1.bf16.msra.mxu0 %v15802_v20  ;;  %11648 = vmatpush1.bf16.msra.mxu1 %v15805_v21  ;;  %v15903_v20 = vld [vmem:[%s17849_s14 + $0x1464] ss:$16 sps:$4 sm:$0xff]   ;;  %v15906_v21 = vld [vmem:[%s17849_s14 + $0x146c] ss:$16 sps:$4 sm:$0xff]  }
 0x307   : > { %10574 = vmatprep.subr.bf16.mxu0 %v15810_v22  ;;  %11649 = vmatprep.subr.bf16.mxu1 %v15813_v23  ;;  %v15901_v22 = vld [vmem:[%s17849_s14 + $0x1460] ss:$16 sps:$4 sm:$0xff]   ;;  %v15904_v23 = vld [vmem:[%s17849_s14 + $0x1468] ss:$16 sps:$4 sm:$0xff]  }
 0x30a   : > { %10575 = vmatpush1.bf16.msra.mxu0 %v15808_v24  ;;  %11650 = vmatpush1.bf16.msra.mxu1 %v15811_v25  ;;  %v15909_v24 = vld [vmem:[%s17849_s14 + $0x1484] ss:$16 sps:$4 sm:$0xff]   ;;  %v15912_v25 = vld [vmem:[%s17849_s14 + $0x148c] ss:$16 sps:$4 sm:$0xff]  }
 0x30b   : > { %10576 = vmatprep.subr.bf16.mxu0 %v15816_v26  ;;  %11651 = vmatprep.subr.bf16.mxu1 %v15819_v27  ;;  %v15907_v26 = vld [vmem:[%s17849_s14 + $0x1480] ss:$16 sps:$4 sm:$0xff]   ;;  %v15910_v27 = vld [vmem:[%s17849_s14 + $0x1488] ss:$16 sps:$4 sm:$0xff]  }
 0x30e   : > { %10577 = vmatpush1.bf16.msra.mxu0 %v15814_v28  ;;  %11652 = vmatpush1.bf16.msra.mxu1 %v15817_v29  ;;  %v15915_v28 = vld [vmem:[%s17849_s14 + $0x14a4] ss:$16 sps:$4 sm:$0xff]   ;;  %v15918_v29 = vld [vmem:[%s17849_s14 + $0x14ac] ss:$16 sps:$4 sm:$0xff]  }
 0x30f   : > { %10578 = vmatprep.subr.bf16.mxu0 %v15822_v30  ;;  %11653 = vmatprep.subr.bf16.mxu1 %v15825_v31  ;;  %v15913_v30 = vld [vmem:[%s17849_s14 + $0x14a0] ss:$16 sps:$4 sm:$0xff]   ;;  %v15916_v31 = vld [vmem:[%s17849_s14 + $0x14a8] ss:$16 sps:$4 sm:$0xff]  }
 0x312   : > { %10579 = vmatpush1.bf16.msra.mxu0 %v15820_v32  ;;  %11654 = vmatpush1.bf16.msra.mxu1 %v15823_v33  ;;  %v15921_v32 = vld [vmem:[%s17849_s14 + $0x14c4] ss:$16 sps:$4 sm:$0xff]   ;;  %v15924_v33 = vld [vmem:[%s17849_s14 + $0x14cc] ss:$16 sps:$4 sm:$0xff]  }
 0x313   : > { %10580 = vmatprep.subr.bf16.mxu0 %v15828_v34  ;;  %11655 = vmatprep.subr.bf16.mxu1 %v15831_v35  ;;  %v15919_v34 = vld [vmem:[%s17849_s14 + $0x14c0] ss:$16 sps:$4 sm:$0xff]   ;;  %v15922_v35 = vld [vmem:[%s17849_s14 + $0x14c8] ss:$16 sps:$4 sm:$0xff]  }
 0x316   : > { %10581 = vmatpush1.bf16.msra.mxu0 %v15826_v36  ;;  %11656 = vmatpush1.bf16.msra.mxu1 %v15829_v37  ;;  %v15927_v36 = vld [vmem:[%s17849_s14 + $0x14e4] ss:$16 sps:$4 sm:$0xff]   ;;  %v15930_v37 = vld [vmem:[%s17849_s14 + $0x14ec] ss:$16 sps:$4 sm:$0xff]  }
 0x317   : > { %10582 = vmatprep.subr.bf16.mxu0 %v15834_v38  ;;  %11657 = vmatprep.subr.bf16.mxu1 %v15837_v39  ;;  %v15925_v38 = vld [vmem:[%s17849_s14 + $0x14e0] ss:$16 sps:$4 sm:$0xff]   ;;  %v15928_v39 = vld [vmem:[%s17849_s14 + $0x14e8] ss:$16 sps:$4 sm:$0xff]  }
 0x31a   : > { %10583 = vmatpush1.bf16.msra.mxu0 %v15832_v40  ;;  %11658 = vmatpush1.bf16.msra.mxu1 %v15835_v41  ;;  %v15933_v40 = vld [vmem:[%s17849_s14 + $0x1504] ss:$16 sps:$4 sm:$0xff]   ;;  %v15936_v41 = vld [vmem:[%s17849_s14 + $0x150c] ss:$16 sps:$4 sm:$0xff]  }
 0x31b   : > { %10584 = vmatprep.subr.bf16.mxu0 %v15840_v42  ;;  %11659 = vmatprep.subr.bf16.mxu1 %v15843_v43  ;;  %v15931_v42 = vld [vmem:[%s17849_s14 + $0x1500] ss:$16 sps:$4 sm:$0xff]   ;;  %v15934_v43 = vld [vmem:[%s17849_s14 + $0x1508] ss:$16 sps:$4 sm:$0xff]  }
 0x31e   : > { %10585 = vmatpush1.bf16.msra.mxu0 %v15838_v44  ;;  %11660 = vmatpush1.bf16.msra.mxu1 %v15841_v45  ;;  %v15939_v44 = vld [vmem:[%s17849_s14 + $0x1524] ss:$16 sps:$4 sm:$0xff]   ;;  %v15942_v45 = vld [vmem:[%s17849_s14 + $0x152c] ss:$16 sps:$4 sm:$0xff]  }
 0x31f   : > { %10586 = vmatprep.subr.bf16.mxu0 %v15846_v46  ;;  %11661 = vmatprep.subr.bf16.mxu1 %v15849_v47  ;;  %v15937_v46 = vld [vmem:[%s17849_s14 + $0x1520] ss:$16 sps:$4 sm:$0xff]   ;;  %v15940_v47 = vld [vmem:[%s17849_s14 + $0x1528] ss:$16 sps:$4 sm:$0xff]  }
 0x322   : > { %10587 = vmatpush1.bf16.msra.mxu0 %v15844_v48  ;;  %11662 = vmatpush1.bf16.msra.mxu1 %v15847_v49  ;;  %v15945_v48 = vld [vmem:[%s17849_s14 + $0x1544] ss:$16 sps:$4 sm:$0xff]   ;;  %v15948_v49 = vld [vmem:[%s17849_s14 + $0x154c] ss:$16 sps:$4 sm:$0xff]  }
 0x323   : > { %10588 = vmatprep.subr.bf16.mxu0 %v15852_v50  ;;  %11663 = vmatprep.subr.bf16.mxu1 %v15855_v51  ;;  %v15943_v50 = vld [vmem:[%s17849_s14 + $0x1540] ss:$16 sps:$4 sm:$0xff]   ;;  %v15946_v51 = vld [vmem:[%s17849_s14 + $0x1548] ss:$16 sps:$4 sm:$0xff]  }
 0x326   : > { %10589 = vmatpush1.bf16.msra.mxu0 %v15850_v52  ;;  %11664 = vmatpush1.bf16.msra.mxu1 %v15853_v53  ;;  %v15951_v52 = vld [vmem:[%s17849_s14 + $0x1564] ss:$16 sps:$4 sm:$0xff]   ;;  %v15954_v53 = vld [vmem:[%s17849_s14 + $0x156c] ss:$16 sps:$4 sm:$0xff]  }
 0x327   : > { %10590 = vmatprep.subr.bf16.mxu0 %v15858_v54  ;;  %11665 = vmatprep.subr.bf16.mxu1 %v15861_v55  ;;  %v15949_v54 = vld [vmem:[%s17849_s14 + $0x1560] ss:$16 sps:$4 sm:$0xff]   ;;  %v15952_v55 = vld [vmem:[%s17849_s14 + $0x1568] ss:$16 sps:$4 sm:$0xff]  }
 0x32a   : > { %10591 = vmatpush1.bf16.msra.mxu0 %v15856_v56  ;;  %11666 = vmatpush1.bf16.msra.mxu1 %v15859_v57  ;;  %v15957_v56 = vld [vmem:[%s17849_s14 + $0x1584] ss:$16 sps:$4 sm:$0xff]   ;;  %v15960_v57 = vld [vmem:[%s17849_s14 + $0x158c] ss:$16 sps:$4 sm:$0xff]  }
 0x32b   : > { %10592 = vmatprep.subr.bf16.mxu0 %v15864_v58  ;;  %11667 = vmatprep.subr.bf16.mxu1 %v15867_v59  ;;  %v15955_v58 = vld [vmem:[%s17849_s14 + $0x1580] ss:$16 sps:$4 sm:$0xff]   ;;  %v15958_v59 = vld [vmem:[%s17849_s14 + $0x1588] ss:$16 sps:$4 sm:$0xff]  }
 0x32e   : > { %10593 = vmatpush1.bf16.msra.mxu0 %v15862_v60  ;;  %11668 = vmatpush1.bf16.msra.mxu1 %v15865_v61  ;;  %v15963_v60 = vld [vmem:[%s17849_s14 + $0x15a4] ss:$16 sps:$4 sm:$0xff]   ;;  %v15966_v61 = vld [vmem:[%s17849_s14 + $0x15ac] ss:$16 sps:$4 sm:$0xff]  }
 0x32f   : > { %10594 = vmatprep.subr.bf16.mxu0 %v15870_v62  ;;  %11669 = vmatprep.subr.bf16.mxu1 %v15873_v63  ;;  %v15961_v62 = vld [vmem:[%s17849_s14 + $0x15a0] ss:$16 sps:$4 sm:$0xff]   ;;  %v15964_v63 = vld [vmem:[%s17849_s14 + $0x15a8] ss:$16 sps:$4 sm:$0xff]  }
 0x332   : > { %10595 = vmatpush1.bf16.msra.mxu0 %v15868_v0  ;;  %11670 = vmatpush1.bf16.msra.mxu1 %v15871_v1  ;;  %v15969_v0 = vld [vmem:[%s17849_s14 + $0x15c4] ss:$16 sps:$4 sm:$0xff]   ;;  %v15972_v1 = vld [vmem:[%s17849_s14 + $0x15cc] ss:$16 sps:$4 sm:$0xff]  }
 0x333   : > { %10596 = vmatprep.subr.bf16.mxu0 %v15876_v2  ;;  %11671 = vmatprep.subr.bf16.mxu1 %v15879_v3  ;;  %v15967_v2 = vld [vmem:[%s17849_s14 + $0x15c0] ss:$16 sps:$4 sm:$0xff]   ;;  %v15970_v3 = vld [vmem:[%s17849_s14 + $0x15c8] ss:$16 sps:$4 sm:$0xff]  }
 0x336   : > { %10597 = vmatpush1.bf16.msra.mxu0 %v15874_v4  ;;  %11672 = vmatpush1.bf16.msra.mxu1 %v15877_v5  ;;  %v15975_v4 = vld [vmem:[%s17849_s14 + $0x15e4] ss:$16 sps:$4 sm:$0xff]   ;;  %v15978_v5 = vld [vmem:[%s17849_s14 + $0x15ec] ss:$16 sps:$4 sm:$0xff]  }
 0x337   : > { %10609 = vmatprep.subr.bf16.mxu0 %v15885_v7  ;;  %11684 = vmatprep.subr.bf16.mxu1 %v15888_v8  ;;  %v15976_v7 = vld [vmem:[%s17849_s14 + $0x15e8] ss:$16 sps:$4 sm:$0xff]  }
 0x338   : > { %v15979_v8 = vld [vmem:[%s17847_s18 + $0x50] ss:$196 sps:$4 sm:$0xff]  }
 0x339   : > { %10599 = vmatmul.mubr.bf16.vlgmr.msra.gmra.mrb[0].mxu0 %v15880_v6  ;;  %11674 = vmatmul.mubr.bf16.vlgmr.msra.gmra.mrb[0].mxu1 %v15880_v6  ;;  %v15973_v6 = vld [vmem:[%s17849_s14 + $0x15e0] ss:$16 sps:$4 sm:$0xff]  }
 0x33a   : > { %10610 = vmatpush1.bf16.msra.mxu0 %v15883_v9  ;;  %11685 = vmatpush1.bf16.msra.mxu1 %v15886_v10  ;;  %v15984_v9 = vld [vmem:[%s17849_s14 + $0x1604] ss:$16 sps:$4 sm:$0xff]   ;;  %v15987_v10 = vld [vmem:[%s17849_s14 + $0x160c] ss:$16 sps:$4 sm:$0xff]  }
 0x33b   : > { %10611 = vmatprep.subr.bf16.mxu0 %v15891_v11  ;;  %11686 = vmatprep.subr.bf16.mxu1 %v15894_v12  ;;  %v15982_v11 = vld [vmem:[%s17849_s14 + $0x1600] ss:$16 sps:$4 sm:$0xff]   ;;  %v15985_v12 = vld [vmem:[%s17849_s14 + $0x1608] ss:$16 sps:$4 sm:$0xff]  }
 0x33c   : > { %10641 = vmatprep.mubr.bf16.mxu0 %v15981_v13  ;;  %11716 = vmatprep.mubr.bf16.mxu1 %v15981_v13  ;;  %v15990_v13 = vld [vmem:[%s17849_s14 + $0x1624] ss:$16 sps:$4 sm:$0xff]  }
 0x33e   : > { %10612 = vmatpush1.bf16.msra.mxu0 %v15889_v14  ;;  %11687 = vmatpush1.bf16.msra.mxu1 %v15892_v15  ;;  %v15993_v14 = vld [vmem:[%s17849_s14 + $0x162c] ss:$16 sps:$4 sm:$0xff]  }
 0x33f   : > { %10613 = vmatprep.subr.bf16.mxu0 %v15897_v16  ;;  %11688 = vmatprep.subr.bf16.mxu1 %v15900_v17  ;;  %v16080_v15 = vld [vmem:[%s17847_s18 + $0x5c] ss:$196 sps:$4 sm:$0xff]  }
 0x340   : > { %v15988_v16 = vld [vmem:[%s17849_s14 + $0x1620] ss:$16 sps:$4 sm:$0xff]   ;;  %v15991_v17 = vld [vmem:[%s17849_s14 + $0x1628] ss:$16 sps:$4 sm:$0xff]  }
 0x342   : > { %10614 = vmatpush1.bf16.msra.mxu0 %v15895_v18  ;;  %11689 = vmatpush1.bf16.msra.mxu1 %v15898_v19  ;;  %v15996_v18 = vld [vmem:[%s17849_s14 + $0x1644] ss:$16 sps:$4 sm:$0xff]   ;;  %v15999_v19 = vld [vmem:[%s17849_s14 + $0x164c] ss:$16 sps:$4 sm:$0xff]  }
 0x343   : > { %10615 = vmatprep.subr.bf16.mxu0 %v15903_v20  ;;  %11690 = vmatprep.subr.bf16.mxu1 %v15906_v21  ;;  %v15994_v20 = vld [vmem:[%s17849_s14 + $0x1640] ss:$16 sps:$4 sm:$0xff]   ;;  %v15997_v21 = vld [vmem:[%s17849_s14 + $0x1648] ss:$16 sps:$4 sm:$0xff]  }
 0x346   : > { %10616 = vmatpush1.bf16.msra.mxu0 %v15901_v22  ;;  %11691 = vmatpush1.bf16.msra.mxu1 %v15904_v23  ;;  %v16002_v22 = vld [vmem:[%s17849_s14 + $0x1664] ss:$16 sps:$4 sm:$0xff]   ;;  %v16005_v23 = vld [vmem:[%s17849_s14 + $0x166c] ss:$16 sps:$4 sm:$0xff]  }
 0x347   : > { %10617 = vmatprep.subr.bf16.mxu0 %v15909_v24  ;;  %11692 = vmatprep.subr.bf16.mxu1 %v15912_v25  ;;  %v16000_v24 = vld [vmem:[%s17849_s14 + $0x1660] ss:$16 sps:$4 sm:$0xff]   ;;  %v16003_v25 = vld [vmem:[%s17849_s14 + $0x1668] ss:$16 sps:$4 sm:$0xff]  }
 0x34a   : > { %10618 = vmatpush1.bf16.msra.mxu0 %v15907_v26  ;;  %11693 = vmatpush1.bf16.msra.mxu1 %v15910_v27  ;;  %v16008_v26 = vld [vmem:[%s17849_s14 + $0x1684] ss:$16 sps:$4 sm:$0xff]   ;;  %v16011_v27 = vld [vmem:[%s17849_s14 + $0x168c] ss:$16 sps:$4 sm:$0xff]  }
 0x34b   : > { %10619 = vmatprep.subr.bf16.mxu0 %v15915_v28  ;;  %11694 = vmatprep.subr.bf16.mxu1 %v15918_v29  ;;  %v16006_v28 = vld [vmem:[%s17849_s14 + $0x1680] ss:$16 sps:$4 sm:$0xff]   ;;  %v16009_v29 = vld [vmem:[%s17849_s14 + $0x1688] ss:$16 sps:$4 sm:$0xff]  }
 0x34e   : > { %10620 = vmatpush1.bf16.msra.mxu0 %v15913_v30  ;;  %11695 = vmatpush1.bf16.msra.mxu1 %v15916_v31  ;;  %v16014_v30 = vld [vmem:[%s17849_s14 + $0x16a4] ss:$16 sps:$4 sm:$0xff]   ;;  %v16017_v31 = vld [vmem:[%s17849_s14 + $0x16ac] ss:$16 sps:$4 sm:$0xff]  }
 0x34f   : > { %10621 = vmatprep.subr.bf16.mxu0 %v15921_v32  ;;  %11696 = vmatprep.subr.bf16.mxu1 %v15924_v33  ;;  %v16012_v32 = vld [vmem:[%s17849_s14 + $0x16a0] ss:$16 sps:$4 sm:$0xff]   ;;  %v16015_v33 = vld [vmem:[%s17849_s14 + $0x16a8] ss:$16 sps:$4 sm:$0xff]  }
 0x352   : > { %10622 = vmatpush1.bf16.msra.mxu0 %v15919_v34  ;;  %11697 = vmatpush1.bf16.msra.mxu1 %v15922_v35  ;;  %v16020_v34 = vld [vmem:[%s17849_s14 + $0x16c4] ss:$16 sps:$4 sm:$0xff]   ;;  %v16023_v35 = vld [vmem:[%s17849_s14 + $0x16cc] ss:$16 sps:$4 sm:$0xff]  }
 0x353   : > { %10623 = vmatprep.subr.bf16.mxu0 %v15927_v36  ;;  %11698 = vmatprep.subr.bf16.mxu1 %v15930_v37  ;;  %v16018_v36 = vld [vmem:[%s17849_s14 + $0x16c0] ss:$16 sps:$4 sm:$0xff]   ;;  %v16021_v37 = vld [vmem:[%s17849_s14 + $0x16c8] ss:$16 sps:$4 sm:$0xff]  }
 0x356   : > { %10624 = vmatpush1.bf16.msra.mxu0 %v15925_v38  ;;  %11699 = vmatpush1.bf16.msra.mxu1 %v15928_v39  ;;  %v16026_v38 = vld [vmem:[%s17849_s14 + $0x16e4] ss:$16 sps:$4 sm:$0xff]   ;;  %v16029_v39 = vld [vmem:[%s17849_s14 + $0x16ec] ss:$16 sps:$4 sm:$0xff]  }
 0x357   : > { %10625 = vmatprep.subr.bf16.mxu0 %v15933_v40  ;;  %11700 = vmatprep.subr.bf16.mxu1 %v15936_v41  ;;  %v16024_v40 = vld [vmem:[%s17849_s14 + $0x16e0] ss:$16 sps:$4 sm:$0xff]   ;;  %v16027_v41 = vld [vmem:[%s17849_s14 + $0x16e8] ss:$16 sps:$4 sm:$0xff]  }
 0x35a   : > { %10626 = vmatpush1.bf16.msra.mxu0 %v15931_v42  ;;  %11701 = vmatpush1.bf16.msra.mxu1 %v15934_v43  ;;  %v16032_v42 = vld [vmem:[%s17849_s14 + $0x1704] ss:$16 sps:$4 sm:$0xff]   ;;  %v16035_v43 = vld [vmem:[%s17849_s14 + $0x170c] ss:$16 sps:$4 sm:$0xff]  }
 0x35b   : > { %10627 = vmatprep.subr.bf16.mxu0 %v15939_v44  ;;  %11702 = vmatprep.subr.bf16.mxu1 %v15942_v45  ;;  %v16030_v44 = vld [vmem:[%s17849_s14 + $0x1700] ss:$16 sps:$4 sm:$0xff]   ;;  %v16033_v45 = vld [vmem:[%s17849_s14 + $0x1708] ss:$16 sps:$4 sm:$0xff]  }
 0x35e   : > { %10628 = vmatpush1.bf16.msra.mxu0 %v15937_v46  ;;  %11703 = vmatpush1.bf16.msra.mxu1 %v15940_v47  ;;  %v16038_v46 = vld [vmem:[%s17849_s14 + $0x1724] ss:$16 sps:$4 sm:$0xff]   ;;  %v16041_v47 = vld [vmem:[%s17849_s14 + $0x172c] ss:$16 sps:$4 sm:$0xff]  }
 0x35f   : > { %10629 = vmatprep.subr.bf16.mxu0 %v15945_v48  ;;  %11704 = vmatprep.subr.bf16.mxu1 %v15948_v49  ;;  %v16036_v48 = vld [vmem:[%s17849_s14 + $0x1720] ss:$16 sps:$4 sm:$0xff]   ;;  %v16039_v49 = vld [vmem:[%s17849_s14 + $0x1728] ss:$16 sps:$4 sm:$0xff]  }
 0x362   : > { %10630 = vmatpush1.bf16.msra.mxu0 %v15943_v50  ;;  %11705 = vmatpush1.bf16.msra.mxu1 %v15946_v51  ;;  %v16044_v50 = vld [vmem:[%s17849_s14 + $0x1744] ss:$16 sps:$4 sm:$0xff]   ;;  %v16047_v51 = vld [vmem:[%s17849_s14 + $0x174c] ss:$16 sps:$4 sm:$0xff]  }
 0x363   : > { %10631 = vmatprep.subr.bf16.mxu0 %v15951_v52  ;;  %11706 = vmatprep.subr.bf16.mxu1 %v15954_v53  ;;  %v16042_v52 = vld [vmem:[%s17849_s14 + $0x1740] ss:$16 sps:$4 sm:$0xff]   ;;  %v16045_v53 = vld [vmem:[%s17849_s14 + $0x1748] ss:$16 sps:$4 sm:$0xff]  }
 0x366   : > { %10632 = vmatpush1.bf16.msra.mxu0 %v15949_v54  ;;  %11707 = vmatpush1.bf16.msra.mxu1 %v15952_v55  ;;  %v16050_v54 = vld [vmem:[%s17849_s14 + $0x1764] ss:$16 sps:$4 sm:$0xff]   ;;  %v16053_v55 = vld [vmem:[%s17849_s14 + $0x176c] ss:$16 sps:$4 sm:$0xff]  }
 0x367   : > { %10633 = vmatprep.subr.bf16.mxu0 %v15957_v56  ;;  %11708 = vmatprep.subr.bf16.mxu1 %v15960_v57  ;;  %v16048_v56 = vld [vmem:[%s17849_s14 + $0x1760] ss:$16 sps:$4 sm:$0xff]   ;;  %v16051_v57 = vld [vmem:[%s17849_s14 + $0x1768] ss:$16 sps:$4 sm:$0xff]  }
 0x36a   : > { %10634 = vmatpush1.bf16.msra.mxu0 %v15955_v58  ;;  %11709 = vmatpush1.bf16.msra.mxu1 %v15958_v59  ;;  %v16056_v58 = vld [vmem:[%s17849_s14 + $0x1784] ss:$16 sps:$4 sm:$0xff]   ;;  %v16059_v59 = vld [vmem:[%s17849_s14 + $0x178c] ss:$16 sps:$4 sm:$0xff]  }
 0x36b   : > { %10635 = vmatprep.subr.bf16.mxu0 %v15963_v60  ;;  %11710 = vmatprep.subr.bf16.mxu1 %v15966_v61  ;;  %v16054_v60 = vld [vmem:[%s17849_s14 + $0x1780] ss:$16 sps:$4 sm:$0xff]   ;;  %v16057_v61 = vld [vmem:[%s17849_s14 + $0x1788] ss:$16 sps:$4 sm:$0xff]  }
 0x36e   : > { %10636 = vmatpush1.bf16.msra.mxu0 %v15961_v62  ;;  %11711 = vmatpush1.bf16.msra.mxu1 %v15964_v63  ;;  %v16062_v62 = vld [vmem:[%s17849_s14 + $0x17a4] ss:$16 sps:$4 sm:$0xff]   ;;  %v16065_v63 = vld [vmem:[%s17849_s14 + $0x17ac] ss:$16 sps:$4 sm:$0xff]  }
 0x36f   : > { %10637 = vmatprep.subr.bf16.mxu0 %v15969_v0  ;;  %11712 = vmatprep.subr.bf16.mxu1 %v15972_v1  ;;  %v16060_v0 = vld [vmem:[%s17849_s14 + $0x17a0] ss:$16 sps:$4 sm:$0xff]   ;;  %v16063_v1 = vld [vmem:[%s17849_s14 + $0x17a8] ss:$16 sps:$4 sm:$0xff]  }
 0x372   : > { %10638 = vmatpush1.bf16.msra.mxu0 %v15967_v2  ;;  %11713 = vmatpush1.bf16.msra.mxu1 %v15970_v3  ;;  %v16068_v2 = vld [vmem:[%s17849_s14 + $0x17c4] ss:$16 sps:$4 sm:$0xff]   ;;  %v16071_v3 = vld [vmem:[%s17849_s14 + $0x17cc] ss:$16 sps:$4 sm:$0xff]  }
 0x373   : > { %10639 = vmatprep.subr.bf16.mxu0 %v15975_v4  ;;  %11714 = vmatprep.subr.bf16.mxu1 %v15978_v5  ;;  %v16066_v4 = vld [vmem:[%s17849_s14 + $0x17c0] ss:$16 sps:$4 sm:$0xff]   ;;  %v16069_v5 = vld [vmem:[%s17849_s14 + $0x17c8] ss:$16 sps:$4 sm:$0xff]  }
 0x376   : > { %10640 = vmatpush1.bf16.msra.mxu0 %v15973_v6  ;;  %11715 = vmatpush1.bf16.msra.mxu1 %v15976_v7  ;;  %v16074_v6 = vld [vmem:[%s17849_s14 + $0x17e4] ss:$16 sps:$4 sm:$0xff]   ;;  %v16077_v7 = vld [vmem:[%s17849_s14 + $0x17ec] ss:$16 sps:$4 sm:$0xff]  }
 0x377   : > { %10652 = vmatprep.subr.bf16.mxu0 %v15984_v9  ;;  %11727 = vmatprep.subr.bf16.mxu1 %v15987_v10  ;;  %v16075_v9 = vld [vmem:[%s17849_s14 + $0x17e8] ss:$16 sps:$4 sm:$0xff]  }
 0x378   : > { %v16078_v10 = vld [vmem:[%s17847_s18 + $0x58] ss:$196 sps:$4 sm:$0xff]  }
 0x379   : > { %10642 = vmatmul.mubr.bf16.vlgmr.msra.gmra.mrb[0].mxu0 %v15979_v8  ;;  %11717 = vmatmul.mubr.bf16.vlgmr.msra.gmra.mrb[0].mxu1 %v15979_v8  ;;  %v16072_v8 = vld [vmem:[%s17849_s14 + $0x17e0] ss:$16 sps:$4 sm:$0xff]  }
 0x37a   : > { %10653 = vmatpush1.bf16.msra.mxu0 %v15982_v11  ;;  %11728 = vmatpush1.bf16.msra.mxu1 %v15985_v12  ;;  %v16083_v11 = vld [vmem:[%s17849_s14 + $0x1804] ss:$16 sps:$4 sm:$0xff]   ;;  %v16086_v12 = vld [vmem:[%s17849_s14 + $0x180c] ss:$16 sps:$4 sm:$0xff]  }
 0x37b   : > { %10654 = vmatprep.subr.bf16.mxu0 %v15990_v13  ;;  %11729 = vmatprep.subr.bf16.mxu1 %v15993_v14  ;;  %v16081_v13 = vld [vmem:[%s17849_s14 + $0x1800] ss:$16 sps:$4 sm:$0xff]   ;;  %v16084_v14 = vld [vmem:[%s17849_s14 + $0x1808] ss:$16 sps:$4 sm:$0xff]  }
 0x37c   : > { %10684 = vmatprep.mubr.bf16.mxu0 %v16080_v15  ;;  %11759 = vmatprep.mubr.bf16.mxu1 %v16080_v15  ;;  %v16089_v15 = vld [vmem:[%s17849_s14 + $0x1824] ss:$16 sps:$4 sm:$0xff]  }
 0x37e   : > { %10655 = vmatpush1.bf16.msra.mxu0 %v15988_v16  ;;  %11730 = vmatpush1.bf16.msra.mxu1 %v15991_v17  ;;  %v16092_v16 = vld [vmem:[%s17849_s14 + $0x182c] ss:$16 sps:$4 sm:$0xff]  }
 0x37f   : > { %10656 = vmatprep.subr.bf16.mxu0 %v15996_v18  ;;  %11731 = vmatprep.subr.bf16.mxu1 %v15999_v19  ;;  %v16179_v17 = vld [vmem:[%s17847_s18 + $0x64] ss:$196 sps:$4 sm:$0xff]  }
 0x380   : > { %v16087_v18 = vld [vmem:[%s17849_s14 + $0x1820] ss:$16 sps:$4 sm:$0xff]   ;;  %v16090_v19 = vld [vmem:[%s17849_s14 + $0x1828] ss:$16 sps:$4 sm:$0xff]  }
 0x382   : > { %10657 = vmatpush1.bf16.msra.mxu0 %v15994_v20  ;;  %11732 = vmatpush1.bf16.msra.mxu1 %v15997_v21  ;;  %v16095_v20 = vld [vmem:[%s17849_s14 + $0x1844] ss:$16 sps:$4 sm:$0xff]   ;;  %v16098_v21 = vld [vmem:[%s17849_s14 + $0x184c] ss:$16 sps:$4 sm:$0xff]  }
 0x383   : > { %10658 = vmatprep.subr.bf16.mxu0 %v16002_v22  ;;  %11733 = vmatprep.subr.bf16.mxu1 %v16005_v23  ;;  %v16093_v22 = vld [vmem:[%s17849_s14 + $0x1840] ss:$16 sps:$4 sm:$0xff]   ;;  %v16096_v23 = vld [vmem:[%s17849_s14 + $0x1848] ss:$16 sps:$4 sm:$0xff]  }
 0x386   : > { %10659 = vmatpush1.bf16.msra.mxu0 %v16000_v24  ;;  %11734 = vmatpush1.bf16.msra.mxu1 %v16003_v25  ;;  %v16101_v24 = vld [vmem:[%s17849_s14 + $0x1864] ss:$16 sps:$4 sm:$0xff]   ;;  %v16104_v25 = vld [vmem:[%s17849_s14 + $0x186c] ss:$16 sps:$4 sm:$0xff]  }
 0x387   : > { %10660 = vmatprep.subr.bf16.mxu0 %v16008_v26  ;;  %11735 = vmatprep.subr.bf16.mxu1 %v16011_v27  ;;  %v16099_v26 = vld [vmem:[%s17849_s14 + $0x1860] ss:$16 sps:$4 sm:$0xff]   ;;  %v16102_v27 = vld [vmem:[%s17849_s14 + $0x1868] ss:$16 sps:$4 sm:$0xff]  }
 0x38a   : > { %10661 = vmatpush1.bf16.msra.mxu0 %v16006_v28  ;;  %11736 = vmatpush1.bf16.msra.mxu1 %v16009_v29  ;;  %v16107_v28 = vld [vmem:[%s17849_s14 + $0x1884] ss:$16 sps:$4 sm:$0xff]   ;;  %v16110_v29 = vld [vmem:[%s17849_s14 + $0x188c] ss:$16 sps:$4 sm:$0xff]  }
 0x38b   : > { %10662 = vmatprep.subr.bf16.mxu0 %v16014_v30  ;;  %11737 = vmatprep.subr.bf16.mxu1 %v16017_v31  ;;  %v16105_v30 = vld [vmem:[%s17849_s14 + $0x1880] ss:$16 sps:$4 sm:$0xff]   ;;  %v16108_v31 = vld [vmem:[%s17849_s14 + $0x1888] ss:$16 sps:$4 sm:$0xff]  }
 0x38e   : > { %10663 = vmatpush1.bf16.msra.mxu0 %v16012_v32  ;;  %11738 = vmatpush1.bf16.msra.mxu1 %v16015_v33  ;;  %v16113_v32 = vld [vmem:[%s17849_s14 + $0x18a4] ss:$16 sps:$4 sm:$0xff]   ;;  %v16116_v33 = vld [vmem:[%s17849_s14 + $0x18ac] ss:$16 sps:$4 sm:$0xff]  }
 0x38f   : > { %10664 = vmatprep.subr.bf16.mxu0 %v16020_v34  ;;  %11739 = vmatprep.subr.bf16.mxu1 %v16023_v35  ;;  %v16111_v34 = vld [vmem:[%s17849_s14 + $0x18a0] ss:$16 sps:$4 sm:$0xff]   ;;  %v16114_v35 = vld [vmem:[%s17849_s14 + $0x18a8] ss:$16 sps:$4 sm:$0xff]  }
 0x392   : > { %10665 = vmatpush1.bf16.msra.mxu0 %v16018_v36  ;;  %11740 = vmatpush1.bf16.msra.mxu1 %v16021_v37  ;;  %v16119_v36 = vld [vmem:[%s17849_s14 + $0x18c4] ss:$16 sps:$4 sm:$0xff]   ;;  %v16122_v37 = vld [vmem:[%s17849_s14 + $0x18cc] ss:$16 sps:$4 sm:$0xff]  }
 0x393   : > { %10666 = vmatprep.subr.bf16.mxu0 %v16026_v38  ;;  %11741 = vmatprep.subr.bf16.mxu1 %v16029_v39  ;;  %v16117_v38 = vld [vmem:[%s17849_s14 + $0x18c0] ss:$16 sps:$4 sm:$0xff]   ;;  %v16120_v39 = vld [vmem:[%s17849_s14 + $0x18c8] ss:$16 sps:$4 sm:$0xff]  }
 0x396   : > { %10667 = vmatpush1.bf16.msra.mxu0 %v16024_v40  ;;  %11742 = vmatpush1.bf16.msra.mxu1 %v16027_v41  ;;  %v16125_v40 = vld [vmem:[%s17849_s14 + $0x18e4] ss:$16 sps:$4 sm:$0xff]   ;;  %v16128_v41 = vld [vmem:[%s17849_s14 + $0x18ec] ss:$16 sps:$4 sm:$0xff]  }
 0x397   : > { %10668 = vmatprep.subr.bf16.mxu0 %v16032_v42  ;;  %11743 = vmatprep.subr.bf16.mxu1 %v16035_v43  ;;  %v16123_v42 = vld [vmem:[%s17849_s14 + $0x18e0] ss:$16 sps:$4 sm:$0xff]   ;;  %v16126_v43 = vld [vmem:[%s17849_s14 + $0x18e8] ss:$16 sps:$4 sm:$0xff]  }
 0x39a   : > { %10669 = vmatpush1.bf16.msra.mxu0 %v16030_v44  ;;  %11744 = vmatpush1.bf16.msra.mxu1 %v16033_v45  ;;  %v16131_v44 = vld [vmem:[%s17849_s14 + $0x1904] ss:$16 sps:$4 sm:$0xff]   ;;  %v16134_v45 = vld [vmem:[%s17849_s14 + $0x190c] ss:$16 sps:$4 sm:$0xff]  }
 0x39b   : > { %10670 = vmatprep.subr.bf16.mxu0 %v16038_v46  ;;  %11745 = vmatprep.subr.bf16.mxu1 %v16041_v47  ;;  %v16129_v46 = vld [vmem:[%s17849_s14 + $0x1900] ss:$16 sps:$4 sm:$0xff]   ;;  %v16132_v47 = vld [vmem:[%s17849_s14 + $0x1908] ss:$16 sps:$4 sm:$0xff]  }
 0x39e   : > { %10671 = vmatpush1.bf16.msra.mxu0 %v16036_v48  ;;  %11746 = vmatpush1.bf16.msra.mxu1 %v16039_v49  ;;  %v16137_v48 = vld [vmem:[%s17849_s14 + $0x1924] ss:$16 sps:$4 sm:$0xff]   ;;  %v16140_v49 = vld [vmem:[%s17849_s14 + $0x192c] ss:$16 sps:$4 sm:$0xff]  }
 0x39f   : > { %10672 = vmatprep.subr.bf16.mxu0 %v16044_v50  ;;  %11747 = vmatprep.subr.bf16.mxu1 %v16047_v51  ;;  %v16135_v50 = vld [vmem:[%s17849_s14 + $0x1920] ss:$16 sps:$4 sm:$0xff]   ;;  %v16138_v51 = vld [vmem:[%s17849_s14 + $0x1928] ss:$16 sps:$4 sm:$0xff]  }
 0x3a2   : > { %10673 = vmatpush1.bf16.msra.mxu0 %v16042_v52  ;;  %11748 = vmatpush1.bf16.msra.mxu1 %v16045_v53  ;;  %v16143_v52 = vld [vmem:[%s17849_s14 + $0x1944] ss:$16 sps:$4 sm:$0xff]   ;;  %v16146_v53 = vld [vmem:[%s17849_s14 + $0x194c] ss:$16 sps:$4 sm:$0xff]  }
 0x3a3   : > { %10674 = vmatprep.subr.bf16.mxu0 %v16050_v54  ;;  %11749 = vmatprep.subr.bf16.mxu1 %v16053_v55  ;;  %v16141_v54 = vld [vmem:[%s17849_s14 + $0x1940] ss:$16 sps:$4 sm:$0xff]   ;;  %v16144_v55 = vld [vmem:[%s17849_s14 + $0x1948] ss:$16 sps:$4 sm:$0xff]  }
 0x3a6   : > { %10675 = vmatpush1.bf16.msra.mxu0 %v16048_v56  ;;  %11750 = vmatpush1.bf16.msra.mxu1 %v16051_v57  ;;  %v16149_v56 = vld [vmem:[%s17849_s14 + $0x1964] ss:$16 sps:$4 sm:$0xff]   ;;  %v16152_v57 = vld [vmem:[%s17849_s14 + $0x196c] ss:$16 sps:$4 sm:$0xff]  }
 0x3a7   : > { %10676 = vmatprep.subr.bf16.mxu0 %v16056_v58  ;;  %11751 = vmatprep.subr.bf16.mxu1 %v16059_v59  ;;  %v16147_v58 = vld [vmem:[%s17849_s14 + $0x1960] ss:$16 sps:$4 sm:$0xff]   ;;  %v16150_v59 = vld [vmem:[%s17849_s14 + $0x1968] ss:$16 sps:$4 sm:$0xff]  }
 0x3aa   : > { %10677 = vmatpush1.bf16.msra.mxu0 %v16054_v60  ;;  %11752 = vmatpush1.bf16.msra.mxu1 %v16057_v61  ;;  %v16155_v60 = vld [vmem:[%s17849_s14 + $0x1984] ss:$16 sps:$4 sm:$0xff]   ;;  %v16158_v61 = vld [vmem:[%s17849_s14 + $0x198c] ss:$16 sps:$4 sm:$0xff]  }
 0x3ab   : > { %10678 = vmatprep.subr.bf16.mxu0 %v16062_v62  ;;  %11753 = vmatprep.subr.bf16.mxu1 %v16065_v63  ;;  %v16153_v62 = vld [vmem:[%s17849_s14 + $0x1980] ss:$16 sps:$4 sm:$0xff]   ;;  %v16156_v63 = vld [vmem:[%s17849_s14 + $0x1988] ss:$16 sps:$4 sm:$0xff]  }
 0x3ae   : > { %10679 = vmatpush1.bf16.msra.mxu0 %v16060_v0  ;;  %11754 = vmatpush1.bf16.msra.mxu1 %v16063_v1  ;;  %v16161_v0 = vld [vmem:[%s17849_s14 + $0x19a4] ss:$16 sps:$4 sm:$0xff]   ;;  %v16164_v1 = vld [vmem:[%s17849_s14 + $0x19ac] ss:$16 sps:$4 sm:$0xff]  }
 0x3af   : > { %10680 = vmatprep.subr.bf16.mxu0 %v16068_v2  ;;  %11755 = vmatprep.subr.bf16.mxu1 %v16071_v3  ;;  %v16159_v2 = vld [vmem:[%s17849_s14 + $0x19a0] ss:$16 sps:$4 sm:$0xff]   ;;  %v16162_v3 = vld [vmem:[%s17849_s14 + $0x19a8] ss:$16 sps:$4 sm:$0xff]  }
 0x3b2   : > { %10681 = vmatpush1.bf16.msra.mxu0 %v16066_v4  ;;  %11756 = vmatpush1.bf16.msra.mxu1 %v16069_v5  ;;  %v16167_v4 = vld [vmem:[%s17849_s14 + $0x19c4] ss:$16 sps:$4 sm:$0xff]   ;;  %v16170_v5 = vld [vmem:[%s17849_s14 + $0x19cc] ss:$16 sps:$4 sm:$0xff]  }
 0x3b3   : > { %10682 = vmatprep.subr.bf16.mxu0 %v16074_v6  ;;  %11757 = vmatprep.subr.bf16.mxu1 %v16077_v7  ;;  %v16165_v6 = vld [vmem:[%s17849_s14 + $0x19c0] ss:$16 sps:$4 sm:$0xff]   ;;  %v16168_v7 = vld [vmem:[%s17849_s14 + $0x19c8] ss:$16 sps:$4 sm:$0xff]  }
 0x3b6   : > { %10683 = vmatpush1.bf16.msra.mxu0 %v16072_v8  ;;  %11758 = vmatpush1.bf16.msra.mxu1 %v16075_v9  ;;  %v16173_v8 = vld [vmem:[%s17849_s14 + $0x19e4] ss:$16 sps:$4 sm:$0xff]   ;;  %v16176_v9 = vld [vmem:[%s17849_s14 + $0x19ec] ss:$16 sps:$4 sm:$0xff]  }
 0x3b7   : > { %10695 = vmatprep.subr.bf16.mxu0 %v16083_v11  ;;  %11770 = vmatprep.subr.bf16.mxu1 %v16086_v12  ;;  %v16174_v11 = vld [vmem:[%s17849_s14 + $0x19e8] ss:$16 sps:$4 sm:$0xff]  }
 0x3b8   : > { %v16177_v12 = vld [vmem:[%s17847_s18 + $0x60] ss:$196 sps:$4 sm:$0xff]  }
 0x3b9   : > { %10685 = vmatmul.mubr.bf16.vlgmr.msra.gmra.mrb[0].mxu0 %v16078_v10  ;;  %11760 = vmatmul.mubr.bf16.vlgmr.msra.gmra.mrb[0].mxu1 %v16078_v10  ;;  %v16171_v10 = vld [vmem:[%s17849_s14 + $0x19e0] ss:$16 sps:$4 sm:$0xff]  }
 0x3ba   : > { %10696 = vmatpush1.bf16.msra.mxu0 %v16081_v13  ;;  %11771 = vmatpush1.bf16.msra.mxu1 %v16084_v14  ;;  %v16182_v13 = vld [vmem:[%s17849_s14 + $0x1a04] ss:$16 sps:$4 sm:$0xff]   ;;  %v16185_v14 = vld [vmem:[%s17849_s14 + $0x1a0c] ss:$16 sps:$4 sm:$0xff]  }
 0x3bb   : > { %10697 = vmatprep.subr.bf16.mxu0 %v16089_v15  ;;  %11772 = vmatprep.subr.bf16.mxu1 %v16092_v16  ;;  %v16180_v15 = vld [vmem:[%s17849_s14 + $0x1a00] ss:$16 sps:$4 sm:$0xff]   ;;  %v16183_v16 = vld [vmem:[%s17849_s14 + $0x1a08] ss:$16 sps:$4 sm:$0xff]  }
 0x3bc   : > { %10727 = vmatprep.mubr.bf16.mxu0 %v16179_v17  ;;  %11802 = vmatprep.mubr.bf16.mxu1 %v16179_v17  ;;  %v16188_v17 = vld [vmem:[%s17849_s14 + $0x1a24] ss:$16 sps:$4 sm:$0xff]  }
 0x3be   : > { %10698 = vmatpush1.bf16.msra.mxu0 %v16087_v18  ;;  %11773 = vmatpush1.bf16.msra.mxu1 %v16090_v19  ;;  %v16191_v18 = vld [vmem:[%s17849_s14 + $0x1a2c] ss:$16 sps:$4 sm:$0xff]  }
 0x3bf   : > { %10699 = vmatprep.subr.bf16.mxu0 %v16095_v20  ;;  %11774 = vmatprep.subr.bf16.mxu1 %v16098_v21  ;;  %v16278_v19 = vld [vmem:[%s17847_s18 + $0x6c] ss:$196 sps:$4 sm:$0xff]  }
 0x3c0   : > { %v16186_v20 = vld [vmem:[%s17849_s14 + $0x1a20] ss:$16 sps:$4 sm:$0xff]   ;;  %v16189_v21 = vld [vmem:[%s17849_s14 + $0x1a28] ss:$16 sps:$4 sm:$0xff]  }
 0x3c2   : > { %10700 = vmatpush1.bf16.msra.mxu0 %v16093_v22  ;;  %11775 = vmatpush1.bf16.msra.mxu1 %v16096_v23  ;;  %v16194_v22 = vld [vmem:[%s17849_s14 + $0x1a44] ss:$16 sps:$4 sm:$0xff]   ;;  %v16197_v23 = vld [vmem:[%s17849_s14 + $0x1a4c] ss:$16 sps:$4 sm:$0xff]  }
 0x3c3   : > { %10701 = vmatprep.subr.bf16.mxu0 %v16101_v24  ;;  %11776 = vmatprep.subr.bf16.mxu1 %v16104_v25  ;;  %v16192_v24 = vld [vmem:[%s17849_s14 + $0x1a40] ss:$16 sps:$4 sm:$0xff]   ;;  %v16195_v25 = vld [vmem:[%s17849_s14 + $0x1a48] ss:$16 sps:$4 sm:$0xff]  }
 0x3c6   : > { %10702 = vmatpush1.bf16.msra.mxu0 %v16099_v26  ;;  %11777 = vmatpush1.bf16.msra.mxu1 %v16102_v27  ;;  %v16200_v26 = vld [vmem:[%s17849_s14 + $0x1a64] ss:$16 sps:$4 sm:$0xff]   ;;  %v16203_v27 = vld [vmem:[%s17849_s14 + $0x1a6c] ss:$16 sps:$4 sm:$0xff]  }
 0x3c7   : > { %10703 = vmatprep.subr.bf16.mxu0 %v16107_v28  ;;  %11778 = vmatprep.subr.bf16.mxu1 %v16110_v29  ;;  %v16198_v28 = vld [vmem:[%s17849_s14 + $0x1a60] ss:$16 sps:$4 sm:$0xff]   ;;  %v16201_v29 = vld [vmem:[%s17849_s14 + $0x1a68] ss:$16 sps:$4 sm:$0xff]  }
 0x3ca   : > { %10704 = vmatpush1.bf16.msra.mxu0 %v16105_v30  ;;  %11779 = vmatpush1.bf16.msra.mxu1 %v16108_v31  ;;  %v16206_v30 = vld [vmem:[%s17849_s14 + $0x1a84] ss:$16 sps:$4 sm:$0xff]   ;;  %v16209_v31 = vld [vmem:[%s17849_s14 + $0x1a8c] ss:$16 sps:$4 sm:$0xff]  }
 0x3cb   : > { %10705 = vmatprep.subr.bf16.mxu0 %v16113_v32  ;;  %11780 = vmatprep.subr.bf16.mxu1 %v16116_v33  ;;  %v16204_v32 = vld [vmem:[%s17849_s14 + $0x1a80] ss:$16 sps:$4 sm:$0xff]   ;;  %v16207_v33 = vld [vmem:[%s17849_s14 + $0x1a88] ss:$16 sps:$4 sm:$0xff]  }
 0x3ce   : > { %10706 = vmatpush1.bf16.msra.mxu0 %v16111_v34  ;;  %11781 = vmatpush1.bf16.msra.mxu1 %v16114_v35  ;;  %v16212_v34 = vld [vmem:[%s17849_s14 + $0x1aa4] ss:$16 sps:$4 sm:$0xff]   ;;  %v16215_v35 = vld [vmem:[%s17849_s14 + $0x1aac] ss:$16 sps:$4 sm:$0xff]  }
 0x3cf   : > { %10707 = vmatprep.subr.bf16.mxu0 %v16119_v36  ;;  %11782 = vmatprep.subr.bf16.mxu1 %v16122_v37  ;;  %v16210_v36 = vld [vmem:[%s17849_s14 + $0x1aa0] ss:$16 sps:$4 sm:$0xff]   ;;  %v16213_v37 = vld [vmem:[%s17849_s14 + $0x1aa8] ss:$16 sps:$4 sm:$0xff]  }
 0x3d2   : > { %10708 = vmatpush1.bf16.msra.mxu0 %v16117_v38  ;;  %11783 = vmatpush1.bf16.msra.mxu1 %v16120_v39  ;;  %v16218_v38 = vld [vmem:[%s17849_s14 + $0x1ac4] ss:$16 sps:$4 sm:$0xff]   ;;  %v16221_v39 = vld [vmem:[%s17849_s14 + $0x1acc] ss:$16 sps:$4 sm:$0xff]  }
 0x3d3   : > { %10709 = vmatprep.subr.bf16.mxu0 %v16125_v40  ;;  %11784 = vmatprep.subr.bf16.mxu1 %v16128_v41  ;;  %v16216_v40 = vld [vmem:[%s17849_s14 + $0x1ac0] ss:$16 sps:$4 sm:$0xff]   ;;  %v16219_v41 = vld [vmem:[%s17849_s14 + $0x1ac8] ss:$16 sps:$4 sm:$0xff]  }
 0x3d6   : > { %10710 = vmatpush1.bf16.msra.mxu0 %v16123_v42  ;;  %11785 = vmatpush1.bf16.msra.mxu1 %v16126_v43  ;;  %v16224_v42 = vld [vmem:[%s17849_s14 + $0x1ae4] ss:$16 sps:$4 sm:$0xff]   ;;  %v16227_v43 = vld [vmem:[%s17849_s14 + $0x1aec] ss:$16 sps:$4 sm:$0xff]  }
 0x3d7   : > { %10711 = vmatprep.subr.bf16.mxu0 %v16131_v44  ;;  %11786 = vmatprep.subr.bf16.mxu1 %v16134_v45  ;;  %v16222_v44 = vld [vmem:[%s17849_s14 + $0x1ae0] ss:$16 sps:$4 sm:$0xff]   ;;  %v16225_v45 = vld [vmem:[%s17849_s14 + $0x1ae8] ss:$16 sps:$4 sm:$0xff]  }
 0x3da   : > { %10712 = vmatpush1.bf16.msra.mxu0 %v16129_v46  ;;  %11787 = vmatpush1.bf16.msra.mxu1 %v16132_v47  ;;  %v16230_v46 = vld [vmem:[%s17849_s14 + $0x1b04] ss:$16 sps:$4 sm:$0xff]   ;;  %v16233_v47 = vld [vmem:[%s17849_s14 + $0x1b0c] ss:$16 sps:$4 sm:$0xff]  }
 0x3db   : > { %10713 = vmatprep.subr.bf16.mxu0 %v16137_v48  ;;  %11788 = vmatprep.subr.bf16.mxu1 %v16140_v49  ;;  %v16228_v48 = vld [vmem:[%s17849_s14 + $0x1b00] ss:$16 sps:$4 sm:$0xff]   ;;  %v16231_v49 = vld [vmem:[%s17849_s14 + $0x1b08] ss:$16 sps:$4 sm:$0xff]  }
 0x3de   : > { %10714 = vmatpush1.bf16.msra.mxu0 %v16135_v50  ;;  %11789 = vmatpush1.bf16.msra.mxu1 %v16138_v51  ;;  %v16236_v50 = vld [vmem:[%s17849_s14 + $0x1b24] ss:$16 sps:$4 sm:$0xff]   ;;  %v16239_v51 = vld [vmem:[%s17849_s14 + $0x1b2c] ss:$16 sps:$4 sm:$0xff]  }
 0x3df   : > { %10715 = vmatprep.subr.bf16.mxu0 %v16143_v52  ;;  %11790 = vmatprep.subr.bf16.mxu1 %v16146_v53  ;;  %v16234_v52 = vld [vmem:[%s17849_s14 + $0x1b20] ss:$16 sps:$4 sm:$0xff]   ;;  %v16237_v53 = vld [vmem:[%s17849_s14 + $0x1b28] ss:$16 sps:$4 sm:$0xff]  }
 0x3e2   : > { %10716 = vmatpush1.bf16.msra.mxu0 %v16141_v54  ;;  %11791 = vmatpush1.bf16.msra.mxu1 %v16144_v55  ;;  %v16242_v54 = vld [vmem:[%s17849_s14 + $0x1b44] ss:$16 sps:$4 sm:$0xff]   ;;  %v16245_v55 = vld [vmem:[%s17849_s14 + $0x1b4c] ss:$16 sps:$4 sm:$0xff]  }
 0x3e3   : > { %10717 = vmatprep.subr.bf16.mxu0 %v16149_v56  ;;  %11792 = vmatprep.subr.bf16.mxu1 %v16152_v57  ;;  %v16240_v56 = vld [vmem:[%s17849_s14 + $0x1b40] ss:$16 sps:$4 sm:$0xff]   ;;  %v16243_v57 = vld [vmem:[%s17849_s14 + $0x1b48] ss:$16 sps:$4 sm:$0xff]  }
 0x3e6   : > { %10718 = vmatpush1.bf16.msra.mxu0 %v16147_v58  ;;  %11793 = vmatpush1.bf16.msra.mxu1 %v16150_v59  ;;  %v16248_v58 = vld [vmem:[%s17849_s14 + $0x1b64] ss:$16 sps:$4 sm:$0xff]   ;;  %v16251_v59 = vld [vmem:[%s17849_s14 + $0x1b6c] ss:$16 sps:$4 sm:$0xff]  }
 0x3e7   : > { %10719 = vmatprep.subr.bf16.mxu0 %v16155_v60  ;;  %11794 = vmatprep.subr.bf16.mxu1 %v16158_v61  ;;  %v16246_v60 = vld [vmem:[%s17849_s14 + $0x1b60] ss:$16 sps:$4 sm:$0xff]   ;;  %v16249_v61 = vld [vmem:[%s17849_s14 + $0x1b68] ss:$16 sps:$4 sm:$0xff]  }
 0x3ea   : > { %10720 = vmatpush1.bf16.msra.mxu0 %v16153_v62  ;;  %11795 = vmatpush1.bf16.msra.mxu1 %v16156_v63  ;;  %v16254_v62 = vld [vmem:[%s17849_s14 + $0x1b84] ss:$16 sps:$4 sm:$0xff]   ;;  %v16257_v63 = vld [vmem:[%s17849_s14 + $0x1b8c] ss:$16 sps:$4 sm:$0xff]  }
 0x3eb   : > { %10721 = vmatprep.subr.bf16.mxu0 %v16161_v0  ;;  %11796 = vmatprep.subr.bf16.mxu1 %v16164_v1  ;;  %v16252_v0 = vld [vmem:[%s17849_s14 + $0x1b80] ss:$16 sps:$4 sm:$0xff]   ;;  %v16255_v1 = vld [vmem:[%s17849_s14 + $0x1b88] ss:$16 sps:$4 sm:$0xff]  }
 0x3ee   : > { %10722 = vmatpush1.bf16.msra.mxu0 %v16159_v2  ;;  %11797 = vmatpush1.bf16.msra.mxu1 %v16162_v3  ;;  %v16260_v2 = vld [vmem:[%s17849_s14 + $0x1ba4] ss:$16 sps:$4 sm:$0xff]   ;;  %v16263_v3 = vld [vmem:[%s17849_s14 + $0x1bac] ss:$16 sps:$4 sm:$0xff]  }
 0x3ef   : > { %10723 = vmatprep.subr.bf16.mxu0 %v16167_v4  ;;  %11798 = vmatprep.subr.bf16.mxu1 %v16170_v5  ;;  %v16258_v4 = vld [vmem:[%s17849_s14 + $0x1ba0] ss:$16 sps:$4 sm:$0xff]   ;;  %v16261_v5 = vld [vmem:[%s17849_s14 + $0x1ba8] ss:$16 sps:$4 sm:$0xff]  }
 0x3f2   : > { %10724 = vmatpush1.bf16.msra.mxu0 %v16165_v6  ;;  %11799 = vmatpush1.bf16.msra.mxu1 %v16168_v7  ;;  %v16266_v6 = vld [vmem:[%s17849_s14 + $0x1bc4] ss:$16 sps:$4 sm:$0xff]   ;;  %v16269_v7 = vld [vmem:[%s17849_s14 + $0x1bcc] ss:$16 sps:$4 sm:$0xff]  }
 0x3f3   : > { %10725 = vmatprep.subr.bf16.mxu0 %v16173_v8  ;;  %11800 = vmatprep.subr.bf16.mxu1 %v16176_v9  ;;  %v16264_v8 = vld [vmem:[%s17849_s14 + $0x1bc0] ss:$16 sps:$4 sm:$0xff]   ;;  %v16267_v9 = vld [vmem:[%s17849_s14 + $0x1bc8] ss:$16 sps:$4 sm:$0xff]  }
 0x3f6   : > { %10726 = vmatpush1.bf16.msra.mxu0 %v16171_v10  ;;  %11801 = vmatpush1.bf16.msra.mxu1 %v16174_v11  ;;  %v16272_v10 = vld [vmem:[%s17849_s14 + $0x1be4] ss:$16 sps:$4 sm:$0xff]   ;;  %v16275_v11 = vld [vmem:[%s17849_s14 + $0x1bec] ss:$16 sps:$4 sm:$0xff]  }
 0x3f7   : > { %10738 = vmatprep.subr.bf16.mxu0 %v16182_v13  ;;  %11813 = vmatprep.subr.bf16.mxu1 %v16185_v14  ;;  %v16273_v13 = vld [vmem:[%s17849_s14 + $0x1be8] ss:$16 sps:$4 sm:$0xff]   ;;  %v16281_v14 = vld [vmem:[%s17849_s14 + $0x1c04] ss:$16 sps:$4 sm:$0xff]  }
 0x3f9   : > { %10728 = vmatmul.mubr.bf16.vlgmr.msra.gmra.mrb[0].mxu0 %v16177_v12  ;;  %11803 = vmatmul.mubr.bf16.vlgmr.msra.gmra.mrb[0].mxu1 %v16177_v12  ;;  %v16270_v12 = vld [vmem:[%s17849_s14 + $0x1be0] ss:$16 sps:$4 sm:$0xff]  }
 0x3fa   : > { %10739 = vmatpush1.bf16.msra.mxu0 %v16180_v15  ;;  %11814 = vmatpush1.bf16.msra.mxu1 %v16183_v16  ;;  %v16284_v15 = vld [vmem:[%s17849_s14 + $0x1c0c] ss:$16 sps:$4 sm:$0xff]  }
 0x3fb   : > { %10740 = vmatprep.subr.bf16.mxu0 %v16188_v17  ;;  %11815 = vmatprep.subr.bf16.mxu1 %v16191_v18  ;;  %v16276_v16 = vld [vmem:[%s17847_s18 + $0x68] ss:$196 sps:$4 sm:$0xff]  }
 0x3fc   : > { %10770 = vmatprep.mubr.bf16.mxu0 %v16278_v19  ;;  %11845 = vmatprep.mubr.bf16.mxu1 %v16278_v19  ;;  %v16279_v17 = vld [vmem:[%s17849_s14 + $0x1c00] ss:$16 sps:$4 sm:$0xff]   ;;  %v16282_v18 = vld [vmem:[%s17849_s14 + $0x1c08] ss:$16 sps:$4 sm:$0xff]   ;;  %v16287_v19 = vld [vmem:[%s17849_s14 + $0x1c24] ss:$16 sps:$4 sm:$0xff]  }
 0x3fe   : > { %10741 = vmatpush1.bf16.msra.mxu0 %v16186_v20  ;;  %11816 = vmatpush1.bf16.msra.mxu1 %v16189_v21  ;;  %v16290_v20 = vld [vmem:[%s17849_s14 + $0x1c2c] ss:$16 sps:$4 sm:$0xff]  }
 0x3ff   : > { %10742 = vmatprep.subr.bf16.mxu0 %v16194_v22  ;;  %11817 = vmatprep.subr.bf16.mxu1 %v16197_v23  ;;  %v16377_v21 = vld [vmem:[%s17847_s18 + $0x74] ss:$196 sps:$4 sm:$0xff]  }
 0x400   : > { %v16285_v22 = vld [vmem:[%s17849_s14 + $0x1c20] ss:$16 sps:$4 sm:$0xff]   ;;  %v16288_v23 = vld [vmem:[%s17849_s14 + $0x1c28] ss:$16 sps:$4 sm:$0xff]  }
 0x402   : > { %10743 = vmatpush1.bf16.msra.mxu0 %v16192_v24  ;;  %11818 = vmatpush1.bf16.msra.mxu1 %v16195_v25  ;;  %v16293_v24 = vld [vmem:[%s17849_s14 + $0x1c44] ss:$16 sps:$4 sm:$0xff]   ;;  %v16296_v25 = vld [vmem:[%s17849_s14 + $0x1c4c] ss:$16 sps:$4 sm:$0xff]  }
 0x403   : > { %10744 = vmatprep.subr.bf16.mxu0 %v16200_v26  ;;  %11819 = vmatprep.subr.bf16.mxu1 %v16203_v27  ;;  %v16291_v26 = vld [vmem:[%s17849_s14 + $0x1c40] ss:$16 sps:$4 sm:$0xff]   ;;  %v16294_v27 = vld [vmem:[%s17849_s14 + $0x1c48] ss:$16 sps:$4 sm:$0xff]  }
 0x406   : > { %10745 = vmatpush1.bf16.msra.mxu0 %v16198_v28  ;;  %11820 = vmatpush1.bf16.msra.mxu1 %v16201_v29  ;;  %v16299_v28 = vld [vmem:[%s17849_s14 + $0x1c64] ss:$16 sps:$4 sm:$0xff]   ;;  %v16302_v29 = vld [vmem:[%s17849_s14 + $0x1c6c] ss:$16 sps:$4 sm:$0xff]  }
 0x407   : > { %10746 = vmatprep.subr.bf16.mxu0 %v16206_v30  ;;  %11821 = vmatprep.subr.bf16.mxu1 %v16209_v31  ;;  %v16297_v30 = vld [vmem:[%s17849_s14 + $0x1c60] ss:$16 sps:$4 sm:$0xff]   ;;  %v16300_v31 = vld [vmem:[%s17849_s14 + $0x1c68] ss:$16 sps:$4 sm:$0xff]  }
 0x40a   : > { %10747 = vmatpush1.bf16.msra.mxu0 %v16204_v32  ;;  %11822 = vmatpush1.bf16.msra.mxu1 %v16207_v33  ;;  %v16305_v32 = vld [vmem:[%s17849_s14 + $0x1c84] ss:$16 sps:$4 sm:$0xff]   ;;  %v16308_v33 = vld [vmem:[%s17849_s14 + $0x1c8c] ss:$16 sps:$4 sm:$0xff]  }
 0x40b   : > { %10748 = vmatprep.subr.bf16.mxu0 %v16212_v34  ;;  %11823 = vmatprep.subr.bf16.mxu1 %v16215_v35  ;;  %v16303_v34 = vld [vmem:[%s17849_s14 + $0x1c80] ss:$16 sps:$4 sm:$0xff]   ;;  %v16306_v35 = vld [vmem:[%s17849_s14 + $0x1c88] ss:$16 sps:$4 sm:$0xff]  }
 0x40e   : > { %10749 = vmatpush1.bf16.msra.mxu0 %v16210_v36  ;;  %11824 = vmatpush1.bf16.msra.mxu1 %v16213_v37  ;;  %v16311_v36 = vld [vmem:[%s17849_s14 + $0x1ca4] ss:$16 sps:$4 sm:$0xff]   ;;  %v16314_v37 = vld [vmem:[%s17849_s14 + $0x1cac] ss:$16 sps:$4 sm:$0xff]  }
 0x40f   : > { %10750 = vmatprep.subr.bf16.mxu0 %v16218_v38  ;;  %11825 = vmatprep.subr.bf16.mxu1 %v16221_v39  ;;  %v16309_v38 = vld [vmem:[%s17849_s14 + $0x1ca0] ss:$16 sps:$4 sm:$0xff]   ;;  %v16312_v39 = vld [vmem:[%s17849_s14 + $0x1ca8] ss:$16 sps:$4 sm:$0xff]  }
 0x412   : > { %10751 = vmatpush1.bf16.msra.mxu0 %v16216_v40  ;;  %11826 = vmatpush1.bf16.msra.mxu1 %v16219_v41  ;;  %v16317_v40 = vld [vmem:[%s17849_s14 + $0x1cc4] ss:$16 sps:$4 sm:$0xff]   ;;  %v16320_v41 = vld [vmem:[%s17849_s14 + $0x1ccc] ss:$16 sps:$4 sm:$0xff]  }
 0x413   : > { %10752 = vmatprep.subr.bf16.mxu0 %v16224_v42  ;;  %11827 = vmatprep.subr.bf16.mxu1 %v16227_v43  ;;  %v16315_v42 = vld [vmem:[%s17849_s14 + $0x1cc0] ss:$16 sps:$4 sm:$0xff]   ;;  %v16318_v43 = vld [vmem:[%s17849_s14 + $0x1cc8] ss:$16 sps:$4 sm:$0xff]  }
 0x416   : > { %10753 = vmatpush1.bf16.msra.mxu0 %v16222_v44  ;;  %11828 = vmatpush1.bf16.msra.mxu1 %v16225_v45  ;;  %v16323_v44 = vld [vmem:[%s17849_s14 + $0x1ce4] ss:$16 sps:$4 sm:$0xff]   ;;  %v16326_v45 = vld [vmem:[%s17849_s14 + $0x1cec] ss:$16 sps:$4 sm:$0xff]  }
 0x417   : > { %10754 = vmatprep.subr.bf16.mxu0 %v16230_v46  ;;  %11829 = vmatprep.subr.bf16.mxu1 %v16233_v47  ;;  %v16321_v46 = vld [vmem:[%s17849_s14 + $0x1ce0] ss:$16 sps:$4 sm:$0xff]   ;;  %v16324_v47 = vld [vmem:[%s17849_s14 + $0x1ce8] ss:$16 sps:$4 sm:$0xff]  }
 0x41a   : > { %10755 = vmatpush1.bf16.msra.mxu0 %v16228_v48  ;;  %11830 = vmatpush1.bf16.msra.mxu1 %v16231_v49  ;;  %v16329_v48 = vld [vmem:[%s17849_s14 + $0x1d04] ss:$16 sps:$4 sm:$0xff]   ;;  %v16332_v49 = vld [vmem:[%s17849_s14 + $0x1d0c] ss:$16 sps:$4 sm:$0xff]  }
 0x41b   : > { %10756 = vmatprep.subr.bf16.mxu0 %v16236_v50  ;;  %11831 = vmatprep.subr.bf16.mxu1 %v16239_v51  ;;  %v16327_v50 = vld [vmem:[%s17849_s14 + $0x1d00] ss:$16 sps:$4 sm:$0xff]   ;;  %v16330_v51 = vld [vmem:[%s17849_s14 + $0x1d08] ss:$16 sps:$4 sm:$0xff]  }
 0x41e   : > { %10757 = vmatpush1.bf16.msra.mxu0 %v16234_v52  ;;  %11832 = vmatpush1.bf16.msra.mxu1 %v16237_v53  ;;  %v16335_v52 = vld [vmem:[%s17849_s14 + $0x1d24] ss:$16 sps:$4 sm:$0xff]   ;;  %v16338_v53 = vld [vmem:[%s17849_s14 + $0x1d2c] ss:$16 sps:$4 sm:$0xff]  }
 0x41f   : > { %10758 = vmatprep.subr.bf16.mxu0 %v16242_v54  ;;  %11833 = vmatprep.subr.bf16.mxu1 %v16245_v55  ;;  %v16333_v54 = vld [vmem:[%s17849_s14 + $0x1d20] ss:$16 sps:$4 sm:$0xff]   ;;  %v16336_v55 = vld [vmem:[%s17849_s14 + $0x1d28] ss:$16 sps:$4 sm:$0xff]  }
 0x422   : > { %10759 = vmatpush1.bf16.msra.mxu0 %v16240_v56  ;;  %11834 = vmatpush1.bf16.msra.mxu1 %v16243_v57  ;;  %v16341_v56 = vld [vmem:[%s17849_s14 + $0x1d44] ss:$16 sps:$4 sm:$0xff]   ;;  %v16344_v57 = vld [vmem:[%s17849_s14 + $0x1d4c] ss:$16 sps:$4 sm:$0xff]  }
 0x423   : > { %10760 = vmatprep.subr.bf16.mxu0 %v16248_v58  ;;  %11835 = vmatprep.subr.bf16.mxu1 %v16251_v59  ;;  %v16339_v58 = vld [vmem:[%s17849_s14 + $0x1d40] ss:$16 sps:$4 sm:$0xff]   ;;  %v16342_v59 = vld [vmem:[%s17849_s14 + $0x1d48] ss:$16 sps:$4 sm:$0xff]  }
 0x426   : > { %10761 = vmatpush1.bf16.msra.mxu0 %v16246_v60  ;;  %11836 = vmatpush1.bf16.msra.mxu1 %v16249_v61  ;;  %v16347_v60 = vld [vmem:[%s17849_s14 + $0x1d64] ss:$16 sps:$4 sm:$0xff]   ;;  %v16350_v61 = vld [vmem:[%s17849_s14 + $0x1d6c] ss:$16 sps:$4 sm:$0xff]  }
 0x427   : > { %10762 = vmatprep.subr.bf16.mxu0 %v16254_v62  ;;  %11837 = vmatprep.subr.bf16.mxu1 %v16257_v63  ;;  %v16345_v62 = vld [vmem:[%s17849_s14 + $0x1d60] ss:$16 sps:$4 sm:$0xff]   ;;  %v16348_v63 = vld [vmem:[%s17849_s14 + $0x1d68] ss:$16 sps:$4 sm:$0xff]  }
 0x42a   : > { %10763 = vmatpush1.bf16.msra.mxu0 %v16252_v0  ;;  %11838 = vmatpush1.bf16.msra.mxu1 %v16255_v1  ;;  %v16353_v0 = vld [vmem:[%s17849_s14 + $0x1d84] ss:$16 sps:$4 sm:$0xff]   ;;  %v16356_v1 = vld [vmem:[%s17849_s14 + $0x1d8c] ss:$16 sps:$4 sm:$0xff]  }
 0x42b   : > { %10764 = vmatprep.subr.bf16.mxu0 %v16260_v2  ;;  %11839 = vmatprep.subr.bf16.mxu1 %v16263_v3  ;;  %v16351_v2 = vld [vmem:[%s17849_s14 + $0x1d80] ss:$16 sps:$4 sm:$0xff]   ;;  %v16354_v3 = vld [vmem:[%s17849_s14 + $0x1d88] ss:$16 sps:$4 sm:$0xff]  }
 0x42e   : > { %10765 = vmatpush1.bf16.msra.mxu0 %v16258_v4  ;;  %11840 = vmatpush1.bf16.msra.mxu1 %v16261_v5  ;;  %v16359_v4 = vld [vmem:[%s17849_s14 + $0x1da4] ss:$16 sps:$4 sm:$0xff]   ;;  %v16362_v5 = vld [vmem:[%s17849_s14 + $0x1dac] ss:$16 sps:$4 sm:$0xff]  }
 0x42f   : > { %10766 = vmatprep.subr.bf16.mxu0 %v16266_v6  ;;  %11841 = vmatprep.subr.bf16.mxu1 %v16269_v7  ;;  %v16357_v6 = vld [vmem:[%s17849_s14 + $0x1da0] ss:$16 sps:$4 sm:$0xff]   ;;  %v16360_v7 = vld [vmem:[%s17849_s14 + $0x1da8] ss:$16 sps:$4 sm:$0xff]  }
 0x432   : > { %10767 = vmatpush1.bf16.msra.mxu0 %v16264_v8  ;;  %11842 = vmatpush1.bf16.msra.mxu1 %v16267_v9  ;;  %v16365_v8 = vld [vmem:[%s17849_s14 + $0x1dc4] ss:$16 sps:$4 sm:$0xff]   ;;  %v16368_v9 = vld [vmem:[%s17849_s14 + $0x1dcc] ss:$16 sps:$4 sm:$0xff]  }
 0x433   : > { %10768 = vmatprep.subr.bf16.mxu0 %v16272_v10  ;;  %11843 = vmatprep.subr.bf16.mxu1 %v16275_v11  ;;  %v16363_v10 = vld [vmem:[%s17849_s14 + $0x1dc0] ss:$16 sps:$4 sm:$0xff]   ;;  %v16366_v11 = vld [vmem:[%s17849_s14 + $0x1dc8] ss:$16 sps:$4 sm:$0xff]  }
 0x436   : > { %10769 = vmatpush1.bf16.msra.mxu0 %v16270_v12  ;;  %11844 = vmatpush1.bf16.msra.mxu1 %v16273_v13  ;;  %v16371_v12 = vld [vmem:[%s17849_s14 + $0x1de4] ss:$16 sps:$4 sm:$0xff]   ;;  %v16374_v13 = vld [vmem:[%s17849_s14 + $0x1dec] ss:$16 sps:$4 sm:$0xff]  }
 0x437   : > { %10781 = vmatprep.subr.bf16.mxu0 %v16281_v14  ;;  %11856 = vmatprep.subr.bf16.mxu1 %v16284_v15  ;;  %v16369_v14 = vld [vmem:[%s17849_s14 + $0x1de0] ss:$16 sps:$4 sm:$0xff]   ;;  %v16372_v15 = vld [vmem:[%s17849_s14 + $0x1de8] ss:$16 sps:$4 sm:$0xff]  }
 0x439   : > { %10771 = vmatmul.mubr.bf16.vlgmr.msra.gmra.mrb[0].mxu0 %v16276_v16  ;;  %11846 = vmatmul.mubr.bf16.vlgmr.msra.gmra.mrb[0].mxu1 %v16276_v16  ;;  %v16380_v16 = vld [vmem:[%s17849_s14 + $0x1e04] ss:$16 sps:$4 sm:$0xff]  }
 0x43a   : > { %10782 = vmatpush1.bf16.msra.mxu0 %v16279_v17  ;;  %11857 = vmatpush1.bf16.msra.mxu1 %v16282_v18  ;;  %v16383_v17 = vld [vmem:[%s17849_s14 + $0x1e0c] ss:$16 sps:$4 sm:$0xff]  }
 0x43b   : > { %10783 = vmatprep.subr.bf16.mxu0 %v16287_v19  ;;  %11858 = vmatprep.subr.bf16.mxu1 %v16290_v20  ;;  %v16375_v18 = vld [vmem:[%s17847_s18 + $0x70] ss:$196 sps:$4 sm:$0xff]  }
 0x43c   : > { %10813 = vmatprep.mubr.bf16.mxu0 %v16377_v21  ;;  %11888 = vmatprep.mubr.bf16.mxu1 %v16377_v21  ;;  %v16378_v19 = vld [vmem:[%s17849_s14 + $0x1e00] ss:$16 sps:$4 sm:$0xff]   ;;  %v16381_v20 = vld [vmem:[%s17849_s14 + $0x1e08] ss:$16 sps:$4 sm:$0xff]   ;;  %v16386_v21 = vld [vmem:[%s17849_s14 + $0x1e24] ss:$16 sps:$4 sm:$0xff]  }
 0x43e   : > { %10784 = vmatpush1.bf16.msra.mxu0 %v16285_v22  ;;  %11859 = vmatpush1.bf16.msra.mxu1 %v16288_v23  ;;  %v16389_v22 = vld [vmem:[%s17849_s14 + $0x1e2c] ss:$16 sps:$4 sm:$0xff]  }
 0x43f   : > { %10785 = vmatprep.subr.bf16.mxu0 %v16293_v24  ;;  %11860 = vmatprep.subr.bf16.mxu1 %v16296_v25  ;;  %v16476_v23 = vld [vmem:[%s17847_s18 + $0x7c] ss:$196 sps:$4 sm:$0xff]  }
 0x440   : > { %v16384_v24 = vld [vmem:[%s17849_s14 + $0x1e20] ss:$16 sps:$4 sm:$0xff]   ;;  %v16387_v25 = vld [vmem:[%s17849_s14 + $0x1e28] ss:$16 sps:$4 sm:$0xff]  }
 0x442   : > { %10786 = vmatpush1.bf16.msra.mxu0 %v16291_v26  ;;  %11861 = vmatpush1.bf16.msra.mxu1 %v16294_v27  ;;  %v16392_v26 = vld [vmem:[%s17849_s14 + $0x1e44] ss:$16 sps:$4 sm:$0xff]   ;;  %v16395_v27 = vld [vmem:[%s17849_s14 + $0x1e4c] ss:$16 sps:$4 sm:$0xff]  }
 0x443   : > { %10787 = vmatprep.subr.bf16.mxu0 %v16299_v28  ;;  %11862 = vmatprep.subr.bf16.mxu1 %v16302_v29  ;;  %v16390_v28 = vld [vmem:[%s17849_s14 + $0x1e40] ss:$16 sps:$4 sm:$0xff]   ;;  %v16393_v29 = vld [vmem:[%s17849_s14 + $0x1e48] ss:$16 sps:$4 sm:$0xff]  }
 0x446   : > { %10788 = vmatpush1.bf16.msra.mxu0 %v16297_v30  ;;  %11863 = vmatpush1.bf16.msra.mxu1 %v16300_v31  ;;  %v16398_v30 = vld [vmem:[%s17849_s14 + $0x1e64] ss:$16 sps:$4 sm:$0xff]   ;;  %v16401_v31 = vld [vmem:[%s17849_s14 + $0x1e6c] ss:$16 sps:$4 sm:$0xff]  }
 0x447   : > { %10789 = vmatprep.subr.bf16.mxu0 %v16305_v32  ;;  %11864 = vmatprep.subr.bf16.mxu1 %v16308_v33  ;;  %v16396_v32 = vld [vmem:[%s17849_s14 + $0x1e60] ss:$16 sps:$4 sm:$0xff]   ;;  %v16399_v33 = vld [vmem:[%s17849_s14 + $0x1e68] ss:$16 sps:$4 sm:$0xff]  }
 0x44a   : > { %10790 = vmatpush1.bf16.msra.mxu0 %v16303_v34  ;;  %11865 = vmatpush1.bf16.msra.mxu1 %v16306_v35  ;;  %v16404_v34 = vld [vmem:[%s17849_s14 + $0x1e84] ss:$16 sps:$4 sm:$0xff]   ;;  %v16407_v35 = vld [vmem:[%s17849_s14 + $0x1e8c] ss:$16 sps:$4 sm:$0xff]  }
 0x44b   : > { %10791 = vmatprep.subr.bf16.mxu0 %v16311_v36  ;;  %11866 = vmatprep.subr.bf16.mxu1 %v16314_v37  ;;  %v16402_v36 = vld [vmem:[%s17849_s14 + $0x1e80] ss:$16 sps:$4 sm:$0xff]   ;;  %v16405_v37 = vld [vmem:[%s17849_s14 + $0x1e88] ss:$16 sps:$4 sm:$0xff]  }
 0x44e   : > { %10792 = vmatpush1.bf16.msra.mxu0 %v16309_v38  ;;  %11867 = vmatpush1.bf16.msra.mxu1 %v16312_v39  ;;  %v16410_v38 = vld [vmem:[%s17849_s14 + $0x1ea4] ss:$16 sps:$4 sm:$0xff]   ;;  %v16413_v39 = vld [vmem:[%s17849_s14 + $0x1eac] ss:$16 sps:$4 sm:$0xff]  }
 0x44f   : > { %10793 = vmatprep.subr.bf16.mxu0 %v16317_v40  ;;  %11868 = vmatprep.subr.bf16.mxu1 %v16320_v41  ;;  %v16408_v40 = vld [vmem:[%s17849_s14 + $0x1ea0] ss:$16 sps:$4 sm:$0xff]   ;;  %v16411_v41 = vld [vmem:[%s17849_s14 + $0x1ea8] ss:$16 sps:$4 sm:$0xff]  }
 0x452   : > { %10794 = vmatpush1.bf16.msra.mxu0 %v16315_v42  ;;  %11869 = vmatpush1.bf16.msra.mxu1 %v16318_v43  ;;  %v16416_v42 = vld [vmem:[%s17849_s14 + $0x1ec4] ss:$16 sps:$4 sm:$0xff]   ;;  %v16419_v43 = vld [vmem:[%s17849_s14 + $0x1ecc] ss:$16 sps:$4 sm:$0xff]  }
 0x453   : > { %10795 = vmatprep.subr.bf16.mxu0 %v16323_v44  ;;  %11870 = vmatprep.subr.bf16.mxu1 %v16326_v45  ;;  %v16414_v44 = vld [vmem:[%s17849_s14 + $0x1ec0] ss:$16 sps:$4 sm:$0xff]   ;;  %v16417_v45 = vld [vmem:[%s17849_s14 + $0x1ec8] ss:$16 sps:$4 sm:$0xff]  }
 0x456   : > { %10796 = vmatpush1.bf16.msra.mxu0 %v16321_v46  ;;  %11871 = vmatpush1.bf16.msra.mxu1 %v16324_v47  ;;  %v16422_v46 = vld [vmem:[%s17849_s14 + $0x1ee4] ss:$16 sps:$4 sm:$0xff]   ;;  %v16425_v47 = vld [vmem:[%s17849_s14 + $0x1eec] ss:$16 sps:$4 sm:$0xff]  }
 0x457   : > { %10797 = vmatprep.subr.bf16.mxu0 %v16329_v48  ;;  %11872 = vmatprep.subr.bf16.mxu1 %v16332_v49  ;;  %v16420_v48 = vld [vmem:[%s17849_s14 + $0x1ee0] ss:$16 sps:$4 sm:$0xff]   ;;  %v16423_v49 = vld [vmem:[%s17849_s14 + $0x1ee8] ss:$16 sps:$4 sm:$0xff]  }
 0x45a   : > { %10798 = vmatpush1.bf16.msra.mxu0 %v16327_v50  ;;  %11873 = vmatpush1.bf16.msra.mxu1 %v16330_v51  ;;  %v16428_v50 = vld [vmem:[%s17849_s14 + $0x1f04] ss:$16 sps:$4 sm:$0xff]   ;;  %v16431_v51 = vld [vmem:[%s17849_s14 + $0x1f0c] ss:$16 sps:$4 sm:$0xff]  }
 0x45b   : > { %10799 = vmatprep.subr.bf16.mxu0 %v16335_v52  ;;  %11874 = vmatprep.subr.bf16.mxu1 %v16338_v53  ;;  %v16426_v52 = vld [vmem:[%s17849_s14 + $0x1f00] ss:$16 sps:$4 sm:$0xff]   ;;  %v16429_v53 = vld [vmem:[%s17849_s14 + $0x1f08] ss:$16 sps:$4 sm:$0xff]  }
 0x45e   : > { %10800 = vmatpush1.bf16.msra.mxu0 %v16333_v54  ;;  %11875 = vmatpush1.bf16.msra.mxu1 %v16336_v55  ;;  %v16434_v54 = vld [vmem:[%s17849_s14 + $0x1f24] ss:$16 sps:$4 sm:$0xff]   ;;  %v16437_v55 = vld [vmem:[%s17849_s14 + $0x1f2c] ss:$16 sps:$4 sm:$0xff]  }
 0x45f   : > { %10801 = vmatprep.subr.bf16.mxu0 %v16341_v56  ;;  %11876 = vmatprep.subr.bf16.mxu1 %v16344_v57  ;;  %v16432_v56 = vld [vmem:[%s17849_s14 + $0x1f20] ss:$16 sps:$4 sm:$0xff]   ;;  %v16435_v57 = vld [vmem:[%s17849_s14 + $0x1f28] ss:$16 sps:$4 sm:$0xff]  }
 0x462   : > { %10802 = vmatpush1.bf16.msra.mxu0 %v16339_v58  ;;  %11877 = vmatpush1.bf16.msra.mxu1 %v16342_v59  ;;  %v16440_v58 = vld [vmem:[%s17849_s14 + $0x1f44] ss:$16 sps:$4 sm:$0xff]   ;;  %v16443_v59 = vld [vmem:[%s17849_s14 + $0x1f4c] ss:$16 sps:$4 sm:$0xff]  }
 0x463   : > { %10803 = vmatprep.subr.bf16.mxu0 %v16347_v60  ;;  %11878 = vmatprep.subr.bf16.mxu1 %v16350_v61  ;;  %v16438_v60 = vld [vmem:[%s17849_s14 + $0x1f40] ss:$16 sps:$4 sm:$0xff]   ;;  %v16441_v61 = vld [vmem:[%s17849_s14 + $0x1f48] ss:$16 sps:$4 sm:$0xff]  }
 0x466   : > { %10804 = vmatpush1.bf16.msra.mxu0 %v16345_v62  ;;  %11879 = vmatpush1.bf16.msra.mxu1 %v16348_v63  ;;  %v16446_v62 = vld [vmem:[%s17849_s14 + $0x1f64] ss:$16 sps:$4 sm:$0xff]   ;;  %v16449_v63 = vld [vmem:[%s17849_s14 + $0x1f6c] ss:$16 sps:$4 sm:$0xff]  }
 0x467   : > { %10805 = vmatprep.subr.bf16.mxu0 %v16353_v0  ;;  %11880 = vmatprep.subr.bf16.mxu1 %v16356_v1  ;;  %v16444_v0 = vld [vmem:[%s17849_s14 + $0x1f60] ss:$16 sps:$4 sm:$0xff]   ;;  %v16447_v1 = vld [vmem:[%s17849_s14 + $0x1f68] ss:$16 sps:$4 sm:$0xff]  }
 0x46a   : > { %10806 = vmatpush1.bf16.msra.mxu0 %v16351_v2  ;;  %11881 = vmatpush1.bf16.msra.mxu1 %v16354_v3  ;;  %v16452_v2 = vld [vmem:[%s17849_s14 + $0x1f84] ss:$16 sps:$4 sm:$0xff]   ;;  %v16455_v3 = vld [vmem:[%s17849_s14 + $0x1f8c] ss:$16 sps:$4 sm:$0xff]  }
 0x46b   : > { %10807 = vmatprep.subr.bf16.mxu0 %v16359_v4  ;;  %11882 = vmatprep.subr.bf16.mxu1 %v16362_v5  ;;  %v16450_v4 = vld [vmem:[%s17849_s14 + $0x1f80] ss:$16 sps:$4 sm:$0xff]   ;;  %v16453_v5 = vld [vmem:[%s17849_s14 + $0x1f88] ss:$16 sps:$4 sm:$0xff]  }
 0x46e   : > { %10808 = vmatpush1.bf16.msra.mxu0 %v16357_v6  ;;  %11883 = vmatpush1.bf16.msra.mxu1 %v16360_v7  ;;  %v16458_v6 = vld [vmem:[%s17849_s14 + $0x1fa4] ss:$16 sps:$4 sm:$0xff]   ;;  %v16461_v7 = vld [vmem:[%s17849_s14 + $0x1fac] ss:$16 sps:$4 sm:$0xff]  }
 0x46f   : > { %10809 = vmatprep.subr.bf16.mxu0 %v16365_v8  ;;  %11884 = vmatprep.subr.bf16.mxu1 %v16368_v9  ;;  %v16456_v8 = vld [vmem:[%s17849_s14 + $0x1fa0] ss:$16 sps:$4 sm:$0xff]   ;;  %v16459_v9 = vld [vmem:[%s17849_s14 + $0x1fa8] ss:$16 sps:$4 sm:$0xff]  }
 0x472   : > { %10810 = vmatpush1.bf16.msra.mxu0 %v16363_v10  ;;  %11885 = vmatpush1.bf16.msra.mxu1 %v16366_v11  ;;  %v16464_v10 = vld [vmem:[%s17849_s14 + $0x1fc4] ss:$16 sps:$4 sm:$0xff]   ;;  %v16467_v11 = vld [vmem:[%s17849_s14 + $0x1fcc] ss:$16 sps:$4 sm:$0xff]  }
 0x473   : > { %10811 = vmatprep.subr.bf16.mxu0 %v16371_v12  ;;  %11886 = vmatprep.subr.bf16.mxu1 %v16374_v13  ;;  %v16462_v12 = vld [vmem:[%s17849_s14 + $0x1fc0] ss:$16 sps:$4 sm:$0xff]   ;;  %v16465_v13 = vld [vmem:[%s17849_s14 + $0x1fc8] ss:$16 sps:$4 sm:$0xff]  }
 0x476   : > { %10812 = vmatpush1.bf16.msra.mxu0 %v16369_v14  ;;  %11887 = vmatpush1.bf16.msra.mxu1 %v16372_v15  ;;  %v16470_v14 = vld [vmem:[%s17849_s14 + $0x1fe4] ss:$16 sps:$4 sm:$0xff]   ;;  %v16473_v15 = vld [vmem:[%s17849_s14 + $0x1fec] ss:$16 sps:$4 sm:$0xff]  }
 0x477   : > { %10824 = vmatprep.subr.bf16.mxu0 %v16380_v16  ;;  %11899 = vmatprep.subr.bf16.mxu1 %v16383_v17  ;;  %v16468_v16 = vld [vmem:[%s17849_s14 + $0x1fe0] ss:$16 sps:$4 sm:$0xff]   ;;  %v16471_v17 = vld [vmem:[%s17849_s14 + $0x1fe8] ss:$16 sps:$4 sm:$0xff]  }
 0x479   : > { %10814 = vmatmul.mubr.bf16.vlgmr.msra.gmra.mrb[0].mxu0 %v16375_v18  ;;  %11889 = vmatmul.mubr.bf16.vlgmr.msra.gmra.mrb[0].mxu1 %v16375_v18  ;;  %v16479_v18 = vld [vmem:[%s17849_s14 + $0x2004] ss:$16 sps:$4 sm:$0xff]  }
 0x47a   : > { %10825 = vmatpush1.bf16.msra.mxu0 %v16378_v19  ;;  %11900 = vmatpush1.bf16.msra.mxu1 %v16381_v20  ;;  %v16482_v19 = vld [vmem:[%s17849_s14 + $0x200c] ss:$16 sps:$4 sm:$0xff]  }
 0x47b   : > { %10826 = vmatprep.subr.bf16.mxu0 %v16386_v21  ;;  %11901 = vmatprep.subr.bf16.mxu1 %v16389_v22  ;;  %v16474_v20 = vld [vmem:[%s17847_s18 + $0x78] ss:$196 sps:$4 sm:$0xff]  }
 0x47c   : > { %10856 = vmatprep.mubr.bf16.mxu0 %v16476_v23  ;;  %11931 = vmatprep.mubr.bf16.mxu1 %v16476_v23  ;;  %v16477_v21 = vld [vmem:[%s17849_s14 + $0x2000] ss:$16 sps:$4 sm:$0xff]   ;;  %v16480_v22 = vld [vmem:[%s17849_s14 + $0x2008] ss:$16 sps:$4 sm:$0xff]   ;;  %v16485_v23 = vld [vmem:[%s17849_s14 + $0x2024] ss:$16 sps:$4 sm:$0xff]  }
 0x47e   : > { %10827 = vmatpush1.bf16.msra.mxu0 %v16384_v24  ;;  %11902 = vmatpush1.bf16.msra.mxu1 %v16387_v25  ;;  %v16488_v24 = vld [vmem:[%s17849_s14 + $0x202c] ss:$16 sps:$4 sm:$0xff]  }
 0x47f   : > { %10828 = vmatprep.subr.bf16.mxu0 %v16392_v26  ;;  %11903 = vmatprep.subr.bf16.mxu1 %v16395_v27  ;;  %v16575_v25 = vld [vmem:[%s17847_s18 + $0x84] ss:$196 sps:$4 sm:$0xff]  }
 0x480   : > { %v16483_v26 = vld [vmem:[%s17849_s14 + $0x2020] ss:$16 sps:$4 sm:$0xff]   ;;  %v16486_v27 = vld [vmem:[%s17849_s14 + $0x2028] ss:$16 sps:$4 sm:$0xff]  }
 0x482   : > { %10829 = vmatpush1.bf16.msra.mxu0 %v16390_v28  ;;  %11904 = vmatpush1.bf16.msra.mxu1 %v16393_v29  ;;  %v16491_v28 = vld [vmem:[%s17849_s14 + $0x2044] ss:$16 sps:$4 sm:$0xff]   ;;  %v16494_v29 = vld [vmem:[%s17849_s14 + $0x204c] ss:$16 sps:$4 sm:$0xff]  }
 0x483   : > { %10830 = vmatprep.subr.bf16.mxu0 %v16398_v30  ;;  %11905 = vmatprep.subr.bf16.mxu1 %v16401_v31  ;;  %v16489_v30 = vld [vmem:[%s17849_s14 + $0x2040] ss:$16 sps:$4 sm:$0xff]   ;;  %v16492_v31 = vld [vmem:[%s17849_s14 + $0x2048] ss:$16 sps:$4 sm:$0xff]  }
 0x486   : > { %10831 = vmatpush1.bf16.msra.mxu0 %v16396_v32  ;;  %11906 = vmatpush1.bf16.msra.mxu1 %v16399_v33  ;;  %v16497_v32 = vld [vmem:[%s17849_s14 + $0x2064] ss:$16 sps:$4 sm:$0xff]   ;;  %v16500_v33 = vld [vmem:[%s17849_s14 + $0x206c] ss:$16 sps:$4 sm:$0xff]  }
 0x487   : > { %10832 = vmatprep.subr.bf16.mxu0 %v16404_v34  ;;  %11907 = vmatprep.subr.bf16.mxu1 %v16407_v35  ;;  %v16495_v34 = vld [vmem:[%s17849_s14 + $0x2060] ss:$16 sps:$4 sm:$0xff]   ;;  %v16498_v35 = vld [vmem:[%s17849_s14 + $0x2068] ss:$16 sps:$4 sm:$0xff]  }
 0x48a   : > { %10833 = vmatpush1.bf16.msra.mxu0 %v16402_v36  ;;  %11908 = vmatpush1.bf16.msra.mxu1 %v16405_v37  ;;  %v16503_v36 = vld [vmem:[%s17849_s14 + $0x2084] ss:$16 sps:$4 sm:$0xff]   ;;  %v16506_v37 = vld [vmem:[%s17849_s14 + $0x208c] ss:$16 sps:$4 sm:$0xff]  }
 0x48b   : > { %10834 = vmatprep.subr.bf16.mxu0 %v16410_v38  ;;  %11909 = vmatprep.subr.bf16.mxu1 %v16413_v39  ;;  %v16501_v38 = vld [vmem:[%s17849_s14 + $0x2080] ss:$16 sps:$4 sm:$0xff]   ;;  %v16504_v39 = vld [vmem:[%s17849_s14 + $0x2088] ss:$16 sps:$4 sm:$0xff]  }
 0x48e   : > { %10835 = vmatpush1.bf16.msra.mxu0 %v16408_v40  ;;  %11910 = vmatpush1.bf16.msra.mxu1 %v16411_v41  ;;  %v16509_v40 = vld [vmem:[%s17849_s14 + $0x20a4] ss:$16 sps:$4 sm:$0xff]   ;;  %v16512_v41 = vld [vmem:[%s17849_s14 + $0x20ac] ss:$16 sps:$4 sm:$0xff]  }
 0x48f   : > { %10836 = vmatprep.subr.bf16.mxu0 %v16416_v42  ;;  %11911 = vmatprep.subr.bf16.mxu1 %v16419_v43  ;;  %v16507_v42 = vld [vmem:[%s17849_s14 + $0x20a0] ss:$16 sps:$4 sm:$0xff]   ;;  %v16510_v43 = vld [vmem:[%s17849_s14 + $0x20a8] ss:$16 sps:$4 sm:$0xff]  }
 0x492   : > { %10837 = vmatpush1.bf16.msra.mxu0 %v16414_v44  ;;  %11912 = vmatpush1.bf16.msra.mxu1 %v16417_v45  ;;  %v16515_v44 = vld [vmem:[%s17849_s14 + $0x20c4] ss:$16 sps:$4 sm:$0xff]   ;;  %v16518_v45 = vld [vmem:[%s17849_s14 + $0x20cc] ss:$16 sps:$4 sm:$0xff]  }
 0x493   : > { %10838 = vmatprep.subr.bf16.mxu0 %v16422_v46  ;;  %11913 = vmatprep.subr.bf16.mxu1 %v16425_v47  ;;  %v16513_v46 = vld [vmem:[%s17849_s14 + $0x20c0] ss:$16 sps:$4 sm:$0xff]   ;;  %v16516_v47 = vld [vmem:[%s17849_s14 + $0x20c8] ss:$16 sps:$4 sm:$0xff]  }
 0x496   : > { %10839 = vmatpush1.bf16.msra.mxu0 %v16420_v48  ;;  %11914 = vmatpush1.bf16.msra.mxu1 %v16423_v49  ;;  %v16521_v48 = vld [vmem:[%s17849_s14 + $0x20e4] ss:$16 sps:$4 sm:$0xff]   ;;  %v16524_v49 = vld [vmem:[%s17849_s14 + $0x20ec] ss:$16 sps:$4 sm:$0xff]  }
 0x497   : > { %10840 = vmatprep.subr.bf16.mxu0 %v16428_v50  ;;  %11915 = vmatprep.subr.bf16.mxu1 %v16431_v51  ;;  %v16519_v50 = vld [vmem:[%s17849_s14 + $0x20e0] ss:$16 sps:$4 sm:$0xff]   ;;  %v16522_v51 = vld [vmem:[%s17849_s14 + $0x20e8] ss:$16 sps:$4 sm:$0xff]  }
 0x49a   : > { %10841 = vmatpush1.bf16.msra.mxu0 %v16426_v52  ;;  %11916 = vmatpush1.bf16.msra.mxu1 %v16429_v53  ;;  %v16527_v52 = vld [vmem:[%s17849_s14 + $0x2104] ss:$16 sps:$4 sm:$0xff]   ;;  %v16530_v53 = vld [vmem:[%s17849_s14 + $0x210c] ss:$16 sps:$4 sm:$0xff]  }
 0x49b   : > { %10842 = vmatprep.subr.bf16.mxu0 %v16434_v54  ;;  %11917 = vmatprep.subr.bf16.mxu1 %v16437_v55  ;;  %v16525_v54 = vld [vmem:[%s17849_s14 + $0x2100] ss:$16 sps:$4 sm:$0xff]   ;;  %v16528_v55 = vld [vmem:[%s17849_s14 + $0x2108] ss:$16 sps:$4 sm:$0xff]  }
 0x49e   : > { %10843 = vmatpush1.bf16.msra.mxu0 %v16432_v56  ;;  %11918 = vmatpush1.bf16.msra.mxu1 %v16435_v57  ;;  %v16533_v56 = vld [vmem:[%s17849_s14 + $0x2124] ss:$16 sps:$4 sm:$0xff]   ;;  %v16536_v57 = vld [vmem:[%s17849_s14 + $0x212c] ss:$16 sps:$4 sm:$0xff]  }
 0x49f   : > { %10844 = vmatprep.subr.bf16.mxu0 %v16440_v58  ;;  %11919 = vmatprep.subr.bf16.mxu1 %v16443_v59  ;;  %v16531_v58 = vld [vmem:[%s17849_s14 + $0x2120] ss:$16 sps:$4 sm:$0xff]   ;;  %v16534_v59 = vld [vmem:[%s17849_s14 + $0x2128] ss:$16 sps:$4 sm:$0xff]  }
 0x4a2   : > { %10845 = vmatpush1.bf16.msra.mxu0 %v16438_v60  ;;  %11920 = vmatpush1.bf16.msra.mxu1 %v16441_v61  ;;  %v16539_v60 = vld [vmem:[%s17849_s14 + $0x2144] ss:$16 sps:$4 sm:$0xff]   ;;  %v16542_v61 = vld [vmem:[%s17849_s14 + $0x214c] ss:$16 sps:$4 sm:$0xff]  }
 0x4a3   : > { %10846 = vmatprep.subr.bf16.mxu0 %v16446_v62  ;;  %11921 = vmatprep.subr.bf16.mxu1 %v16449_v63  ;;  %v16537_v62 = vld [vmem:[%s17849_s14 + $0x2140] ss:$16 sps:$4 sm:$0xff]   ;;  %v16540_v63 = vld [vmem:[%s17849_s14 + $0x2148] ss:$16 sps:$4 sm:$0xff]  }
 0x4a6   : > { %10847 = vmatpush1.bf16.msra.mxu0 %v16444_v0  ;;  %11922 = vmatpush1.bf16.msra.mxu1 %v16447_v1  ;;  %v16545_v0 = vld [vmem:[%s17849_s14 + $0x2164] ss:$16 sps:$4 sm:$0xff]   ;;  %v16548_v1 = vld [vmem:[%s17849_s14 + $0x216c] ss:$16 sps:$4 sm:$0xff]  }
 0x4a7   : > { %10848 = vmatprep.subr.bf16.mxu0 %v16452_v2  ;;  %11923 = vmatprep.subr.bf16.mxu1 %v16455_v3  ;;  %v16543_v2 = vld [vmem:[%s17849_s14 + $0x2160] ss:$16 sps:$4 sm:$0xff]   ;;  %v16546_v3 = vld [vmem:[%s17849_s14 + $0x2168] ss:$16 sps:$4 sm:$0xff]  }
 0x4aa   : > { %10849 = vmatpush1.bf16.msra.mxu0 %v16450_v4  ;;  %11924 = vmatpush1.bf16.msra.mxu1 %v16453_v5  ;;  %v16551_v4 = vld [vmem:[%s17849_s14 + $0x2184] ss:$16 sps:$4 sm:$0xff]   ;;  %v16554_v5 = vld [vmem:[%s17849_s14 + $0x218c] ss:$16 sps:$4 sm:$0xff]  }
 0x4ab   : > { %10850 = vmatprep.subr.bf16.mxu0 %v16458_v6  ;;  %11925 = vmatprep.subr.bf16.mxu1 %v16461_v7  ;;  %v16549_v6 = vld [vmem:[%s17849_s14 + $0x2180] ss:$16 sps:$4 sm:$0xff]   ;;  %v16552_v7 = vld [vmem:[%s17849_s14 + $0x2188] ss:$16 sps:$4 sm:$0xff]  }
 0x4ae   : > { %10851 = vmatpush1.bf16.msra.mxu0 %v16456_v8  ;;  %11926 = vmatpush1.bf16.msra.mxu1 %v16459_v9  ;;  %v16557_v8 = vld [vmem:[%s17849_s14 + $0x21a4] ss:$16 sps:$4 sm:$0xff]   ;;  %v16560_v9 = vld [vmem:[%s17849_s14 + $0x21ac] ss:$16 sps:$4 sm:$0xff]  }
 0x4af   : > { %10852 = vmatprep.subr.bf16.mxu0 %v16464_v10  ;;  %11927 = vmatprep.subr.bf16.mxu1 %v16467_v11  ;;  %v16555_v10 = vld [vmem:[%s17849_s14 + $0x21a0] ss:$16 sps:$4 sm:$0xff]   ;;  %v16558_v11 = vld [vmem:[%s17849_s14 + $0x21a8] ss:$16 sps:$4 sm:$0xff]  }
 0x4b2   : > { %10853 = vmatpush1.bf16.msra.mxu0 %v16462_v12  ;;  %11928 = vmatpush1.bf16.msra.mxu1 %v16465_v13  ;;  %v16563_v12 = vld [vmem:[%s17849_s14 + $0x21c4] ss:$16 sps:$4 sm:$0xff]   ;;  %v16566_v13 = vld [vmem:[%s17849_s14 + $0x21cc] ss:$16 sps:$4 sm:$0xff]  }
 0x4b3   : > { %10854 = vmatprep.subr.bf16.mxu0 %v16470_v14  ;;  %11929 = vmatprep.subr.bf16.mxu1 %v16473_v15  ;;  %v16561_v14 = vld [vmem:[%s17849_s14 + $0x21c0] ss:$16 sps:$4 sm:$0xff]   ;;  %v16564_v15 = vld [vmem:[%s17849_s14 + $0x21c8] ss:$16 sps:$4 sm:$0xff]  }
 0x4b6   : > { %10855 = vmatpush1.bf16.msra.mxu0 %v16468_v16  ;;  %11930 = vmatpush1.bf16.msra.mxu1 %v16471_v17  ;;  %v16569_v16 = vld [vmem:[%s17849_s14 + $0x21e4] ss:$16 sps:$4 sm:$0xff]   ;;  %v16572_v17 = vld [vmem:[%s17849_s14 + $0x21ec] ss:$16 sps:$4 sm:$0xff]  }
 0x4b7   : > { %10867 = vmatprep.subr.bf16.mxu0 %v16479_v18  ;;  %11942 = vmatprep.subr.bf16.mxu1 %v16482_v19  ;;  %v16567_v18 = vld [vmem:[%s17849_s14 + $0x21e0] ss:$16 sps:$4 sm:$0xff]   ;;  %v16570_v19 = vld [vmem:[%s17849_s14 + $0x21e8] ss:$16 sps:$4 sm:$0xff]  }
 0x4b9   : > { %10857 = vmatmul.mubr.bf16.vlgmr.msra.gmra.mrb[0].mxu0 %v16474_v20  ;;  %11932 = vmatmul.mubr.bf16.vlgmr.msra.gmra.mrb[0].mxu1 %v16474_v20  ;;  %v16578_v20 = vld [vmem:[%s17849_s14 + $0x2204] ss:$16 sps:$4 sm:$0xff]  }
 0x4ba   : > { %10868 = vmatpush1.bf16.msra.mxu0 %v16477_v21  ;;  %11943 = vmatpush1.bf16.msra.mxu1 %v16480_v22  ;;  %v16581_v21 = vld [vmem:[%s17849_s14 + $0x220c] ss:$16 sps:$4 sm:$0xff]  }
 0x4bb   : > { %10869 = vmatprep.subr.bf16.mxu0 %v16485_v23  ;;  %11944 = vmatprep.subr.bf16.mxu1 %v16488_v24  ;;  %v16573_v22 = vld [vmem:[%s17847_s18 + $0x80] ss:$196 sps:$4 sm:$0xff]  }
 0x4bc   : > { %10899 = vmatprep.mubr.bf16.mxu0 %v16575_v25  ;;  %11974 = vmatprep.mubr.bf16.mxu1 %v16575_v25  ;;  %v16576_v23 = vld [vmem:[%s17849_s14 + $0x2200] ss:$16 sps:$4 sm:$0xff]   ;;  %v16579_v24 = vld [vmem:[%s17849_s14 + $0x2208] ss:$16 sps:$4 sm:$0xff]   ;;  %v16584_v25 = vld [vmem:[%s17849_s14 + $0x2224] ss:$16 sps:$4 sm:$0xff]  }
 0x4be   : > { %10870 = vmatpush1.bf16.msra.mxu0 %v16483_v26  ;;  %11945 = vmatpush1.bf16.msra.mxu1 %v16486_v27  ;;  %v16587_v26 = vld [vmem:[%s17849_s14 + $0x222c] ss:$16 sps:$4 sm:$0xff]  }
 0x4bf   : > { %10871 = vmatprep.subr.bf16.mxu0 %v16491_v28  ;;  %11946 = vmatprep.subr.bf16.mxu1 %v16494_v29  ;;  %v16674_v27 = vld [vmem:[%s17847_s18 + $0x8c] ss:$196 sps:$4 sm:$0xff]  }
 0x4c0   : > { %v16582_v28 = vld [vmem:[%s17849_s14 + $0x2220] ss:$16 sps:$4 sm:$0xff]   ;;  %v16585_v29 = vld [vmem:[%s17849_s14 + $0x2228] ss:$16 sps:$4 sm:$0xff]  }
 0x4c2   : > { %10872 = vmatpush1.bf16.msra.mxu0 %v16489_v30  ;;  %11947 = vmatpush1.bf16.msra.mxu1 %v16492_v31  ;;  %v16590_v30 = vld [vmem:[%s17849_s14 + $0x2244] ss:$16 sps:$4 sm:$0xff]   ;;  %v16593_v31 = vld [vmem:[%s17849_s14 + $0x224c] ss:$16 sps:$4 sm:$0xff]  }
 0x4c3   : > { %10873 = vmatprep.subr.bf16.mxu0 %v16497_v32  ;;  %11948 = vmatprep.subr.bf16.mxu1 %v16500_v33  ;;  %v16588_v32 = vld [vmem:[%s17849_s14 + $0x2240] ss:$16 sps:$4 sm:$0xff]   ;;  %v16591_v33 = vld [vmem:[%s17849_s14 + $0x2248] ss:$16 sps:$4 sm:$0xff]  }
 0x4c6   : > { %10874 = vmatpush1.bf16.msra.mxu0 %v16495_v34  ;;  %11949 = vmatpush1.bf16.msra.mxu1 %v16498_v35  ;;  %v16596_v34 = vld [vmem:[%s17849_s14 + $0x2264] ss:$16 sps:$4 sm:$0xff]   ;;  %v16599_v35 = vld [vmem:[%s17849_s14 + $0x226c] ss:$16 sps:$4 sm:$0xff]  }
 0x4c7   : > { %10875 = vmatprep.subr.bf16.mxu0 %v16503_v36  ;;  %11950 = vmatprep.subr.bf16.mxu1 %v16506_v37  ;;  %v16594_v36 = vld [vmem:[%s17849_s14 + $0x2260] ss:$16 sps:$4 sm:$0xff]   ;;  %v16597_v37 = vld [vmem:[%s17849_s14 + $0x2268] ss:$16 sps:$4 sm:$0xff]  }
 0x4ca   : > { %10876 = vmatpush1.bf16.msra.mxu0 %v16501_v38  ;;  %11951 = vmatpush1.bf16.msra.mxu1 %v16504_v39  ;;  %v16602_v38 = vld [vmem:[%s17849_s14 + $0x2284] ss:$16 sps:$4 sm:$0xff]   ;;  %v16605_v39 = vld [vmem:[%s17849_s14 + $0x228c] ss:$16 sps:$4 sm:$0xff]  }
 0x4cb   : > { %10877 = vmatprep.subr.bf16.mxu0 %v16509_v40  ;;  %11952 = vmatprep.subr.bf16.mxu1 %v16512_v41  ;;  %v16600_v40 = vld [vmem:[%s17849_s14 + $0x2280] ss:$16 sps:$4 sm:$0xff]   ;;  %v16603_v41 = vld [vmem:[%s17849_s14 + $0x2288] ss:$16 sps:$4 sm:$0xff]  }
 0x4ce   : > { %10878 = vmatpush1.bf16.msra.mxu0 %v16507_v42  ;;  %11953 = vmatpush1.bf16.msra.mxu1 %v16510_v43  ;;  %v16608_v42 = vld [vmem:[%s17849_s14 + $0x22a4] ss:$16 sps:$4 sm:$0xff]   ;;  %v16611_v43 = vld [vmem:[%s17849_s14 + $0x22ac] ss:$16 sps:$4 sm:$0xff]  }
 0x4cf   : > { %10879 = vmatprep.subr.bf16.mxu0 %v16515_v44  ;;  %11954 = vmatprep.subr.bf16.mxu1 %v16518_v45  ;;  %v16606_v44 = vld [vmem:[%s17849_s14 + $0x22a0] ss:$16 sps:$4 sm:$0xff]   ;;  %v16609_v45 = vld [vmem:[%s17849_s14 + $0x22a8] ss:$16 sps:$4 sm:$0xff]  }
 0x4d2   : > { %10880 = vmatpush1.bf16.msra.mxu0 %v16513_v46  ;;  %11955 = vmatpush1.bf16.msra.mxu1 %v16516_v47  ;;  %v16614_v46 = vld [vmem:[%s17849_s14 + $0x22c4] ss:$16 sps:$4 sm:$0xff]   ;;  %v16617_v47 = vld [vmem:[%s17849_s14 + $0x22cc] ss:$16 sps:$4 sm:$0xff]  }
 0x4d3   : > { %10881 = vmatprep.subr.bf16.mxu0 %v16521_v48  ;;  %11956 = vmatprep.subr.bf16.mxu1 %v16524_v49  ;;  %v16612_v48 = vld [vmem:[%s17849_s14 + $0x22c0] ss:$16 sps:$4 sm:$0xff]   ;;  %v16615_v49 = vld [vmem:[%s17849_s14 + $0x22c8] ss:$16 sps:$4 sm:$0xff]  }
 0x4d6   : > { %10882 = vmatpush1.bf16.msra.mxu0 %v16519_v50  ;;  %11957 = vmatpush1.bf16.msra.mxu1 %v16522_v51  ;;  %v16620_v50 = vld [vmem:[%s17849_s14 + $0x22e4] ss:$16 sps:$4 sm:$0xff]   ;;  %v16623_v51 = vld [vmem:[%s17849_s14 + $0x22ec] ss:$16 sps:$4 sm:$0xff]  }
 0x4d7   : > { %10883 = vmatprep.subr.bf16.mxu0 %v16527_v52  ;;  %11958 = vmatprep.subr.bf16.mxu1 %v16530_v53  ;;  %v16618_v52 = vld [vmem:[%s17849_s14 + $0x22e0] ss:$16 sps:$4 sm:$0xff]   ;;  %v16621_v53 = vld [vmem:[%s17849_s14 + $0x22e8] ss:$16 sps:$4 sm:$0xff]  }
 0x4da   : > { %10884 = vmatpush1.bf16.msra.mxu0 %v16525_v54  ;;  %11959 = vmatpush1.bf16.msra.mxu1 %v16528_v55  ;;  %v16626_v54 = vld [vmem:[%s17849_s14 + $0x2304] ss:$16 sps:$4 sm:$0xff]   ;;  %v16629_v55 = vld [vmem:[%s17849_s14 + $0x230c] ss:$16 sps:$4 sm:$0xff]  }
 0x4db   : > { %10885 = vmatprep.subr.bf16.mxu0 %v16533_v56  ;;  %11960 = vmatprep.subr.bf16.mxu1 %v16536_v57  ;;  %v16624_v56 = vld [vmem:[%s17849_s14 + $0x2300] ss:$16 sps:$4 sm:$0xff]   ;;  %v16627_v57 = vld [vmem:[%s17849_s14 + $0x2308] ss:$16 sps:$4 sm:$0xff]  }
 0x4de   : > { %10886 = vmatpush1.bf16.msra.mxu0 %v16531_v58  ;;  %11961 = vmatpush1.bf16.msra.mxu1 %v16534_v59  ;;  %v16632_v58 = vld [vmem:[%s17849_s14 + $0x2324] ss:$16 sps:$4 sm:$0xff]   ;;  %v16635_v59 = vld [vmem:[%s17849_s14 + $0x232c] ss:$16 sps:$4 sm:$0xff]  }
 0x4df   : > { %10887 = vmatprep.subr.bf16.mxu0 %v16539_v60  ;;  %11962 = vmatprep.subr.bf16.mxu1 %v16542_v61  ;;  %v16630_v60 = vld [vmem:[%s17849_s14 + $0x2320] ss:$16 sps:$4 sm:$0xff]   ;;  %v16633_v61 = vld [vmem:[%s17849_s14 + $0x2328] ss:$16 sps:$4 sm:$0xff]  }
 0x4e2   : > { %10888 = vmatpush1.bf16.msra.mxu0 %v16537_v62  ;;  %11963 = vmatpush1.bf16.msra.mxu1 %v16540_v63  ;;  %v16638_v62 = vld [vmem:[%s17849_s14 + $0x2344] ss:$16 sps:$4 sm:$0xff]   ;;  %v16641_v63 = vld [vmem:[%s17849_s14 + $0x234c] ss:$16 sps:$4 sm:$0xff]  }
 0x4e3   : > { %10889 = vmatprep.subr.bf16.mxu0 %v16545_v0  ;;  %11964 = vmatprep.subr.bf16.mxu1 %v16548_v1  ;;  %v16636_v0 = vld [vmem:[%s17849_s14 + $0x2340] ss:$16 sps:$4 sm:$0xff]   ;;  %v16639_v1 = vld [vmem:[%s17849_s14 + $0x2348] ss:$16 sps:$4 sm:$0xff]  }
 0x4e6   : > { %10890 = vmatpush1.bf16.msra.mxu0 %v16543_v2  ;;  %11965 = vmatpush1.bf16.msra.mxu1 %v16546_v3  ;;  %v16644_v2 = vld [vmem:[%s17849_s14 + $0x2364] ss:$16 sps:$4 sm:$0xff]   ;;  %v16647_v3 = vld [vmem:[%s17849_s14 + $0x236c] ss:$16 sps:$4 sm:$0xff]  }
 0x4e7   : > { %10891 = vmatprep.subr.bf16.mxu0 %v16551_v4  ;;  %11966 = vmatprep.subr.bf16.mxu1 %v16554_v5  ;;  %v16642_v4 = vld [vmem:[%s17849_s14 + $0x2360] ss:$16 sps:$4 sm:$0xff]   ;;  %v16645_v5 = vld [vmem:[%s17849_s14 + $0x2368] ss:$16 sps:$4 sm:$0xff]  }
 0x4ea   : > { %10892 = vmatpush1.bf16.msra.mxu0 %v16549_v6  ;;  %11967 = vmatpush1.bf16.msra.mxu1 %v16552_v7  ;;  %v16650_v6 = vld [vmem:[%s17849_s14 + $0x2384] ss:$16 sps:$4 sm:$0xff]   ;;  %v16653_v7 = vld [vmem:[%s17849_s14 + $0x238c] ss:$16 sps:$4 sm:$0xff]  }
 0x4eb   : > { %10893 = vmatprep.subr.bf16.mxu0 %v16557_v8  ;;  %11968 = vmatprep.subr.bf16.mxu1 %v16560_v9  ;;  %v16648_v8 = vld [vmem:[%s17849_s14 + $0x2380] ss:$16 sps:$4 sm:$0xff]   ;;  %v16651_v9 = vld [vmem:[%s17849_s14 + $0x2388] ss:$16 sps:$4 sm:$0xff]  }
 0x4ee   : > { %10894 = vmatpush1.bf16.msra.mxu0 %v16555_v10  ;;  %11969 = vmatpush1.bf16.msra.mxu1 %v16558_v11  ;;  %v16656_v10 = vld [vmem:[%s17849_s14 + $0x23a4] ss:$16 sps:$4 sm:$0xff]   ;;  %v16659_v11 = vld [vmem:[%s17849_s14 + $0x23ac] ss:$16 sps:$4 sm:$0xff]  }
 0x4ef   : > { %10895 = vmatprep.subr.bf16.mxu0 %v16563_v12  ;;  %11970 = vmatprep.subr.bf16.mxu1 %v16566_v13  ;;  %v16654_v12 = vld [vmem:[%s17849_s14 + $0x23a0] ss:$16 sps:$4 sm:$0xff]   ;;  %v16657_v13 = vld [vmem:[%s17849_s14 + $0x23a8] ss:$16 sps:$4 sm:$0xff]  }
 0x4f2   : > { %10896 = vmatpush1.bf16.msra.mxu0 %v16561_v14  ;;  %11971 = vmatpush1.bf16.msra.mxu1 %v16564_v15  ;;  %v16662_v14 = vld [vmem:[%s17849_s14 + $0x23c4] ss:$16 sps:$4 sm:$0xff]   ;;  %v16665_v15 = vld [vmem:[%s17849_s14 + $0x23cc] ss:$16 sps:$4 sm:$0xff]  }
 0x4f3   : > { %10897 = vmatprep.subr.bf16.mxu0 %v16569_v16  ;;  %11972 = vmatprep.subr.bf16.mxu1 %v16572_v17  ;;  %v16660_v16 = vld [vmem:[%s17849_s14 + $0x23c0] ss:$16 sps:$4 sm:$0xff]   ;;  %v16663_v17 = vld [vmem:[%s17849_s14 + $0x23c8] ss:$16 sps:$4 sm:$0xff]  }
 0x4f6   : > { %10898 = vmatpush1.bf16.msra.mxu0 %v16567_v18  ;;  %11973 = vmatpush1.bf16.msra.mxu1 %v16570_v19  ;;  %v16668_v18 = vld [vmem:[%s17849_s14 + $0x23e4] ss:$16 sps:$4 sm:$0xff]   ;;  %v16671_v19 = vld [vmem:[%s17849_s14 + $0x23ec] ss:$16 sps:$4 sm:$0xff]  }
 0x4f7   : > { %10910 = vmatprep.subr.bf16.mxu0 %v16578_v20  ;;  %11985 = vmatprep.subr.bf16.mxu1 %v16581_v21  ;;  %v16666_v20 = vld [vmem:[%s17849_s14 + $0x23e0] ss:$16 sps:$4 sm:$0xff]   ;;  %v16669_v21 = vld [vmem:[%s17849_s14 + $0x23e8] ss:$16 sps:$4 sm:$0xff]  }
 0x4f9   : > { %10900 = vmatmul.mubr.bf16.vlgmr.msra.gmra.mrb[0].mxu0 %v16573_v22  ;;  %11975 = vmatmul.mubr.bf16.vlgmr.msra.gmra.mrb[0].mxu1 %v16573_v22  ;;  %v16677_v22 = vld [vmem:[%s17849_s14 + $0x2404] ss:$16 sps:$4 sm:$0xff]  }
 0x4fa   : > { %10911 = vmatpush1.bf16.msra.mxu0 %v16576_v23  ;;  %11986 = vmatpush1.bf16.msra.mxu1 %v16579_v24  ;;  %v16680_v23 = vld [vmem:[%s17849_s14 + $0x240c] ss:$16 sps:$4 sm:$0xff]  }
 0x4fb   : > { %10912 = vmatprep.subr.bf16.mxu0 %v16584_v25  ;;  %11987 = vmatprep.subr.bf16.mxu1 %v16587_v26  ;;  %v16672_v24 = vld [vmem:[%s17847_s18 + $0x88] ss:$196 sps:$4 sm:$0xff]  }
 0x4fc   : > { %10942 = vmatprep.mubr.bf16.mxu0 %v16674_v27  ;;  %12017 = vmatprep.mubr.bf16.mxu1 %v16674_v27  ;;  %v16675_v25 = vld [vmem:[%s17849_s14 + $0x2400] ss:$16 sps:$4 sm:$0xff]   ;;  %v16678_v26 = vld [vmem:[%s17849_s14 + $0x2408] ss:$16 sps:$4 sm:$0xff]   ;;  %v16683_v27 = vld [vmem:[%s17849_s14 + $0x2424] ss:$16 sps:$4 sm:$0xff]  }
 0x4fe   : > { %10913 = vmatpush1.bf16.msra.mxu0 %v16582_v28  ;;  %11988 = vmatpush1.bf16.msra.mxu1 %v16585_v29  ;;  %v16686_v28 = vld [vmem:[%s17849_s14 + $0x242c] ss:$16 sps:$4 sm:$0xff]  }
 0x4ff   : > { %10914 = vmatprep.subr.bf16.mxu0 %v16590_v30  ;;  %11989 = vmatprep.subr.bf16.mxu1 %v16593_v31  ;;  %v16773_v29 = vld [vmem:[%s17847_s18 + $0x94] ss:$196 sps:$4 sm:$0xff]  }
 0x500   : > { %v16681_v30 = vld [vmem:[%s17849_s14 + $0x2420] ss:$16 sps:$4 sm:$0xff]   ;;  %v16684_v31 = vld [vmem:[%s17849_s14 + $0x2428] ss:$16 sps:$4 sm:$0xff]  }
 0x502   : > { %10915 = vmatpush1.bf16.msra.mxu0 %v16588_v32  ;;  %11990 = vmatpush1.bf16.msra.mxu1 %v16591_v33  ;;  %v16689_v32 = vld [vmem:[%s17849_s14 + $0x2444] ss:$16 sps:$4 sm:$0xff]   ;;  %v16692_v33 = vld [vmem:[%s17849_s14 + $0x244c] ss:$16 sps:$4 sm:$0xff]  }
 0x503   : > { %10916 = vmatprep.subr.bf16.mxu0 %v16596_v34  ;;  %11991 = vmatprep.subr.bf16.mxu1 %v16599_v35  ;;  %v16687_v34 = vld [vmem:[%s17849_s14 + $0x2440] ss:$16 sps:$4 sm:$0xff]   ;;  %v16690_v35 = vld [vmem:[%s17849_s14 + $0x2448] ss:$16 sps:$4 sm:$0xff]  }
 0x506   : > { %10917 = vmatpush1.bf16.msra.mxu0 %v16594_v36  ;;  %11992 = vmatpush1.bf16.msra.mxu1 %v16597_v37  ;;  %v16695_v36 = vld [vmem:[%s17849_s14 + $0x2464] ss:$16 sps:$4 sm:$0xff]   ;;  %v16698_v37 = vld [vmem:[%s17849_s14 + $0x246c] ss:$16 sps:$4 sm:$0xff]  }
 0x507   : > { %10918 = vmatprep.subr.bf16.mxu0 %v16602_v38  ;;  %11993 = vmatprep.subr.bf16.mxu1 %v16605_v39  ;;  %v16693_v38 = vld [vmem:[%s17849_s14 + $0x2460] ss:$16 sps:$4 sm:$0xff]   ;;  %v16696_v39 = vld [vmem:[%s17849_s14 + $0x2468] ss:$16 sps:$4 sm:$0xff]  }
 0x50a   : > { %10919 = vmatpush1.bf16.msra.mxu0 %v16600_v40  ;;  %11994 = vmatpush1.bf16.msra.mxu1 %v16603_v41  ;;  %v16701_v40 = vld [vmem:[%s17849_s14 + $0x2484] ss:$16 sps:$4 sm:$0xff]   ;;  %v16704_v41 = vld [vmem:[%s17849_s14 + $0x248c] ss:$16 sps:$4 sm:$0xff]  }
 0x50b   : > { %10920 = vmatprep.subr.bf16.mxu0 %v16608_v42  ;;  %11995 = vmatprep.subr.bf16.mxu1 %v16611_v43  ;;  %v16699_v42 = vld [vmem:[%s17849_s14 + $0x2480] ss:$16 sps:$4 sm:$0xff]   ;;  %v16702_v43 = vld [vmem:[%s17849_s14 + $0x2488] ss:$16 sps:$4 sm:$0xff]  }
 0x50e   : > { %10921 = vmatpush1.bf16.msra.mxu0 %v16606_v44  ;;  %11996 = vmatpush1.bf16.msra.mxu1 %v16609_v45  ;;  %v16707_v44 = vld [vmem:[%s17849_s14 + $0x24a4] ss:$16 sps:$4 sm:$0xff]   ;;  %v16710_v45 = vld [vmem:[%s17849_s14 + $0x24ac] ss:$16 sps:$4 sm:$0xff]  }
 0x50f   : > { %10922 = vmatprep.subr.bf16.mxu0 %v16614_v46  ;;  %11997 = vmatprep.subr.bf16.mxu1 %v16617_v47  ;;  %v16705_v46 = vld [vmem:[%s17849_s14 + $0x24a0] ss:$16 sps:$4 sm:$0xff]   ;;  %v16708_v47 = vld [vmem:[%s17849_s14 + $0x24a8] ss:$16 sps:$4 sm:$0xff]  }
 0x512   : > { %10923 = vmatpush1.bf16.msra.mxu0 %v16612_v48  ;;  %11998 = vmatpush1.bf16.msra.mxu1 %v16615_v49  ;;  %v16713_v48 = vld [vmem:[%s17849_s14 + $0x24c4] ss:$16 sps:$4 sm:$0xff]   ;;  %v16716_v49 = vld [vmem:[%s17849_s14 + $0x24cc] ss:$16 sps:$4 sm:$0xff]  }
 0x513   : > { %10924 = vmatprep.subr.bf16.mxu0 %v16620_v50  ;;  %11999 = vmatprep.subr.bf16.mxu1 %v16623_v51  ;;  %v16711_v50 = vld [vmem:[%s17849_s14 + $0x24c0] ss:$16 sps:$4 sm:$0xff]   ;;  %v16714_v51 = vld [vmem:[%s17849_s14 + $0x24c8] ss:$16 sps:$4 sm:$0xff]  }
 0x516   : > { %10925 = vmatpush1.bf16.msra.mxu0 %v16618_v52  ;;  %12000 = vmatpush1.bf16.msra.mxu1 %v16621_v53  ;;  %v16719_v52 = vld [vmem:[%s17849_s14 + $0x24e4] ss:$16 sps:$4 sm:$0xff]   ;;  %v16722_v53 = vld [vmem:[%s17849_s14 + $0x24ec] ss:$16 sps:$4 sm:$0xff]  }
 0x517   : > { %10926 = vmatprep.subr.bf16.mxu0 %v16626_v54  ;;  %12001 = vmatprep.subr.bf16.mxu1 %v16629_v55  ;;  %v16717_v54 = vld [vmem:[%s17849_s14 + $0x24e0] ss:$16 sps:$4 sm:$0xff]   ;;  %v16720_v55 = vld [vmem:[%s17849_s14 + $0x24e8] ss:$16 sps:$4 sm:$0xff]  }
 0x51a   : > { %10927 = vmatpush1.bf16.msra.mxu0 %v16624_v56  ;;  %12002 = vmatpush1.bf16.msra.mxu1 %v16627_v57  ;;  %v16725_v56 = vld [vmem:[%s17849_s14 + $0x2504] ss:$16 sps:$4 sm:$0xff]   ;;  %v16728_v57 = vld [vmem:[%s17849_s14 + $0x250c] ss:$16 sps:$4 sm:$0xff]  }
 0x51b   : > { %10928 = vmatprep.subr.bf16.mxu0 %v16632_v58  ;;  %12003 = vmatprep.subr.bf16.mxu1 %v16635_v59  ;;  %v16723_v58 = vld [vmem:[%s17849_s14 + $0x2500] ss:$16 sps:$4 sm:$0xff]   ;;  %v16726_v59 = vld [vmem:[%s17849_s14 + $0x2508] ss:$16 sps:$4 sm:$0xff]  }
 0x51e   : > { %10929 = vmatpush1.bf16.msra.mxu0 %v16630_v60  ;;  %12004 = vmatpush1.bf16.msra.mxu1 %v16633_v61  ;;  %v16731_v60 = vld [vmem:[%s17849_s14 + $0x2524] ss:$16 sps:$4 sm:$0xff]   ;;  %v16734_v61 = vld [vmem:[%s17849_s14 + $0x252c] ss:$16 sps:$4 sm:$0xff]  }
 0x51f   : > { %10930 = vmatprep.subr.bf16.mxu0 %v16638_v62  ;;  %12005 = vmatprep.subr.bf16.mxu1 %v16641_v63  ;;  %v16729_v62 = vld [vmem:[%s17849_s14 + $0x2520] ss:$16 sps:$4 sm:$0xff]   ;;  %v16732_v63 = vld [vmem:[%s17849_s14 + $0x2528] ss:$16 sps:$4 sm:$0xff]  }
 0x522   : > { %10931 = vmatpush1.bf16.msra.mxu0 %v16636_v0  ;;  %12006 = vmatpush1.bf16.msra.mxu1 %v16639_v1  ;;  %v16737_v0 = vld [vmem:[%s17849_s14 + $0x2544] ss:$16 sps:$4 sm:$0xff]   ;;  %v16740_v1 = vld [vmem:[%s17849_s14 + $0x254c] ss:$16 sps:$4 sm:$0xff]  }
 0x523   : > { %10932 = vmatprep.subr.bf16.mxu0 %v16644_v2  ;;  %12007 = vmatprep.subr.bf16.mxu1 %v16647_v3  ;;  %v16735_v2 = vld [vmem:[%s17849_s14 + $0x2540] ss:$16 sps:$4 sm:$0xff]   ;;  %v16738_v3 = vld [vmem:[%s17849_s14 + $0x2548] ss:$16 sps:$4 sm:$0xff]  }
 0x526   : > { %10933 = vmatpush1.bf16.msra.mxu0 %v16642_v4  ;;  %12008 = vmatpush1.bf16.msra.mxu1 %v16645_v5  ;;  %v16743_v4 = vld [vmem:[%s17849_s14 + $0x2564] ss:$16 sps:$4 sm:$0xff]   ;;  %v16746_v5 = vld [vmem:[%s17849_s14 + $0x256c] ss:$16 sps:$4 sm:$0xff]  }
 0x527   : > { %10934 = vmatprep.subr.bf16.mxu0 %v16650_v6  ;;  %12009 = vmatprep.subr.bf16.mxu1 %v16653_v7  ;;  %v16741_v6 = vld [vmem:[%s17849_s14 + $0x2560] ss:$16 sps:$4 sm:$0xff]   ;;  %v16744_v7 = vld [vmem:[%s17849_s14 + $0x2568] ss:$16 sps:$4 sm:$0xff]  }
 0x52a   : > { %10935 = vmatpush1.bf16.msra.mxu0 %v16648_v8  ;;  %12010 = vmatpush1.bf16.msra.mxu1 %v16651_v9  ;;  %v16749_v8 = vld [vmem:[%s17849_s14 + $0x2584] ss:$16 sps:$4 sm:$0xff]   ;;  %v16752_v9 = vld [vmem:[%s17849_s14 + $0x258c] ss:$16 sps:$4 sm:$0xff]  }
 0x52b   : > { %10936 = vmatprep.subr.bf16.mxu0 %v16656_v10  ;;  %12011 = vmatprep.subr.bf16.mxu1 %v16659_v11  ;;  %v16747_v10 = vld [vmem:[%s17849_s14 + $0x2580] ss:$16 sps:$4 sm:$0xff]   ;;  %v16750_v11 = vld [vmem:[%s17849_s14 + $0x2588] ss:$16 sps:$4 sm:$0xff]  }
 0x52e   : > { %10937 = vmatpush1.bf16.msra.mxu0 %v16654_v12  ;;  %12012 = vmatpush1.bf16.msra.mxu1 %v16657_v13  ;;  %v16755_v12 = vld [vmem:[%s17849_s14 + $0x25a4] ss:$16 sps:$4 sm:$0xff]   ;;  %v16758_v13 = vld [vmem:[%s17849_s14 + $0x25ac] ss:$16 sps:$4 sm:$0xff]  }
 0x52f   : > { %10938 = vmatprep.subr.bf16.mxu0 %v16662_v14  ;;  %12013 = vmatprep.subr.bf16.mxu1 %v16665_v15  ;;  %v16753_v14 = vld [vmem:[%s17849_s14 + $0x25a0] ss:$16 sps:$4 sm:$0xff]   ;;  %v16756_v15 = vld [vmem:[%s17849_s14 + $0x25a8] ss:$16 sps:$4 sm:$0xff]  }
 0x532   : > { %10939 = vmatpush1.bf16.msra.mxu0 %v16660_v16  ;;  %12014 = vmatpush1.bf16.msra.mxu1 %v16663_v17  ;;  %v16761_v16 = vld [vmem:[%s17849_s14 + $0x25c4] ss:$16 sps:$4 sm:$0xff]   ;;  %v16764_v17 = vld [vmem:[%s17849_s14 + $0x25cc] ss:$16 sps:$4 sm:$0xff]  }
 0x533   : > { %10940 = vmatprep.subr.bf16.mxu0 %v16668_v18  ;;  %12015 = vmatprep.subr.bf16.mxu1 %v16671_v19  ;;  %v16759_v18 = vld [vmem:[%s17849_s14 + $0x25c0] ss:$16 sps:$4 sm:$0xff]   ;;  %v16762_v19 = vld [vmem:[%s17849_s14 + $0x25c8] ss:$16 sps:$4 sm:$0xff]  }
 0x536   : > { %10941 = vmatpush1.bf16.msra.mxu0 %v16666_v20  ;;  %12016 = vmatpush1.bf16.msra.mxu1 %v16669_v21  ;;  %v16767_v20 = vld [vmem:[%s17849_s14 + $0x25e4] ss:$16 sps:$4 sm:$0xff]   ;;  %v16770_v21 = vld [vmem:[%s17849_s14 + $0x25ec] ss:$16 sps:$4 sm:$0xff]  }
 0x537   : > { %10953 = vmatprep.subr.bf16.mxu0 %v16677_v22  ;;  %12028 = vmatprep.subr.bf16.mxu1 %v16680_v23  ;;  %v16765_v22 = vld [vmem:[%s17849_s14 + $0x25e0] ss:$16 sps:$4 sm:$0xff]   ;;  %v16768_v23 = vld [vmem:[%s17849_s14 + $0x25e8] ss:$16 sps:$4 sm:$0xff]  }
 0x539   : > { %10943 = vmatmul.mubr.bf16.vlgmr.msra.gmra.mrb[0].mxu0 %v16672_v24  ;;  %12018 = vmatmul.mubr.bf16.vlgmr.msra.gmra.mrb[0].mxu1 %v16672_v24  ;;  %v16776_v24 = vld [vmem:[%s17849_s14 + $0x2604] ss:$16 sps:$4 sm:$0xff]  }
 0x53a   : > { %10954 = vmatpush1.bf16.msra.mxu0 %v16675_v25  ;;  %12029 = vmatpush1.bf16.msra.mxu1 %v16678_v26  ;;  %v16779_v25 = vld [vmem:[%s17849_s14 + $0x260c] ss:$16 sps:$4 sm:$0xff]  }
 0x53b   : > { %10955 = vmatprep.subr.bf16.mxu0 %v16683_v27  ;;  %12030 = vmatprep.subr.bf16.mxu1 %v16686_v28  ;;  %v16771_v26 = vld [vmem:[%s17847_s18 + $0x90] ss:$196 sps:$4 sm:$0xff]  }
 0x53c   : > { %10985 = vmatprep.mubr.bf16.mxu0 %v16773_v29  ;;  %12060 = vmatprep.mubr.bf16.mxu1 %v16773_v29  ;;  %v16774_v27 = vld [vmem:[%s17849_s14 + $0x2600] ss:$16 sps:$4 sm:$0xff]   ;;  %v16777_v28 = vld [vmem:[%s17849_s14 + $0x2608] ss:$16 sps:$4 sm:$0xff]   ;;  %v16782_v29 = vld [vmem:[%s17849_s14 + $0x2624] ss:$16 sps:$4 sm:$0xff]  }
 0x53e   : > { %10956 = vmatpush1.bf16.msra.mxu0 %v16681_v30  ;;  %12031 = vmatpush1.bf16.msra.mxu1 %v16684_v31  ;;  %v16785_v30 = vld [vmem:[%s17849_s14 + $0x262c] ss:$16 sps:$4 sm:$0xff]  }
 0x53f   : > { %10957 = vmatprep.subr.bf16.mxu0 %v16689_v32  ;;  %12032 = vmatprep.subr.bf16.mxu1 %v16692_v33  ;;  %v16872_v31 = vld [vmem:[%s17847_s18 + $0x9c] ss:$196 sps:$4 sm:$0xff]  }
 0x540   : > { %v16780_v32 = vld [vmem:[%s17849_s14 + $0x2620] ss:$16 sps:$4 sm:$0xff]   ;;  %v16783_v33 = vld [vmem:[%s17849_s14 + $0x2628] ss:$16 sps:$4 sm:$0xff]  }
 0x542   : > { %10958 = vmatpush1.bf16.msra.mxu0 %v16687_v34  ;;  %12033 = vmatpush1.bf16.msra.mxu1 %v16690_v35  ;;  %v16788_v34 = vld [vmem:[%s17849_s14 + $0x2644] ss:$16 sps:$4 sm:$0xff]   ;;  %v16791_v35 = vld [vmem:[%s17849_s14 + $0x264c] ss:$16 sps:$4 sm:$0xff]  }
 0x543   : > { %10959 = vmatprep.subr.bf16.mxu0 %v16695_v36  ;;  %12034 = vmatprep.subr.bf16.mxu1 %v16698_v37  ;;  %v16786_v36 = vld [vmem:[%s17849_s14 + $0x2640] ss:$16 sps:$4 sm:$0xff]   ;;  %v16789_v37 = vld [vmem:[%s17849_s14 + $0x2648] ss:$16 sps:$4 sm:$0xff]  }
 0x546   : > { %10960 = vmatpush1.bf16.msra.mxu0 %v16693_v38  ;;  %12035 = vmatpush1.bf16.msra.mxu1 %v16696_v39  ;;  %v16794_v38 = vld [vmem:[%s17849_s14 + $0x2664] ss:$16 sps:$4 sm:$0xff]   ;;  %v16797_v39 = vld [vmem:[%s17849_s14 + $0x266c] ss:$16 sps:$4 sm:$0xff]  }
 0x547   : > { %10961 = vmatprep.subr.bf16.mxu0 %v16701_v40  ;;  %12036 = vmatprep.subr.bf16.mxu1 %v16704_v41  ;;  %v16792_v40 = vld [vmem:[%s17849_s14 + $0x2660] ss:$16 sps:$4 sm:$0xff]   ;;  %v16795_v41 = vld [vmem:[%s17849_s14 + $0x2668] ss:$16 sps:$4 sm:$0xff]  }
 0x54a   : > { %10962 = vmatpush1.bf16.msra.mxu0 %v16699_v42  ;;  %12037 = vmatpush1.bf16.msra.mxu1 %v16702_v43  ;;  %v16800_v42 = vld [vmem:[%s17849_s14 + $0x2684] ss:$16 sps:$4 sm:$0xff]   ;;  %v16803_v43 = vld [vmem:[%s17849_s14 + $0x268c] ss:$16 sps:$4 sm:$0xff]  }
 0x54b   : > { %10963 = vmatprep.subr.bf16.mxu0 %v16707_v44  ;;  %12038 = vmatprep.subr.bf16.mxu1 %v16710_v45  ;;  %v16798_v44 = vld [vmem:[%s17849_s14 + $0x2680] ss:$16 sps:$4 sm:$0xff]   ;;  %v16801_v45 = vld [vmem:[%s17849_s14 + $0x2688] ss:$16 sps:$4 sm:$0xff]  }
 0x54e   : > { %10964 = vmatpush1.bf16.msra.mxu0 %v16705_v46  ;;  %12039 = vmatpush1.bf16.msra.mxu1 %v16708_v47  ;;  %v16806_v46 = vld [vmem:[%s17849_s14 + $0x26a4] ss:$16 sps:$4 sm:$0xff]   ;;  %v16809_v47 = vld [vmem:[%s17849_s14 + $0x26ac] ss:$16 sps:$4 sm:$0xff]  }
 0x54f   : > { %10965 = vmatprep.subr.bf16.mxu0 %v16713_v48  ;;  %12040 = vmatprep.subr.bf16.mxu1 %v16716_v49  ;;  %v16804_v48 = vld [vmem:[%s17849_s14 + $0x26a0] ss:$16 sps:$4 sm:$0xff]   ;;  %v16807_v49 = vld [vmem:[%s17849_s14 + $0x26a8] ss:$16 sps:$4 sm:$0xff]  }
 0x552   : > { %10966 = vmatpush1.bf16.msra.mxu0 %v16711_v50  ;;  %12041 = vmatpush1.bf16.msra.mxu1 %v16714_v51  ;;  %v16812_v50 = vld [vmem:[%s17849_s14 + $0x26c4] ss:$16 sps:$4 sm:$0xff]   ;;  %v16815_v51 = vld [vmem:[%s17849_s14 + $0x26cc] ss:$16 sps:$4 sm:$0xff]  }
 0x553   : > { %10967 = vmatprep.subr.bf16.mxu0 %v16719_v52  ;;  %12042 = vmatprep.subr.bf16.mxu1 %v16722_v53  ;;  %v16810_v52 = vld [vmem:[%s17849_s14 + $0x26c0] ss:$16 sps:$4 sm:$0xff]   ;;  %v16813_v53 = vld [vmem:[%s17849_s14 + $0x26c8] ss:$16 sps:$4 sm:$0xff]  }
 0x556   : > { %10968 = vmatpush1.bf16.msra.mxu0 %v16717_v54  ;;  %12043 = vmatpush1.bf16.msra.mxu1 %v16720_v55  ;;  %v16818_v54 = vld [vmem:[%s17849_s14 + $0x26e4] ss:$16 sps:$4 sm:$0xff]   ;;  %v16821_v55 = vld [vmem:[%s17849_s14 + $0x26ec] ss:$16 sps:$4 sm:$0xff]  }
 0x557   : > { %10969 = vmatprep.subr.bf16.mxu0 %v16725_v56  ;;  %12044 = vmatprep.subr.bf16.mxu1 %v16728_v57  ;;  %v16816_v56 = vld [vmem:[%s17849_s14 + $0x26e0] ss:$16 sps:$4 sm:$0xff]   ;;  %v16819_v57 = vld [vmem:[%s17849_s14 + $0x26e8] ss:$16 sps:$4 sm:$0xff]  }
 0x55a   : > { %10970 = vmatpush1.bf16.msra.mxu0 %v16723_v58  ;;  %12045 = vmatpush1.bf16.msra.mxu1 %v16726_v59  ;;  %v16824_v58 = vld [vmem:[%s17849_s14 + $0x2704] ss:$16 sps:$4 sm:$0xff]   ;;  %v16827_v59 = vld [vmem:[%s17849_s14 + $0x270c] ss:$16 sps:$4 sm:$0xff]  }
 0x55b   : > { %10971 = vmatprep.subr.bf16.mxu0 %v16731_v60  ;;  %12046 = vmatprep.subr.bf16.mxu1 %v16734_v61  ;;  %v16822_v60 = vld [vmem:[%s17849_s14 + $0x2700] ss:$16 sps:$4 sm:$0xff]   ;;  %v16825_v61 = vld [vmem:[%s17849_s14 + $0x2708] ss:$16 sps:$4 sm:$0xff]  }
 0x55e   : > { %10972 = vmatpush1.bf16.msra.mxu0 %v16729_v62  ;;  %12047 = vmatpush1.bf16.msra.mxu1 %v16732_v63  ;;  %v16830_v62 = vld [vmem:[%s17849_s14 + $0x2724] ss:$16 sps:$4 sm:$0xff]   ;;  %v16833_v63 = vld [vmem:[%s17849_s14 + $0x272c] ss:$16 sps:$4 sm:$0xff]  }
 0x55f   : > { %10973 = vmatprep.subr.bf16.mxu0 %v16737_v0  ;;  %12048 = vmatprep.subr.bf16.mxu1 %v16740_v1  ;;  %v16828_v0 = vld [vmem:[%s17849_s14 + $0x2720] ss:$16 sps:$4 sm:$0xff]   ;;  %v16831_v1 = vld [vmem:[%s17849_s14 + $0x2728] ss:$16 sps:$4 sm:$0xff]  }
 0x562   : > { %10974 = vmatpush1.bf16.msra.mxu0 %v16735_v2  ;;  %12049 = vmatpush1.bf16.msra.mxu1 %v16738_v3  ;;  %v16836_v2 = vld [vmem:[%s17849_s14 + $0x2744] ss:$16 sps:$4 sm:$0xff]   ;;  %v16839_v3 = vld [vmem:[%s17849_s14 + $0x274c] ss:$16 sps:$4 sm:$0xff]  }
 0x563   : > { %10975 = vmatprep.subr.bf16.mxu0 %v16743_v4  ;;  %12050 = vmatprep.subr.bf16.mxu1 %v16746_v5  ;;  %v16834_v4 = vld [vmem:[%s17849_s14 + $0x2740] ss:$16 sps:$4 sm:$0xff]   ;;  %v16837_v5 = vld [vmem:[%s17849_s14 + $0x2748] ss:$16 sps:$4 sm:$0xff]  }
 0x566   : > { %10976 = vmatpush1.bf16.msra.mxu0 %v16741_v6  ;;  %12051 = vmatpush1.bf16.msra.mxu1 %v16744_v7  ;;  %v16842_v6 = vld [vmem:[%s17849_s14 + $0x2764] ss:$16 sps:$4 sm:$0xff]   ;;  %v16845_v7 = vld [vmem:[%s17849_s14 + $0x276c] ss:$16 sps:$4 sm:$0xff]  }
 0x567   : > { %10977 = vmatprep.subr.bf16.mxu0 %v16749_v8  ;;  %12052 = vmatprep.subr.bf16.mxu1 %v16752_v9  ;;  %v16840_v8 = vld [vmem:[%s17849_s14 + $0x2760] ss:$16 sps:$4 sm:$0xff]   ;;  %v16843_v9 = vld [vmem:[%s17849_s14 + $0x2768] ss:$16 sps:$4 sm:$0xff]  }
 0x56a   : > { %10978 = vmatpush1.bf16.msra.mxu0 %v16747_v10  ;;  %12053 = vmatpush1.bf16.msra.mxu1 %v16750_v11  ;;  %v16848_v10 = vld [vmem:[%s17849_s14 + $0x2784] ss:$16 sps:$4 sm:$0xff]   ;;  %v16851_v11 = vld [vmem:[%s17849_s14 + $0x278c] ss:$16 sps:$4 sm:$0xff]  }
 0x56b   : > { %10979 = vmatprep.subr.bf16.mxu0 %v16755_v12  ;;  %12054 = vmatprep.subr.bf16.mxu1 %v16758_v13  ;;  %v16846_v12 = vld [vmem:[%s17849_s14 + $0x2780] ss:$16 sps:$4 sm:$0xff]   ;;  %v16849_v13 = vld [vmem:[%s17849_s14 + $0x2788] ss:$16 sps:$4 sm:$0xff]  }
 0x56e   : > { %10980 = vmatpush1.bf16.msra.mxu0 %v16753_v14  ;;  %12055 = vmatpush1.bf16.msra.mxu1 %v16756_v15  ;;  %v16854_v14 = vld [vmem:[%s17849_s14 + $0x27a4] ss:$16 sps:$4 sm:$0xff]   ;;  %v16857_v15 = vld [vmem:[%s17849_s14 + $0x27ac] ss:$16 sps:$4 sm:$0xff]  }
 0x56f   : > { %10981 = vmatprep.subr.bf16.mxu0 %v16761_v16  ;;  %12056 = vmatprep.subr.bf16.mxu1 %v16764_v17  ;;  %v16852_v16 = vld [vmem:[%s17849_s14 + $0x27a0] ss:$16 sps:$4 sm:$0xff]   ;;  %v16855_v17 = vld [vmem:[%s17849_s14 + $0x27a8] ss:$16 sps:$4 sm:$0xff]  }
 0x572   : > { %10982 = vmatpush1.bf16.msra.mxu0 %v16759_v18  ;;  %12057 = vmatpush1.bf16.msra.mxu1 %v16762_v19  ;;  %v16860_v18 = vld [vmem:[%s17849_s14 + $0x27c4] ss:$16 sps:$4 sm:$0xff]   ;;  %v16863_v19 = vld [vmem:[%s17849_s14 + $0x27cc] ss:$16 sps:$4 sm:$0xff]  }
 0x573   : > { %10983 = vmatprep.subr.bf16.mxu0 %v16767_v20  ;;  %12058 = vmatprep.subr.bf16.mxu1 %v16770_v21  ;;  %v16858_v20 = vld [vmem:[%s17849_s14 + $0x27c0] ss:$16 sps:$4 sm:$0xff]   ;;  %v16861_v21 = vld [vmem:[%s17849_s14 + $0x27c8] ss:$16 sps:$4 sm:$0xff]  }
 0x576   : > { %10984 = vmatpush1.bf16.msra.mxu0 %v16765_v22  ;;  %12059 = vmatpush1.bf16.msra.mxu1 %v16768_v23  ;;  %v16866_v22 = vld [vmem:[%s17849_s14 + $0x27e4] ss:$16 sps:$4 sm:$0xff]   ;;  %v16869_v23 = vld [vmem:[%s17849_s14 + $0x27ec] ss:$16 sps:$4 sm:$0xff]  }
 0x577   : > { %10996 = vmatprep.subr.bf16.mxu0 %v16776_v24  ;;  %12071 = vmatprep.subr.bf16.mxu1 %v16779_v25  ;;  %v16864_v24 = vld [vmem:[%s17849_s14 + $0x27e0] ss:$16 sps:$4 sm:$0xff]   ;;  %v16867_v25 = vld [vmem:[%s17849_s14 + $0x27e8] ss:$16 sps:$4 sm:$0xff]  }
 0x579   : > { %10986 = vmatmul.mubr.bf16.vlgmr.msra.gmra.mrb[0].mxu0 %v16771_v26  ;;  %12061 = vmatmul.mubr.bf16.vlgmr.msra.gmra.mrb[0].mxu1 %v16771_v26  ;;  %v16875_v26 = vld [vmem:[%s17849_s14 + $0x2804] ss:$16 sps:$4 sm:$0xff]  }
 0x57a   : > { %10997 = vmatpush1.bf16.msra.mxu0 %v16774_v27  ;;  %12072 = vmatpush1.bf16.msra.mxu1 %v16777_v28  ;;  %v16878_v27 = vld [vmem:[%s17849_s14 + $0x280c] ss:$16 sps:$4 sm:$0xff]  }
 0x57b   : > { %10998 = vmatprep.subr.bf16.mxu0 %v16782_v29  ;;  %12073 = vmatprep.subr.bf16.mxu1 %v16785_v30  ;;  %v16870_v28 = vld [vmem:[%s17847_s18 + $0x98] ss:$196 sps:$4 sm:$0xff]  }
 0x57c   : > { %11028 = vmatprep.mubr.bf16.mxu0 %v16872_v31  ;;  %12103 = vmatprep.mubr.bf16.mxu1 %v16872_v31  ;;  %v16873_v29 = vld [vmem:[%s17849_s14 + $0x2800] ss:$16 sps:$4 sm:$0xff]   ;;  %v16876_v30 = vld [vmem:[%s17849_s14 + $0x2808] ss:$16 sps:$4 sm:$0xff]   ;;  %v16881_v31 = vld [vmem:[%s17849_s14 + $0x2824] ss:$16 sps:$4 sm:$0xff]  }
 0x57e   : > { %10999 = vmatpush1.bf16.msra.mxu0 %v16780_v32  ;;  %12074 = vmatpush1.bf16.msra.mxu1 %v16783_v33  ;;  %v16884_v32 = vld [vmem:[%s17849_s14 + $0x282c] ss:$16 sps:$4 sm:$0xff]  }
 0x57f   : > { %11000 = vmatprep.subr.bf16.mxu0 %v16788_v34  ;;  %12075 = vmatprep.subr.bf16.mxu1 %v16791_v35  ;;  %v16971_v33 = vld [vmem:[%s17847_s18 + $0xa4] ss:$196 sps:$4 sm:$0xff]  }
 0x580   : > { %v16879_v34 = vld [vmem:[%s17849_s14 + $0x2820] ss:$16 sps:$4 sm:$0xff]   ;;  %v16882_v35 = vld [vmem:[%s17849_s14 + $0x2828] ss:$16 sps:$4 sm:$0xff]  }
 0x582   : > { %11001 = vmatpush1.bf16.msra.mxu0 %v16786_v36  ;;  %12076 = vmatpush1.bf16.msra.mxu1 %v16789_v37  ;;  %v16887_v36 = vld [vmem:[%s17849_s14 + $0x2844] ss:$16 sps:$4 sm:$0xff]   ;;  %v16890_v37 = vld [vmem:[%s17849_s14 + $0x284c] ss:$16 sps:$4 sm:$0xff]  }
 0x583   : > { %11002 = vmatprep.subr.bf16.mxu0 %v16794_v38  ;;  %12077 = vmatprep.subr.bf16.mxu1 %v16797_v39  ;;  %v16885_v38 = vld [vmem:[%s17849_s14 + $0x2840] ss:$16 sps:$4 sm:$0xff]   ;;  %v16888_v39 = vld [vmem:[%s17849_s14 + $0x2848] ss:$16 sps:$4 sm:$0xff]  }
 0x586   : > { %11003 = vmatpush1.bf16.msra.mxu0 %v16792_v40  ;;  %12078 = vmatpush1.bf16.msra.mxu1 %v16795_v41  ;;  %v16893_v40 = vld [vmem:[%s17849_s14 + $0x2864] ss:$16 sps:$4 sm:$0xff]   ;;  %v16896_v41 = vld [vmem:[%s17849_s14 + $0x286c] ss:$16 sps:$4 sm:$0xff]  }
 0x587   : > { %11004 = vmatprep.subr.bf16.mxu0 %v16800_v42  ;;  %12079 = vmatprep.subr.bf16.mxu1 %v16803_v43  ;;  %v16891_v42 = vld [vmem:[%s17849_s14 + $0x2860] ss:$16 sps:$4 sm:$0xff]   ;;  %v16894_v43 = vld [vmem:[%s17849_s14 + $0x2868] ss:$16 sps:$4 sm:$0xff]  }
 0x58a   : > { %11005 = vmatpush1.bf16.msra.mxu0 %v16798_v44  ;;  %12080 = vmatpush1.bf16.msra.mxu1 %v16801_v45  ;;  %v16899_v44 = vld [vmem:[%s17849_s14 + $0x2884] ss:$16 sps:$4 sm:$0xff]   ;;  %v16902_v45 = vld [vmem:[%s17849_s14 + $0x288c] ss:$16 sps:$4 sm:$0xff]  }
 0x58b   : > { %11006 = vmatprep.subr.bf16.mxu0 %v16806_v46  ;;  %12081 = vmatprep.subr.bf16.mxu1 %v16809_v47  ;;  %v16897_v46 = vld [vmem:[%s17849_s14 + $0x2880] ss:$16 sps:$4 sm:$0xff]   ;;  %v16900_v47 = vld [vmem:[%s17849_s14 + $0x2888] ss:$16 sps:$4 sm:$0xff]  }
 0x58e   : > { %11007 = vmatpush1.bf16.msra.mxu0 %v16804_v48  ;;  %12082 = vmatpush1.bf16.msra.mxu1 %v16807_v49  ;;  %v16905_v48 = vld [vmem:[%s17849_s14 + $0x28a4] ss:$16 sps:$4 sm:$0xff]   ;;  %v16908_v49 = vld [vmem:[%s17849_s14 + $0x28ac] ss:$16 sps:$4 sm:$0xff]  }
 0x58f   : > { %11008 = vmatprep.subr.bf16.mxu0 %v16812_v50  ;;  %12083 = vmatprep.subr.bf16.mxu1 %v16815_v51  ;;  %v16903_v50 = vld [vmem:[%s17849_s14 + $0x28a0] ss:$16 sps:$4 sm:$0xff]   ;;  %v16906_v51 = vld [vmem:[%s17849_s14 + $0x28a8] ss:$16 sps:$4 sm:$0xff]  }
 0x592   : > { %11009 = vmatpush1.bf16.msra.mxu0 %v16810_v52  ;;  %12084 = vmatpush1.bf16.msra.mxu1 %v16813_v53  ;;  %v16911_v52 = vld [vmem:[%s17849_s14 + $0x28c4] ss:$16 sps:$4 sm:$0xff]   ;;  %v16914_v53 = vld [vmem:[%s17849_s14 + $0x28cc] ss:$16 sps:$4 sm:$0xff]  }
 0x593   : > { %11010 = vmatprep.subr.bf16.mxu0 %v16818_v54  ;;  %12085 = vmatprep.subr.bf16.mxu1 %v16821_v55  ;;  %v16909_v54 = vld [vmem:[%s17849_s14 + $0x28c0] ss:$16 sps:$4 sm:$0xff]   ;;  %v16912_v55 = vld [vmem:[%s17849_s14 + $0x28c8] ss:$16 sps:$4 sm:$0xff]  }
 0x596   : > { %11011 = vmatpush1.bf16.msra.mxu0 %v16816_v56  ;;  %12086 = vmatpush1.bf16.msra.mxu1 %v16819_v57  ;;  %v16917_v56 = vld [vmem:[%s17849_s14 + $0x28e4] ss:$16 sps:$4 sm:$0xff]   ;;  %v16920_v57 = vld [vmem:[%s17849_s14 + $0x28ec] ss:$16 sps:$4 sm:$0xff]  }
 0x597   : > { %11012 = vmatprep.subr.bf16.mxu0 %v16824_v58  ;;  %12087 = vmatprep.subr.bf16.mxu1 %v16827_v59  ;;  %v16915_v58 = vld [vmem:[%s17849_s14 + $0x28e0] ss:$16 sps:$4 sm:$0xff]   ;;  %v16918_v59 = vld [vmem:[%s17849_s14 + $0x28e8] ss:$16 sps:$4 sm:$0xff]  }
 0x59a   : > { %11013 = vmatpush1.bf16.msra.mxu0 %v16822_v60  ;;  %12088 = vmatpush1.bf16.msra.mxu1 %v16825_v61  ;;  %v16923_v60 = vld [vmem:[%s17849_s14 + $0x2904] ss:$16 sps:$4 sm:$0xff]   ;;  %v16926_v61 = vld [vmem:[%s17849_s14 + $0x290c] ss:$16 sps:$4 sm:$0xff]  }
 0x59b   : > { %11014 = vmatprep.subr.bf16.mxu0 %v16830_v62  ;;  %12089 = vmatprep.subr.bf16.mxu1 %v16833_v63  ;;  %v16921_v62 = vld [vmem:[%s17849_s14 + $0x2900] ss:$16 sps:$4 sm:$0xff]   ;;  %v16924_v63 = vld [vmem:[%s17849_s14 + $0x2908] ss:$16 sps:$4 sm:$0xff]  }
 0x59e   : > { %11015 = vmatpush1.bf16.msra.mxu0 %v16828_v0  ;;  %12090 = vmatpush1.bf16.msra.mxu1 %v16831_v1  ;;  %v16929_v0 = vld [vmem:[%s17849_s14 + $0x2924] ss:$16 sps:$4 sm:$0xff]   ;;  %v16932_v1 = vld [vmem:[%s17849_s14 + $0x292c] ss:$16 sps:$4 sm:$0xff]  }
 0x59f   : > { %11016 = vmatprep.subr.bf16.mxu0 %v16836_v2  ;;  %12091 = vmatprep.subr.bf16.mxu1 %v16839_v3  ;;  %v16927_v2 = vld [vmem:[%s17849_s14 + $0x2920] ss:$16 sps:$4 sm:$0xff]   ;;  %v16930_v3 = vld [vmem:[%s17849_s14 + $0x2928] ss:$16 sps:$4 sm:$0xff]  }
 0x5a2   : > { %11017 = vmatpush1.bf16.msra.mxu0 %v16834_v4  ;;  %12092 = vmatpush1.bf16.msra.mxu1 %v16837_v5  ;;  %v16935_v4 = vld [vmem:[%s17849_s14 + $0x2944] ss:$16 sps:$4 sm:$0xff]   ;;  %v16938_v5 = vld [vmem:[%s17849_s14 + $0x294c] ss:$16 sps:$4 sm:$0xff]  }
 0x5a3   : > { %11018 = vmatprep.subr.bf16.mxu0 %v16842_v6  ;;  %12093 = vmatprep.subr.bf16.mxu1 %v16845_v7  ;;  %v16933_v6 = vld [vmem:[%s17849_s14 + $0x2940] ss:$16 sps:$4 sm:$0xff]   ;;  %v16936_v7 = vld [vmem:[%s17849_s14 + $0x2948] ss:$16 sps:$4 sm:$0xff]  }
 0x5a6   : > { %11019 = vmatpush1.bf16.msra.mxu0 %v16840_v8  ;;  %12094 = vmatpush1.bf16.msra.mxu1 %v16843_v9  ;;  %v16941_v8 = vld [vmem:[%s17849_s14 + $0x2964] ss:$16 sps:$4 sm:$0xff]   ;;  %v16944_v9 = vld [vmem:[%s17849_s14 + $0x296c] ss:$16 sps:$4 sm:$0xff]  }
 0x5a7   : > { %11020 = vmatprep.subr.bf16.mxu0 %v16848_v10  ;;  %12095 = vmatprep.subr.bf16.mxu1 %v16851_v11  ;;  %v16939_v10 = vld [vmem:[%s17849_s14 + $0x2960] ss:$16 sps:$4 sm:$0xff]   ;;  %v16942_v11 = vld [vmem:[%s17849_s14 + $0x2968] ss:$16 sps:$4 sm:$0xff]  }
 0x5aa   : > { %11021 = vmatpush1.bf16.msra.mxu0 %v16846_v12  ;;  %12096 = vmatpush1.bf16.msra.mxu1 %v16849_v13  ;;  %v16947_v12 = vld [vmem:[%s17849_s14 + $0x2984] ss:$16 sps:$4 sm:$0xff]   ;;  %v16950_v13 = vld [vmem:[%s17849_s14 + $0x298c] ss:$16 sps:$4 sm:$0xff]  }
 0x5ab   : > { %11022 = vmatprep.subr.bf16.mxu0 %v16854_v14  ;;  %12097 = vmatprep.subr.bf16.mxu1 %v16857_v15  ;;  %v16945_v14 = vld [vmem:[%s17849_s14 + $0x2980] ss:$16 sps:$4 sm:$0xff]   ;;  %v16948_v15 = vld [vmem:[%s17849_s14 + $0x2988] ss:$16 sps:$4 sm:$0xff]  }
 0x5ae   : > { %11023 = vmatpush1.bf16.msra.mxu0 %v16852_v16  ;;  %12098 = vmatpush1.bf16.msra.mxu1 %v16855_v17  ;;  %v16953_v16 = vld [vmem:[%s17849_s14 + $0x29a4] ss:$16 sps:$4 sm:$0xff]   ;;  %v16956_v17 = vld [vmem:[%s17849_s14 + $0x29ac] ss:$16 sps:$4 sm:$0xff]  }
 0x5af   : > { %11024 = vmatprep.subr.bf16.mxu0 %v16860_v18  ;;  %12099 = vmatprep.subr.bf16.mxu1 %v16863_v19  ;;  %v16951_v18 = vld [vmem:[%s17849_s14 + $0x29a0] ss:$16 sps:$4 sm:$0xff]   ;;  %v16954_v19 = vld [vmem:[%s17849_s14 + $0x29a8] ss:$16 sps:$4 sm:$0xff]  }
 0x5b2   : > { %11025 = vmatpush1.bf16.msra.mxu0 %v16858_v20  ;;  %12100 = vmatpush1.bf16.msra.mxu1 %v16861_v21  ;;  %v16959_v20 = vld [vmem:[%s17849_s14 + $0x29c4] ss:$16 sps:$4 sm:$0xff]   ;;  %v16962_v21 = vld [vmem:[%s17849_s14 + $0x29cc] ss:$16 sps:$4 sm:$0xff]  }
 0x5b3   : > { %11026 = vmatprep.subr.bf16.mxu0 %v16866_v22  ;;  %12101 = vmatprep.subr.bf16.mxu1 %v16869_v23  ;;  %v16957_v22 = vld [vmem:[%s17849_s14 + $0x29c0] ss:$16 sps:$4 sm:$0xff]   ;;  %v16960_v23 = vld [vmem:[%s17849_s14 + $0x29c8] ss:$16 sps:$4 sm:$0xff]  }
 0x5b6   : > { %11027 = vmatpush1.bf16.msra.mxu0 %v16864_v24  ;;  %12102 = vmatpush1.bf16.msra.mxu1 %v16867_v25  ;;  %v16965_v24 = vld [vmem:[%s17849_s14 + $0x29e4] ss:$16 sps:$4 sm:$0xff]   ;;  %v16968_v25 = vld [vmem:[%s17849_s14 + $0x29ec] ss:$16 sps:$4 sm:$0xff]  }
 0x5b7   : > { %11039 = vmatprep.subr.bf16.mxu0 %v16875_v26  ;;  %12114 = vmatprep.subr.bf16.mxu1 %v16878_v27  ;;  %v16963_v26 = vld [vmem:[%s17849_s14 + $0x29e0] ss:$16 sps:$4 sm:$0xff]   ;;  %v16966_v27 = vld [vmem:[%s17849_s14 + $0x29e8] ss:$16 sps:$4 sm:$0xff]  }
 0x5b9   : > { %11029 = vmatmul.mubr.bf16.vlgmr.msra.gmra.mrb[0].mxu0 %v16870_v28  ;;  %12104 = vmatmul.mubr.bf16.vlgmr.msra.gmra.mrb[0].mxu1 %v16870_v28  ;;  %v16974_v28 = vld [vmem:[%s17849_s14 + $0x2a04] ss:$16 sps:$4 sm:$0xff]  }
 0x5ba   : > { %11040 = vmatpush1.bf16.msra.mxu0 %v16873_v29  ;;  %12115 = vmatpush1.bf16.msra.mxu1 %v16876_v30  ;;  %v16977_v29 = vld [vmem:[%s17849_s14 + $0x2a0c] ss:$16 sps:$4 sm:$0xff]  }
 0x5bb   : > { %11041 = vmatprep.subr.bf16.mxu0 %v16881_v31  ;;  %12116 = vmatprep.subr.bf16.mxu1 %v16884_v32  ;;  %v16969_v30 = vld [vmem:[%s17847_s18 + $0xa0] ss:$196 sps:$4 sm:$0xff]  }
 0x5bc   : > { %11071 = vmatprep.mubr.bf16.mxu0 %v16971_v33  ;;  %12146 = vmatprep.mubr.bf16.mxu1 %v16971_v33  ;;  %v16972_v31 = vld [vmem:[%s17849_s14 + $0x2a00] ss:$16 sps:$4 sm:$0xff]   ;;  %v16975_v32 = vld [vmem:[%s17849_s14 + $0x2a08] ss:$16 sps:$4 sm:$0xff]   ;;  %v16980_v33 = vld [vmem:[%s17849_s14 + $0x2a24] ss:$16 sps:$4 sm:$0xff]  }
 0x5be   : > { %11042 = vmatpush1.bf16.msra.mxu0 %v16879_v34  ;;  %12117 = vmatpush1.bf16.msra.mxu1 %v16882_v35  ;;  %v16983_v34 = vld [vmem:[%s17849_s14 + $0x2a2c] ss:$16 sps:$4 sm:$0xff]  }
 0x5bf   : > { %11043 = vmatprep.subr.bf16.mxu0 %v16887_v36  ;;  %12118 = vmatprep.subr.bf16.mxu1 %v16890_v37  ;;  %v17070_v35 = vld [vmem:[%s17847_s18 + $0xac] ss:$196 sps:$4 sm:$0xff]  }
 0x5c0   : > { %v16978_v36 = vld [vmem:[%s17849_s14 + $0x2a20] ss:$16 sps:$4 sm:$0xff]   ;;  %v16981_v37 = vld [vmem:[%s17849_s14 + $0x2a28] ss:$16 sps:$4 sm:$0xff]  }
 0x5c2   : > { %11044 = vmatpush1.bf16.msra.mxu0 %v16885_v38  ;;  %12119 = vmatpush1.bf16.msra.mxu1 %v16888_v39  ;;  %v16986_v38 = vld [vmem:[%s17849_s14 + $0x2a44] ss:$16 sps:$4 sm:$0xff]   ;;  %v16989_v39 = vld [vmem:[%s17849_s14 + $0x2a4c] ss:$16 sps:$4 sm:$0xff]  }
 0x5c3   : > { %11045 = vmatprep.subr.bf16.mxu0 %v16893_v40  ;;  %12120 = vmatprep.subr.bf16.mxu1 %v16896_v41  ;;  %v16984_v40 = vld [vmem:[%s17849_s14 + $0x2a40] ss:$16 sps:$4 sm:$0xff]   ;;  %v16987_v41 = vld [vmem:[%s17849_s14 + $0x2a48] ss:$16 sps:$4 sm:$0xff]  }
 0x5c6   : > { %11046 = vmatpush1.bf16.msra.mxu0 %v16891_v42  ;;  %12121 = vmatpush1.bf16.msra.mxu1 %v16894_v43  ;;  %v16992_v42 = vld [vmem:[%s17849_s14 + $0x2a64] ss:$16 sps:$4 sm:$0xff]   ;;  %v16995_v43 = vld [vmem:[%s17849_s14 + $0x2a6c] ss:$16 sps:$4 sm:$0xff]  }
 0x5c7   : > { %11047 = vmatprep.subr.bf16.mxu0 %v16899_v44  ;;  %12122 = vmatprep.subr.bf16.mxu1 %v16902_v45  ;;  %v16990_v44 = vld [vmem:[%s17849_s14 + $0x2a60] ss:$16 sps:$4 sm:$0xff]   ;;  %v16993_v45 = vld [vmem:[%s17849_s14 + $0x2a68] ss:$16 sps:$4 sm:$0xff]  }
 0x5ca   : > { %11048 = vmatpush1.bf16.msra.mxu0 %v16897_v46  ;;  %12123 = vmatpush1.bf16.msra.mxu1 %v16900_v47  ;;  %v16998_v46 = vld [vmem:[%s17849_s14 + $0x2a84] ss:$16 sps:$4 sm:$0xff]   ;;  %v17001_v47 = vld [vmem:[%s17849_s14 + $0x2a8c] ss:$16 sps:$4 sm:$0xff]  }
 0x5cb   : > { %11049 = vmatprep.subr.bf16.mxu0 %v16905_v48  ;;  %12124 = vmatprep.subr.bf16.mxu1 %v16908_v49  ;;  %v16996_v48 = vld [vmem:[%s17849_s14 + $0x2a80] ss:$16 sps:$4 sm:$0xff]   ;;  %v16999_v49 = vld [vmem:[%s17849_s14 + $0x2a88] ss:$16 sps:$4 sm:$0xff]  }
 0x5ce   : > { %11050 = vmatpush1.bf16.msra.mxu0 %v16903_v50  ;;  %12125 = vmatpush1.bf16.msra.mxu1 %v16906_v51  ;;  %v17004_v50 = vld [vmem:[%s17849_s14 + $0x2aa4] ss:$16 sps:$4 sm:$0xff]   ;;  %v17007_v51 = vld [vmem:[%s17849_s14 + $0x2aac] ss:$16 sps:$4 sm:$0xff]  }
 0x5cf   : > { %11051 = vmatprep.subr.bf16.mxu0 %v16911_v52  ;;  %12126 = vmatprep.subr.bf16.mxu1 %v16914_v53  ;;  %v17002_v52 = vld [vmem:[%s17849_s14 + $0x2aa0] ss:$16 sps:$4 sm:$0xff]   ;;  %v17005_v53 = vld [vmem:[%s17849_s14 + $0x2aa8] ss:$16 sps:$4 sm:$0xff]  }
 0x5d2   : > { %11052 = vmatpush1.bf16.msra.mxu0 %v16909_v54  ;;  %12127 = vmatpush1.bf16.msra.mxu1 %v16912_v55  ;;  %v17010_v54 = vld [vmem:[%s17849_s14 + $0x2ac4] ss:$16 sps:$4 sm:$0xff]   ;;  %v17013_v55 = vld [vmem:[%s17849_s14 + $0x2acc] ss:$16 sps:$4 sm:$0xff]  }
 0x5d3   : > { %11053 = vmatprep.subr.bf16.mxu0 %v16917_v56  ;;  %12128 = vmatprep.subr.bf16.mxu1 %v16920_v57  ;;  %v17008_v56 = vld [vmem:[%s17849_s14 + $0x2ac0] ss:$16 sps:$4 sm:$0xff]   ;;  %v17011_v57 = vld [vmem:[%s17849_s14 + $0x2ac8] ss:$16 sps:$4 sm:$0xff]  }
 0x5d6   : > { %11054 = vmatpush1.bf16.msra.mxu0 %v16915_v58  ;;  %12129 = vmatpush1.bf16.msra.mxu1 %v16918_v59  ;;  %v17016_v58 = vld [vmem:[%s17849_s14 + $0x2ae4] ss:$16 sps:$4 sm:$0xff]   ;;  %v17019_v59 = vld [vmem:[%s17849_s14 + $0x2aec] ss:$16 sps:$4 sm:$0xff]  }
 0x5d7   : > { %11055 = vmatprep.subr.bf16.mxu0 %v16923_v60  ;;  %12130 = vmatprep.subr.bf16.mxu1 %v16926_v61  ;;  %v17014_v60 = vld [vmem:[%s17849_s14 + $0x2ae0] ss:$16 sps:$4 sm:$0xff]   ;;  %v17017_v61 = vld [vmem:[%s17849_s14 + $0x2ae8] ss:$16 sps:$4 sm:$0xff]  }
 0x5da   : > { %11056 = vmatpush1.bf16.msra.mxu0 %v16921_v62  ;;  %12131 = vmatpush1.bf16.msra.mxu1 %v16924_v63  ;;  %v17022_v62 = vld [vmem:[%s17849_s14 + $0x2b04] ss:$16 sps:$4 sm:$0xff]   ;;  %v17025_v63 = vld [vmem:[%s17849_s14 + $0x2b0c] ss:$16 sps:$4 sm:$0xff]  }
 0x5db   : > { %11057 = vmatprep.subr.bf16.mxu0 %v16929_v0  ;;  %12132 = vmatprep.subr.bf16.mxu1 %v16932_v1  ;;  %v17020_v0 = vld [vmem:[%s17849_s14 + $0x2b00] ss:$16 sps:$4 sm:$0xff]   ;;  %v17023_v1 = vld [vmem:[%s17849_s14 + $0x2b08] ss:$16 sps:$4 sm:$0xff]  }
 0x5de   : > { %11058 = vmatpush1.bf16.msra.mxu0 %v16927_v2  ;;  %12133 = vmatpush1.bf16.msra.mxu1 %v16930_v3  ;;  %v17028_v2 = vld [vmem:[%s17849_s14 + $0x2b24] ss:$16 sps:$4 sm:$0xff]   ;;  %v17031_v3 = vld [vmem:[%s17849_s14 + $0x2b2c] ss:$16 sps:$4 sm:$0xff]  }
 0x5df   : > { %11059 = vmatprep.subr.bf16.mxu0 %v16935_v4  ;;  %12134 = vmatprep.subr.bf16.mxu1 %v16938_v5  ;;  %v17026_v4 = vld [vmem:[%s17849_s14 + $0x2b20] ss:$16 sps:$4 sm:$0xff]   ;;  %v17029_v5 = vld [vmem:[%s17849_s14 + $0x2b28] ss:$16 sps:$4 sm:$0xff]  }
 0x5e2   : > { %11060 = vmatpush1.bf16.msra.mxu0 %v16933_v6  ;;  %12135 = vmatpush1.bf16.msra.mxu1 %v16936_v7  ;;  %v17034_v6 = vld [vmem:[%s17849_s14 + $0x2b44] ss:$16 sps:$4 sm:$0xff]   ;;  %v17037_v7 = vld [vmem:[%s17849_s14 + $0x2b4c] ss:$16 sps:$4 sm:$0xff]  }
 0x5e3   : > { %11061 = vmatprep.subr.bf16.mxu0 %v16941_v8  ;;  %12136 = vmatprep.subr.bf16.mxu1 %v16944_v9  ;;  %v17032_v8 = vld [vmem:[%s17849_s14 + $0x2b40] ss:$16 sps:$4 sm:$0xff]   ;;  %v17035_v9 = vld [vmem:[%s17849_s14 + $0x2b48] ss:$16 sps:$4 sm:$0xff]  }
 0x5e6   : > { %11062 = vmatpush1.bf16.msra.mxu0 %v16939_v10  ;;  %12137 = vmatpush1.bf16.msra.mxu1 %v16942_v11  ;;  %v17040_v10 = vld [vmem:[%s17849_s14 + $0x2b64] ss:$16 sps:$4 sm:$0xff]   ;;  %v17043_v11 = vld [vmem:[%s17849_s14 + $0x2b6c] ss:$16 sps:$4 sm:$0xff]  }
 0x5e7   : > { %11063 = vmatprep.subr.bf16.mxu0 %v16947_v12  ;;  %12138 = vmatprep.subr.bf16.mxu1 %v16950_v13  ;;  %v17038_v12 = vld [vmem:[%s17849_s14 + $0x2b60] ss:$16 sps:$4 sm:$0xff]   ;;  %v17041_v13 = vld [vmem:[%s17849_s14 + $0x2b68] ss:$16 sps:$4 sm:$0xff]  }
 0x5ea   : > { %11064 = vmatpush1.bf16.msra.mxu0 %v16945_v14  ;;  %12139 = vmatpush1.bf16.msra.mxu1 %v16948_v15  ;;  %v17046_v14 = vld [vmem:[%s17849_s14 + $0x2b84] ss:$16 sps:$4 sm:$0xff]   ;;  %v17049_v15 = vld [vmem:[%s17849_s14 + $0x2b8c] ss:$16 sps:$4 sm:$0xff]  }
 0x5eb   : > { %11065 = vmatprep.subr.bf16.mxu0 %v16953_v16  ;;  %12140 = vmatprep.subr.bf16.mxu1 %v16956_v17  ;;  %v17044_v16 = vld [vmem:[%s17849_s14 + $0x2b80] ss:$16 sps:$4 sm:$0xff]   ;;  %v17047_v17 = vld [vmem:[%s17849_s14 + $0x2b88] ss:$16 sps:$4 sm:$0xff]  }
 0x5ee   : > { %11066 = vmatpush1.bf16.msra.mxu0 %v16951_v18  ;;  %12141 = vmatpush1.bf16.msra.mxu1 %v16954_v19  ;;  %v17052_v18 = vld [vmem:[%s17849_s14 + $0x2ba4] ss:$16 sps:$4 sm:$0xff]   ;;  %v17055_v19 = vld [vmem:[%s17849_s14 + $0x2bac] ss:$16 sps:$4 sm:$0xff]  }
 0x5ef   : > { %11067 = vmatprep.subr.bf16.mxu0 %v16959_v20  ;;  %12142 = vmatprep.subr.bf16.mxu1 %v16962_v21  ;;  %v17050_v20 = vld [vmem:[%s17849_s14 + $0x2ba0] ss:$16 sps:$4 sm:$0xff]   ;;  %v17053_v21 = vld [vmem:[%s17849_s14 + $0x2ba8] ss:$16 sps:$4 sm:$0xff]  }
 0x5f2   : > { %11068 = vmatpush1.bf16.msra.mxu0 %v16957_v22  ;;  %12143 = vmatpush1.bf16.msra.mxu1 %v16960_v23  ;;  %v17058_v22 = vld [vmem:[%s17849_s14 + $0x2bc4] ss:$16 sps:$4 sm:$0xff]   ;;  %v17061_v23 = vld [vmem:[%s17849_s14 + $0x2bcc] ss:$16 sps:$4 sm:$0xff]  }
 0x5f3   : > { %11069 = vmatprep.subr.bf16.mxu0 %v16965_v24  ;;  %12144 = vmatprep.subr.bf16.mxu1 %v16968_v25  ;;  %v17056_v24 = vld [vmem:[%s17849_s14 + $0x2bc0] ss:$16 sps:$4 sm:$0xff]   ;;  %v17059_v25 = vld [vmem:[%s17849_s14 + $0x2bc8] ss:$16 sps:$4 sm:$0xff]  }
 0x5f6   : > { %11070 = vmatpush1.bf16.msra.mxu0 %v16963_v26  ;;  %12145 = vmatpush1.bf16.msra.mxu1 %v16966_v27  ;;  %v17064_v26 = vld [vmem:[%s17849_s14 + $0x2be4] ss:$16 sps:$4 sm:$0xff]   ;;  %v17067_v27 = vld [vmem:[%s17849_s14 + $0x2bec] ss:$16 sps:$4 sm:$0xff]  }
 0x5f7   : > { %11082 = vmatprep.subr.bf16.mxu0 %v16974_v28  ;;  %12157 = vmatprep.subr.bf16.mxu1 %v16977_v29  ;;  %v17062_v28 = vld [vmem:[%s17849_s14 + $0x2be0] ss:$16 sps:$4 sm:$0xff]   ;;  %v17065_v29 = vld [vmem:[%s17849_s14 + $0x2be8] ss:$16 sps:$4 sm:$0xff]  }
 0x5f9   : > { %11072 = vmatmul.mubr.bf16.vlgmr.msra.gmra.mrb[0].mxu0 %v16969_v30  ;;  %12147 = vmatmul.mubr.bf16.vlgmr.msra.gmra.mrb[0].mxu1 %v16969_v30  ;;  %v17073_v30 = vld [vmem:[%s17849_s14 + $0x2c04] ss:$16 sps:$4 sm:$0xff]  }
 0x5fa   : > { %11083 = vmatpush1.bf16.msra.mxu0 %v16972_v31  ;;  %12158 = vmatpush1.bf16.msra.mxu1 %v16975_v32  ;;  %v17076_v31 = vld [vmem:[%s17849_s14 + $0x2c0c] ss:$16 sps:$4 sm:$0xff]  }
 0x5fb   : > { %11084 = vmatprep.subr.bf16.mxu0 %v16980_v33  ;;  %12159 = vmatprep.subr.bf16.mxu1 %v16983_v34  ;;  %v17068_v32 = vld [vmem:[%s17847_s18 + $0xa8] ss:$196 sps:$4 sm:$0xff]  }
 0x5fc   : > { %11114 = vmatprep.mubr.bf16.mxu0 %v17070_v35  ;;  %12189 = vmatprep.mubr.bf16.mxu1 %v17070_v35  ;;  %v17071_v33 = vld [vmem:[%s17849_s14 + $0x2c00] ss:$16 sps:$4 sm:$0xff]   ;;  %v17074_v34 = vld [vmem:[%s17849_s14 + $0x2c08] ss:$16 sps:$4 sm:$0xff]   ;;  %v17079_v35 = vld [vmem:[%s17849_s14 + $0x2c24] ss:$16 sps:$4 sm:$0xff]  }
 0x5fe   : > { %11085 = vmatpush1.bf16.msra.mxu0 %v16978_v36  ;;  %12160 = vmatpush1.bf16.msra.mxu1 %v16981_v37  ;;  %v17082_v36 = vld [vmem:[%s17849_s14 + $0x2c2c] ss:$16 sps:$4 sm:$0xff]  }
 0x5ff   : > { %11086 = vmatprep.subr.bf16.mxu0 %v16986_v38  ;;  %12161 = vmatprep.subr.bf16.mxu1 %v16989_v39  ;;  %v17169_v37 = vld [vmem:[%s17847_s18 + $0xb4] ss:$196 sps:$4 sm:$0xff]  }
 0x600   : > { %v17077_v38 = vld [vmem:[%s17849_s14 + $0x2c20] ss:$16 sps:$4 sm:$0xff]   ;;  %v17080_v39 = vld [vmem:[%s17849_s14 + $0x2c28] ss:$16 sps:$4 sm:$0xff]  }
 0x602   : > { %11087 = vmatpush1.bf16.msra.mxu0 %v16984_v40  ;;  %12162 = vmatpush1.bf16.msra.mxu1 %v16987_v41  ;;  %v17085_v40 = vld [vmem:[%s17849_s14 + $0x2c44] ss:$16 sps:$4 sm:$0xff]   ;;  %v17088_v41 = vld [vmem:[%s17849_s14 + $0x2c4c] ss:$16 sps:$4 sm:$0xff]  }
 0x603   : > { %11088 = vmatprep.subr.bf16.mxu0 %v16992_v42  ;;  %12163 = vmatprep.subr.bf16.mxu1 %v16995_v43  ;;  %v17083_v42 = vld [vmem:[%s17849_s14 + $0x2c40] ss:$16 sps:$4 sm:$0xff]   ;;  %v17086_v43 = vld [vmem:[%s17849_s14 + $0x2c48] ss:$16 sps:$4 sm:$0xff]  }
 0x606   : > { %11089 = vmatpush1.bf16.msra.mxu0 %v16990_v44  ;;  %12164 = vmatpush1.bf16.msra.mxu1 %v16993_v45  ;;  %v17091_v44 = vld [vmem:[%s17849_s14 + $0x2c64] ss:$16 sps:$4 sm:$0xff]   ;;  %v17094_v45 = vld [vmem:[%s17849_s14 + $0x2c6c] ss:$16 sps:$4 sm:$0xff]  }
 0x607   : > { %11090 = vmatprep.subr.bf16.mxu0 %v16998_v46  ;;  %12165 = vmatprep.subr.bf16.mxu1 %v17001_v47  ;;  %v17089_v46 = vld [vmem:[%s17849_s14 + $0x2c60] ss:$16 sps:$4 sm:$0xff]   ;;  %v17092_v47 = vld [vmem:[%s17849_s14 + $0x2c68] ss:$16 sps:$4 sm:$0xff]  }
 0x60a   : > { %11091 = vmatpush1.bf16.msra.mxu0 %v16996_v48  ;;  %12166 = vmatpush1.bf16.msra.mxu1 %v16999_v49  ;;  %v17097_v48 = vld [vmem:[%s17849_s14 + $0x2c84] ss:$16 sps:$4 sm:$0xff]   ;;  %v17100_v49 = vld [vmem:[%s17849_s14 + $0x2c8c] ss:$16 sps:$4 sm:$0xff]  }
 0x60b   : > { %11092 = vmatprep.subr.bf16.mxu0 %v17004_v50  ;;  %12167 = vmatprep.subr.bf16.mxu1 %v17007_v51  ;;  %v17095_v50 = vld [vmem:[%s17849_s14 + $0x2c80] ss:$16 sps:$4 sm:$0xff]   ;;  %v17098_v51 = vld [vmem:[%s17849_s14 + $0x2c88] ss:$16 sps:$4 sm:$0xff]  }
 0x60e   : > { %11093 = vmatpush1.bf16.msra.mxu0 %v17002_v52  ;;  %12168 = vmatpush1.bf16.msra.mxu1 %v17005_v53  ;;  %v17103_v52 = vld [vmem:[%s17849_s14 + $0x2ca4] ss:$16 sps:$4 sm:$0xff]   ;;  %v17106_v53 = vld [vmem:[%s17849_s14 + $0x2cac] ss:$16 sps:$4 sm:$0xff]  }
 0x60f   : > { %11094 = vmatprep.subr.bf16.mxu0 %v17010_v54  ;;  %12169 = vmatprep.subr.bf16.mxu1 %v17013_v55  ;;  %v17101_v54 = vld [vmem:[%s17849_s14 + $0x2ca0] ss:$16 sps:$4 sm:$0xff]   ;;  %v17104_v55 = vld [vmem:[%s17849_s14 + $0x2ca8] ss:$16 sps:$4 sm:$0xff]  }
 0x612   : > { %11095 = vmatpush1.bf16.msra.mxu0 %v17008_v56  ;;  %12170 = vmatpush1.bf16.msra.mxu1 %v17011_v57  ;;  %v17109_v56 = vld [vmem:[%s17849_s14 + $0x2cc4] ss:$16 sps:$4 sm:$0xff]   ;;  %v17112_v57 = vld [vmem:[%s17849_s14 + $0x2ccc] ss:$16 sps:$4 sm:$0xff]  }
 0x613   : > { %11096 = vmatprep.subr.bf16.mxu0 %v17016_v58  ;;  %12171 = vmatprep.subr.bf16.mxu1 %v17019_v59  ;;  %v17107_v58 = vld [vmem:[%s17849_s14 + $0x2cc0] ss:$16 sps:$4 sm:$0xff]   ;;  %v17110_v59 = vld [vmem:[%s17849_s14 + $0x2cc8] ss:$16 sps:$4 sm:$0xff]  }
 0x616   : > { %11097 = vmatpush1.bf16.msra.mxu0 %v17014_v60  ;;  %12172 = vmatpush1.bf16.msra.mxu1 %v17017_v61  ;;  %v17115_v60 = vld [vmem:[%s17849_s14 + $0x2ce4] ss:$16 sps:$4 sm:$0xff]   ;;  %v17118_v61 = vld [vmem:[%s17849_s14 + $0x2cec] ss:$16 sps:$4 sm:$0xff]  }
 0x617   : > { %11098 = vmatprep.subr.bf16.mxu0 %v17022_v62  ;;  %12173 = vmatprep.subr.bf16.mxu1 %v17025_v63  ;;  %v17113_v62 = vld [vmem:[%s17849_s14 + $0x2ce0] ss:$16 sps:$4 sm:$0xff]   ;;  %v17116_v63 = vld [vmem:[%s17849_s14 + $0x2ce8] ss:$16 sps:$4 sm:$0xff]  }
 0x61a   : > { %11099 = vmatpush1.bf16.msra.mxu0 %v17020_v0  ;;  %12174 = vmatpush1.bf16.msra.mxu1 %v17023_v1  ;;  %v17121_v0 = vld [vmem:[%s17849_s14 + $0x2d04] ss:$16 sps:$4 sm:$0xff]   ;;  %v17124_v1 = vld [vmem:[%s17849_s14 + $0x2d0c] ss:$16 sps:$4 sm:$0xff]  }
 0x61b   : > { %11100 = vmatprep.subr.bf16.mxu0 %v17028_v2  ;;  %12175 = vmatprep.subr.bf16.mxu1 %v17031_v3  ;;  %v17119_v2 = vld [vmem:[%s17849_s14 + $0x2d00] ss:$16 sps:$4 sm:$0xff]   ;;  %v17122_v3 = vld [vmem:[%s17849_s14 + $0x2d08] ss:$16 sps:$4 sm:$0xff]  }
 0x61e   : > { %11101 = vmatpush1.bf16.msra.mxu0 %v17026_v4  ;;  %12176 = vmatpush1.bf16.msra.mxu1 %v17029_v5  ;;  %v17127_v4 = vld [vmem:[%s17849_s14 + $0x2d24] ss:$16 sps:$4 sm:$0xff]   ;;  %v17130_v5 = vld [vmem:[%s17849_s14 + $0x2d2c] ss:$16 sps:$4 sm:$0xff]  }
 0x61f   : > { %11102 = vmatprep.subr.bf16.mxu0 %v17034_v6  ;;  %12177 = vmatprep.subr.bf16.mxu1 %v17037_v7  ;;  %v17125_v6 = vld [vmem:[%s17849_s14 + $0x2d20] ss:$16 sps:$4 sm:$0xff]   ;;  %v17128_v7 = vld [vmem:[%s17849_s14 + $0x2d28] ss:$16 sps:$4 sm:$0xff]  }
 0x622   : > { %11103 = vmatpush1.bf16.msra.mxu0 %v17032_v8  ;;  %12178 = vmatpush1.bf16.msra.mxu1 %v17035_v9  ;;  %v17133_v8 = vld [vmem:[%s17849_s14 + $0x2d44] ss:$16 sps:$4 sm:$0xff]   ;;  %v17136_v9 = vld [vmem:[%s17849_s14 + $0x2d4c] ss:$16 sps:$4 sm:$0xff]  }
 0x623   : > { %11104 = vmatprep.subr.bf16.mxu0 %v17040_v10  ;;  %12179 = vmatprep.subr.bf16.mxu1 %v17043_v11  ;;  %v17131_v10 = vld [vmem:[%s17849_s14 + $0x2d40] ss:$16 sps:$4 sm:$0xff]   ;;  %v17134_v11 = vld [vmem:[%s17849_s14 + $0x2d48] ss:$16 sps:$4 sm:$0xff]  }
 0x626   : > { %11105 = vmatpush1.bf16.msra.mxu0 %v17038_v12  ;;  %12180 = vmatpush1.bf16.msra.mxu1 %v17041_v13  ;;  %v17139_v12 = vld [vmem:[%s17849_s14 + $0x2d64] ss:$16 sps:$4 sm:$0xff]   ;;  %v17142_v13 = vld [vmem:[%s17849_s14 + $0x2d6c] ss:$16 sps:$4 sm:$0xff]  }
 0x627   : > { %11106 = vmatprep.subr.bf16.mxu0 %v17046_v14  ;;  %12181 = vmatprep.subr.bf16.mxu1 %v17049_v15  ;;  %v17137_v14 = vld [vmem:[%s17849_s14 + $0x2d60] ss:$16 sps:$4 sm:$0xff]   ;;  %v17140_v15 = vld [vmem:[%s17849_s14 + $0x2d68] ss:$16 sps:$4 sm:$0xff]  }
 0x62a   : > { %11107 = vmatpush1.bf16.msra.mxu0 %v17044_v16  ;;  %12182 = vmatpush1.bf16.msra.mxu1 %v17047_v17  ;;  %v17145_v16 = vld [vmem:[%s17849_s14 + $0x2d84] ss:$16 sps:$4 sm:$0xff]   ;;  %v17148_v17 = vld [vmem:[%s17849_s14 + $0x2d8c] ss:$16 sps:$4 sm:$0xff]  }
 0x62b   : > { %11108 = vmatprep.subr.bf16.mxu0 %v17052_v18  ;;  %12183 = vmatprep.subr.bf16.mxu1 %v17055_v19  ;;  %v17143_v18 = vld [vmem:[%s17849_s14 + $0x2d80] ss:$16 sps:$4 sm:$0xff]   ;;  %v17146_v19 = vld [vmem:[%s17849_s14 + $0x2d88] ss:$16 sps:$4 sm:$0xff]  }
 0x62e   : > { %11109 = vmatpush1.bf16.msra.mxu0 %v17050_v20  ;;  %12184 = vmatpush1.bf16.msra.mxu1 %v17053_v21  ;;  %v17151_v20 = vld [vmem:[%s17849_s14 + $0x2da4] ss:$16 sps:$4 sm:$0xff]   ;;  %v17154_v21 = vld [vmem:[%s17849_s14 + $0x2dac] ss:$16 sps:$4 sm:$0xff]  }
 0x62f   : > { %11110 = vmatprep.subr.bf16.mxu0 %v17058_v22  ;;  %12185 = vmatprep.subr.bf16.mxu1 %v17061_v23  ;;  %v17149_v22 = vld [vmem:[%s17849_s14 + $0x2da0] ss:$16 sps:$4 sm:$0xff]   ;;  %v17152_v23 = vld [vmem:[%s17849_s14 + $0x2da8] ss:$16 sps:$4 sm:$0xff]  }
 0x632   : > { %11111 = vmatpush1.bf16.msra.mxu0 %v17056_v24  ;;  %12186 = vmatpush1.bf16.msra.mxu1 %v17059_v25  ;;  %v17157_v24 = vld [vmem:[%s17849_s14 + $0x2dc4] ss:$16 sps:$4 sm:$0xff]   ;;  %v17160_v25 = vld [vmem:[%s17849_s14 + $0x2dcc] ss:$16 sps:$4 sm:$0xff]  }
 0x633   : > { %11112 = vmatprep.subr.bf16.mxu0 %v17064_v26  ;;  %12187 = vmatprep.subr.bf16.mxu1 %v17067_v27  ;;  %v17155_v26 = vld [vmem:[%s17849_s14 + $0x2dc0] ss:$16 sps:$4 sm:$0xff]   ;;  %v17158_v27 = vld [vmem:[%s17849_s14 + $0x2dc8] ss:$16 sps:$4 sm:$0xff]  }
 0x636   : > { %11113 = vmatpush1.bf16.msra.mxu0 %v17062_v28  ;;  %12188 = vmatpush1.bf16.msra.mxu1 %v17065_v29  ;;  %v17163_v28 = vld [vmem:[%s17849_s14 + $0x2de4] ss:$16 sps:$4 sm:$0xff]   ;;  %v17166_v29 = vld [vmem:[%s17849_s14 + $0x2dec] ss:$16 sps:$4 sm:$0xff]  }
 0x637   : > { %11125 = vmatprep.subr.bf16.mxu0 %v17073_v30  ;;  %12200 = vmatprep.subr.bf16.mxu1 %v17076_v31  ;;  %v17161_v30 = vld [vmem:[%s17849_s14 + $0x2de0] ss:$16 sps:$4 sm:$0xff]   ;;  %v17164_v31 = vld [vmem:[%s17849_s14 + $0x2de8] ss:$16 sps:$4 sm:$0xff]  }
 0x639   : > { %11115 = vmatmul.mubr.bf16.vlgmr.msra.gmra.mrb[0].mxu0 %v17068_v32  ;;  %12190 = vmatmul.mubr.bf16.vlgmr.msra.gmra.mrb[0].mxu1 %v17068_v32  ;;  %v17172_v32 = vld [vmem:[%s17849_s14 + $0x2e04] ss:$16 sps:$4 sm:$0xff]  }
 0x63a   : > { %11126 = vmatpush1.bf16.msra.mxu0 %v17071_v33  ;;  %12201 = vmatpush1.bf16.msra.mxu1 %v17074_v34  ;;  %v17175_v33 = vld [vmem:[%s17849_s14 + $0x2e0c] ss:$16 sps:$4 sm:$0xff]  }
 0x63b   : > { %11127 = vmatprep.subr.bf16.mxu0 %v17079_v35  ;;  %12202 = vmatprep.subr.bf16.mxu1 %v17082_v36  ;;  %v17167_v34 = vld [vmem:[%s17847_s18 + $0xb0] ss:$196 sps:$4 sm:$0xff]  }
 0x63c   : > { %11157 = vmatprep.mubr.bf16.mxu0 %v17169_v37  ;;  %12232 = vmatprep.mubr.bf16.mxu1 %v17169_v37  ;;  %v17170_v35 = vld [vmem:[%s17849_s14 + $0x2e00] ss:$16 sps:$4 sm:$0xff]   ;;  %v17173_v36 = vld [vmem:[%s17849_s14 + $0x2e08] ss:$16 sps:$4 sm:$0xff]   ;;  %v17178_v37 = vld [vmem:[%s17849_s14 + $0x2e24] ss:$16 sps:$4 sm:$0xff]  }
 0x63e   : > { %11128 = vmatpush1.bf16.msra.mxu0 %v17077_v38  ;;  %12203 = vmatpush1.bf16.msra.mxu1 %v17080_v39  ;;  %v17181_v38 = vld [vmem:[%s17849_s14 + $0x2e2c] ss:$16 sps:$4 sm:$0xff]  }
 0x63f   : > { %11129 = vmatprep.subr.bf16.mxu0 %v17085_v40  ;;  %12204 = vmatprep.subr.bf16.mxu1 %v17088_v41  ;;  %v17268_v39 = vld [vmem:[%s17847_s18 + $0xbc] ss:$196 sps:$4 sm:$0xff]  }
 0x640   : > { %v17176_v40 = vld [vmem:[%s17849_s14 + $0x2e20] ss:$16 sps:$4 sm:$0xff]   ;;  %v17179_v41 = vld [vmem:[%s17849_s14 + $0x2e28] ss:$16 sps:$4 sm:$0xff]  }
 0x642   : > { %11130 = vmatpush1.bf16.msra.mxu0 %v17083_v42  ;;  %12205 = vmatpush1.bf16.msra.mxu1 %v17086_v43  ;;  %v17184_v42 = vld [vmem:[%s17849_s14 + $0x2e44] ss:$16 sps:$4 sm:$0xff]   ;;  %v17187_v43 = vld [vmem:[%s17849_s14 + $0x2e4c] ss:$16 sps:$4 sm:$0xff]  }
 0x643   : > { %11131 = vmatprep.subr.bf16.mxu0 %v17091_v44  ;;  %12206 = vmatprep.subr.bf16.mxu1 %v17094_v45  ;;  %v17182_v44 = vld [vmem:[%s17849_s14 + $0x2e40] ss:$16 sps:$4 sm:$0xff]   ;;  %v17185_v45 = vld [vmem:[%s17849_s14 + $0x2e48] ss:$16 sps:$4 sm:$0xff]  }
 0x646   : > { %11132 = vmatpush1.bf16.msra.mxu0 %v17089_v46  ;;  %12207 = vmatpush1.bf16.msra.mxu1 %v17092_v47  ;;  %v17190_v46 = vld [vmem:[%s17849_s14 + $0x2e64] ss:$16 sps:$4 sm:$0xff]   ;;  %v17193_v47 = vld [vmem:[%s17849_s14 + $0x2e6c] ss:$16 sps:$4 sm:$0xff]  }
 0x647   : > { %11133 = vmatprep.subr.bf16.mxu0 %v17097_v48  ;;  %12208 = vmatprep.subr.bf16.mxu1 %v17100_v49  ;;  %v17188_v48 = vld [vmem:[%s17849_s14 + $0x2e60] ss:$16 sps:$4 sm:$0xff]   ;;  %v17191_v49 = vld [vmem:[%s17849_s14 + $0x2e68] ss:$16 sps:$4 sm:$0xff]  }
 0x64a   : > { %11134 = vmatpush1.bf16.msra.mxu0 %v17095_v50  ;;  %12209 = vmatpush1.bf16.msra.mxu1 %v17098_v51  ;;  %v17196_v50 = vld [vmem:[%s17849_s14 + $0x2e84] ss:$16 sps:$4 sm:$0xff]   ;;  %v17199_v51 = vld [vmem:[%s17849_s14 + $0x2e8c] ss:$16 sps:$4 sm:$0xff]  }
 0x64b   : > { %11135 = vmatprep.subr.bf16.mxu0 %v17103_v52  ;;  %12210 = vmatprep.subr.bf16.mxu1 %v17106_v53  ;;  %v17194_v52 = vld [vmem:[%s17849_s14 + $0x2e80] ss:$16 sps:$4 sm:$0xff]   ;;  %v17197_v53 = vld [vmem:[%s17849_s14 + $0x2e88] ss:$16 sps:$4 sm:$0xff]  }
 0x64e   : > { %11136 = vmatpush1.bf16.msra.mxu0 %v17101_v54  ;;  %12211 = vmatpush1.bf16.msra.mxu1 %v17104_v55  ;;  %v17202_v54 = vld [vmem:[%s17849_s14 + $0x2ea4] ss:$16 sps:$4 sm:$0xff]   ;;  %v17205_v55 = vld [vmem:[%s17849_s14 + $0x2eac] ss:$16 sps:$4 sm:$0xff]  }
 0x64f   : > { %11137 = vmatprep.subr.bf16.mxu0 %v17109_v56  ;;  %12212 = vmatprep.subr.bf16.mxu1 %v17112_v57  ;;  %v17200_v56 = vld [vmem:[%s17849_s14 + $0x2ea0] ss:$16 sps:$4 sm:$0xff]   ;;  %v17203_v57 = vld [vmem:[%s17849_s14 + $0x2ea8] ss:$16 sps:$4 sm:$0xff]  }
 0x652   : > { %11138 = vmatpush1.bf16.msra.mxu0 %v17107_v58  ;;  %12213 = vmatpush1.bf16.msra.mxu1 %v17110_v59  ;;  %v17208_v58 = vld [vmem:[%s17849_s14 + $0x2ec4] ss:$16 sps:$4 sm:$0xff]   ;;  %v17211_v59 = vld [vmem:[%s17849_s14 + $0x2ecc] ss:$16 sps:$4 sm:$0xff]  }
 0x653   : > { %11139 = vmatprep.subr.bf16.mxu0 %v17115_v60  ;;  %12214 = vmatprep.subr.bf16.mxu1 %v17118_v61  ;;  %v17206_v60 = vld [vmem:[%s17849_s14 + $0x2ec0] ss:$16 sps:$4 sm:$0xff]   ;;  %v17209_v61 = vld [vmem:[%s17849_s14 + $0x2ec8] ss:$16 sps:$4 sm:$0xff]  }
 0x656   : > { %11140 = vmatpush1.bf16.msra.mxu0 %v17113_v62  ;;  %12215 = vmatpush1.bf16.msra.mxu1 %v17116_v63  ;;  %v17214_v62 = vld [vmem:[%s17849_s14 + $0x2ee4] ss:$16 sps:$4 sm:$0xff]   ;;  %v17217_v63 = vld [vmem:[%s17849_s14 + $0x2eec] ss:$16 sps:$4 sm:$0xff]  }
 0x657   : > { %11141 = vmatprep.subr.bf16.mxu0 %v17121_v0  ;;  %12216 = vmatprep.subr.bf16.mxu1 %v17124_v1  ;;  %v17212_v0 = vld [vmem:[%s17849_s14 + $0x2ee0] ss:$16 sps:$4 sm:$0xff]   ;;  %v17215_v1 = vld [vmem:[%s17849_s14 + $0x2ee8] ss:$16 sps:$4 sm:$0xff]  }
 0x65a   : > { %11142 = vmatpush1.bf16.msra.mxu0 %v17119_v2  ;;  %12217 = vmatpush1.bf16.msra.mxu1 %v17122_v3  ;;  %v17220_v2 = vld [vmem:[%s17849_s14 + $0x2f04] ss:$16 sps:$4 sm:$0xff]   ;;  %v17223_v3 = vld [vmem:[%s17849_s14 + $0x2f0c] ss:$16 sps:$4 sm:$0xff]  }
 0x65b   : > { %11143 = vmatprep.subr.bf16.mxu0 %v17127_v4  ;;  %12218 = vmatprep.subr.bf16.mxu1 %v17130_v5  ;;  %v17218_v4 = vld [vmem:[%s17849_s14 + $0x2f00] ss:$16 sps:$4 sm:$0xff]   ;;  %v17221_v5 = vld [vmem:[%s17849_s14 + $0x2f08] ss:$16 sps:$4 sm:$0xff]  }
 0x65e   : > { %11144 = vmatpush1.bf16.msra.mxu0 %v17125_v6  ;;  %12219 = vmatpush1.bf16.msra.mxu1 %v17128_v7  ;;  %v17226_v6 = vld [vmem:[%s17849_s14 + $0x2f24] ss:$16 sps:$4 sm:$0xff]   ;;  %v17229_v7 = vld [vmem:[%s17849_s14 + $0x2f2c] ss:$16 sps:$4 sm:$0xff]  }
 0x65f   : > { %11145 = vmatprep.subr.bf16.mxu0 %v17133_v8  ;;  %12220 = vmatprep.subr.bf16.mxu1 %v17136_v9  ;;  %v17224_v8 = vld [vmem:[%s17849_s14 + $0x2f20] ss:$16 sps:$4 sm:$0xff]   ;;  %v17227_v9 = vld [vmem:[%s17849_s14 + $0x2f28] ss:$16 sps:$4 sm:$0xff]  }
 0x662   : > { %11146 = vmatpush1.bf16.msra.mxu0 %v17131_v10  ;;  %12221 = vmatpush1.bf16.msra.mxu1 %v17134_v11  ;;  %v17232_v10 = vld [vmem:[%s17849_s14 + $0x2f44] ss:$16 sps:$4 sm:$0xff]   ;;  %v17235_v11 = vld [vmem:[%s17849_s14 + $0x2f4c] ss:$16 sps:$4 sm:$0xff]  }
 0x663   : > { %11147 = vmatprep.subr.bf16.mxu0 %v17139_v12  ;;  %12222 = vmatprep.subr.bf16.mxu1 %v17142_v13  ;;  %v17230_v12 = vld [vmem:[%s17849_s14 + $0x2f40] ss:$16 sps:$4 sm:$0xff]   ;;  %v17233_v13 = vld [vmem:[%s17849_s14 + $0x2f48] ss:$16 sps:$4 sm:$0xff]  }
 0x666   : > { %11148 = vmatpush1.bf16.msra.mxu0 %v17137_v14  ;;  %12223 = vmatpush1.bf16.msra.mxu1 %v17140_v15  ;;  %v17238_v14 = vld [vmem:[%s17849_s14 + $0x2f64] ss:$16 sps:$4 sm:$0xff]   ;;  %v17241_v15 = vld [vmem:[%s17849_s14 + $0x2f6c] ss:$16 sps:$4 sm:$0xff]  }
 0x667   : > { %11149 = vmatprep.subr.bf16.mxu0 %v17145_v16  ;;  %12224 = vmatprep.subr.bf16.mxu1 %v17148_v17  ;;  %v17236_v16 = vld [vmem:[%s17849_s14 + $0x2f60] ss:$16 sps:$4 sm:$0xff]   ;;  %v17239_v17 = vld [vmem:[%s17849_s14 + $0x2f68] ss:$16 sps:$4 sm:$0xff]  }
 0x66a   : > { %11150 = vmatpush1.bf16.msra.mxu0 %v17143_v18  ;;  %12225 = vmatpush1.bf16.msra.mxu1 %v17146_v19  ;;  %v17244_v18 = vld [vmem:[%s17849_s14 + $0x2f84] ss:$16 sps:$4 sm:$0xff]   ;;  %v17247_v19 = vld [vmem:[%s17849_s14 + $0x2f8c] ss:$16 sps:$4 sm:$0xff]  }
 0x66b   : > { %11151 = vmatprep.subr.bf16.mxu0 %v17151_v20  ;;  %12226 = vmatprep.subr.bf16.mxu1 %v17154_v21  ;;  %v17242_v20 = vld [vmem:[%s17849_s14 + $0x2f80] ss:$16 sps:$4 sm:$0xff]   ;;  %v17245_v21 = vld [vmem:[%s17849_s14 + $0x2f88] ss:$16 sps:$4 sm:$0xff]  }
 0x66e   : > { %11152 = vmatpush1.bf16.msra.mxu0 %v17149_v22  ;;  %12227 = vmatpush1.bf16.msra.mxu1 %v17152_v23  ;;  %v17250_v22 = vld [vmem:[%s17849_s14 + $0x2fa4] ss:$16 sps:$4 sm:$0xff]   ;;  %v17253_v23 = vld [vmem:[%s17849_s14 + $0x2fac] ss:$16 sps:$4 sm:$0xff]  }
 0x66f   : > { %11153 = vmatprep.subr.bf16.mxu0 %v17157_v24  ;;  %12228 = vmatprep.subr.bf16.mxu1 %v17160_v25  ;;  %v17248_v24 = vld [vmem:[%s17849_s14 + $0x2fa0] ss:$16 sps:$4 sm:$0xff]   ;;  %v17251_v25 = vld [vmem:[%s17849_s14 + $0x2fa8] ss:$16 sps:$4 sm:$0xff]  }
 0x672   : > { %11154 = vmatpush1.bf16.msra.mxu0 %v17155_v26  ;;  %12229 = vmatpush1.bf16.msra.mxu1 %v17158_v27  ;;  %v17256_v26 = vld [vmem:[%s17849_s14 + $0x2fc4] ss:$16 sps:$4 sm:$0xff]   ;;  %v17259_v27 = vld [vmem:[%s17849_s14 + $0x2fcc] ss:$16 sps:$4 sm:$0xff]  }
 0x673   : > { %11155 = vmatprep.subr.bf16.mxu0 %v17163_v28  ;;  %12230 = vmatprep.subr.bf16.mxu1 %v17166_v29  ;;  %v17254_v28 = vld [vmem:[%s17849_s14 + $0x2fc0] ss:$16 sps:$4 sm:$0xff]   ;;  %v17257_v29 = vld [vmem:[%s17849_s14 + $0x2fc8] ss:$16 sps:$4 sm:$0xff]  }
 0x676   : > { %11156 = vmatpush1.bf16.msra.mxu0 %v17161_v30  ;;  %12231 = vmatpush1.bf16.msra.mxu1 %v17164_v31  ;;  %v17262_v30 = vld [vmem:[%s17849_s14 + $0x2fe4] ss:$16 sps:$4 sm:$0xff]   ;;  %v17265_v31 = vld [vmem:[%s17849_s14 + $0x2fec] ss:$16 sps:$4 sm:$0xff]  }
 0x677   : > { %11168 = vmatprep.subr.bf16.mxu0 %v17172_v32  ;;  %12243 = vmatprep.subr.bf16.mxu1 %v17175_v33  ;;  %v17260_v32 = vld [vmem:[%s17849_s14 + $0x2fe0] ss:$16 sps:$4 sm:$0xff]   ;;  %v17263_v33 = vld [vmem:[%s17849_s14 + $0x2fe8] ss:$16 sps:$4 sm:$0xff]  }
 0x679   : > { %11158 = vmatmul.mubr.bf16.vlgmr.msra.gmra.mrb[0].mxu0 %v17167_v34  ;;  %12233 = vmatmul.mubr.bf16.vlgmr.msra.gmra.mrb[0].mxu1 %v17167_v34  ;;  %v17271_v34 = vld [vmem:[%s17849_s14 + $0x3004] ss:$16 sps:$4 sm:$0xff]  }
 0x67a   : > { %11169 = vmatpush1.bf16.msra.mxu0 %v17170_v35  ;;  %12244 = vmatpush1.bf16.msra.mxu1 %v17173_v36  ;;  %v17274_v35 = vld [vmem:[%s17849_s14 + $0x300c] ss:$16 sps:$4 sm:$0xff]  }
 0x67b   : > { %11170 = vmatprep.subr.bf16.mxu0 %v17178_v37  ;;  %12245 = vmatprep.subr.bf16.mxu1 %v17181_v38  ;;  %v17266_v36 = vld [vmem:[%s17847_s18 + $0xb8] ss:$196 sps:$4 sm:$0xff]  }
 0x67c   : > { %11200 = vmatprep.mubr.bf16.mxu0 %v17268_v39  ;;  %12275 = vmatprep.mubr.bf16.mxu1 %v17268_v39  ;;  %v17269_v37 = vld [vmem:[%s17849_s14 + $0x3000] ss:$16 sps:$4 sm:$0xff]   ;;  %v17272_v38 = vld [vmem:[%s17849_s14 + $0x3008] ss:$16 sps:$4 sm:$0xff]   ;;  %v17277_v39 = vld [vmem:[%s17849_s14 + $0x3024] ss:$16 sps:$4 sm:$0xff]  }
 0x67e   : > { %11171 = vmatpush1.bf16.msra.mxu0 %v17176_v40  ;;  %12246 = vmatpush1.bf16.msra.mxu1 %v17179_v41  ;;  %v17280_v40 = vld [vmem:[%s17849_s14 + $0x302c] ss:$16 sps:$4 sm:$0xff]   ;;  %v17275_v41 = vld [vmem:[%s17849_s14 + $0x3020] ss:$16 sps:$4 sm:$0xff]  }
 0x67f   : > { %11172 = vmatprep.subr.bf16.mxu0 %v17184_v42  ;;  %12247 = vmatprep.subr.bf16.mxu1 %v17187_v43  ;;  %v17278_v42 = vld [vmem:[%s17849_s14 + $0x3028] ss:$16 sps:$4 sm:$0xff]   ;;  %v17283_v43 = vld [vmem:[%s17849_s14 + $0x3044] ss:$16 sps:$4 sm:$0xff]  }
 0x682   : > { %11173 = vmatpush1.bf16.msra.mxu0 %v17182_v44  ;;  %12248 = vmatpush1.bf16.msra.mxu1 %v17185_v45  ;;  %v17286_v44 = vld [vmem:[%s17849_s14 + $0x304c] ss:$16 sps:$4 sm:$0xff]   ;;  %v17531_v45 = vmov 0  }
 0x683   : > { %11174 = vmatprep.subr.bf16.mxu0 %v17190_v46  ;;  %12249 = vmatprep.subr.bf16.mxu1 %v17193_v47  ;;  %v17281_v46 = vld [vmem:[%s17849_s14 + $0x3040] ss:$16 sps:$4 sm:$0xff]   ;;  %v17284_v47 = vld [vmem:[%s17849_s14 + $0x3048] ss:$16 sps:$4 sm:$0xff]  }
 0x686   : > { %11175 = vmatpush1.bf16.msra.mxu0 %v17188_v48  ;;  %12250 = vmatpush1.bf16.msra.mxu1 %v17191_v49  ;;  %v17289_v48 = vld [vmem:[%s17849_s14 + $0x3064] ss:$16 sps:$4 sm:$0xff]   ;;  %v17292_v49 = vld [vmem:[%s17849_s14 + $0x306c] ss:$16 sps:$4 sm:$0xff]  }
 0x687   : > { %11176 = vmatprep.subr.bf16.mxu0 %v17196_v50  ;;  %12251 = vmatprep.subr.bf16.mxu1 %v17199_v51  ;;  %v17287_v50 = vld [vmem:[%s17849_s14 + $0x3060] ss:$16 sps:$4 sm:$0xff]   ;;  %v17290_v51 = vld [vmem:[%s17849_s14 + $0x3068] ss:$16 sps:$4 sm:$0xff]  }
 0x68a   : > { %11177 = vmatpush1.bf16.msra.mxu0 %v17194_v52  ;;  %12252 = vmatpush1.bf16.msra.mxu1 %v17197_v53  ;;  %v17295_v52 = vld [vmem:[%s17849_s14 + $0x3084] ss:$16 sps:$4 sm:$0xff]   ;;  %v17298_v53 = vld [vmem:[%s17849_s14 + $0x308c] ss:$16 sps:$4 sm:$0xff]  }
 0x68b   : > { %11178 = vmatprep.subr.bf16.mxu0 %v17202_v54  ;;  %12253 = vmatprep.subr.bf16.mxu1 %v17205_v55  ;;  %v17293_v54 = vld [vmem:[%s17849_s14 + $0x3080] ss:$16 sps:$4 sm:$0xff]   ;;  %v17296_v55 = vld [vmem:[%s17849_s14 + $0x3088] ss:$16 sps:$4 sm:$0xff]  }
 0x68e   : > { %11179 = vmatpush1.bf16.msra.mxu0 %v17200_v56  ;;  %12254 = vmatpush1.bf16.msra.mxu1 %v17203_v57  ;;  %v17301_v56 = vld [vmem:[%s17849_s14 + $0x30a4] ss:$16 sps:$4 sm:$0xff]   ;;  %v17304_v57 = vld [vmem:[%s17849_s14 + $0x30ac] ss:$16 sps:$4 sm:$0xff]  }
 0x68f   : > { %11180 = vmatprep.subr.bf16.mxu0 %v17208_v58  ;;  %12255 = vmatprep.subr.bf16.mxu1 %v17211_v59  ;;  %v17299_v58 = vld [vmem:[%s17849_s14 + $0x30a0] ss:$16 sps:$4 sm:$0xff]   ;;  %v17302_v59 = vld [vmem:[%s17849_s14 + $0x30a8] ss:$16 sps:$4 sm:$0xff]  }
 0x692   : > { %11181 = vmatpush1.bf16.msra.mxu0 %v17206_v60  ;;  %12256 = vmatpush1.bf16.msra.mxu1 %v17209_v61  ;;  %v17307_v60 = vld [vmem:[%s17849_s14 + $0x30c4] ss:$16 sps:$4 sm:$0xff]   ;;  %v17310_v61 = vld [vmem:[%s17849_s14 + $0x30cc] ss:$16 sps:$4 sm:$0xff]  }
 0x693   : > { %11182 = vmatprep.subr.bf16.mxu0 %v17214_v62  ;;  %12257 = vmatprep.subr.bf16.mxu1 %v17217_v63  ;;  %v17305_v62 = vld [vmem:[%s17849_s14 + $0x30c0] ss:$16 sps:$4 sm:$0xff]   ;;  %v17308_v63 = vld [vmem:[%s17849_s14 + $0x30c8] ss:$16 sps:$4 sm:$0xff]  }
 0x696   : > { %11183 = vmatpush1.bf16.msra.mxu0 %v17212_v0  ;;  %12258 = vmatpush1.bf16.msra.mxu1 %v17215_v1  ;;  %v17313_v0 = vld [vmem:[%s17849_s14 + $0x30e4] ss:$16 sps:$4 sm:$0xff]   ;;  %v17316_v1 = vld [vmem:[%s17849_s14 + $0x30ec] ss:$16 sps:$4 sm:$0xff]  }
 0x697   : > { %11184 = vmatprep.subr.bf16.mxu0 %v17220_v2  ;;  %12259 = vmatprep.subr.bf16.mxu1 %v17223_v3  ;;  %v17311_v2 = vld [vmem:[%s17849_s14 + $0x30e0] ss:$16 sps:$4 sm:$0xff]   ;;  %v17314_v3 = vld [vmem:[%s17849_s14 + $0x30e8] ss:$16 sps:$4 sm:$0xff]  }
 0x69a   : > { %11185 = vmatpush1.bf16.msra.mxu0 %v17218_v4  ;;  %12260 = vmatpush1.bf16.msra.mxu1 %v17221_v5  ;;  %v17317_v4 = vld [vmem:[%s17847_s18 + $0xc0] ss:$196 sps:$4 sm:$0xff]  }
 0x69b   : > { %11186 = vmatprep.subr.bf16.mxu0 %v17226_v6  ;;  %12261 = vmatprep.subr.bf16.mxu1 %v17229_v7  ;;  %v467_v5 = vld [vmem:[#allocation2] sm:$0xff]  ;;  %v469_v6 = vld [vmem:[#allocation2 + $0x10] sm:$0xff]  ;;  %v468_v7 = vld [vmem:[#allocation2 + $0x8] sm:$0xff] }
 0x69e   : > { %11187 = vmatpush1.bf16.msra.mxu0 %v17224_v8  ;;  %12262 = vmatpush1.bf16.msra.mxu1 %v17227_v9  ;;  %v470_v8 = vld [vmem:[#allocation2 + $0x18] sm:$0xff] }
 0x69f   : > { %11188 = vmatprep.subr.bf16.mxu0 %v17232_v10  ;;  %12263 = vmatprep.subr.bf16.mxu1 %v17235_v11  ;;  %v471_v11 = vld [vmem:[#allocation2 + $0x20] sm:$0xff] }
 0x6a2   : > { %11189 = vmatpush1.bf16.msra.mxu0 %v17230_v12  ;;  %12264 = vmatpush1.bf16.msra.mxu1 %v17233_v13  ;;  %v473_v12 = vld [vmem:[#allocation2 + $0x30] sm:$0xff] }
 0x6a3   : > { %11190 = vmatprep.subr.bf16.mxu0 %v17238_v14  ;;  %12265 = vmatprep.subr.bf16.mxu1 %v17241_v15 }
 0x6a6   : > { %11191 = vmatpush1.bf16.msra.mxu0 %v17236_v16  ;;  %12266 = vmatpush1.bf16.msra.mxu1 %v17239_v17  ;;  %v472_v17 = vld [vmem:[#allocation2 + $0x28] sm:$0xff] }
 0x6a7   : > { %11192 = vmatprep.subr.bf16.mxu0 %v17244_v18  ;;  %12267 = vmatprep.subr.bf16.mxu1 %v17247_v19  ;;  %v474_v18 = vld [vmem:[#allocation2 + $0x38] sm:$0xff] }
 0x6aa   : > { %11193 = vmatpush1.bf16.msra.mxu0 %v17242_v20  ;;  %12268 = vmatpush1.bf16.msra.mxu1 %v17245_v21 }
 0x6ab   : > { %11194 = vmatprep.subr.bf16.mxu0 %v17250_v22  ;;  %12269 = vmatprep.subr.bf16.mxu1 %v17253_v23 }
 0x6ae   : > { %11195 = vmatpush1.bf16.msra.mxu0 %v17248_v24  ;;  %12270 = vmatpush1.bf16.msra.mxu1 %v17251_v25 }
 0x6af   : > { %11196 = vmatprep.subr.bf16.mxu0 %v17256_v26  ;;  %12271 = vmatprep.subr.bf16.mxu1 %v17259_v27 }
 0x6b2   : > { %11197 = vmatpush1.bf16.msra.mxu0 %v17254_v28  ;;  %12272 = vmatpush1.bf16.msra.mxu1 %v17257_v29  ;;  %v17318_v29 = vld [vmem:[#allocation8 + $0x40] sm:$0xff] (!%p14524_p4)  }
 0x6b3   : > { %11198 = vmatprep.subr.bf16.mxu0 %v17262_v30  ;;  %12273 = vmatprep.subr.bf16.mxu1 %v17265_v31  ;;  %v17319_v30 = vld [vmem:[#allocation8 + $0xc0] sm:$0xff] (!%p14524_p4)  }
 0x6b4   : > { %v17320_v31 = vld [vmem:[#allocation8] sm:$0xff] (!%p14524_p4)  }
 0x6b6   : > { %11199 = vmatpush1.bf16.msra.mxu0 %v17260_v32  ;;  %12274 = vmatpush1.bf16.msra.mxu1 %v17263_v33  ;;  %v17321_v32 = vld [vmem:[#allocation8 + $0x80] sm:$0xff] (!%p14524_p4)   ;;  %v17322_v33 = vld [vmem:[#allocation8 + $0x48] sm:$0xff] (!%p14524_p4)  }
 0x6b7   : > { %11211 = vmatprep.subr.bf16.mxu0 %v17271_v34  ;;  %12286 = vmatprep.subr.bf16.mxu1 %v17274_v35  ;;  %v17323_v34 = vld [vmem:[#allocation8 + $0xc8] sm:$0xff] (!%p14524_p4)  }
 0x6b8   : > { %v17324_v35 = vld [vmem:[#allocation8 + $0x8] sm:$0xff] (!%p14524_p4)  }
 0x6b9   : > { %11201 = vmatmul.mubr.bf16.vlgmr.msra.gmra.mrb[0].mxu0 %v17266_v36  ;;  %12276 = vmatmul.mubr.bf16.vlgmr.msra.gmra.mrb[0].mxu1 %v17266_v36  ;;  %v17325_v36 = vld [vmem:[#allocation8 + $0x88] sm:$0xff] (!%p14524_p4)  }
 0x6ba   : > { %11212 = vmatpush1.bf16.msra.mxu0 %v17269_v37  ;;  %12287 = vmatpush1.bf16.msra.mxu1 %v17272_v38  ;;  %v17326_v37 = vld [vmem:[#allocation8 + $0x50] sm:$0xff] (!%p14524_p4)  }
 0x6bb   : > { %11213 = vmatprep.subr.bf16.mxu0 %v17277_v39  ;;  %12288 = vmatprep.subr.bf16.mxu1 %v17280_v40  ;;  %v17327_v38 = vld [vmem:[#allocation8 + $0xd0] sm:$0xff] (!%p14524_p4)  }
 0x6bc   : > { %11243 = vmatprep.mubr.bf16.mxu0 %v17531_v45  ;;  %12318 = vmatprep.mubr.bf16.mxu1 %v17531_v45  ;;  %v17328_v39 = vld [vmem:[#allocation8 + $0x10] sm:$0xff] (!%p14524_p4)   ;;  %v17334_v45 = vld [vmem:[#allocation8 + $0x60] sm:$0xff] (!%p14524_p4)  }
 0x6bd   : > { %v17329_v40 = vld [vmem:[#allocation8 + $0x90] sm:$0xff] (!%p14524_p4)  }
 0x6be   : > { %11214 = vmatpush1.bf16.msra.mxu0 %v17275_v41  ;;  %12289 = vmatpush1.bf16.msra.mxu1 %v17278_v42  ;;  %v17330_v41 = vld [vmem:[#allocation8 + $0x58] sm:$0xff] (!%p14524_p4)  }
 0x6bf   : > { %11215 = vmatprep.subr.bf16.mxu0 %v17283_v43  ;;  %12290 = vmatprep.subr.bf16.mxu1 %v17286_v44  ;;  %v17331_v42 = vld [vmem:[#allocation8 + $0xd8] sm:$0xff] (!%p14524_p4)  }
 0x6c0   : > { %v17332_v43 = vld [vmem:[#allocation8 + $0x18] sm:$0xff] (!%p14524_p4)  }
 0x6c1   : > { %v17333_v44 = vld [vmem:[#allocation8 + $0x98] sm:$0xff] (!%p14524_p4)  }
 0x6c2   : > { %11216 = vmatpush1.bf16.msra.mxu0 %v17281_v46  ;;  %12291 = vmatpush1.bf16.msra.mxu1 %v17284_v47  ;;  %v17335_v46 = vld [vmem:[#allocation8 + $0xe0] sm:$0xff] (!%p14524_p4)  }
 0x6c3   : > { %11217 = vmatprep.subr.bf16.mxu0 %v17289_v48  ;;  %12292 = vmatprep.subr.bf16.mxu1 %v17292_v49  ;;  %v17336_v47 = vld [vmem:[#allocation8 + $0x20] sm:$0xff] (!%p14524_p4)   ;;  %v12359_v48 = vlaneseq (!%p14524_p4) }
 0x6c4   : > { %v17337_v49 = vld [vmem:[#allocation8 + $0xa0] sm:$0xff] (!%p14524_p4)  }
 0x6c6   : > { %11218 = vmatpush1.bf16.msra.mxu0 %v17287_v50  ;;  %12293 = vmatpush1.bf16.msra.mxu1 %v17290_v51  ;;  %v17338_v50 = vld [vmem:[#allocation8 + $0x68] sm:$0xff] (!%p14524_p4)  }
 0x6c7   : > { %11219 = vmatprep.subr.bf16.mxu0 %v17295_v52  ;;  %12294 = vmatprep.subr.bf16.mxu1 %v17298_v53  ;;  %v17339_v51 = vld [vmem:[#allocation8 + $0xe8] sm:$0xff] (!%p14524_p4)   ;;  %v12360_v53 = vshrl.u32 (!%p14524_p4), %v12359_v48, 7 }
 0x6c8   : > { %v17340_v52 = vld [vmem:[#allocation8 + $0x28] sm:$0xff] (!%p14524_p4)  }
 0x6ca   : > { %11220 = vmatpush1.bf16.msra.mxu0 %v17293_v54  ;;  %12295 = vmatpush1.bf16.msra.mxu1 %v17296_v55  ;;  %v17341_v54 = vld [vmem:[#allocation8 + $0xa8] sm:$0xff] (!%p14524_p4)   ;;  %v17342_v55 = vld [vmem:[#allocation8 + $0x70] sm:$0xff] (!%p14524_p4)  }
 0x6cb   : > { %11221 = vmatprep.subr.bf16.mxu0 %v17301_v56  ;;  %12296 = vmatprep.subr.bf16.mxu1 %v17304_v57  ;;  %v17343_v56 = vld [vmem:[#allocation8 + $0xf0] sm:$0xff] (!%p14524_p4)  }
 0x6cc   : > { %v17344_v57 = vld [vmem:[#allocation8 + $0x30] sm:$0xff] (!%p14524_p4)  }
 0x6ce   : > { %11222 = vmatpush1.bf16.msra.mxu0 %v17299_v58  ;;  %12297 = vmatpush1.bf16.msra.mxu1 %v17302_v59  ;;  %v12365_v58 = vsub.s32 (!%p14524_p4), 1, %v12360_v53  ;;  %v17345_v59 = vld [vmem:[#allocation8 + $0xb0] sm:$0xff] (!%p14524_p4)  }
 0x6cf   : > { %11223 = vmatprep.subr.bf16.mxu0 %v17307_v60  ;;  %12298 = vmatprep.subr.bf16.mxu1 %v17310_v61  ;;  %v12373_v60 = vsub.s32 (!%p14524_p4), 3, %v12360_v53  ;;  %v17346_v61 = vld [vmem:[#allocation8 + $0x78] sm:$0xff] (!%p14524_p4)  }
 0x6d2   : > { %11224 = vmatpush1.bf16.msra.mxu0 %v17305_v62  ;;  %12299 = vmatpush1.bf16.msra.mxu1 %v17308_v63  ;;  %v12361_v62 = vsub.s32 (!%p14524_p4), 0, %v12360_v53  ;;  %v17347_v63 = vld [vmem:[#allocation8 + $0xf8] sm:$0xff] (!%p14524_p4)  }
 0x6d3   : > { %11225 = vmatprep.subr.bf16.mxu0 %v17313_v0  ;;  %12300 = vmatprep.subr.bf16.mxu1 %v17316_v1  ;;  %v12369_v0 = vsub.s32 (!%p14524_p4), 2, %v12360_v53  ;;  %v17348_v1 = vld [vmem:[#allocation8 + $0x38] sm:$0xff] (!%p14524_p4)  }
 0x6d6   : > { %11226 = vmatpush1.bf16.msra.mxu0 %v17311_v2  ;;  %12301 = vmatpush1.bf16.msra.mxu1 %v17314_v3  ;;  %v17349_v2 = vld [vmem:[#allocation8 + $0xb8] sm:$0xff] (!%p14524_p4)  }
 0x6d7   : > { %14566 = vmatprep.subr.bf16.mxu0 (!%p14524_p4), %v17318_v29  ;;  %14588 = vmatprep.subr.bf16.mxu1 (!%p14524_p4), %v17319_v30 }
 0x6d9   : > { %11244 = vmatmul.mubr.bf16.vlgmr.msra.gmra.mrb[0].mxu0 %v17317_v4  ;;  %12319 = vmatmul.mubr.bf16.vlgmr.msra.gmra.mrb[0].mxu1 %v17317_v4 }
 0x6da   : > { %14567 = vmatpush3.bf16.msra.mxu0 (!%p14524_p4), %v17320_v31  ;;  %14589 = vmatpush3.bf16.msra.mxu1 (!%p14524_p4), %v17321_v32 }
 0x6db   : > { %14568 = vmatprep.subr.bf16.mxu0 (!%p14524_p4), %v17322_v33  ;;  %14590 = vmatprep.subr.bf16.mxu1 (!%p14524_p4), %v17323_v34 }
 0x6de   : > { %14569 = vmatpush3.bf16.msra.mxu0 (!%p14524_p4), %v17324_v35  ;;  %14591 = vmatpush3.bf16.msra.mxu1 (!%p14524_p4), %v17325_v36 }
 0x6df   : > { %14570 = vmatprep.subr.bf16.mxu0 (!%p14524_p4), %v17326_v37  ;;  %14592 = vmatprep.subr.bf16.mxu1 (!%p14524_p4), %v17327_v38 }
 0x6e2   : > { %14571 = vmatpush3.bf16.msra.mxu0 (!%p14524_p4), %v17328_v39  ;;  %14593 = vmatpush3.bf16.msra.mxu1 (!%p14524_p4), %v17329_v40 }
 0x6e3   : > { %14572 = vmatprep.subr.bf16.mxu0 (!%p14524_p4), %v17330_v41  ;;  %14594 = vmatprep.subr.bf16.mxu1 (!%p14524_p4), %v17331_v42 }
 0x6e6   : > { %14573 = vmatpush3.bf16.msra.mxu0 (!%p14524_p4), %v17332_v43  ;;  %14595 = vmatpush3.bf16.msra.mxu1 (!%p14524_p4), %v17333_v44 }
 0x6e7   : > { %14574 = vmatprep.subr.bf16.mxu0 (!%p14524_p4), %v17334_v45  ;;  %14596 = vmatprep.subr.bf16.mxu1 (!%p14524_p4), %v17335_v46  ;;  %v14525_v46 = vld [vmem:[#allocation9] ss:$0 sm:$0xff] (!%p14524_p4) }
 0x6ea   : > { %14575 = vmatpush3.bf16.msra.mxu0 (!%p14524_p4), %v17336_v47  ;;  %14597 = vmatpush3.bf16.msra.mxu1 (!%p14524_p4), %v17337_v49 }
 0x6eb   : > { %14576 = vmatprep.subr.bf16.mxu0 (!%p14524_p4), %v17338_v50  ;;  %14598 = vmatprep.subr.bf16.mxu1 (!%p14524_p4), %v17339_v51 }
 0x6ee   : > { %14577 = vmatpush3.bf16.msra.mxu0 (!%p14524_p4), %v17340_v52  ;;  %14599 = vmatpush3.bf16.msra.mxu1 (!%p14524_p4), %v17341_v54 }
 0x6ef   : > { %14578 = vmatprep.subr.bf16.mxu0 (!%p14524_p4), %v17342_v55  ;;  %14600 = vmatprep.subr.bf16.mxu1 (!%p14524_p4), %v17343_v56 }
 0x6f2   : > { %14579 = vmatpush3.bf16.msra.mxu0 (!%p14524_p4), %v17344_v57  ;;  %14601 = vmatpush3.bf16.msra.mxu1 (!%p14524_p4), %v17345_v59 }
 0x6f3   : > { %14580 = vmatprep.subr.bf16.mxu0 (!%p14524_p4), %v17346_v61  ;;  %14602 = vmatprep.subr.bf16.mxu1 (!%p14524_p4), %v17347_v63 }
 0x6f6   : > { %14581 = vmatpush3.bf16.msra.mxu0 (!%p14524_p4), %v17348_v1  ;;  %14603 = vmatpush3.bf16.msra.mxu1 (!%p14524_p4), %v17349_v2 }
 0x7ac   : > { %v11245_v9 = vpop.f32.mrb[0].mxu0  ;;  %v12320_v10 = vpop.f32.mrb[0].mxu1  ;;  %12348 = sbr.rel (%p14524_p4) target bundleno = 2208 (0x8a0), region = 90 }
 0x7ad   : > { %v12329_v13 = vadd.f32 %v11245_v9, %v467_v5  ;;  %v12331_v14 = vadd.f32 %v12320_v10, %v469_v6  ;;  %v11247_v15 = vpop.f32.mrb[1].mxu0  ;;  %v12322_v16 = vpop.f32.mrb[1].mxu1  ;;  %v12357_v5 = vld [vmem:[#allocation6] sm:$0xf] (!%p14524_p4) }
 0x7ae   : > { %v12330_v19 = vadd.f32 %v11247_v15, %v468_v7  ;;  %v12332_v20 = vadd.f32 %v12322_v16, %v470_v8  ;;  %v11249_v21 = vpop.f32.mrb[2].mxu0  ;;  %v12324_v22 = vpop.f32.mrb[2].mxu1  ;;  %v12366_v6 = vrot.slane (!%p14524_p4), %v12357_v5, %v12365_v58  ;;  %v12374_v9 = vrot.slane (!%p14524_p4), %v12357_v5, %v12373_v60 }
 0x7af   : > { %12337 = vst [vmem:[#allocation2] sm:$0xff] %v12329_v13  ;;  %12339 = vst [vmem:[#allocation2 + $0x10] sm:$0xff] %v12331_v14  ;;  %v12333_v23 = vadd.f32 %v11249_v21, %v471_v11  ;;  %v12335_v24 = vadd.f32 %v12324_v22, %v473_v12  ;;  %v11251_v25 = vpop.f32.mrb[3].mxu0  ;;  %v12326_v26 = vpop.f32.mrb[3].mxu1  ;;  %v12362_v11 = vrot.slane (!%p14524_p4), %v12357_v5, %v12361_v62 }
 0x7b0   : > { %12338 = vst [vmem:[#allocation2 + $0x8] sm:$0xff] %v12330_v19  ;;  %12340 = vst [vmem:[#allocation2 + $0x18] sm:$0xff] %v12332_v20  ;;  %v12334_v27 = vadd.f32 %v11251_v25, %v472_v17  ;;  %v12336_v28 = vadd.f32 %v12326_v26, %v474_v18  ;;  %v12370_v12 = vrot.slane (!%p14524_p4), %v12357_v5, %v12369_v0 }
 0x7b1   : > { %12341 = vst [vmem:[#allocation2 + $0x20] sm:$0xff] %v12333_v23  ;;  %12343 = vst [vmem:[#allocation2 + $0x30] sm:$0xff] %v12335_v24 }
 0x7b2   : > { %12342 = vst [vmem:[#allocation2 + $0x28] sm:$0xff] %v12334_v27  ;;  %12344 = vst [vmem:[#allocation2 + $0x38] sm:$0xff] %v12336_v28 }
 0x7b6   : > { %v12349_v10 = vld [vmem:[#allocation2] sm:$0xff]  ;;  %v12351_v14 = vld [vmem:[#allocation2 + $0x10] sm:$0xff] }
 0x7b7   : > { %v12350_v3 = vld [vmem:[#allocation2 + $0x8] sm:$0xff]  ;;  %v12352_v7 = vld [vmem:[#allocation2 + $0x18] sm:$0xff]  ;;  %v12379_v20 = vadd.f32 %v12362_v11, %v12349_v10  ;;  %v12381_v22 = vadd.f32 %v12370_v12, %v12351_v14 }
 0x7b8   : > { %v12353_v13 = vld [vmem:[#allocation2 + $0x20] sm:$0xff]  ;;  %v12355_v15 = vld [vmem:[#allocation2 + $0x30] sm:$0xff]  ;;  %v12380_v16 = vadd.f32 %v12366_v6, %v12350_v3  ;;  %v12382_v18 = vadd.f32 %v12374_v9, %v12352_v7 }
 0x7b9   : > { %v12354_v4 = vld [vmem:[#allocation2 + $0x28] sm:$0xff]  ;;  %v12356_v8 = vld [vmem:[#allocation2 + $0x38] sm:$0xff]  ;;  %v12383_v21 = vadd.f32 %v12362_v11, %v12353_v13  ;;  %v12385_v23 = vadd.f32 %v12370_v12, %v12355_v15  ;;  %vm12387_vm4 = vcmp.ge.f32.partialorder %v12379_v20, 0.0  ;;  %v12395_v33 = vmul.f32 0.2, %v12379_v20 }
 0x7ba   : > { %v12384_v17 = vadd.f32 %v12366_v6, %v12354_v4  ;;  %v12386_v19 = vadd.f32 %v12374_v9, %v12356_v8  ;;  %vm12388_vm0 = vcmp.ge.f32.partialorder %v12380_v16, 0.0  ;;  %v12396_v24 = vmul.f32 0.2, %v12380_v16 }
 0x7bb   : > { %vm12390_vm2 = vcmp.ge.f32.partialorder %v12382_v18, 0.0  ;;  %v12398_v26 = vmul.f32 0.2, %v12382_v18  ;;  %vm12391_vm5 = vcmp.ge.f32.partialorder %v12383_v21, 0.0  ;;  %v12399_v35 = vmul.f32 0.2, %v12383_v21 }
 0x7bc   : > { %vm12392_vm1 = vcmp.ge.f32.partialorder %v12384_v17, 0.0  ;;  %v12400_v25 = vmul.f32 0.2, %v12384_v17  ;;  %vm12394_vm3 = vcmp.ge.f32.partialorder %v12386_v19, 0.0  ;;  %v12402_v27 = vmul.f32 0.2, %v12386_v19 }
 0x7bd   : > { %v12404_v28 = vsel %vm12388_vm0, %v12380_v16, %v12396_v24  ;;  %v12406_v31 = vsel %vm12390_vm2, %v12382_v18, %v12398_v26  ;;  %vm12389_vm6 = vcmp.ge.f32.partialorder %v12381_v22, 0.0  ;;  %vm12393_vm7 = vcmp.ge.f32.partialorder %v12385_v23, 0.0 }
 0x7be   : > { %v12408_v29 = vsel %vm12392_vm1, %v12384_v17, %v12400_v25  ;;  %v12410_v32 = vsel %vm12394_vm3, %v12386_v19, %v12402_v27  ;;  %v12403_v36 = vsel %vm12387_vm4, %v12379_v20, %v12395_v33  ;;  %v12397_v37 = vmul.f32 0.2, %v12381_v22 }
 0x7bf   : > { %v12412_v30 = vpack.c.bf16 %v12408_v29, %v12404_v28  ;;  %v12414_v34 = vpack.c.bf16 %v12410_v32, %v12406_v31  ;;  %v12401_v38 = vmul.f32 0.2, %v12385_v23  ;;  %v12407_v39 = vsel %vm12391_vm5, %v12383_v21, %v12399_v35 }
 0x7c0   : > { %v12411_v40 = vpack.c.bf16 %v12407_v39, %v12403_v36  ;;  %v12405_v41 = vsel %vm12389_vm6, %v12381_v22, %v12397_v37 }
 0x7c1   : > { %12710 = vmatprep.mubr.bf16.mxu0 %v12412_v30  ;;  %12751 = vmatprep.mubr.bf16.mxu1 %v12414_v34  ;;  %v12409_v42 = vsel %vm12393_vm7, %v12385_v23, %v12401_v38 }
 0x7c2   : > { %v12413_v43 = vpack.c.bf16 %v12409_v42, %v12405_v41  ;;  %12711 = vmatmul.mubr.bf16.vlgmr.msra.gmra.mrb[0].mxu0 %v12411_v40 }
 0x7c4   : > { %12752 = vmatmul.mubr.bf16.vlgmr.msra.gmra.mrb[0].mxu1 %v12413_v43 }
 0x895   : > { %v14582_v44 = vpop.f32.mrb[0].mxu0 }
 0x896   : > { %v14583_v47 = vpop.f32.mrb[1].mxu0 }
 0x897   : > { %v14604_v45 = vpop.f32.mrb[0].mxu1  ;;  %v14584_v48 = vadd.f32 %v14583_v47, %v14582_v44  ;;  %v14585_v50 = vpop.f32.mrb[2].mxu0 }
 0x898   : > { %v14605_v49 = vpop.f32.mrb[1].mxu1  ;;  %v14586_v53 = vpop.f32.mrb[3].mxu0 }
 0x899   : > { %v14606_v51 = vadd.f32 %v14605_v49, %v14604_v45  ;;  %v14607_v52 = vpop.f32.mrb[2].mxu1  ;;  %v12713_v54 = vadd.f32 %v14584_v48, %v14525_v46  ;;  %v14587_v55 = vadd.f32 %v14586_v53, %v14585_v50 }
 0x89a   : > { %v14608_v56 = vpop.f32.mrb[3].mxu1 }
 0x89b   : > { %v14609_v57 = vadd.f32 %v14608_v56, %v14607_v52  ;;  %v12754_v58 = vadd.f32 %v14606_v51, %v12713_v54  ;;  %v12716_v59 = vadd.f32 %v14587_v55, %v14525_v46 }
 0x89d   : > { %12760 = vst [vmem:[%s19511_s5] sm:$0xff] %v12754_v58  ;;  %v12757_v60 = vadd.f32 %v14609_v57, %v12716_v59 }
 0x89f   : > { %12761 = vst [vmem:[%s19511_s5 + $0x8] sm:$0xff] %v12757_v60 }
 0x8a0 PF: > { %s20_s23 = sadd.s32 1, %s17520_s23   ;;  %s19532_s7 = sld [smem:[#allocation14_spill]] }
 0x8a1   : > { %p17_p6 = scmp.ge.s32.totalorder %s20_s23, 4   ;;  %s19533_s18 = smov %s17504_s19 }
 0x8a2   : > { %s19534_s19 = smov %s17508_s20  ;;  %s19535_s20 = smov %s17618_s6 }
 0x8a3   : > { %s19536_s21 = smov %s17516_s22  ;;  %19 = sbr.rel (!%p17_p6) target bundleno = 8 (0x8), region = 140 }
 0x8a6   : > { %s19537_s22 = smov %s19532_s7 }
 0x8aa   :  { %12784 = vsyncpa [#allocation5], 1 }
 0x8ab   :  { %12786 = vsyncpa [#allocation5 + $0x1], 1 }
 0x8ac   :  { %12787 = vsyncpa [#allocation7], 1 }
 0x8ad   :  { %12788 = vsyncpa [#allocation10], 1 }

</bundles_post_ra>
